<compile_context>
chip_gen: v7x
topology: tpu7x:2x2x1
jax: 0.10.0
libtpu: 0.0.40
codegen_flags: <defaults>
</compile_context>

<pallas_src>
import functools

import jax
import jax.numpy as jnp
from jax.experimental import pallas as pl
from jax.experimental.pallas import tpu as pltpu

_BN_EPS = 1e-5


# ----------------------------------------------------------------------------
# Generation-aware tiling config
# ----------------------------------------------------------------------------
def pick_device_config():
    """Pick layer-3 tile_n and the hidden-layer column-tile count per chip.

      * v6e : tile_n=4096 (grid=3) - fewest pipeline steps, biggest DMAs.
      * v7x : tile_n=3072 (grid=4) - even megacore split (2 tiles per TC);
              h2_tiles=2 so the small fused L1/L2 call also uses both TCs.
      * v5e / unknown: tile_n=3072 (grid=4) - fits the 16 MiB scoped-VMEM
              default with large headroom (w2 tiles are int8: 3 MiB each).
    """
    try:
        kind = jax.devices()[0].device_kind.lower()
    except Exception:
        kind = ""
    if "v7" in kind:
        return {"tile_n": 3072, "h2_tiles": 2}
    if "v6" in kind:
        return {"tile_n": 4096, "h2_tiles": 1}
    return {"tile_n": 3072, "h2_tiles": 1}


# ----------------------------------------------------------------------------
# Kernels
# ----------------------------------------------------------------------------
def _bn_train(y, gamma, beta):
    # Training-mode BatchNorm1d: batch statistics, biased variance, eps=1e-5.
    mean = jnp.mean(y, axis=0, keepdims=True)
    var = jnp.mean((y - mean) * (y - mean), axis=0, keepdims=True)
    return gamma * (y - mean) * jax.lax.rsqrt(var + _BN_EPS) + beta


def _fused_l12_kernel(z_ref, w0_ref, g0_ref, b0_ref, w1_ref, g1_ref, b1_ref,
                      o_ref):
    # Layer 1: Linear(zdim->512) [bias dropped: cancelled by BN mean] + BN + ReLU.
    # Recomputed per layer-2 column tile when h2_tiles > 1 (cost ~0.5 MFLOP).
    y1 = jnp.dot(z_ref[...], w0_ref[...], preferred_element_type=jnp.float32)
    h1 = jnp.maximum(_bn_train(y1, g0_ref[...], b0_ref[...]), 0.0)
    # Layer 2: Linear(512->1024) [bias dropped] + BN + ReLU, over this column tile.
    y2 = jnp.dot(h1.astype(jnp.bfloat16), w1_ref[...],
                 preferred_element_type=jnp.float32)
    h2 = jnp.maximum(_bn_train(y2, g1_ref[...], b1_ref[...]), 0.0)
    o_ref[...] = h2.astype(o_ref.dtype)  # emit bf16: consumed as bf16 by layer 3


def _linear_q8_bias_tanh_kernel(x_ref, wq_ref, scale_ref, b_ref, o_ref):
    # Layer 3: Linear(1024->12288) with int8 weights (per-column scale) + bias + tanh.
    w = wq_ref[...].astype(jnp.bfloat16)        # exact cast: |q| <= 127
    y = jnp.dot(x_ref[...], w, preferred_element_type=jnp.float32)
    o_ref[...] = jnp.tanh(y * scale_ref[...] + b_ref[...])


# ----------------------------------------------------------------------------
# Pallas wrappers
# ----------------------------------------------------------------------------
def fused_hidden_layers(z, w0, gamma0, beta0, w1, gamma1, beta1, *, h2_tiles=1):
    """Fused Linear+BN+ReLU x2; optionally column-split over layer-2 features."""
    B, K0 = z.shape
    H1 = w0.shape[1]          # 512
    H2 = w1.shape[1]          # 1024
    assert H2 % h2_tiles == 0
    tile_h2 = H2 // h2_tiles
    return pl.pallas_call(
        _fused_l12_kernel,
        out_shape=jax.ShapeDtypeStruct((B, H2), jnp.bfloat16),
        grid=(h2_tiles,),
        in_specs=[
            pl.BlockSpec((B, K0), lambda j: (0, 0)),
            pl.BlockSpec((K0, H1), lambda j: (0, 0)),
            pl.BlockSpec((1, H1), lambda j: (0, 0)),
            pl.BlockSpec((1, H1), lambda j: (0, 0)),
            pl.BlockSpec((H1, tile_h2), lambda j: (0, j)),
            pl.BlockSpec((1, tile_h2), lambda j: (0, j)),
            pl.BlockSpec((1, tile_h2), lambda j: (0, j)),
        ],
        out_specs=pl.BlockSpec((B, tile_h2), lambda j: (0, j)),
        compiler_params=pltpu.CompilerParams(
            dimension_semantics=("parallel",)),
        cost_estimate=pl.CostEstimate(
            flops=2 * B * (K0 * H1 * h2_tiles + H1 * H2),
            transcendentals=(H1 + tile_h2) * h2_tiles,
            bytes_accessed=2 * (K0 * H1 + H1 * H2) + 2 * B * (K0 + H2)
            + 4 * 2 * (H1 + H2)),
    )(z, w0, gamma0, beta0, w1, gamma1, beta1)


def linear_q8_bias_tanh(x, w_q, scale, b):
    """Tiled int8-weight Linear + per-column dequant + bias + tanh.

    x:     (B, K)  bf16 activations
    w_q:   (N//tile_n, K, tile_n) int8, tile-contiguous weight layout
    scale: (1, N) f32 per-output-column dequant scales
    b:     (1, N) f32 bias
    """
    B, K = x.shape
    nt, k_w, tile_n = w_q.shape
    assert k_w == K
    N = nt * tile_n
    return pl.pallas_call(
        _linear_q8_bias_tanh_kernel,
        out_shape=jax.ShapeDtypeStruct((B, N), jnp.float32),
        grid=(nt,),
        in_specs=[
            pl.BlockSpec((B, K), lambda j: (0, 0)),
            pl.BlockSpec((None, K, tile_n), lambda j: (j, 0, 0)),
            pl.BlockSpec((1, tile_n), lambda j: (0, j)),
            pl.BlockSpec((1, tile_n), lambda j: (0, j)),
        ],
        out_specs=pl.BlockSpec((B, tile_n), lambda j: (0, j)),
        compiler_params=pltpu.CompilerParams(
            dimension_semantics=("parallel",)),
        cost_estimate=pl.CostEstimate(
            flops=2 * B * K * N,
            transcendentals=B * N,
            bytes_accessed=K * N + 4 * B * N + 2 * B * K + 8 * N),
    )(x, w_q, scale, b)


# ----------------------------------------------------------------------------
# Parameters
# ----------------------------------------------------------------------------
def init_generator_params(key, z_dim=100, img_dim=64 * 64 * 3):
    """PyTorch-style init matching the module's parameter shapes (f32 masters)."""
    dims = [(z_dim, 512), (512, 1024), (1024, img_dim)]
    params = {}
    for i, (fan_in, fan_out) in enumerate(dims):
        key, kw, kb = jax.random.split(key, 3)
        bound = 1.0 / jnp.sqrt(float(fan_in))
        params[f"w{i}"] = jax.random.uniform(
            kw, (fan_in, fan_out), jnp.float32, -bound, bound)
        params[f"b{i}"] = jax.random.uniform(
            kb, (fan_out,), jnp.float32, -bound, bound)
    params["gamma0"] = jnp.ones((512,), jnp.float32)
    params["beta0"] = jnp.zeros((512,), jnp.float32)
    params["gamma1"] = jnp.ones((1024,), jnp.float32)
    params["beta1"] = jnp.zeros((1024,), jnp.float32)
    return params


def prepare_inference_params(params, *, tile_n, lane=128):
    """One-time, outside-jit prep:
      * w0/w1 cast to bf16; w0's contraction dim zero-padded 100 -> 128,
      * w2 quantized to int8 with per-output-column symmetric scales and
        reordered into a tile-contiguous (N//tile_n, K, tile_n) layout,
      * per-feature vectors reshaped to (1, N),
      * b0/b1 dropped (cancelled by training-mode BatchNorm)."""
    z_dim = params["w0"].shape[0]
    k_pad = ((z_dim + lane - 1) // lane) * lane
    w0 = params["w0"]
    if k_pad != z_dim:
        w0 = jnp.pad(w0, ((0, k_pad - z_dim), (0, 0)))

    w2 = params["w2"]
    K, N = w2.shape
    assert N % tile_n == 0
    nt = N // tile_n
    absmax = jnp.max(jnp.abs(w2), axis=0, keepdims=True)            # (1, N)
    scale = jnp.maximum(absmax, 1e-12) / 127.0
    w2_q = jnp.clip(jnp.round(w2 / scale), -127.0, 127.0).astype(jnp.int8)
    w2_q = jnp.transpose(w2_q.reshape(K, nt, tile_n), (1, 0, 2))     # (nt, K, tile_n)

    return {
        "w0": w0.astype(jnp.bfloat16),
        "w1": params["w1"].astype(jnp.bfloat16),
        "w2_q": w2_q,
        "w2_scale": scale.astype(jnp.float32),
        "b2": params["b2"].reshape(1, -1).astype(jnp.float32),
        "gamma0": params["gamma0"].reshape(1, -1),
        "beta0": params["beta0"].reshape(1, -1),
        "gamma1": params["gamma1"].reshape(1, -1),
        "beta1": params["beta1"].reshape(1, -1),
    }


# ----------------------------------------------------------------------------
# Forward
# ----------------------------------------------------------------------------
@functools.partial(jax.jit, static_argnames=("h2_tiles",))
def generator_forward(prepared, z, *, h2_tiles=1):
    # Lane-align the latent dim to match the padded w0 (zeros contribute 0).
    pad = prepared["w0"].shape[0] - z.shape[1]
    if pad:
        z = jnp.pad(z, ((0, 0), (0, pad)))
    z = z.astype(jnp.bfloat16)
    # Layers 1+2 fused: Linear+BN+ReLU, Linear+BN+ReLU  -> (B, 1024) bf16
    h = fused_hidden_layers(z, prepared["w0"], prepared["gamma0"],
                            prepared["beta0"], prepared["w1"],
                            prepared["gamma1"], prepared["beta1"],
                            h2_tiles=h2_tiles)
    # Layer 3: int8-weight Linear(1024, 12288) + bias + Tanh, tiled over columns.
    img = linear_q8_bias_tanh(h, prepared["w2_q"], prepared["w2_scale"],
                              prepared["b2"])
    # x.view(-1, 3, 64, 64)  -> NCHW, same as PyTorch
    return img.reshape(-1, 3, 64, 64)


# ----------------------------------------------------------------------------
# Pure-JAX reference (original module semantics, bf16 matmuls, f32 BN/tanh;
# includes the pre-BN biases, which training-mode BN cancels).
# ----------------------------------------------------------------------------
def _reference_forward(params, z):
    def bn(y, g, b):
        mean = jnp.mean(y, axis=0, keepdims=True)
        var = jnp.mean((y - mean) ** 2, axis=0, keepdims=True)
        return g * (y - mean) * jax.lax.rsqrt(var + _BN_EPS) + b

    def mm(x, w_f32):
        return jnp.dot(x.astype(jnp.bfloat16), w_f32.astype(jnp.bfloat16),
                       preferred_element_type=jnp.float32)

    h = jnp.maximum(bn(mm(z, params["w0"]) + params["b0"],
                       params["gamma0"], params["beta0"]), 0.0)
    h = jnp.maximum(bn(mm(h, params["w1"]) + params["b1"],
                       params["gamma1"], params["beta1"]), 0.0)
    img = jnp.tanh(mm(h, params["w2"]) + params["b2"])
    return img.reshape(-1, 3, 64, 64)


if __name__ == "__main__":
    key = jax.random.PRNGKey(0)
    k_params, k_z = jax.random.split(key)

    Z_DIM = 100
    IMG_DIM = 64 * 64 * 3
    BATCH = 8  # small batch; feature dims are fixed by the module

    cfg = pick_device_config()
    params = init_generator_params(k_params, Z_DIM, IMG_DIM)
    prepared = prepare_inference_params(params, tile_n=cfg["tile_n"])
    z = jax.random.normal(k_z, (BATCH, Z_DIM), jnp.float32)

    out = generator_forward(prepared, z, h2_tiles=cfg["h2_tiles"])
    out = jax.block_until_ready(out)
    assert out.shape == (BATCH, 3, 64, 64), out.shape

    ref = _reference_forward(params, z)
    max_diff = float(jnp.max(jnp.abs(out - ref)))
    # Tolerance covers MXU-vs-XLA accumulation order, bf16 rounding of the
    # inter-layer activations, and the per-column int8 quantization of w2
    # (estimated pre-tanh error < ~1e-2 at these weight scales).
    assert max_diff < 3e-2, max_diff

    print("KERNEL_OK")
</pallas_src>

<mosaic_0001>
module attributes {stable_mosaic.version = 11 : i64} {
  func.func @_fused_l12_kernel(%arg0: i32, %arg1: memref<8x128xbf16, #tpu.memory_space<vmem>>, %arg2: memref<128x512xbf16, #tpu.memory_space<vmem>>, %arg3: memref<1x512xf32, #tpu.memory_space<vmem>>, %arg4: memref<1x512xf32, #tpu.memory_space<vmem>>, %arg5: memref<512x1024xbf16, #tpu.memory_space<vmem>>, %arg6: memref<1x1024xf32, #tpu.memory_space<vmem>>, %arg7: memref<1x1024xf32, #tpu.memory_space<vmem>>, %arg8: memref<8x1024xbf16, #tpu.memory_space<vmem>>) attributes {dimension_semantics = [#tpu.dimension_semantics<parallel>], iteration_bounds = array<i64: 1>, scalar_prefetch = 0 : i64, scratch_operands = 0 : i64, tpu.core_type = #tpu.core_type<tc>, window_params = [{pipeline_mode = #tpu.pipeline_mode<synchronous>, transform_indices = @transform_0, window_bounds = array<i64: 8, 128>}, {pipeline_mode = #tpu.pipeline_mode<synchronous>, transform_indices = @transform_1, window_bounds = array<i64: 128, 512>}, {pipeline_mode = #tpu.pipeline_mode<synchronous>, transform_indices = @transform_2, window_bounds = array<i64: 1, 512>}, {pipeline_mode = #tpu.pipeline_mode<synchronous>, transform_indices = @transform_3, window_bounds = array<i64: 1, 512>}, {transform_indices = @transform_4, window_bounds = array<i64: 512, 1024>}, {transform_indices = @transform_5, window_bounds = array<i64: 1, 1024>}, {transform_indices = @transform_6, window_bounds = array<i64: 1, 1024>}, {transform_indices = @transform_7, window_bounds = array<i64: 8, 1024>}]} {
    %c0 = arith.constant 0 : index
    %c0_0 = arith.constant 0 : index
    %0 = vector.load %arg1[%c0, %c0_0] : memref<8x128xbf16, #tpu.memory_space<vmem>>, vector<8x128xbf16>
    %c0_1 = arith.constant 0 : index
    %c0_2 = arith.constant 0 : index
    %1 = vector.load %arg2[%c0_1, %c0_2] : memref<128x512xbf16, #tpu.memory_space<vmem>>, vector<128x512xbf16>
    %cst = arith.constant dense<0.000000e+00> : vector<8x512xf32>
    %2 = tpu.matmul %0, %1, %cst {dimension_numbers = #tpu.dot_dimension_numbers<[1], [0], [0], [1], [0, 0, 1, 1], [], []>} : vector<8x128xbf16>, vector<128x512xbf16>, vector<8x512xf32> -> vector<8x512xf32>
    %c0_3 = arith.constant 0 : index
    %c0_4 = arith.constant 0 : index
    %3 = vector.load %arg3[%c0_3, %c0_4] : memref<1x512xf32, #tpu.memory_space<vmem>>, vector<1x512xf32>
    %c0_5 = arith.constant 0 : index
    %c0_6 = arith.constant 0 : index
    %4 = vector.load %arg4[%c0_5, %c0_6] : memref<1x512xf32, #tpu.memory_space<vmem>>, vector<1x512xf32>
    %cst_7 = arith.constant dense<0.000000e+00> : vector<512xf32>
    %5 = vector.multi_reduction <add>, %2, %cst_7 [0] : vector<8x512xf32> to vector<512xf32>
    %6 = vector.shape_cast %5 : vector<512xf32> to vector<1x512xf32>
    %cst_8 = arith.constant 8.000000e+00 : f32
    %7 = vector.broadcast %cst_8 : f32 to vector<1x512xf32>
    %8 = arith.divf %6, %7 : vector<1x512xf32>
    %9 = vector.broadcast %8 : vector<1x512xf32> to vector<8x512xf32>
    %10 = arith.subf %2, %9 : vector<8x512xf32>
    %11 = vector.broadcast %8 : vector<1x512xf32> to vector<8x512xf32>
    %12 = arith.subf %2, %11 : vector<8x512xf32>
    %13 = arith.mulf %10, %12 : vector<8x512xf32>
    %cst_9 = arith.constant dense<0.000000e+00> : vector<512xf32>
    %14 = vector.multi_reduction <add>, %13, %cst_9 [0] : vector<8x512xf32> to vector<512xf32>
    %15 = vector.shape_cast %14 : vector<512xf32> to vector<1x512xf32>
    %cst_10 = arith.constant 8.000000e+00 : f32
    %16 = vector.broadcast %cst_10 : f32 to vector<1x512xf32>
    %17 = arith.divf %15, %16 : vector<1x512xf32>
    %18 = vector.broadcast %8 : vector<1x512xf32> to vector<8x512xf32>
    %19 = arith.subf %2, %18 : vector<8x512xf32>
    %20 = vector.broadcast %3 : vector<1x512xf32> to vector<8x512xf32>
    %21 = arith.mulf %20, %19 : vector<8x512xf32>
    %cst_11 = arith.constant 9.99999974E-6 : f32
    %22 = vector.broadcast %cst_11 : f32 to vector<1x512xf32>
    %23 = arith.addf %17, %22 : vector<1x512xf32>
    %24 = math.rsqrt %23 : vector<1x512xf32>
    %25 = vector.broadcast %24 : vector<1x512xf32> to vector<8x512xf32>
    %26 = arith.mulf %21, %25 : vector<8x512xf32>
    %27 = vector.broadcast %4 : vector<1x512xf32> to vector<8x512xf32>
    %28 = arith.addf %26, %27 : vector<8x512xf32>
    %cst_12 = arith.constant 0.000000e+00 : f32
    %29 = vector.broadcast %cst_12 : f32 to vector<8x512xf32>
    %30 = arith.maximumf %28, %29 : vector<8x512xf32>
    %31 = arith.truncf %30 : vector<8x512xf32> to vector<8x512xbf16>
    %c0_13 = arith.constant 0 : index
    %c0_14 = arith.constant 0 : index
    %32 = vector.load %arg5[%c0_13, %c0_14] : memref<512x1024xbf16, #tpu.memory_space<vmem>>, vector<512x1024xbf16>
    %cst_15 = arith.constant dense<0.000000e+00> : vector<8x1024xf32>
    %33 = tpu.matmul %31, %32, %cst_15 {dimension_numbers = #tpu.dot_dimension_numbers<[1], [0], [0], [1], [0, 0, 1, 1], [], []>} : vector<8x512xbf16>, vector<512x1024xbf16>, vector<8x1024xf32> -> vector<8x1024xf32>
    %c0_16 = arith.constant 0 : index
    %c0_17 = arith.constant 0 : index
    %34 = vector.load %arg6[%c0_16, %c0_17] : memref<1x1024xf32, #tpu.memory_space<vmem>>, vector<1x1024xf32>
    %c0_18 = arith.constant 0 : index
    %c0_19 = arith.constant 0 : index
    %35 = vector.load %arg7[%c0_18, %c0_19] : memref<1x1024xf32, #tpu.memory_space<vmem>>, vector<1x1024xf32>
    %cst_20 = arith.constant dense<0.000000e+00> : vector<1024xf32>
    %36 = vector.multi_reduction <add>, %33, %cst_20 [0] : vector<8x1024xf32> to vector<1024xf32>
    %37 = vector.shape_cast %36 : vector<1024xf32> to vector<1x1024xf32>
    %cst_21 = arith.constant 8.000000e+00 : f32
    %38 = vector.broadcast %cst_21 : f32 to vector<1x1024xf32>
    %39 = arith.divf %37, %38 : vector<1x1024xf32>
    %40 = vector.broadcast %39 : vector<1x1024xf32> to vector<8x1024xf32>
    %41 = arith.subf %33, %40 : vector<8x1024xf32>
    %42 = vector.broadcast %39 : vector<1x1024xf32> to vector<8x1024xf32>
    %43 = arith.subf %33, %42 : vector<8x1024xf32>
    %44 = arith.mulf %41, %43 : vector<8x1024xf32>
    %cst_22 = arith.constant dense<0.000000e+00> : vector<1024xf32>
    %45 = vector.multi_reduction <add>, %44, %cst_22 [0] : vector<8x1024xf32> to vector<1024xf32>
    %46 = vector.shape_cast %45 : vector<1024xf32> to vector<1x1024xf32>
    %cst_23 = arith.constant 8.000000e+00 : f32
    %47 = vector.broadcast %cst_23 : f32 to vector<1x1024xf32>
    %48 = arith.divf %46, %47 : vector<1x1024xf32>
    %49 = vector.broadcast %39 : vector<1x1024xf32> to vector<8x1024xf32>
    %50 = arith.subf %33, %49 : vector<8x1024xf32>
    %51 = vector.broadcast %34 : vector<1x1024xf32> to vector<8x1024xf32>
    %52 = arith.mulf %51, %50 : vector<8x1024xf32>
    %cst_24 = arith.constant 9.99999974E-6 : f32
    %53 = vector.broadcast %cst_24 : f32 to vector<1x1024xf32>
    %54 = arith.addf %48, %53 : vector<1x1024xf32>
    %55 = math.rsqrt %54 : vector<1x1024xf32>
    %56 = vector.broadcast %55 : vector<1x1024xf32> to vector<8x1024xf32>
    %57 = arith.mulf %52, %56 : vector<8x1024xf32>
    %58 = vector.broadcast %35 : vector<1x1024xf32> to vector<8x1024xf32>
    %59 = arith.addf %57, %58 : vector<8x1024xf32>
    %cst_25 = arith.constant 0.000000e+00 : f32
    %60 = vector.broadcast %cst_25 : f32 to vector<8x1024xf32>
    %61 = arith.maximumf %59, %60 : vector<8x1024xf32>
    %62 = arith.truncf %61 : vector<8x1024xf32> to vector<8x1024xbf16>
    %c0_26 = arith.constant 0 : index
    %c0_27 = arith.constant 0 : index
    %63 = vector.load %arg8[%c0_26, %c0_27] : memref<8x1024xbf16, #tpu.memory_space<vmem>>, vector<8x1024xbf16>
    tpu.vector_store %arg8[%c0_26, %c0_27], %62 {strides = array<i32>} : memref<8x1024xbf16, #tpu.memory_space<vmem>>, vector<8x1024xbf16>,
    return
  }
  func.func @transform_0(%arg0: i32) -> (i32, i32) {
    %c0_i32 = arith.constant 0 : i32
    %c0_i32_0 = arith.constant 0 : i32
    %c0_i32_1 = arith.constant 0 : i32
    return %c0_i32, %c0_i32_0 : i32, i32
  }
  func.func @transform_1(%arg0: i32) -> (i32, i32) {
    %c0_i32 = arith.constant 0 : i32
    %c0_i32_0 = arith.constant 0 : i32
    %c0_i32_1 = arith.constant 0 : i32
    return %c0_i32, %c0_i32_0 : i32, i32
  }
  func.func @transform_2(%arg0: i32) -> (i32, i32) {
    %c0_i32 = arith.constant 0 : i32
    %c0_i32_0 = arith.constant 0 : i32
    %c0_i32_1 = arith.constant 0 : i32
    return %c0_i32, %c0_i32_0 : i32, i32
  }
  func.func @transform_3(%arg0: i32) -> (i32, i32) {
    %c0_i32 = arith.constant 0 : i32
    %c0_i32_0 = arith.constant 0 : i32
    %c0_i32_1 = arith.constant 0 : i32
    return %c0_i32, %c0_i32_0 : i32, i32
  }
  func.func @transform_4(%arg0: i32) -> (i32, i32) {
    %c0_i32 = arith.constant 0 : i32
    %c0_i32_0 = arith.constant 0 : i32
    return %c0_i32, %arg0 : i32, i32
  }
  func.func @transform_5(%arg0: i32) -> (i32, i32) {
    %c0_i32 = arith.constant 0 : i32
    %c0_i32_0 = arith.constant 0 : i32
    return %c0_i32, %arg0 : i32, i32
  }
  func.func @transform_6(%arg0: i32) -> (i32, i32) {
    %c0_i32 = arith.constant 0 : i32
    %c0_i32_0 = arith.constant 0 : i32
    return %c0_i32, %arg0 : i32, i32
  }
  func.func @transform_7(%arg0: i32) -> (i32, i32) {
    %c0_i32 = arith.constant 0 : i32
    %c0_i32_0 = arith.constant 0 : i32
    return %c0_i32, %arg0 : i32, i32
  }
}

module attributes {stable_mosaic.version = 11 : i64} {
  func.func @_linear_q8_bias_tanh_kernel(%arg0: i32, %arg1: memref<8x1024xbf16, #tpu.memory_space<vmem>>, %arg2: memref<1x1024x3072xi8, #tpu.memory_space<vmem>>, %arg3: memref<1x3072xf32, #tpu.memory_space<vmem>>, %arg4: memref<1x3072xf32, #tpu.memory_space<vmem>>, %arg5: memref<8x3072xf32, #tpu.memory_space<vmem>>) attributes {dimension_semantics = [#tpu.dimension_semantics<parallel>], iteration_bounds = array<i64: 4>, scalar_prefetch = 0 : i64, scratch_operands = 0 : i64, tpu.core_type = #tpu.core_type<tc>, window_params = [{pipeline_mode = #tpu.pipeline_mode<synchronous>, transform_indices = @transform_0, window_bounds = array<i64: 8, 1024>}, {transform_indices = @transform_1, window_bounds = array<i64: 1, 1024, 3072>}, {transform_indices = @transform_2, window_bounds = array<i64: 1, 3072>}, {transform_indices = @transform_3, window_bounds = array<i64: 1, 3072>}, {transform_indices = @transform_4, window_bounds = array<i64: 8, 3072>}]} {
    %c0 = arith.constant 0 : index
    %c0_0 = arith.constant 0 : index
    %c0_1 = arith.constant 0 : index
    %0 = vector.load %arg2[%c0, %c0_0, %c0_1] : memref<1x1024x3072xi8, #tpu.memory_space<vmem>>, vector<1x1024x3072xi8>
    %1 = vector.shape_cast %0 : vector<1x1024x3072xi8> to vector<1024x3072xi8>
    %2 = arith.sitofp %1 : vector<1024x3072xi8> to vector<1024x3072xbf16>
    %c0_2 = arith.constant 0 : index
    %c0_3 = arith.constant 0 : index
    %3 = vector.load %arg1[%c0_2, %c0_3] : memref<8x1024xbf16, #tpu.memory_space<vmem>>, vector<8x1024xbf16>
    %cst = arith.constant dense<0.000000e+00> : vector<8x3072xf32>
    %4 = tpu.matmul %3, %2, %cst {dimension_numbers = #tpu.dot_dimension_numbers<[1], [0], [0], [1], [0, 0, 1, 1], [], []>} : vector<8x1024xbf16>, vector<1024x3072xbf16>, vector<8x3072xf32> -> vector<8x3072xf32>
    %c0_4 = arith.constant 0 : index
    %c0_5 = arith.constant 0 : index
    %5 = vector.load %arg3[%c0_4, %c0_5] : memref<1x3072xf32, #tpu.memory_space<vmem>>, vector<1x3072xf32>
    %6 = vector.broadcast %5 : vector<1x3072xf32> to vector<8x3072xf32>
    %7 = arith.mulf %4, %6 : vector<8x3072xf32>
    %c0_6 = arith.constant 0 : index
    %c0_7 = arith.constant 0 : index
    %8 = vector.load %arg4[%c0_6, %c0_7] : memref<1x3072xf32, #tpu.memory_space<vmem>>, vector<1x3072xf32>
    %9 = vector.broadcast %8 : vector<1x3072xf32> to vector<8x3072xf32>
    %10 = arith.addf %7, %9 : vector<8x3072xf32>
    %11 = math.tanh %10 : vector<8x3072xf32>
    %c0_8 = arith.constant 0 : index
    %c0_9 = arith.constant 0 : index
    %12 = vector.load %arg5[%c0_8, %c0_9] : memref<8x3072xf32, #tpu.memory_space<vmem>>, vector<8x3072xf32>
    tpu.vector_store %arg5[%c0_8, %c0_9], %11 {strides = array<i32>} : memref<8x3072xf32, #tpu.memory_space<vmem>>, vector<8x3072xf32>,
    return
  }
  func.func @transform_0(%arg0: i32) -> (i32, i32) {
    %c0_i32 = arith.constant 0 : i32
    %c0_i32_0 = arith.constant 0 : i32
    %c0_i32_1 = arith.constant 0 : i32
    return %c0_i32, %c0_i32_0 : i32, i32
  }
  func.func @transform_1(%arg0: i32) -> (i32, i32, i32) {
    %c0_i32 = arith.constant 0 : i32
    %c0_i32_0 = arith.constant 0 : i32
    %c0_i32_1 = arith.constant 0 : i32
    return %arg0, %c0_i32, %c0_i32_0 : i32, i32, i32
  }
  func.func @transform_2(%arg0: i32) -> (i32, i32) {
    %c0_i32 = arith.constant 0 : i32
    %c0_i32_0 = arith.constant 0 : i32
    return %c0_i32, %arg0 : i32, i32
  }
  func.func @transform_3(%arg0: i32) -> (i32, i32) {
    %c0_i32 = arith.constant 0 : i32
    %c0_i32_0 = arith.constant 0 : i32
    return %c0_i32, %arg0 : i32, i32
  }
  func.func @transform_4(%arg0: i32) -> (i32, i32) {
    %c0_i32 = arith.constant 0 : i32
    %c0_i32_0 = arith.constant 0 : i32
    return %c0_i32, %arg0 : i32, i32
  }
}

</mosaic_0001>

<bundles_post_ra>
// kernel: generator_forward.2
= control target key start
LH: loop header
LB: loop body
LE: loop exit
PB: predicated region body
PF: predicated region fallthrough
CT: control target
= control target key end

     0   :  { %12 = vsyncpa [#allocation3], 0  ;;  %s3475_s0 = inlined_call_operand.vmem [shape: bf16[8,128], index: 0, kind: input, shape index: {}]   ;;  %s3476_s1 = inlined_call_operand.hbm [shape: bf16[128,512], index: 1, kind: input, shape index: {}]   ;;  %s3477_s2 = inlined_call_operand.hbm [shape: f32[1,512], index: 2, kind: input, shape index: {}]   ;;  %s3478_s3 = inlined_call_operand.hbm [shape: f32[1,512], index: 3, kind: input, shape index: {}]   ;;  %s3479_s4 = inlined_call_operand.hbm [shape: bf16[512,1024], index: 4, kind: input, shape index: {}]   ;;  %s3480_s5 = inlined_call_operand.hbm [shape: f32[1,1024], index: 5, kind: input, shape index: {}]   ;;  %s3481_s6 = inlined_call_operand.hbm [shape: f32[1,1024], index: 6, kind: input, shape index: {}]   ;;  %s3482_s7 = inlined_call_operand.vmem [shape: bf16[8,1024], index: 7, kind: output, shape index: {}]  }
   0x1   :  { %13 = vsyncpa [#allocation5], 0 }
   0x2   :  { %14 = vsyncpa [#allocation8], 0 }
   0x3   :  { %15 = vsyncpa [#allocation11], 0  ;;  %s3216_s24 = smov [#allocation4]   ;;  %s3217_s26 = smov [#allocation7]  }
   0x4   :  { %s36_s25 = sshll.u32 %s3216_s24, 4  ;;  %s55_s27 = sshll.u32 %s3217_s26, 4  ;;  %s37_s25 = int_to_ptr.vmem [resolvable:$true] %s36_s25  ;;  %s3267_s27 = int_to_ptr.vmem [resolvable:$true] %s55_s27 }
   0x5   :  { %s3076_s30 = scalar_lea.hbm %s3477_s2, 64 }
   0x6   :  { %p3077_p0 = scmp.ne.s32.totalorder %s3477_s2, %s3076_s30  ;;  %p3080_p1 = scmp.lt.u32.totalorder %s3076_s30, %s3477_s2 }
   0x8   :  { %p3082_p2 = pnand %p3080_p1, %p3077_p0 }
   0xa   :  { %3085 = shalt.err (!%p3082_p2)
}
   0xb   :  { %s3086_s12 = scalar_lea.vmem %s37_s25, 64  ;;  %p3091_p4 = scmp.lt.s32.totalorder %s37_s25, %s37_s25 }
   0xc   :  { %p3087_p3 = scmp.ne.s32.totalorder %s37_s25, %s3086_s12  ;;  %p3092_p5 = scmp.lt.s32.totalorder %s3086_s12, %s3086_s12 }
   0xe   :  { %p3093_p6 = por %p3092_p5, %p3091_p4 }
  0x10   :  { %p3094_p7 = pnand %p3093_p6, %p3087_p3 }
  0x12   :  { %3097 = shalt.err (!%p3094_p7)
}
  0x13   :  { %39 = dma.hbm_to_vmem [thread:$0]  %s3477_s2, 64, %s37_s25, [#allocation5]  }
  0x14   :  { %s3098_s17 = scalar_lea.hbm %s3479_s4, 32768 }
  0x15   :  { %p3099_p8 = scmp.ne.s32.totalorder %s3479_s4, %s3098_s17  ;;  %p3102_p9 = scmp.lt.u32.totalorder %s3098_s17, %s3479_s4 }
  0x17   :  { %p3104_p10 = pnand %p3102_p9, %p3099_p8 }
  0x19   :  { %3107 = shalt.err (!%p3104_p10)
}
  0x1a   :  { %s3108_s22 = scalar_lea.vmem %s3267_s27, 32768  ;;  %p3113_p12 = scmp.lt.s32.totalorder %s3267_s27, %s3267_s27 }
  0x1b   :  { %p3109_p11 = scmp.ne.s32.totalorder %s3267_s27, %s3108_s22  ;;  %p3114_p13 = scmp.lt.s32.totalorder %s3108_s22, %s3108_s22 }
  0x1d   :  { %p3115_p0 = por %p3114_p13, %p3113_p12 }
  0x1f   :  { %p3116_p1 = pnand %p3115_p0, %p3109_p11 }
  0x21   :  { %3119 = shalt.err (!%p3116_p1)
}
  0x22   :  { %s3218_s2 = smov 512   ;;  %s3219_s23 = smov 32  }
  0x23   :  { %61 = dma.hbm_to_vmem [thread:$0]  %s3479_s4, 32768, %s3267_s27, [#allocation8], %s3218_s2, %s3218_s2, %s3219_s23  }
  0x24   :  { %s3220_s26 = smov [#allocation2]   ;;  %s3120_s8 = scalar_lea.hbm %s3476_s1, 4096 }
  0x25   :  { %s23_s28 = sshll.u32 %s3220_s26, 4  ;;  %p3121_p2 = scmp.ne.s32.totalorder %s3476_s1, %s3120_s8  ;;  %s24_s28 = int_to_ptr.vmem [resolvable:$true] %s23_s28 }
  0x26   :  { %p3124_p3 = scmp.lt.u32.totalorder %s3120_s8, %s3476_s1 }
  0x28   :  { %p3126_p4 = pnand %p3124_p3, %p3121_p2 }
  0x2a   :  { %3129 = shalt.err (!%p3126_p4)
}
  0x2b   :  { %s3130_s13 = scalar_lea.vmem %s24_s28, 4096  ;;  %p3135_p6 = scmp.lt.s32.totalorder %s24_s28, %s24_s28 }
  0x2c   :  { %p3131_p5 = scmp.ne.s32.totalorder %s24_s28, %s3130_s13  ;;  %p3136_p7 = scmp.lt.s32.totalorder %s3130_s13, %s3130_s13 }
  0x2e   :  { %p3137_p8 = por %p3136_p7, %p3135_p6 }
  0x30   :  { %p3138_p9 = pnand %p3137_p8, %p3131_p5 }
  0x32   :  { %3141 = shalt.err (!%p3138_p9)
}
  0x33   :  { %s3221_s4 = smov 256   ;;  %s3222_s27 = smov 16  }
  0x34   :  { %29 = dma.hbm_to_vmem [thread:$0]  %s3476_s1, 4096, %s24_s28, [#allocation3], %s3221_s4, %s3221_s4, %s3222_s27  }
  0x35   :  { %s3223_s16 = smov [#allocation6]   ;;  %s3224_s18 = smov [#allocation9]  }
  0x36   :  { %s46_s17 = sshll.u32 %s3223_s16, 4  ;;  %s68_s19 = sshll.u32 %s3224_s18, 4  ;;  %s47_s17 = int_to_ptr.vmem [resolvable:$true] %s46_s17  ;;  %s69_s19 = int_to_ptr.vmem [resolvable:$true] %s68_s19 }
  0x37   :  { %s3142_s22 = scalar_lea.hbm %s3478_s3, 64 }
  0x38   :  { %p3143_p10 = scmp.ne.s32.totalorder %s3478_s3, %s3142_s22  ;;  %p3146_p11 = scmp.lt.u32.totalorder %s3142_s22, %s3478_s3 }
  0x3a   :  { %p3148_p12 = pnand %p3146_p11, %p3143_p10 }
  0x3c   :  { %3151 = shalt.err (!%p3148_p12)
}
  0x3d   :  { %s3152_s1 = scalar_lea.vmem %s47_s17, 64  ;;  %p3157_p0 = scmp.lt.s32.totalorder %s47_s17, %s47_s17 }
  0x3e   :  { %p3153_p13 = scmp.ne.s32.totalorder %s47_s17, %s3152_s1  ;;  %p3158_p1 = scmp.lt.s32.totalorder %s3152_s1, %s3152_s1 }
  0x40   :  { %p3159_p2 = por %p3158_p1, %p3157_p0 }
  0x42   :  { %p3160_p3 = pnand %p3159_p2, %p3153_p13 }
  0x44   :  { %3163 = shalt.err (!%p3160_p3)
}
  0x45   :  { %49 = dma.hbm_to_vmem [thread:$0]  %s3478_s3, 64, %s47_s17, [#allocation5]  }
  0x46   :  { %s3164_s8 = scalar_lea.hbm %s3480_s5, 128 }
  0x47   :  { %p3165_p4 = scmp.ne.s32.totalorder %s3480_s5, %s3164_s8  ;;  %p3168_p5 = scmp.lt.u32.totalorder %s3164_s8, %s3480_s5 }
  0x49   :  { %p3170_p6 = pnand %p3168_p5, %p3165_p4 }
  0x4b   :  { %3173 = shalt.err (!%p3170_p6)
}
  0x4c   :  { %s3174_s13 = scalar_lea.vmem %s69_s19, 128  ;;  %p3179_p8 = scmp.lt.s32.totalorder %s69_s19, %s69_s19 }
  0x4d   :  { %p3175_p7 = scmp.ne.s32.totalorder %s69_s19, %s3174_s13  ;;  %p3180_p9 = scmp.lt.s32.totalorder %s3174_s13, %s3174_s13 }
  0x4f   :  { %p3181_p10 = por %p3180_p9, %p3179_p8 }
  0x51   :  { %p3182_p11 = pnand %p3181_p10, %p3175_p7 }
  0x53   :  { %3185 = shalt.err (!%p3182_p11)
}
  0x54   :  { %71 = dma.hbm_to_vmem [thread:$0]  %s3480_s5, 128, %s69_s19, [#allocation8]  }
  0x55   :  { %s3225_s27 = smov [#allocation10]   ;;  %s3186_s17 = scalar_lea.hbm %s3481_s6, 128 }
  0x56   :  { %s78_s14 = sshll.u32 %s3225_s27, 4  ;;  %p3187_p12 = scmp.ne.s32.totalorder %s3481_s6, %s3186_s17  ;;  %s79_s14 = int_to_ptr.vmem [resolvable:$true] %s78_s14 }
  0x57   :  { %p3190_p13 = scmp.lt.u32.totalorder %s3186_s17, %s3481_s6 }
  0x59   :  { %p3192_p0 = pnand %p3190_p13, %p3187_p12 }
  0x5b   :  { %3195 = shalt.err (!%p3192_p0)
}
  0x5c   :  { %s3196_s2 = scalar_lea.vmem %s79_s14, 128  ;;  %p3201_p2 = scmp.lt.s32.totalorder %s79_s14, %s79_s14 }
  0x5d   :  { %p3197_p1 = scmp.ne.s32.totalorder %s79_s14, %s3196_s2  ;;  %p3202_p3 = scmp.lt.s32.totalorder %s3196_s2, %s3196_s2 }
  0x5f   :  { %p3203_p4 = por %p3202_p3, %p3201_p2 }
  0x61   :  { %p3204_p5 = pnand %p3203_p4, %p3197_p1 }
  0x63   :  { %3207 = shalt.err (!%p3204_p5)
}
  0x64   :  { %81 = dma.hbm_to_vmem [thread:$0]  %s3481_s6, 128, %s79_s14, [#allocation11]  }
  0x65   :  { %3208 = dma.done.wait [#allocation3], 4096  }
  0x66   :  { %3209 = vsyncadd [#allocation3], 4294963200 }
  0x67   :  { %3210 = dma.done.wait [#allocation5], 128  }
  0x68   :  { %3211 = vsyncadd [#allocation5], 4294967168 }
  0x69   :  { %3212 = dma.done.wait [#allocation8], 32896  }
  0x6a   :  { %3213 = vsyncadd [#allocation8], 4294934400 }
  0x6b   :  { %3214 = dma.done.wait [#allocation11], 128  }
  0x6c   :  { %3215 = vsyncadd [#allocation11], 4294967168  ;;  %v3226_v0 = vmov 0   ;;  %v3004_v1 = vld [vmem:[#allocation2 + $0x4] ss:$16 sps:$4 sm:$0xff]   ;;  %v513_v27 = vld [vmem:[#allocation7] sm:$0xff] }
  0x6d   :  { %326 = vmatprep.mubr.bf16.mxu0 %v3226_v0  ;;  %367 = vmatprep.mubr.bf16.mxu1 %v3226_v0  ;;  %v3006_v2 = vld [vmem:[#allocation2] ss:$16 sps:$4 sm:$0xff]   ;;  %v3007_v3 = vld [vmem:[#allocation2 + $0x24] ss:$16 sps:$4 sm:$0xff]   ;;  %v3022_v8 = vld [vmem:[#allocation2 + $0xc] ss:$16 sps:$4 sm:$0xff]  }
  0x6e   :  { %294 = vmatprep.subr.bf16.mxu0 %v3004_v1  ;;  %v3009_v4 = vld [vmem:[#allocation2 + $0x20] ss:$16 sps:$4 sm:$0xff]   ;;  %v3010_v5 = vld [vmem:[#allocation2 + $0x44] ss:$16 sps:$4 sm:$0xff]   ;;  %v3024_v9 = vld [vmem:[#allocation2 + $0x8] ss:$16 sps:$4 sm:$0xff]   ;;  %335 = vmatprep.subr.bf16.mxu1 %v3022_v8 }
  0x6f   :  { %295 = vmatpush1.bf16.msra.mxu0 %v3006_v2  ;;  %v3012_v6 = vld [vmem:[#allocation2 + $0x40] ss:$16 sps:$4 sm:$0xff]   ;;  %v3013_v7 = vld [vmem:[#allocation2 + $0x64] ss:$16 sps:$4 sm:$0xff]   ;;  %336 = vmatpush1.bf16.msra.mxu1 %v3024_v9  ;;  %v3028_v11 = vld [vmem:[#allocation2 + $0x2c] ss:$16 sps:$4 sm:$0xff]  }
  0x70   :  { %296 = vmatprep.subr.bf16.mxu0 %v3007_v3  ;;  %v3015_v10 = vld [vmem:[#allocation2 + $0x60] ss:$16 sps:$4 sm:$0xff]   ;;  %v3030_v12 = vld [vmem:[#allocation2 + $0x28] ss:$16 sps:$4 sm:$0xff]   ;;  %v3016_v13 = vld [vmem:[#allocation2 + $0x84] ss:$16 sps:$4 sm:$0xff]   ;;  %337 = vmatprep.subr.bf16.mxu1 %v3028_v11 }
  0x71   :  { %v3018_v14 = vld [vmem:[#allocation2 + $0x80] ss:$16 sps:$4 sm:$0xff]   ;;  %v3019_v15 = vld [vmem:[#allocation2 + $0xa4] ss:$16 sps:$4 sm:$0xff]   ;;  %v3034_v16 = vld [vmem:[#allocation2 + $0x4c] ss:$16 sps:$4 sm:$0xff]  }
  0x72   :  { %v3036_v17 = vld [vmem:[#allocation2 + $0x48] ss:$16 sps:$4 sm:$0xff]   ;;  %v3037_v18 = vld [vmem:[#allocation2 + $0x6c] ss:$16 sps:$4 sm:$0xff]   ;;  %v3021_v19 = vld [vmem:[#allocation2 + $0xa0] ss:$16 sps:$4 sm:$0xff]  }
  0x73   :  { %297 = vmatpush1.bf16.msra.mxu0 %v3009_v4  ;;  %338 = vmatpush1.bf16.msra.mxu1 %v3030_v12  ;;  %v3025_v20 = vld [vmem:[#allocation2 + $0xc4] ss:$16 sps:$4 sm:$0xff]   ;;  %v3039_v21 = vld [vmem:[#allocation2 + $0x68] ss:$16 sps:$4 sm:$0xff]   ;;  %v3040_v22 = vld [vmem:[#allocation2 + $0x8c] ss:$16 sps:$4 sm:$0xff]  }
  0x74   :  { %298 = vmatprep.subr.bf16.mxu0 %v3010_v5  ;;  %339 = vmatprep.subr.bf16.mxu1 %v3034_v16  ;;  %v3027_v23 = vld [vmem:[#allocation2 + $0xc0] ss:$16 sps:$4 sm:$0xff]   ;;  %v3042_v24 = vld [vmem:[#allocation2 + $0x88] ss:$16 sps:$4 sm:$0xff]   ;;  %v3031_v25 = vld [vmem:[#allocation2 + $0xe4] ss:$16 sps:$4 sm:$0xff]  }
  0x75   :  { %v3043_v26 = vld [vmem:[#allocation2 + $0xac] ss:$16 sps:$4 sm:$0xff]   ;;  %v3033_v29 = vld [vmem:[#allocation2 + $0xe0] ss:$16 sps:$4 sm:$0xff]   ;;  %v3045_v30 = vld [vmem:[#allocation2 + $0xa8] ss:$16 sps:$4 sm:$0xff]  }
  0x76   :  { %v517_v28 = vld [vmem:[#allocation7 + $0x20] sm:$0xff]  ;;  %v101_v35 = vld [vmem:[%s3475_s0] sm:$0xf]  ;;  %v514_v39 = vld [vmem:[#allocation7 + $0x8] sm:$0xff] }
  0x77   :  { %299 = vmatpush1.bf16.msra.mxu0 %v3012_v6  ;;  %340 = vmatpush1.bf16.msra.mxu1 %v3036_v17  ;;  %v3046_v31 = vld [vmem:[#allocation2 + $0xcc] ss:$16 sps:$4 sm:$0xff]   ;;  %v2714_v32 = vcombine.high %v513_v27, %v517_v28  ;;  %v3048_v36 = vld [vmem:[#allocation2 + $0xc8] ss:$16 sps:$4 sm:$0xff]   ;;  %v2713_v37 = vcombine.low %v513_v27, %v517_v28  ;;  %v518_v41 = vld [vmem:[#allocation7 + $0x28] sm:$0xff] }
  0x78   :  { %300 = vmatprep.subr.bf16.mxu0 %v3013_v7  ;;  %341 = vmatprep.subr.bf16.mxu1 %v3037_v18  ;;  %v521_v33 = vld [vmem:[#allocation7 + $0x40] sm:$0xff]  ;;  %v2716_v46 = vcombine.high %v514_v39, %v518_v41  ;;  %v522_v48 = vld [vmem:[#allocation7 + $0x48] sm:$0xff]  ;;  %v2715_v50 = vcombine.low %v514_v39, %v518_v41 }
  0x79   :  { %v525_v34 = vld [vmem:[#allocation7 + $0x60] sm:$0xff]  ;;  %v526_v49 = vld [vmem:[#allocation7 + $0x68] sm:$0xff] }
  0x7a   :  { %v3049_v38 = vld [vmem:[#allocation2 + $0xec] ss:$16 sps:$4 sm:$0xff]   ;;  %v2722_v40 = vcombine.high %v521_v33, %v525_v34  ;;  %v3051_v44 = vld [vmem:[#allocation2 + $0xe8] ss:$16 sps:$4 sm:$0xff]   ;;  %v2721_v45 = vcombine.low %v521_v33, %v525_v34  ;;  %v2724_v52 = vcombine.high %v522_v48, %v526_v49  ;;  %v530_v53 = vld [vmem:[#allocation7 + $0x88] sm:$0xff]  ;;  %v2723_v55 = vcombine.low %v522_v48, %v526_v49 }
  0x7b   :  { %301 = vmatpush1.bf16.msra.mxu0 %v3015_v10  ;;  %342 = vmatpush1.bf16.msra.mxu1 %v3039_v21  ;;  %v529_v42 = vld [vmem:[#allocation7 + $0x80] sm:$0xff]  ;;  %v534_v54 = vld [vmem:[#allocation7 + $0xa8] sm:$0xff] }
  0x7c   :  { %302 = vmatprep.subr.bf16.mxu0 %v3016_v13  ;;  %343 = vmatprep.subr.bf16.mxu1 %v3040_v22  ;;  %v533_v43 = vld [vmem:[#allocation7 + $0xa0] sm:$0xff]  ;;  %v2732_v56 = vcombine.high %v530_v53, %v534_v54  ;;  %v2731_v57 = vcombine.low %v530_v53, %v534_v54  ;;  %v538_v61 = vld [vmem:[#allocation7 + $0xc8] sm:$0xff] }
  0x7d   :  { %v2730_v47 = vcombine.high %v529_v42, %v533_v43  ;;  %v2729_v51 = vcombine.low %v529_v42, %v533_v43  ;;  %v537_v58 = vld [vmem:[#allocation7 + $0xc0] sm:$0xff]  ;;  %v542_v62 = vld [vmem:[#allocation7 + $0xe8] sm:$0xff] }
  0x7e   :  { %v541_v59 = vld [vmem:[#allocation7 + $0xe0] sm:$0xff]  ;;  %v2739_v0 = vcombine.low %v538_v61, %v542_v62  ;;  %v2740_v1 = vcombine.high %v538_v61, %v542_v62  ;;  %v546_v4 = vld [vmem:[#allocation7 + $0x108] sm:$0xff] }
  0x7f   :  { %303 = vmatpush1.bf16.msra.mxu0 %v3018_v14  ;;  %344 = vmatpush1.bf16.msra.mxu1 %v3042_v24  ;;  %v2738_v60 = vcombine.high %v537_v58, %v541_v59  ;;  %v2737_v63 = vcombine.low %v537_v58, %v541_v59  ;;  %v545_v2 = vld [vmem:[#allocation7 + $0x100] sm:$0xff]  ;;  %v550_v6 = vld [vmem:[#allocation7 + $0x128] sm:$0xff] }
  0x80   :  { %304 = vmatprep.subr.bf16.mxu0 %v3019_v15  ;;  %345 = vmatprep.subr.bf16.mxu1 %v3043_v26  ;;  %v549_v3 = vld [vmem:[#allocation7 + $0x120] sm:$0xff]  ;;  %v2747_v8 = vcombine.low %v546_v4, %v550_v6  ;;  %v2748_v9 = vcombine.high %v546_v4, %v550_v6  ;;  %v554_v12 = vld [vmem:[#allocation7 + $0x148] sm:$0xff] }
  0x81   :  { %v2746_v5 = vcombine.high %v545_v2, %v549_v3  ;;  %v2745_v7 = vcombine.low %v545_v2, %v549_v3  ;;  %v553_v10 = vld [vmem:[#allocation7 + $0x140] sm:$0xff]  ;;  %v558_v14 = vld [vmem:[#allocation7 + $0x168] sm:$0xff] }
  0x82   :  { %v557_v11 = vld [vmem:[#allocation7 + $0x160] sm:$0xff]  ;;  %v2755_v16 = vcombine.low %v554_v12, %v558_v14  ;;  %v2756_v17 = vcombine.high %v554_v12, %v558_v14  ;;  %v566_v22 = vld [vmem:[#allocation7 + $0x1a8] sm:$0xff] }
  0x83   :  { %305 = vmatpush1.bf16.msra.mxu0 %v3021_v19  ;;  %346 = vmatpush1.bf16.msra.mxu1 %v3045_v30  ;;  %v2754_v13 = vcombine.high %v553_v10, %v557_v11  ;;  %v2753_v15 = vcombine.low %v553_v10, %v557_v11  ;;  %v561_v18 = vld [vmem:[#allocation7 + $0x180] sm:$0xff]  ;;  %v570_v28 = vld [vmem:[#allocation7 + $0x1c8] sm:$0xff] }
  0x84   :  { %306 = vmatprep.subr.bf16.mxu0 %v3025_v20  ;;  %347 = vmatprep.subr.bf16.mxu1 %v3046_v31  ;;  %v565_v19 = vld [vmem:[#allocation7 + $0x1a0] sm:$0xff]  ;;  %v562_v20 = vld [vmem:[#allocation7 + $0x188] sm:$0xff] }
  0x85   :  { %v2762_v21 = vcombine.high %v561_v18, %v565_v19  ;;  %v2763_v24 = vcombine.low %v562_v20, %v566_v22  ;;  %v569_v26 = vld [vmem:[#allocation7 + $0x1c0] sm:$0xff]  ;;  %v574_v30 = vld [vmem:[#allocation7 + $0x1e8] sm:$0xff] }
  0x86   :  { %v573_v27 = vld [vmem:[#allocation7 + $0x1e0] sm:$0xff]  ;;  %v2772_v33 = vcombine.high %v570_v28, %v574_v30  ;;  %v598_v54 = vld [vmem:[#allocation7 + $0x2a8] sm:$0xff] }
  0x87   :  { %307 = vmatpush1.bf16.msra.mxu0 %v3027_v23  ;;  %348 = vmatpush1.bf16.msra.mxu1 %v3048_v36  ;;  %v2761_v23 = vcombine.low %v561_v18, %v565_v19  ;;  %v2769_v31 = vcombine.low %v569_v26, %v573_v27  ;;  %v577_v34 = vld [vmem:[#allocation7 + $0x200] sm:$0xff]  ;;  %v578_v36 = vld [vmem:[#allocation7 + $0x208] sm:$0xff] }
  0x88   :  { %308 = vmatprep.subr.bf16.mxu0 %v3031_v25  ;;  %349 = vmatprep.subr.bf16.mxu1 %v3049_v38  ;;  %v2764_v25 = vcombine.high %v562_v20, %v566_v22  ;;  %v582_v38 = vld [vmem:[#allocation7 + $0x228] sm:$0xff]  ;;  %v585_v42 = vld [vmem:[#allocation7 + $0x240] sm:$0xff] }
  0x89   :  { %v2780_v41 = vcombine.high %v578_v36, %v582_v38  ;;  %v589_v43 = vld [vmem:[#allocation7 + $0x260] sm:$0xff]  ;;  %v606_v62 = vld [vmem:[#allocation7 + $0x2e8] sm:$0xff] }
  0x8a   :  { %v601_v58 = vld [vmem:[#allocation7 + $0x2c0] sm:$0xff]  ;;  %v610_v4 = vld [vmem:[#allocation7 + $0x308] sm:$0xff] }
  0x8b   :  { %309 = vmatpush1.bf16.msra.mxu0 %v3033_v29  ;;  %350 = vmatpush1.bf16.msra.mxu1 %v3051_v44  ;;  %v2770_v29 = vcombine.high %v569_v26, %v573_v27  ;;  %v586_v44 = vld [vmem:[#allocation7 + $0x248] sm:$0xff]  ;;  %v605_v59 = vld [vmem:[#allocation7 + $0x2e0] sm:$0xff] }
  0x8c   :  { %2049 = vmatprep.subr.bf16.mxu0 %v2714_v32  ;;  %2131 = vmatprep.subr.bf16.mxu1 %v2716_v46  ;;  %v2771_v32 = vcombine.low %v570_v28, %v574_v30  ;;  %v590_v46 = vld [vmem:[#allocation7 + $0x268] sm:$0xff]  ;;  %v2802_v61 = vcombine.high %v601_v58, %v605_v59  ;;  %v609_v2 = vld [vmem:[#allocation7 + $0x300] sm:$0xff] }
  0x8d   :  { %v2787_v48 = vcombine.low %v586_v44, %v590_v46  ;;  %v2788_v49 = vcombine.high %v586_v44, %v590_v46  ;;  %v613_v3 = vld [vmem:[#allocation7 + $0x320] sm:$0xff]  ;;  %v614_v6 = vld [vmem:[#allocation7 + $0x328] sm:$0xff] }
  0x8e   :  { %327 = vmatmul.mubr.bf16.vlgmr.msra.gmra.mrb[0].mxu0 %v101_v35  ;;  %368 = vmatmul.mubr.bf16.vlgmr.msra.gmra.mrb[0].mxu1 %v101_v35  ;;  %v581_v35 = vld [vmem:[#allocation7 + $0x220] sm:$0xff]  ;;  %v618_v12 = vld [vmem:[#allocation7 + $0x348] sm:$0xff] }
  0x8f   :  { %2050 = vmatpush1.bf16.msra.mxu0 %v2713_v37  ;;  %2132 = vmatpush1.bf16.msra.mxu1 %v2715_v50  ;;  %v2778_v37 = vcombine.high %v577_v34, %v581_v35  ;;  %v2777_v39 = vcombine.low %v577_v34, %v581_v35  ;;  %v593_v50 = vld [vmem:[#allocation7 + $0x280] sm:$0xff]  ;;  %v622_v14 = vld [vmem:[#allocation7 + $0x368] sm:$0xff] }
  0x90   :  { %2051 = vmatprep.subr.bf16.mxu0 %v2722_v40  ;;  %2133 = vmatprep.subr.bf16.mxu1 %v2724_v52  ;;  %v2779_v40 = vcombine.low %v578_v36, %v582_v38  ;;  %v594_v52 = vld [vmem:[#allocation7 + $0x288] sm:$0xff]  ;;  %v617_v10 = vld [vmem:[#allocation7 + $0x340] sm:$0xff] }
  0x91   :  { %v621_v11 = vld [vmem:[#allocation7 + $0x360] sm:$0xff]  ;;  %v626_v20 = vld [vmem:[#allocation7 + $0x388] sm:$0xff] }
  0x92   :  { %v625_v18 = vld [vmem:[#allocation7 + $0x380] sm:$0xff]  ;;  %v630_v22 = vld [vmem:[#allocation7 + $0x3a8] sm:$0xff] }
  0x93   :  { %2052 = vmatpush1.bf16.msra.mxu0 %v2721_v45  ;;  %2134 = vmatpush1.bf16.msra.mxu1 %v2723_v55  ;;  %v2786_v45 = vcombine.high %v585_v42, %v589_v43  ;;  %v629_v19 = vld [vmem:[#allocation7 + $0x3a0] sm:$0xff]  ;;  %v634_v28 = vld [vmem:[#allocation7 + $0x3c8] sm:$0xff] }
  0x94   :  { %2053 = vmatprep.subr.bf16.mxu0 %v2730_v47  ;;  %2135 = vmatprep.subr.bf16.mxu1 %v2732_v56  ;;  %v2785_v47 = vcombine.low %v585_v42, %v589_v43  ;;  %v2795_v56 = vcombine.low %v594_v52, %v598_v54  ;;  %v633_v26 = vld [vmem:[#allocation7 + $0x3c0] sm:$0xff]  ;;  %v638_v30 = vld [vmem:[#allocation7 + $0x3e8] sm:$0xff] }
  0x95   :  { %v637_v27 = vld [vmem:[#allocation7 + $0x3e0] sm:$0xff]  ;;  %v3353_v36 = vld [vmem:[#allocation7 + $0x408] sm:$0xff] }
  0x96   :  { %v3349_v34 = vld [vmem:[#allocation7 + $0x400] sm:$0xff]  ;;  %v3357_v38 = vld [vmem:[#allocation7 + $0x428] sm:$0xff] }
  0x97   :  { %2054 = vmatpush1.bf16.msra.mxu0 %v2729_v51  ;;  %2136 = vmatpush1.bf16.msra.mxu1 %v2731_v57  ;;  %v597_v51 = vld [vmem:[#allocation7 + $0x2a0] sm:$0xff]  ;;  %v2796_v57 = vcombine.high %v594_v52, %v598_v54 }
  0x98   :  { %2055 = vmatprep.subr.bf16.mxu0 %v2738_v60  ;;  %2137 = vmatprep.subr.bf16.mxu1 %v2740_v1  ;;  %v2794_v53 = vcombine.high %v593_v50, %v597_v51  ;;  %v2793_v55 = vcombine.low %v593_v50, %v597_v51  ;;  %v602_v60 = vld [vmem:[#allocation7 + $0x2c8] sm:$0xff]  ;;  %v3351_v35 = vld [vmem:[#allocation7 + $0x420] sm:$0xff] }
  0x99   :  { %v2804_v1 = vcombine.high %v602_v60, %v606_v62 }
  0x9b   :  { %2056 = vmatpush1.bf16.msra.mxu0 %v2737_v63  ;;  %2138 = vmatpush1.bf16.msra.mxu1 %v2739_v0  ;;  %v2801_v63 = vcombine.low %v601_v58, %v605_v59  ;;  %v2803_v0 = vcombine.low %v602_v60, %v606_v62  ;;  %v444_v62 = vlaneseq }
  0x9c   :  { %2057 = vmatprep.subr.bf16.mxu0 %v2746_v5  ;;  %2139 = vmatprep.subr.bf16.mxu1 %v2748_v9  ;;  %v2810_v5 = vcombine.high %v609_v2, %v613_v3  ;;  %v2812_v9 = vcombine.high %v610_v4, %v614_v6 }
  0x9f   :  { %2058 = vmatpush1.bf16.msra.mxu0 %v2745_v7  ;;  %2140 = vmatpush1.bf16.msra.mxu1 %v2747_v8  ;;  %v2809_v7 = vcombine.low %v609_v2, %v613_v3  ;;  %v2811_v8 = vcombine.low %v610_v4, %v614_v6 }
  0xa0   :  { %2059 = vmatprep.subr.bf16.mxu0 %v2754_v13  ;;  %2141 = vmatprep.subr.bf16.mxu1 %v2756_v17  ;;  %v2818_v13 = vcombine.high %v617_v10, %v621_v11  ;;  %v2820_v17 = vcombine.high %v618_v12, %v622_v14 }
  0xa3   :  { %2060 = vmatpush1.bf16.msra.mxu0 %v2753_v15  ;;  %2142 = vmatpush1.bf16.msra.mxu1 %v2755_v16  ;;  %v2817_v15 = vcombine.low %v617_v10, %v621_v11  ;;  %v2819_v16 = vcombine.low %v618_v12, %v622_v14 }
  0xa4   :  { %2061 = vmatprep.subr.bf16.mxu0 %v2762_v21  ;;  %2143 = vmatprep.subr.bf16.mxu1 %v2764_v25  ;;  %v2826_v21 = vcombine.high %v625_v18, %v629_v19  ;;  %v2828_v25 = vcombine.high %v626_v20, %v630_v22 }
  0xa7   :  { %2062 = vmatpush1.bf16.msra.mxu0 %v2761_v23  ;;  %2144 = vmatpush1.bf16.msra.mxu1 %v2763_v24  ;;  %v2825_v23 = vcombine.low %v625_v18, %v629_v19  ;;  %v2827_v24 = vcombine.low %v626_v20, %v630_v22  ;;  %v3374_v19 = vld [vmem:[#allocation4] sm:$0xf] }
  0xa8   :  { %2063 = vmatprep.subr.bf16.mxu0 %v2770_v29  ;;  %2145 = vmatprep.subr.bf16.mxu1 %v2772_v33  ;;  %v2834_v29 = vcombine.high %v633_v26, %v637_v27  ;;  %v2836_v33 = vcombine.high %v634_v28, %v638_v30 }
  0xab   :  { %2064 = vmatpush1.bf16.msra.mxu0 %v2769_v31  ;;  %2146 = vmatpush1.bf16.msra.mxu1 %v2771_v32  ;;  %v2833_v31 = vcombine.low %v633_v26, %v637_v27  ;;  %v2835_v32 = vcombine.low %v634_v28, %v638_v30 }
  0xac   :  { %2065 = vmatprep.subr.bf16.mxu0 %v2778_v37  ;;  %2147 = vmatprep.subr.bf16.mxu1 %v2780_v41  ;;  %v2842_v37 = vcombine.high %v3349_v34, %v3351_v35  ;;  %v2844_v41 = vcombine.high %v3353_v36, %v3357_v38 }
  0xaf   :  { %2066 = vmatpush1.bf16.msra.mxu0 %v2777_v39  ;;  %2148 = vmatpush1.bf16.msra.mxu1 %v2779_v40  ;;  %v2841_v39 = vcombine.low %v3349_v34, %v3351_v35  ;;  %v2843_v40 = vcombine.low %v3353_v36, %v3357_v38 }
  0xb0   :  { %2067 = vmatprep.subr.bf16.mxu0 %v2786_v45  ;;  %2149 = vmatprep.subr.bf16.mxu1 %v2788_v49 }
  0xb3   :  { %2068 = vmatpush1.bf16.msra.mxu0 %v2785_v47  ;;  %2150 = vmatpush1.bf16.msra.mxu1 %v2787_v48 }
  0xb4   :  { %2069 = vmatprep.subr.bf16.mxu0 %v2794_v53  ;;  %2151 = vmatprep.subr.bf16.mxu1 %v2796_v57 }
  0xb7   :  { %2070 = vmatpush1.bf16.msra.mxu0 %v2793_v55  ;;  %2152 = vmatpush1.bf16.msra.mxu1 %v2795_v56 }
  0xb8   :  { %2071 = vmatprep.subr.bf16.mxu0 %v2802_v61  ;;  %2153 = vmatprep.subr.bf16.mxu1 %v2804_v1 }
  0xbb   :  { %2072 = vmatpush1.bf16.msra.mxu0 %v2801_v63  ;;  %2154 = vmatpush1.bf16.msra.mxu1 %v2803_v0 }
  0xbc   :  { %2073 = vmatprep.subr.bf16.mxu0 %v2810_v5  ;;  %2155 = vmatprep.subr.bf16.mxu1 %v2812_v9 }
  0xbf   :  { %2074 = vmatpush1.bf16.msra.mxu0 %v2809_v7  ;;  %2156 = vmatpush1.bf16.msra.mxu1 %v2811_v8  ;;  %v3365_v8 = vshrl.u32 %v444_v62, 7 }
  0xc0   :  { %2075 = vmatprep.subr.bf16.mxu0 %v2818_v13  ;;  %2157 = vmatprep.subr.bf16.mxu1 %v2820_v17 }
  0xc1   :  { %v3370_v14 = vsub.s32 2, %v3365_v8 }
  0xc3   :  { %2076 = vmatpush1.bf16.msra.mxu0 %v2817_v15  ;;  %2158 = vmatpush1.bf16.msra.mxu1 %v2819_v16 }
  0xc4   :  { %2077 = vmatprep.subr.bf16.mxu0 %v2826_v21  ;;  %2159 = vmatprep.subr.bf16.mxu1 %v2828_v25 }
  0xc7   :  { %2078 = vmatpush1.bf16.msra.mxu0 %v2825_v23  ;;  %2160 = vmatpush1.bf16.msra.mxu1 %v2827_v24  ;;  %v455_v24 = vrot.slane %v3374_v19, %v3370_v14 }
  0xc8   :  { %2079 = vmatprep.subr.bf16.mxu0 %v2834_v29  ;;  %2161 = vmatprep.subr.bf16.mxu1 %v2836_v33 }
  0xcb   :  { %2080 = vmatpush1.bf16.msra.mxu0 %v2833_v31  ;;  %2162 = vmatpush1.bf16.msra.mxu1 %v2835_v32 }
  0xcc   :  { %2090 = vmatprep.subr.bf16.mxu0 %v2842_v37  ;;  %2172 = vmatprep.subr.bf16.mxu1 %v2844_v41 }
 0x161   :  { %v328_v42 = vpop.f32.mrb[0].mxu0  ;;  %v369_v54 = vpop.f32.mrb[0].mxu1 }
 0x162   :  { %v378_v43 = vrot.slane %v328_v42, 4  ;;  %v330_v44 = vpop.f32.mrb[1].mxu0  ;;  %v390_v56 = vrot.slane %v369_v54, 4  ;;  %v371_v57 = vpop.f32.mrb[1].mxu1 }
 0x163   :  { %v384_v45 = vrot.slane %v330_v44, 4  ;;  %v332_v46 = vpop.f32.mrb[2].mxu0  ;;  %v396_v59 = vrot.slane %v371_v57, 4  ;;  %v373_v60 = vpop.f32.mrb[2].mxu1 }
 0x164   :  { %v379_v47 = vadd.f32 %v378_v43, %v328_v42  ;;  %v333_v48 = vpop.f32.mrb[3].mxu0  ;;  %v391_v63 = vadd.f32 %v390_v56, %v369_v54  ;;  %v374_v0 = vpop.f32.mrb[3].mxu1 }
 0x165   :  { %v385_v49 = vadd.f32 %v384_v45, %v330_v44  ;;  %v397_v2 = vadd.f32 %v396_v59, %v371_v57  ;;  %v3379_v59 = vsub.s32 0, %v3365_v8 }
 0x166   :  { %v380_v50 = vrot.slane %v379_v47, 2  ;;  %v392_v4 = vrot.slane %v391_v63, 2 }
 0x167   :  { %v386_v51 = vrot.slane %v385_v49, 2  ;;  %v398_v6 = vrot.slane %v397_v2, 2 }
 0x168   :  { %v381_v52 = vadd.f32 %v380_v50, %v379_v47  ;;  %v393_v9 = vadd.f32 %v392_v4, %v391_v63 }
 0x169   :  { %v387_v53 = vadd.f32 %v386_v51, %v385_v49  ;;  %v399_v11 = vadd.f32 %v398_v6, %v397_v2 }
 0x16a   :  { %v382_v55 = vrot.slane %v381_v52, 1  ;;  %v394_v13 = vrot.slane %v393_v9, 1 }
 0x16b   :  { %v388_v58 = vrot.slane %v387_v53, 1  ;;  %v400_v16 = vrot.slane %v399_v11, 1 }
 0x16c   :  { %v383_v61 = vadd.f32 %v382_v55, %v381_v52  ;;  %v395_v18 = vadd.f32 %v394_v13, %v393_v9  ;;  %v3389_v9 = vsub.s32 3, %v3365_v8 }
 0x16d   :  { %v389_v1 = vadd.f32 %v388_v58, %v387_v53  ;;  %v401_v21 = vadd.f32 %v400_v16, %v399_v11 }
 0x16e   :  { %v403_v3 = vmul.f32 0.125, %v383_v61  ;;  %v405_v23 = vmul.f32 0.125, %v395_v18  ;;  %v3382_v61 = vsub.s32 1, %v3365_v8 }
 0x16f   :  { %v404_v5 = vmul.f32 0.125, %v389_v1  ;;  %v406_v26 = vmul.f32 0.125, %v401_v21  ;;  %v447_v1 = vrot.slane %v3374_v19, %v3379_v59  ;;  %v459_v21 = vrot.slane %v3374_v19, %v3389_v9 }
 0x170   :  { %v407_v7 = vsub.f32 %v328_v42, %v403_v3  ;;  %v409_v28 = vsub.f32 %v369_v54, %v405_v23  ;;  %v451_v3 = vrot.slane %v3374_v19, %v3382_v61 }
 0x171   :  { %v3367_v10 = vsub.f32 %v330_v44, %v404_v5  ;;  %v410_v30 = vsub.f32 %v371_v57, %v406_v26  ;;  %v377_v5 = vld [vmem:[#allocation6] sm:$0xf] }
 0x172   :  { %v411_v12 = vmul.f32 %v407_v7, %v407_v7  ;;  %v413_v32 = vmul.f32 %v409_v28, %v409_v28  ;;  %v466_v33 = vmul.f32 %v455_v24, %v409_v28  ;;  %v464_v11 = vmul.f32 %v447_v1, %v407_v7  ;;  %v650_v28 = vld [vmem:[#allocation7 + $0x448] sm:$0xff] }
 0x173   :  { %v412_v15 = vmul.f32 %v3367_v10, %v3367_v10  ;;  %v414_v41 = vmul.f32 %v410_v30, %v410_v30  ;;  %v488_v16 = vrot.slane %v377_v5, %v3382_v61  ;;  %v467_v26 = vmul.f32 %v459_v21, %v410_v30  ;;  %v661_v30 = vld [vmem:[#allocation7 + $0x4a0] sm:$0xff]  ;;  %v694_v21 = vld [vmem:[#allocation7 + $0x5a8] sm:$0xff] }
 0x174   :  { %v415_v17 = vrot.slane %v411_v12, 4  ;;  %v427_v43 = vrot.slane %v413_v32, 4 }
 0x175   :  { %v421_v20 = vrot.slane %v412_v15, 4  ;;  %v433_v45 = vrot.slane %v414_v41, 4 }
 0x176   :  { %v416_v22 = vadd.f32 %v415_v17, %v411_v12  ;;  %v428_v47 = vadd.f32 %v427_v43, %v413_v32  ;;  %v484_v12 = vrot.slane %v377_v5, %v3379_v59 }
 0x177   :  { %v422_v25 = vadd.f32 %v421_v20, %v412_v15  ;;  %v434_v49 = vadd.f32 %v433_v45, %v414_v41  ;;  %v465_v15 = vmul.f32 %v451_v3, %v3367_v10  ;;  %v657_v45 = vld [vmem:[#allocation7 + $0x480] sm:$0xff] }
 0x178   :  { %v417_v27 = vrot.slane %v416_v22, 2  ;;  %v429_v51 = vrot.slane %v428_v47, 2  ;;  %v2857_v34 = vcombine.low %v657_v45, %v661_v30 }
 0x179   :  { %v423_v29 = vrot.slane %v422_v25, 2  ;;  %v435_v53 = vrot.slane %v434_v49, 2 }
 0x17a   :  { %v418_v31 = vadd.f32 %v417_v27, %v416_v22  ;;  %v430_v55 = vadd.f32 %v429_v51, %v428_v47  ;;  %v653_v27 = vld [vmem:[#allocation7 + $0x460] sm:$0xff]  ;;  %v658_v47 = vld [vmem:[#allocation7 + $0x488] sm:$0xff] }
 0x17b   :  { %v424_v37 = vadd.f32 %v423_v29, %v422_v25  ;;  %v436_v57 = vadd.f32 %v435_v53, %v434_v49  ;;  %v649_v25 = vld [vmem:[#allocation7 + $0x440] sm:$0xff]  ;;  %v654_v29 = vld [vmem:[#allocation7 + $0x468] sm:$0xff] }
 0x17c   :  { %v419_v42 = vrot.slane %v418_v31, 1  ;;  %v431_v58 = vrot.slane %v430_v55, 1  ;;  %v2850_v19 = vcombine.high %v649_v25, %v653_v27 }
 0x17d   :  { %v425_v44 = vrot.slane %v424_v37, 1  ;;  %v437_v60 = vrot.slane %v436_v57, 1 }
 0x17e   :  { %v420_v46 = vadd.f32 %v419_v42, %v418_v31  ;;  %v432_v62 = vadd.f32 %v431_v58, %v430_v55  ;;  %v492_v31 = vrot.slane %v377_v5, %v3370_v14  ;;  %v669_v55 = vld [vmem:[#allocation7 + $0x4e0] sm:$0xff] }
 0x17f   :  { %v426_v48 = vadd.f32 %v425_v44, %v424_v37  ;;  %v438_v63 = vadd.f32 %v437_v60, %v436_v57  ;;  %v496_v37 = vrot.slane %v377_v5, %v3389_v9  ;;  %v2852_v44 = vcombine.high %v650_v28, %v654_v29  ;;  %v670_v57 = vld [vmem:[#allocation7 + $0x4e8] sm:$0xff]  ;;  %v677_v60 = vld [vmem:[#allocation7 + $0x520] sm:$0xff] }
 0x180   :  { %v439_v50 = vmul.f32 0.125, %v420_v46  ;;  %v441_v0 = vmul.f32 0.125, %v432_v62  ;;  %v674_v62 = vld [vmem:[#allocation7 + $0x508] sm:$0xff]  ;;  %v685_v5 = vld [vmem:[#allocation7 + $0x560] sm:$0xff] }
 0x181   :  { %v440_v52 = vmul.f32 0.125, %v426_v48  ;;  %v442_v2 = vmul.f32 0.125, %v438_v63  ;;  %v662_v48 = vld [vmem:[#allocation7 + $0x4a8] sm:$0xff] }
 0x182   :  { %v468_v54 = vadd.f32 1e-05, %v439_v50  ;;  %v470_v4 = vadd.f32 1e-05, %v441_v0  ;;  %v2851_v50 = vcombine.low %v650_v28, %v654_v29  ;;  %v2860_v53 = vcombine.high %v658_v47, %v662_v48  ;;  %v678_v63 = vld [vmem:[#allocation7 + $0x528] sm:$0xff] }
 0x183   :  { %v469_v56 = vadd.f32 1e-05, %v440_v52  ;;  %v471_v6 = vadd.f32 1e-05, %v442_v2  ;;  %v2858_v52 = vcombine.high %v657_v45, %v661_v30  ;;  %v2859_v35 = vcombine.low %v658_v47, %v662_v48  ;;  %v702_v28 = vld [vmem:[#allocation7 + $0x5e8] sm:$0xff]  ;;  %v713_v48 = vld [vmem:[#allocation7 + $0x640] sm:$0xff] }
 0x184   :  { %3052 = vrsqrt.f32 %v468_v54  ;;  %v665_v54 = vld [vmem:[#allocation7 + $0x4c0] sm:$0xff]  ;;  %v2876_v3 = vcombine.high %v674_v62, %v678_v63 }
 0x185   :  { %3054 = vrsqrt.f32 %v469_v56  ;;  %v666_v56 = vld [vmem:[#allocation7 + $0x4c8] sm:$0xff]  ;;  %v2866_v36 = vcombine.high %v665_v54, %v669_v55  ;;  %v2865_v0 = vcombine.low %v665_v54, %v669_v55 }
 0x186   :  { %3056 = vrsqrt.f32 %v470_v4  ;;  %v2868_v38 = vcombine.high %v666_v56, %v670_v57  ;;  %v2867_v1 = vcombine.low %v666_v56, %v670_v57  ;;  %v681_v4 = vld [vmem:[#allocation7 + $0x540] sm:$0xff] }
 0x187   :  { %3058 = vrsqrt.f32 %v471_v6  ;;  %v682_v6 = vld [vmem:[#allocation7 + $0x548] sm:$0xff]  ;;  %v721_v56 = vld [vmem:[#allocation7 + $0x680] sm:$0xff] }
 0x188   :  { %v725_v57 = vld [vmem:[#allocation7 + $0x6a0] sm:$0xff] }
 0x18e   :  { %v3053_v13 = vpop.eup %3052 }
 0x18f   :  { %v3055_v17 = vpop.eup %3054  ;;  %v476_v18 = vmul.f32 %v3053_v13, %v464_v11  ;;  %v686_v11 = vld [vmem:[#allocation7 + $0x568] sm:$0xff]  ;;  %v2875_v13 = vcombine.low %v674_v62, %v678_v63  ;;  %v733_v62 = vld [vmem:[#allocation7 + $0x6e0] sm:$0xff] }
 0x190   :  { %v477_v20 = vmul.f32 %v3055_v17, %v465_v15  ;;  %v3057_v10 = vpop.eup %3056  ;;  %v2882_v15 = vcombine.high %v681_v4, %v685_v5  ;;  %v689_v17 = vld [vmem:[#allocation7 + $0x580] sm:$0xff]  ;;  %v730_v63 = vld [vmem:[#allocation7 + $0x6c8] sm:$0xff] }
 0x191   :  { %v501_v22 = vadd.f32 %v484_v12, %v476_v18  ;;  %v3059_v41 = vpop.eup %3058  ;;  %v478_v42 = vmul.f32 %v3057_v10, %v466_v33  ;;  %v2849_v33 = vcombine.low %v649_v25, %v653_v27  ;;  %v693_v18 = vld [vmem:[#allocation7 + $0x5a0] sm:$0xff]  ;;  %v698_v27 = vld [vmem:[#allocation7 + $0x5c8] sm:$0xff] }
 0x192   :  { %v502_v23 = vadd.f32 %v488_v16, %v477_v20  ;;  %v479_v46 = vmul.f32 %v3059_v41, %v467_v26  ;;  %v2884_v16 = vcombine.high %v682_v6, %v686_v11  ;;  %v690_v20 = vld [vmem:[#allocation7 + $0x588] sm:$0xff]  ;;  %v697_v26 = vld [vmem:[#allocation7 + $0x5c0] sm:$0xff]  ;;  %v2889_v29 = vcombine.low %v689_v17, %v693_v18 }
 0x193   :  { %v505_v24 = vmax.f32 %v501_v22, 0.0  ;;  %v3406_v49 = vadd.f32 %v492_v31, %v478_v42  ;;  %v2881_v22 = vcombine.low %v681_v4, %v685_v5  ;;  %v2892_v25 = vcombine.high %v690_v20, %v694_v21  ;;  %v705_v41 = vld [vmem:[#allocation7 + $0x600] sm:$0xff] }
 0x194   :  { %v506_v7 = vmax.f32 %v502_v23, 0.0  ;;  %v504_v51 = vadd.f32 %v496_v37, %v479_v46  ;;  %v2883_v23 = vcombine.low %v682_v6, %v686_v11  ;;  %v2891_v31 = vcombine.low %v690_v20, %v694_v21  ;;  %v709_v42 = vld [vmem:[#allocation7 + $0x620] sm:$0xff]  ;;  %v738_v11 = vld [vmem:[#allocation7 + $0x708] sm:$0xff] }
 0x195   :  { %v3400_v43 = vpack.c.bf16 %v505_v24, %v505_v24  ;;  %v2890_v24 = vcombine.high %v689_v17, %v693_v18  ;;  %v2900_v37 = vcombine.high %v698_v27, %v702_v28  ;;  %v2899_v46 = vcombine.low %v698_v27, %v702_v28  ;;  %v737_v5 = vld [vmem:[#allocation7 + $0x700] sm:$0xff]  ;;  %v746_v21 = vld [vmem:[#allocation7 + $0x748] sm:$0xff] }
 0x196   :  { %v3397_v32 = vpack.c.bf16 %v506_v7, %v506_v7  ;;  %v508_v58 = vmax.f32 %v504_v51, 0.0  ;;  %v701_v7 = vld [vmem:[#allocation7 + $0x5e0] sm:$0xff]  ;;  %v2906_v30 = vcombine.high %v705_v41, %v709_v42  ;;  %v718_v51 = vld [vmem:[#allocation7 + $0x668] sm:$0xff] }
 0x197   :  { %v2898_v10 = vcombine.high %v697_v26, %v701_v7  ;;  %v2897_v45 = vcombine.low %v697_v26, %v701_v7  ;;  %v741_v6 = vld [vmem:[#allocation7 + $0x720] sm:$0xff]  ;;  %v754_v28 = vld [vmem:[#allocation7 + $0x788] sm:$0xff] }
 0x198   :  { %2081 = vmatprep.mubr.bf16.mxu0 %v3397_v32  ;;  %2163 = vmatprep.mubr.bf16.mxu1 %v3397_v32  ;;  %v745_v18 = vld [vmem:[#allocation7 + $0x740] sm:$0xff] }
 0x199   :  { %2082 = vmatmul.mubr.bf16.vlgmr.msra.gmra.mrb[4].mxu0 %v3400_v43  ;;  %2164 = vmatmul.mubr.bf16.vlgmr.msra.gmra.mrb[4].mxu1 %v3400_v43  ;;  %v749_v20 = vld [vmem:[#allocation7 + $0x760] sm:$0xff] }
 0x19a   :  { %2091 = vmatpush1.bf16.msra.mxu0 %v2841_v39  ;;  %2173 = vmatpush1.bf16.msra.mxu1 %v2843_v40  ;;  %v3414_v39 = vpack.c.bf16 %v508_v58, %v508_v58  ;;  %v673_v40 = vld [vmem:[#allocation7 + $0x500] sm:$0xff]  ;;  %v722_v58 = vld [vmem:[#allocation7 + $0x688] sm:$0xff] }
 0x19b   :  { %2092 = vmatprep.subr.bf16.mxu0 %v2850_v19  ;;  %2174 = vmatprep.subr.bf16.mxu1 %v2852_v44  ;;  %v2874_v2 = vcombine.high %v673_v40, %v677_v60  ;;  %v2873_v12 = vcombine.low %v673_v40, %v677_v60  ;;  %v706_v19 = vld [vmem:[#allocation7 + $0x608] sm:$0xff]  ;;  %v729_v60 = vld [vmem:[#allocation7 + $0x6c0] sm:$0xff] }
 0x19c   :  { %2122 = vmatprep.mubr.bf16.mxu0 %v3414_v39  ;;  %2204 = vmatprep.mubr.bf16.mxu1 %v3414_v39  ;;  %v710_v44 = vld [vmem:[#allocation7 + $0x628] sm:$0xff]  ;;  %v753_v7 = vld [vmem:[#allocation7 + $0x780] sm:$0xff] }
 0x19d   :  { %v2908_v47 = vcombine.high %v706_v19, %v710_v44  ;;  %v757_v27 = vld [vmem:[#allocation7 + $0x7a0] sm:$0xff] }
 0x19e   :  { %2093 = vmatpush1.bf16.msra.mxu0 %v2849_v33  ;;  %2175 = vmatpush1.bf16.msra.mxu1 %v2851_v50  ;;  %v717_v33 = vld [vmem:[#allocation7 + $0x660] sm:$0xff]  ;;  %v714_v50 = vld [vmem:[#allocation7 + $0x648] sm:$0xff] }
 0x19f   :  { %2094 = vmatprep.subr.bf16.mxu0 %v2858_v52  ;;  %2176 = vmatprep.subr.bf16.mxu1 %v2860_v53  ;;  %v2905_v52 = vcombine.low %v705_v41, %v709_v42  ;;  %v2907_v53 = vcombine.low %v706_v19, %v710_v44  ;;  %v2914_v54 = vcombine.high %v713_v48, %v717_v33  ;;  %v761_v42 = vld [vmem:[#allocation7 + $0x7c0] sm:$0xff]  ;;  %v762_v44 = vld [vmem:[#allocation7 + $0x7c8] sm:$0xff] }
 0x1a0   :  { %v2916_v55 = vcombine.high %v714_v50, %v718_v51  ;;  %v765_v19 = vld [vmem:[#allocation7 + $0x7e0] sm:$0xff] }
 0x1a2   :  { %2095 = vmatpush1.bf16.msra.mxu0 %v2857_v34  ;;  %2177 = vmatpush1.bf16.msra.mxu1 %v2859_v35  ;;  %v726_v34 = vld [vmem:[#allocation7 + $0x6a8] sm:$0xff]  ;;  %v2913_v35 = vcombine.low %v713_v48, %v717_v33  ;;  %v515_v33 = vld [vmem:[#allocation7 + $0x10] sm:$0xff] }
 0x1a3   :  { %2096 = vmatprep.subr.bf16.mxu0 %v2866_v36  ;;  %2178 = vmatprep.subr.bf16.mxu1 %v2868_v38  ;;  %v2915_v36 = vcombine.low %v714_v50, %v718_v51  ;;  %v2922_v38 = vcombine.high %v721_v56, %v725_v57  ;;  %v2924_v40 = vcombine.high %v722_v58, %v726_v34  ;;  %v519_v50 = vld [vmem:[#allocation7 + $0x30] sm:$0xff]  ;;  %v516_v51 = vld [vmem:[#allocation7 + $0x18] sm:$0xff] }
 0x1a6   :  { %2097 = vmatpush1.bf16.msra.mxu0 %v2865_v0  ;;  %2179 = vmatpush1.bf16.msra.mxu1 %v2867_v1  ;;  %v734_v0 = vld [vmem:[#allocation7 + $0x6e8] sm:$0xff]  ;;  %v2921_v1 = vcombine.low %v721_v56, %v725_v57  ;;  %v2718_v56 = vcombine.high %v515_v33, %v519_v50 }
 0x1a7   :  { %2098 = vmatprep.subr.bf16.mxu0 %v2874_v2  ;;  %2180 = vmatprep.subr.bf16.mxu1 %v2876_v3  ;;  %v2923_v2 = vcombine.low %v722_v58, %v726_v34  ;;  %v2930_v3 = vcombine.high %v729_v60, %v733_v62  ;;  %v2932_v4 = vcombine.high %v730_v63, %v734_v0  ;;  %v523_v58 = vld [vmem:[#allocation7 + $0x50] sm:$0xff] }
 0x1a8   :  { %v527_v34 = vld [vmem:[#allocation7 + $0x70] sm:$0xff] }
 0x1aa   :  { %2099 = vmatpush1.bf16.msra.mxu0 %v2873_v12  ;;  %2181 = vmatpush1.bf16.msra.mxu1 %v2875_v13  ;;  %v742_v12 = vld [vmem:[#allocation7 + $0x728] sm:$0xff]  ;;  %v2929_v13 = vcombine.low %v729_v60, %v733_v62  ;;  %v2726_v62 = vcombine.high %v523_v58, %v527_v34 }
 0x1ab   :  { %2100 = vmatprep.subr.bf16.mxu0 %v2882_v15  ;;  %2182 = vmatprep.subr.bf16.mxu1 %v2884_v16  ;;  %v2931_v15 = vcombine.low %v730_v63, %v734_v0  ;;  %v2938_v16 = vcombine.high %v737_v5, %v741_v6  ;;  %v2940_v17 = vcombine.high %v738_v11, %v742_v12  ;;  %v531_v0 = vld [vmem:[#allocation7 + $0x90] sm:$0xff] }
 0x1ae   :  { %2101 = vmatpush1.bf16.msra.mxu0 %v2881_v22  ;;  %2183 = vmatpush1.bf16.msra.mxu1 %v2883_v23  ;;  %v750_v22 = vld [vmem:[#allocation7 + $0x768] sm:$0xff]  ;;  %v2937_v23 = vcombine.low %v737_v5, %v741_v6 }
 0x1af   :  { %2102 = vmatprep.subr.bf16.mxu0 %v2890_v24  ;;  %2184 = vmatprep.subr.bf16.mxu1 %v2892_v25  ;;  %v2939_v24 = vcombine.low %v738_v11, %v742_v12  ;;  %v2946_v25 = vcombine.high %v745_v18, %v749_v20  ;;  %v2948_v26 = vcombine.high %v746_v21, %v750_v22  ;;  %v539_v11 = vld [vmem:[#allocation7 + $0xd0] sm:$0xff] }
 0x1b0   :  { %v543_v12 = vld [vmem:[#allocation7 + $0xf0] sm:$0xff] }
 0x1b2   :  { %2103 = vmatpush1.bf16.msra.mxu0 %v2889_v29  ;;  %2185 = vmatpush1.bf16.msra.mxu1 %v2891_v31  ;;  %v758_v29 = vld [vmem:[#allocation7 + $0x7a8] sm:$0xff]  ;;  %v2945_v31 = vcombine.low %v745_v18, %v749_v20  ;;  %v2742_v18 = vcombine.high %v539_v11, %v543_v12 }
 0x1b3   :  { %2104 = vmatprep.subr.bf16.mxu0 %v2898_v10  ;;  %2186 = vmatprep.subr.bf16.mxu1 %v2900_v37  ;;  %v2947_v10 = vcombine.low %v746_v21, %v750_v22  ;;  %v2954_v37 = vcombine.high %v753_v7, %v757_v27  ;;  %v2956_v41 = vcombine.high %v754_v28, %v758_v29  ;;  %v547_v21 = vld [vmem:[#allocation7 + $0x110] sm:$0xff] }
 0x1b4   :  { %v551_v22 = vld [vmem:[#allocation7 + $0x130] sm:$0xff] }
 0x1b6   :  { %2105 = vmatpush1.bf16.msra.mxu0 %v2897_v45  ;;  %2187 = vmatpush1.bf16.msra.mxu1 %v2899_v46  ;;  %v766_v45 = vld [vmem:[#allocation7 + $0x7e8] sm:$0xff]  ;;  %v2953_v46 = vcombine.low %v753_v7, %v757_v27  ;;  %v555_v27 = vld [vmem:[#allocation7 + $0x150] sm:$0xff] }
 0x1b7   :  { %2106 = vmatprep.subr.bf16.mxu0 %v2906_v30  ;;  %2188 = vmatprep.subr.bf16.mxu1 %v2908_v47  ;;  %v2955_v30 = vcombine.low %v754_v28, %v758_v29  ;;  %v2962_v47 = vcombine.high %v761_v42, %v765_v19  ;;  %v2964_v48 = vcombine.high %v762_v44, %v766_v45  ;;  %v559_v28 = vld [vmem:[#allocation7 + $0x170] sm:$0xff]  ;;  %v556_v29 = vld [vmem:[#allocation7 + $0x158] sm:$0xff] }
 0x1ba   :  { %2107 = vmatpush1.bf16.msra.mxu0 %v2905_v52  ;;  %2189 = vmatpush1.bf16.msra.mxu1 %v2907_v53  ;;  %v520_v52 = vld [vmem:[#allocation7 + $0x38] sm:$0xff]  ;;  %v2961_v53 = vcombine.low %v761_v42, %v765_v19  ;;  %v563_v19 = vld [vmem:[#allocation7 + $0x190] sm:$0xff] }
 0x1bb   :  { %2108 = vmatprep.subr.bf16.mxu0 %v2914_v54  ;;  %2190 = vmatprep.subr.bf16.mxu1 %v2916_v55  ;;  %v2963_v54 = vcombine.low %v762_v44, %v766_v45  ;;  %v507_v55 = vmax.f32 %v3406_v49, 0.0  ;;  %v2720_v57 = vcombine.high %v516_v51, %v520_v52  ;;  %v2719_v60 = vcombine.low %v516_v51, %v520_v52  ;;  %v532_v49 = vld [vmem:[#allocation7 + $0x98] sm:$0xff]  ;;  %v567_v44 = vld [vmem:[#allocation7 + $0x1b0] sm:$0xff] }
 0x1bc   :  { %v564_v45 = vld [vmem:[#allocation7 + $0x198] sm:$0xff]  ;;  %v575_v51 = vld [vmem:[#allocation7 + $0x1f0] sm:$0xff] }
 0x1bd   :  { %v572_v52 = vld [vmem:[#allocation7 + $0x1d8] sm:$0xff] }
 0x1be   :  { %2109 = vmatpush1.bf16.msra.mxu0 %v2913_v35  ;;  %2191 = vmatpush1.bf16.msra.mxu1 %v2915_v36  ;;  %v524_v35 = vld [vmem:[#allocation7 + $0x58] sm:$0xff] }
 0x1bf   :  { %2110 = vmatprep.subr.bf16.mxu0 %v2922_v38  ;;  %2192 = vmatprep.subr.bf16.mxu1 %v2924_v40  ;;  %v528_v36 = vld [vmem:[#allocation7 + $0x78] sm:$0xff]  ;;  %v2717_v38 = vcombine.low %v515_v33, %v519_v50  ;;  %v3419_v40 = vpack.c.bf16 %v507_v55, %v507_v55  ;;  %v571_v50 = vld [vmem:[#allocation7 + $0x1d0] sm:$0xff] }
 0x1c0   :  { %v2728_v63 = vcombine.high %v524_v35, %v528_v36 }
 0x1c2   :  { %2111 = vmatpush1.bf16.msra.mxu0 %v2921_v1  ;;  %2193 = vmatpush1.bf16.msra.mxu1 %v2923_v2  ;;  %v535_v1 = vld [vmem:[#allocation7 + $0xb0] sm:$0xff]  ;;  %v536_v2 = vld [vmem:[#allocation7 + $0xb8] sm:$0xff] }
 0x1c3   :  { %2112 = vmatprep.subr.bf16.mxu0 %v2930_v3  ;;  %2194 = vmatprep.subr.bf16.mxu1 %v2932_v4  ;;  %v2725_v3 = vcombine.low %v523_v58, %v527_v34  ;;  %v2727_v4 = vcombine.low %v524_v35, %v528_v36  ;;  %v2734_v5 = vcombine.high %v531_v0, %v535_v1  ;;  %v579_v58 = vld [vmem:[#allocation7 + $0x210] sm:$0xff]  ;;  %v580_v35 = vld [vmem:[#allocation7 + $0x218] sm:$0xff] }
 0x1c4   :  { %v2736_v6 = vcombine.high %v532_v49, %v536_v2  ;;  %v583_v34 = vld [vmem:[#allocation7 + $0x230] sm:$0xff]  ;;  %v584_v36 = vld [vmem:[#allocation7 + $0x238] sm:$0xff] }
 0x1c6   :  { %2113 = vmatpush1.bf16.msra.mxu0 %v2929_v13  ;;  %2195 = vmatpush1.bf16.msra.mxu1 %v2931_v15  ;;  %v540_v13 = vld [vmem:[#allocation7 + $0xd8] sm:$0xff] }
 0x1c7   :  { %2114 = vmatprep.subr.bf16.mxu0 %v2938_v16  ;;  %2196 = vmatprep.subr.bf16.mxu1 %v2940_v17  ;;  %v544_v15 = vld [vmem:[#allocation7 + $0xf8] sm:$0xff]  ;;  %v2733_v16 = vcombine.low %v531_v0, %v535_v1  ;;  %v2735_v17 = vcombine.low %v532_v49, %v536_v2  ;;  %v587_v0 = vld [vmem:[#allocation7 + $0x250] sm:$0xff] }
 0x1c8   :  { %v2744_v20 = vcombine.high %v540_v13, %v544_v15  ;;  %v591_v1 = vld [vmem:[#allocation7 + $0x270] sm:$0xff]  ;;  %v588_v49 = vld [vmem:[#allocation7 + $0x258] sm:$0xff] }
 0x1c9   :  { %v592_v2 = vld [vmem:[#allocation7 + $0x278] sm:$0xff] }
 0x1ca   :  { %2115 = vmatpush1.bf16.msra.mxu0 %v2937_v23  ;;  %2197 = vmatpush1.bf16.msra.mxu1 %v2939_v24  ;;  %v552_v23 = vld [vmem:[#allocation7 + $0x138] sm:$0xff]  ;;  %v2741_v24 = vcombine.low %v539_v11, %v543_v12  ;;  %v595_v11 = vld [vmem:[#allocation7 + $0x290] sm:$0xff] }
 0x1cb   :  { %2116 = vmatprep.subr.bf16.mxu0 %v2946_v25  ;;  %2198 = vmatprep.subr.bf16.mxu1 %v2948_v26  ;;  %v2743_v25 = vcombine.low %v540_v13, %v544_v15  ;;  %v2750_v26 = vcombine.high %v547_v21, %v551_v22  ;;  %v599_v12 = vld [vmem:[#allocation7 + $0x2b0] sm:$0xff]  ;;  %v596_v13 = vld [vmem:[#allocation7 + $0x298] sm:$0xff] }
 0x1cc   :  { %v600_v15 = vld [vmem:[#allocation7 + $0x2b8] sm:$0xff] }
 0x1ce   :  { %2117 = vmatpush1.bf16.msra.mxu0 %v2945_v31  ;;  %2199 = vmatpush1.bf16.msra.mxu1 %v2947_v10  ;;  %v560_v31 = vld [vmem:[#allocation7 + $0x178] sm:$0xff]  ;;  %v2749_v10 = vcombine.low %v547_v21, %v551_v22  ;;  %v603_v21 = vld [vmem:[#allocation7 + $0x2d0] sm:$0xff] }
 0x1cf   :  { %2118 = vmatprep.subr.bf16.mxu0 %v2954_v37  ;;  %2200 = vmatprep.subr.bf16.mxu1 %v2956_v41  ;;  %v2758_v41 = vcombine.high %v555_v27, %v559_v28  ;;  %v2760_v42 = vcombine.high %v556_v29, %v560_v31  ;;  %v607_v22 = vld [vmem:[#allocation7 + $0x2f0] sm:$0xff] }
 0x1d2   :  { %2119 = vmatpush1.bf16.msra.mxu0 %v2953_v46  ;;  %2201 = vmatpush1.bf16.msra.mxu1 %v2955_v30  ;;  %v568_v46 = vld [vmem:[#allocation7 + $0x1b8] sm:$0xff]  ;;  %v2757_v30 = vcombine.low %v555_v27, %v559_v28  ;;  %v611_v27 = vld [vmem:[#allocation7 + $0x310] sm:$0xff] }
 0x1d3   :  { %2120 = vmatprep.subr.bf16.mxu0 %v2962_v47  ;;  %2202 = vmatprep.subr.bf16.mxu1 %v2964_v48  ;;  %v2759_v47 = vcombine.low %v556_v29, %v560_v31  ;;  %v2766_v48 = vcombine.high %v563_v19, %v567_v44  ;;  %v2768_v33 = vcombine.high %v564_v45, %v568_v46  ;;  %v615_v28 = vld [vmem:[#allocation7 + $0x330] sm:$0xff]  ;;  %v612_v29 = vld [vmem:[#allocation7 + $0x318] sm:$0xff] }
 0x1d4   :  { %v2767_v55 = vcombine.low %v564_v45, %v568_v46  ;;  %v616_v31 = vld [vmem:[#allocation7 + $0x338] sm:$0xff] }
 0x1d5   :  { %v620_v45 = vld [vmem:[#allocation7 + $0x358] sm:$0xff] }
 0x1d6   :  { %2121 = vmatpush1.bf16.msra.mxu0 %v2961_v53  ;;  %2203 = vmatpush1.bf16.msra.mxu1 %v2963_v54  ;;  %v576_v53 = vld [vmem:[#allocation7 + $0x1f8] sm:$0xff]  ;;  %v2765_v54 = vcombine.low %v563_v19, %v567_v44  ;;  %v619_v19 = vld [vmem:[#allocation7 + $0x350] sm:$0xff] }
 0x1d7   :  { %2213 = vmatprep.subr.bf16.mxu0 %v2718_v56  ;;  %2295 = vmatprep.subr.bf16.mxu1 %v2720_v57  ;;  %v2774_v56 = vcombine.high %v571_v50, %v575_v51  ;;  %v2776_v57 = vcombine.high %v572_v52, %v576_v53  ;;  %v623_v44 = vld [vmem:[#allocation7 + $0x370] sm:$0xff]  ;;  %v624_v46 = vld [vmem:[#allocation7 + $0x378] sm:$0xff] }
 0x1d9   :  { %2123 = vmatmul.mubr.bf16.vlgmr.msra.gmra.mrb[4].mxu0 %v3419_v40  ;;  %2205 = vmatmul.mubr.bf16.vlgmr.msra.gmra.mrb[4].mxu1 %v3419_v40 }
 0x1da   :  { %2214 = vmatpush1.bf16.msra.mxu0 %v2717_v38  ;;  %2245 = vmatprep.mubr.bf16.mxu0 %v3397_v32  ;;  %v2773_v38 = vcombine.low %v571_v50, %v575_v51  ;;  %v627_v50 = vld [vmem:[#allocation7 + $0x390] sm:$0xff] }
 0x1db   :  { %2296 = vmatpush1.bf16.msra.mxu1 %v2719_v60  ;;  %2327 = vmatprep.mubr.bf16.mxu1 %v3397_v32  ;;  %v548_v32 = vld [vmem:[#allocation7 + $0x118] sm:$0xff]  ;;  %v2775_v60 = vcombine.low %v572_v52, %v576_v53  ;;  %v631_v51 = vld [vmem:[#allocation7 + $0x3b0] sm:$0xff] }
 0x1dc   :  { %2215 = vmatprep.subr.bf16.mxu0 %v2726_v62  ;;  %2297 = vmatprep.subr.bf16.mxu1 %v2728_v63  ;;  %v2752_v7 = vcombine.high %v548_v32, %v552_v23  ;;  %v2751_v37 = vcombine.low %v548_v32, %v552_v23  ;;  %v2782_v62 = vcombine.high %v579_v58, %v583_v34  ;;  %v604_v32 = vld [vmem:[#allocation7 + $0x2d8] sm:$0xff] }
 0x1dd   :  { %v2784_v63 = vcombine.high %v580_v35, %v584_v36  ;;  %v608_v23 = vld [vmem:[#allocation7 + $0x2f8] sm:$0xff] }
 0x1de   :  { %2216 = vmatpush1.bf16.msra.mxu0 %v2725_v3  ;;  %v2781_v3 = vcombine.low %v579_v58, %v583_v34  ;;  %v628_v52 = vld [vmem:[#allocation7 + $0x398] sm:$0xff]  ;;  %v635_v58 = vld [vmem:[#allocation7 + $0x3d0] sm:$0xff] }
 0x1df   :  { %2298 = vmatpush1.bf16.msra.mxu1 %v2727_v4  ;;  %2217 = vmatprep.subr.bf16.mxu0 %v2734_v5  ;;  %v2783_v4 = vcombine.low %v580_v35, %v584_v36  ;;  %v2790_v5 = vcombine.high %v587_v0, %v591_v1  ;;  %v632_v53 = vld [vmem:[#allocation7 + $0x3b8] sm:$0xff]  ;;  %v639_v34 = vld [vmem:[#allocation7 + $0x3f0] sm:$0xff] }
 0x1e0   :  { %2299 = vmatprep.subr.bf16.mxu1 %v2736_v6  ;;  %v2792_v6 = vcombine.high %v588_v49, %v592_v2  ;;  %v636_v35 = vld [vmem:[#allocation7 + $0x3d8] sm:$0xff] }
 0x1e1   :  { %v640_v36 = vld [vmem:[#allocation7 + $0x3f8] sm:$0xff] }
 0x1e2   :  { %2218 = vmatpush1.bf16.msra.mxu0 %v2733_v16  ;;  %v2789_v16 = vcombine.low %v587_v0, %v591_v1  ;;  %v643_v0 = vld [vmem:[#allocation7 + $0x410] sm:$0xff] }
 0x1e3   :  { %2300 = vmatpush1.bf16.msra.mxu1 %v2735_v17  ;;  %2219 = vmatprep.subr.bf16.mxu0 %v2742_v18  ;;  %v2791_v17 = vcombine.low %v588_v49, %v592_v2  ;;  %v2798_v18 = vcombine.high %v595_v11, %v599_v12  ;;  %v647_v1 = vld [vmem:[#allocation7 + $0x430] sm:$0xff]  ;;  %v644_v49 = vld [vmem:[#allocation7 + $0x418] sm:$0xff] }
 0x1e4   :  { %2301 = vmatprep.subr.bf16.mxu1 %v2744_v20  ;;  %v2800_v20 = vcombine.high %v596_v13, %v600_v15  ;;  %v648_v2 = vld [vmem:[#allocation7 + $0x438] sm:$0xff] }
 0x1e6   :  { %2220 = vmatpush1.bf16.msra.mxu0 %v2741_v24  ;;  %v2797_v24 = vcombine.low %v595_v11, %v599_v12  ;;  %v651_v11 = vld [vmem:[#allocation7 + $0x450] sm:$0xff] }
 0x1e7   :  { %2302 = vmatpush1.bf16.msra.mxu1 %v2743_v25  ;;  %2221 = vmatprep.subr.bf16.mxu0 %v2750_v26  ;;  %v2799_v25 = vcombine.low %v596_v13, %v600_v15  ;;  %v2806_v26 = vcombine.high %v603_v21, %v607_v22  ;;  %v655_v12 = vld [vmem:[#allocation7 + $0x470] sm:$0xff]  ;;  %v2845_v13 = vcombine.low %v643_v0, %v647_v1  ;;  %v652_v15 = vld [vmem:[#allocation7 + $0x458] sm:$0xff] }
 0x1e8   :  { %2303 = vmatprep.subr.bf16.mxu1 %v2752_v7  ;;  %v2808_v7 = vcombine.high %v604_v32, %v608_v23 }
 0x1ea   :  { %2222 = vmatpush1.bf16.msra.mxu0 %v2749_v10  ;;  %v2805_v10 = vcombine.low %v603_v21, %v607_v22  ;;  %v663_v21 = vld [vmem:[#allocation7 + $0x4b0] sm:$0xff] }
 0x1eb   :  { %2304 = vmatpush1.bf16.msra.mxu1 %v2751_v37  ;;  %2223 = vmatprep.subr.bf16.mxu0 %v2758_v41  ;;  %v2807_v37 = vcombine.low %v604_v32, %v608_v23  ;;  %v2814_v41 = vcombine.high %v611_v27, %v615_v28  ;;  %v660_v32 = vld [vmem:[#allocation7 + $0x498] sm:$0xff] }
 0x1ec   :  { %2305 = vmatprep.subr.bf16.mxu1 %v2760_v42  ;;  %v2816_v42 = vcombine.high %v612_v29, %v616_v31  ;;  %v664_v23 = vld [vmem:[#allocation7 + $0x4b8] sm:$0xff] }
 0x1ee   :  { %2224 = vmatpush1.bf16.msra.mxu0 %v2757_v30  ;;  %v2813_v30 = vcombine.low %v611_v27, %v615_v28  ;;  %v667_v27 = vld [vmem:[#allocation7 + $0x4d0] sm:$0xff] }
 0x1ef   :  { %2306 = vmatpush1.bf16.msra.mxu1 %v2759_v47  ;;  %2225 = vmatprep.subr.bf16.mxu0 %v2766_v48  ;;  %v2815_v47 = vcombine.low %v612_v29, %v616_v31  ;;  %v2822_v48 = vcombine.high %v619_v19, %v623_v44  ;;  %v671_v28 = vld [vmem:[#allocation7 + $0x4f0] sm:$0xff]  ;;  %v668_v29 = vld [vmem:[#allocation7 + $0x4d8] sm:$0xff] }
 0x1f0   :  { %2307 = vmatprep.subr.bf16.mxu1 %v2768_v33  ;;  %v2824_v33 = vcombine.high %v620_v45, %v624_v46  ;;  %v672_v31 = vld [vmem:[#allocation7 + $0x4f8] sm:$0xff] }
 0x1f2   :  { %2226 = vmatpush1.bf16.msra.mxu0 %v2765_v54  ;;  %v2821_v54 = vcombine.low %v619_v19, %v623_v44  ;;  %v679_v19 = vld [vmem:[#allocation7 + $0x530] sm:$0xff]  ;;  %v676_v44 = vld [vmem:[#allocation7 + $0x518] sm:$0xff] }
 0x1f3   :  { %2308 = vmatpush1.bf16.msra.mxu1 %v2767_v55  ;;  %2227 = vmatprep.subr.bf16.mxu0 %v2774_v56  ;;  %v2823_v55 = vcombine.low %v620_v45, %v624_v46  ;;  %v2830_v56 = vcombine.high %v627_v50, %v631_v51  ;;  %v680_v45 = vld [vmem:[#allocation7 + $0x538] sm:$0xff]  ;;  %v2871_v46 = vcombine.low %v668_v29, %v672_v31 }
 0x1f4   :  { %2309 = vmatprep.subr.bf16.mxu1 %v2776_v57  ;;  %v2832_v57 = vcombine.high %v628_v52, %v632_v53 }
 0x1f6   :  { %2228 = vmatpush1.bf16.msra.mxu0 %v2773_v38  ;;  %v2829_v38 = vcombine.low %v627_v50, %v631_v51  ;;  %v684_v50 = vld [vmem:[#allocation7 + $0x558] sm:$0xff] }
 0x1f7   :  { %2310 = vmatpush1.bf16.msra.mxu1 %v2775_v60  ;;  %2229 = vmatprep.subr.bf16.mxu0 %v2782_v62  ;;  %v2831_v60 = vcombine.low %v628_v52, %v632_v53  ;;  %v2838_v62 = vcombine.high %v635_v58, %v639_v34  ;;  %v688_v51 = vld [vmem:[#allocation7 + $0x578] sm:$0xff]  ;;  %v2879_v53 = vcombine.low %v676_v44, %v680_v45 }
 0x1f8   :  { %2311 = vmatprep.subr.bf16.mxu1 %v2784_v63  ;;  %v2840_v63 = vcombine.high %v636_v35, %v640_v36 }
 0x1fa   :  { %2230 = vmatpush1.bf16.msra.mxu0 %v2781_v3  ;;  %v2837_v3 = vcombine.low %v635_v58, %v639_v34  ;;  %v692_v58 = vld [vmem:[#allocation7 + $0x598] sm:$0xff] }
 0x1fb   :  { %2312 = vmatpush1.bf16.msra.mxu1 %v2783_v4  ;;  %2231 = vmatprep.subr.bf16.mxu0 %v2790_v5  ;;  %v2839_v4 = vcombine.low %v636_v35, %v640_v36  ;;  %v2846_v5 = vcombine.high %v643_v0, %v647_v1  ;;  %v696_v34 = vld [vmem:[#allocation7 + $0x5b8] sm:$0xff]  ;;  %v2887_v36 = vcombine.low %v684_v50, %v688_v51 }
 0x1fc   :  { %2313 = vmatprep.subr.bf16.mxu1 %v2792_v6  ;;  %v2848_v6 = vcombine.high %v644_v49, %v648_v2  ;;  %v700_v0 = vld [vmem:[#allocation7 + $0x5d8] sm:$0xff] }
 0x1fd   :  { %v704_v1 = vld [vmem:[#allocation7 + $0x5f8] sm:$0xff] }
 0x1fe   :  { %2232 = vmatpush1.bf16.msra.mxu0 %v2789_v16  ;;  %v656_v16 = vld [vmem:[#allocation7 + $0x478] sm:$0xff] }
 0x1ff   :  { %2314 = vmatpush1.bf16.msra.mxu1 %v2791_v17  ;;  %2233 = vmatprep.subr.bf16.mxu0 %v2798_v18  ;;  %v2847_v17 = vcombine.low %v644_v49, %v648_v2  ;;  %v2854_v18 = vcombine.high %v651_v11, %v655_v12  ;;  %v2856_v22 = vcombine.high %v652_v15, %v656_v16 }
 0x200   :  { %2315 = vmatprep.subr.bf16.mxu1 %v2800_v20  ;;  %v659_v20 = vld [vmem:[#allocation7 + $0x490] sm:$0xff]  ;;  %v2895_v2 = vcombine.low %v692_v58, %v696_v34 }
 0x202   :  { %2234 = vmatpush1.bf16.msra.mxu0 %v2797_v24  ;;  %v2853_v24 = vcombine.low %v651_v11, %v655_v12  ;;  %v708_v11 = vld [vmem:[#allocation7 + $0x618] sm:$0xff] }
 0x203   :  { %2316 = vmatpush1.bf16.msra.mxu1 %v2799_v25  ;;  %2235 = vmatprep.subr.bf16.mxu0 %v2806_v26  ;;  %v2855_v25 = vcombine.low %v652_v15, %v656_v16  ;;  %v2862_v26 = vcombine.high %v659_v20, %v663_v21  ;;  %v712_v12 = vld [vmem:[#allocation7 + $0x638] sm:$0xff]  ;;  %v2903_v15 = vcombine.low %v700_v0, %v704_v1 }
 0x204   :  { %2317 = vmatprep.subr.bf16.mxu1 %v2808_v7  ;;  %v2864_v7 = vcombine.high %v660_v32, %v664_v23 }
 0x206   :  { %2236 = vmatpush1.bf16.msra.mxu0 %v2805_v10  ;;  %v2861_v10 = vcombine.low %v659_v20, %v663_v21  ;;  %v719_v20 = vld [vmem:[#allocation7 + $0x670] sm:$0xff]  ;;  %v716_v21 = vld [vmem:[#allocation7 + $0x658] sm:$0xff] }
 0x207   :  { %2318 = vmatpush1.bf16.msra.mxu1 %v2807_v37  ;;  %2237 = vmatprep.subr.bf16.mxu0 %v2814_v41  ;;  %v2870_v37 = vcombine.high %v667_v27, %v671_v28  ;;  %v2872_v41 = vcombine.high %v668_v29, %v672_v31 }
 0x208   :  { %2319 = vmatprep.subr.bf16.mxu1 %v2816_v42  ;;  %v675_v42 = vld [vmem:[#allocation7 + $0x510] sm:$0xff] }
 0x209   :  { %v2877_v52 = vcombine.low %v675_v42, %v679_v19 }
 0x20a   :  { %2238 = vmatpush1.bf16.msra.mxu0 %v2813_v30  ;;  %v2878_v30 = vcombine.high %v675_v42, %v679_v19  ;;  %v732_v42 = vld [vmem:[#allocation7 + $0x6d8] sm:$0xff] }
 0x20b   :  { %2320 = vmatpush1.bf16.msra.mxu1 %v2815_v47  ;;  %2239 = vmatprep.subr.bf16.mxu0 %v2822_v48  ;;  %v2880_v47 = vcombine.high %v676_v44, %v680_v45  ;;  %v683_v48 = vld [vmem:[#allocation7 + $0x550] sm:$0xff]  ;;  %v736_v19 = vld [vmem:[#allocation7 + $0x6f8] sm:$0xff] }
 0x20c   :  { %2321 = vmatprep.subr.bf16.mxu1 %v2824_v33  ;;  %v687_v33 = vld [vmem:[#allocation7 + $0x570] sm:$0xff] }
 0x20d   :  { %v2885_v35 = vcombine.low %v683_v48, %v687_v33 }
 0x20e   :  { %2240 = vmatpush1.bf16.msra.mxu0 %v2821_v54  ;;  %v2886_v54 = vcombine.high %v683_v48, %v687_v33  ;;  %v740_v48 = vld [vmem:[#allocation7 + $0x718] sm:$0xff] }
 0x20f   :  { %2322 = vmatpush1.bf16.msra.mxu1 %v2823_v55  ;;  %2241 = vmatprep.subr.bf16.mxu0 %v2830_v56  ;;  %v2888_v55 = vcombine.high %v684_v50, %v688_v51  ;;  %v691_v56 = vld [vmem:[#allocation7 + $0x590] sm:$0xff]  ;;  %v744_v33 = vld [vmem:[#allocation7 + $0x738] sm:$0xff]  ;;  %v2935_v51 = vcombine.low %v732_v42, %v736_v19 }
 0x210   :  { %2323 = vmatprep.subr.bf16.mxu1 %v2832_v57  ;;  %v695_v57 = vld [vmem:[#allocation7 + $0x5b0] sm:$0xff] }
 0x211   :  { %v2893_v49 = vcombine.low %v691_v56, %v695_v57 }
 0x212   :  { %2242 = vmatpush1.bf16.msra.mxu0 %v2829_v38  ;;  %v2894_v38 = vcombine.high %v691_v56, %v695_v57  ;;  %v748_v56 = vld [vmem:[#allocation7 + $0x758] sm:$0xff] }
 0x213   :  { %2324 = vmatpush1.bf16.msra.mxu1 %v2831_v60  ;;  %2243 = vmatprep.subr.bf16.mxu0 %v2838_v62  ;;  %v2896_v60 = vcombine.high %v692_v58, %v696_v34  ;;  %v699_v62 = vld [vmem:[#allocation7 + $0x5d0] sm:$0xff]  ;;  %v752_v57 = vld [vmem:[#allocation7 + $0x778] sm:$0xff]  ;;  %v2943_v34 = vcombine.low %v740_v48, %v744_v33 }
 0x214   :  { %2325 = vmatprep.subr.bf16.mxu1 %v2840_v63  ;;  %v703_v63 = vld [vmem:[#allocation7 + $0x5f0] sm:$0xff] }
 0x216   :  { %2244 = vmatpush1.bf16.msra.mxu0 %v2837_v3  ;;  %v2902_v3 = vcombine.high %v699_v62, %v703_v63 }
 0x217   :  { %2326 = vmatpush1.bf16.msra.mxu1 %v2839_v4  ;;  %2254 = vmatprep.subr.bf16.mxu0 %v2846_v5  ;;  %v2904_v4 = vcombine.high %v700_v0, %v704_v1  ;;  %v707_v5 = vld [vmem:[#allocation7 + $0x610] sm:$0xff]  ;;  %v2951_v1 = vcombine.low %v748_v56, %v752_v57 }
 0x218   :  { %2336 = vmatprep.subr.bf16.mxu1 %v2848_v6  ;;  %v711_v6 = vld [vmem:[#allocation7 + $0x630] sm:$0xff] }
 0x219   :  { %2246 = vmatmul.mubr.bf16.vlgmr.msra.gmra.mrb[8].mxu0 %v3400_v43  ;;  %v2910_v16 = vcombine.high %v707_v5, %v711_v6 }
 0x21a   :  { %2328 = vmatmul.mubr.bf16.vlgmr.msra.gmra.mrb[8].mxu1 %v3400_v43  ;;  %2255 = vmatpush1.bf16.msra.mxu0 %v2845_v13  ;;  %v2863_v43 = vcombine.low %v660_v32, %v664_v23  ;;  %v2901_v13 = vcombine.low %v699_v62, %v703_v63  ;;  %v2909_v32 = vcombine.low %v707_v5, %v711_v6  ;;  %v756_v62 = vld [vmem:[#allocation7 + $0x798] sm:$0xff] }
 0x21b   :  { %2286 = vmatprep.mubr.bf16.mxu0 %v3414_v39  ;;  %2337 = vmatpush1.bf16.msra.mxu1 %v2847_v17  ;;  %v2912_v17 = vcombine.high %v708_v11, %v712_v12  ;;  %v2911_v23 = vcombine.low %v708_v11, %v712_v12  ;;  %v760_v63 = vld [vmem:[#allocation7 + $0x7b8] sm:$0xff] }
 0x21c   :  { %2368 = vmatprep.mubr.bf16.mxu1 %v3414_v39  ;;  %2256 = vmatprep.subr.bf16.mxu0 %v2854_v18  ;;  %v2869_v39 = vcombine.low %v667_v27, %v671_v28  ;;  %v715_v18 = vld [vmem:[#allocation7 + $0x650] sm:$0xff]  ;;  %v724_v27 = vld [vmem:[#allocation7 + $0x698] sm:$0xff]  ;;  %v2959_v12 = vcombine.low %v756_v62, %v760_v63 }
 0x21d   :  { %2338 = vmatprep.subr.bf16.mxu1 %v2856_v22  ;;  %v720_v22 = vld [vmem:[#allocation7 + $0x678] sm:$0xff]  ;;  %v2917_v29 = vcombine.low %v715_v18, %v719_v20 }
 0x21e   :  { %2257 = vmatpush1.bf16.msra.mxu0 %v2853_v24  ;;  %v2918_v24 = vcombine.high %v715_v18, %v719_v20  ;;  %v728_v28 = vld [vmem:[#allocation7 + $0x6b8] sm:$0xff]  ;;  %v2919_v31 = vcombine.low %v716_v21, %v720_v22 }
 0x21f   :  { %2339 = vmatpush1.bf16.msra.mxu1 %v2855_v25  ;;  %2258 = vmatprep.subr.bf16.mxu0 %v2862_v26  ;;  %v2920_v25 = vcombine.high %v716_v21, %v720_v22  ;;  %v723_v26 = vld [vmem:[#allocation7 + $0x690] sm:$0xff]  ;;  %v2927_v45 = vcombine.low %v724_v27, %v728_v28  ;;  %v764_v5 = vld [vmem:[#allocation7 + $0x7d8] sm:$0xff] }
 0x220   :  { %2340 = vmatprep.subr.bf16.mxu1 %v2864_v7  ;;  %v727_v7 = vld [vmem:[#allocation7 + $0x6b0] sm:$0xff]  ;;  %v768_v6 = vld [vmem:[#allocation7 + $0x7f8] sm:$0xff] }
 0x221   :  { %v2925_v44 = vcombine.low %v723_v26, %v727_v7 }
 0x222   :  { %2259 = vmatpush1.bf16.msra.mxu0 %v2861_v10  ;;  %v2926_v10 = vcombine.high %v723_v26, %v727_v7 }
 0x223   :  { %2341 = vmatpush1.bf16.msra.mxu1 %v2863_v43  ;;  %2260 = vmatprep.subr.bf16.mxu0 %v2870_v37  ;;  %v2928_v43 = vcombine.high %v724_v27, %v728_v28  ;;  %v731_v37 = vld [vmem:[#allocation7 + $0x6d0] sm:$0xff] }
 0x224   :  { %2342 = vmatprep.subr.bf16.mxu1 %v2872_v41  ;;  %v735_v41 = vld [vmem:[#allocation7 + $0x6f0] sm:$0xff] }
 0x225   :  { %v2933_v50 = vcombine.low %v731_v37, %v735_v41 }
 0x226   :  { %2261 = vmatpush1.bf16.msra.mxu0 %v2869_v39  ;;  %v2934_v39 = vcombine.high %v731_v37, %v735_v41 }
 0x227   :  { %2343 = vmatpush1.bf16.msra.mxu1 %v2871_v46  ;;  %2262 = vmatprep.subr.bf16.mxu0 %v2878_v30  ;;  %v2936_v46 = vcombine.high %v732_v42, %v736_v19  ;;  %v739_v30 = vld [vmem:[#allocation7 + $0x710] sm:$0xff] }
 0x228   :  { %2344 = vmatprep.subr.bf16.mxu1 %v2880_v47  ;;  %v743_v47 = vld [vmem:[#allocation7 + $0x730] sm:$0xff] }
 0x229   :  { %v2941_v58 = vcombine.low %v739_v30, %v743_v47 }
 0x22a   :  { %2263 = vmatpush1.bf16.msra.mxu0 %v2877_v52  ;;  %v2942_v52 = vcombine.high %v739_v30, %v743_v47 }
 0x22b   :  { %2345 = vmatpush1.bf16.msra.mxu1 %v2879_v53  ;;  %2264 = vmatprep.subr.bf16.mxu0 %v2886_v54  ;;  %v2944_v53 = vcombine.high %v740_v48, %v744_v33  ;;  %v747_v54 = vld [vmem:[#allocation7 + $0x750] sm:$0xff] }
 0x22c   :  { %2346 = vmatprep.subr.bf16.mxu1 %v2888_v55  ;;  %v751_v55 = vld [vmem:[#allocation7 + $0x770] sm:$0xff] }
 0x22d   :  { %v2949_v0 = vcombine.low %v747_v54, %v751_v55 }
 0x22e   :  { %2265 = vmatpush1.bf16.msra.mxu0 %v2885_v35  ;;  %v2950_v35 = vcombine.high %v747_v54, %v751_v55 }
 0x22f   :  { %2347 = vmatpush1.bf16.msra.mxu1 %v2887_v36  ;;  %2266 = vmatprep.subr.bf16.mxu0 %v2894_v38  ;;  %v2952_v36 = vcombine.high %v748_v56, %v752_v57  ;;  %v755_v38 = vld [vmem:[#allocation7 + $0x790] sm:$0xff] }
 0x230   :  { %2348 = vmatprep.subr.bf16.mxu1 %v2896_v60  ;;  %v759_v60 = vld [vmem:[#allocation7 + $0x7b0] sm:$0xff] }
 0x231   :  { %v2957_v11 = vcombine.low %v755_v38, %v759_v60 }
 0x232   :  { %2267 = vmatpush1.bf16.msra.mxu0 %v2893_v49  ;;  %v2958_v49 = vcombine.high %v755_v38, %v759_v60 }
 0x233   :  { %2349 = vmatpush1.bf16.msra.mxu1 %v2895_v2  ;;  %2268 = vmatprep.subr.bf16.mxu0 %v2902_v3  ;;  %v2960_v2 = vcombine.high %v756_v62, %v760_v63  ;;  %v763_v3 = vld [vmem:[#allocation7 + $0x7d0] sm:$0xff] }
 0x234   :  { %2350 = vmatprep.subr.bf16.mxu1 %v2904_v4  ;;  %v767_v4 = vld [vmem:[#allocation7 + $0x7f0] sm:$0xff] }
 0x236   :  { %2269 = vmatpush1.bf16.msra.mxu0 %v2901_v13  ;;  %v2966_v13 = vcombine.high %v763_v3, %v767_v4 }
 0x237   :  { %2351 = vmatpush1.bf16.msra.mxu1 %v2903_v15  ;;  %2270 = vmatprep.subr.bf16.mxu0 %v2910_v16  ;;  %v2968_v15 = vcombine.high %v764_v5, %v768_v6  ;;  %v2965_v16 = vcombine.low %v763_v3, %v767_v4 }
 0x238   :  { %2352 = vmatprep.subr.bf16.mxu1 %v2912_v17  ;;  %v2967_v17 = vcombine.low %v764_v5, %v768_v6 }
 0x23a   :  { %2271 = vmatpush1.bf16.msra.mxu0 %v2909_v32 }
 0x23b   :  { %2353 = vmatpush1.bf16.msra.mxu1 %v2911_v23  ;;  %2272 = vmatprep.subr.bf16.mxu0 %v2918_v24 }
 0x23c   :  { %2354 = vmatprep.subr.bf16.mxu1 %v2920_v25 }
 0x23e   :  { %2273 = vmatpush1.bf16.msra.mxu0 %v2917_v29 }
 0x23f   :  { %2355 = vmatpush1.bf16.msra.mxu1 %v2919_v31  ;;  %2274 = vmatprep.subr.bf16.mxu0 %v2926_v10 }
 0x240   :  { %2356 = vmatprep.subr.bf16.mxu1 %v2928_v43 }
 0x242   :  { %2275 = vmatpush1.bf16.msra.mxu0 %v2925_v44 }
 0x243   :  { %2357 = vmatpush1.bf16.msra.mxu1 %v2927_v45  ;;  %2276 = vmatprep.subr.bf16.mxu0 %v2934_v39 }
 0x244   :  { %2358 = vmatprep.subr.bf16.mxu1 %v2936_v46 }
 0x246   :  { %2277 = vmatpush1.bf16.msra.mxu0 %v2933_v50 }
 0x247   :  { %2359 = vmatpush1.bf16.msra.mxu1 %v2935_v51  ;;  %2278 = vmatprep.subr.bf16.mxu0 %v2942_v52 }
 0x248   :  { %2360 = vmatprep.subr.bf16.mxu1 %v2944_v53 }
 0x24a   :  { %2279 = vmatpush1.bf16.msra.mxu0 %v2941_v58 }
 0x24b   :  { %2361 = vmatpush1.bf16.msra.mxu1 %v2943_v34  ;;  %2280 = vmatprep.subr.bf16.mxu0 %v2950_v35 }
 0x24c   :  { %2362 = vmatprep.subr.bf16.mxu1 %v2952_v36 }
 0x24e   :  { %2281 = vmatpush1.bf16.msra.mxu0 %v2949_v0 }
 0x24f   :  { %2363 = vmatpush1.bf16.msra.mxu1 %v2951_v1  ;;  %2282 = vmatprep.subr.bf16.mxu0 %v2958_v49 }
 0x250   :  { %2364 = vmatprep.subr.bf16.mxu1 %v2960_v2 }
 0x252   :  { %2283 = vmatpush1.bf16.msra.mxu0 %v2957_v11 }
 0x253   :  { %2365 = vmatpush1.bf16.msra.mxu1 %v2959_v12  ;;  %2284 = vmatprep.subr.bf16.mxu0 %v2966_v13 }
 0x254   :  { %2366 = vmatprep.subr.bf16.mxu1 %v2968_v15 }
 0x256   :  { %2285 = vmatpush1.bf16.msra.mxu0 %v2965_v16 }
 0x257   :  { %2367 = vmatpush1.bf16.msra.mxu1 %v2967_v17 }
 0x259   :  { %2287 = vmatmul.mubr.bf16.vlgmr.msra.gmra.mrb[8].mxu0 %v3419_v40 }
 0x25a   :  { %2369 = vmatmul.mubr.bf16.vlgmr.msra.gmra.mrb[8].mxu1 %v3419_v40 }
 0x2ac   :  { %v2124_v18 = vpop.f32.mrb[4].mxu0  ;;  %v2206_v20 = vpop.f32.mrb[4].mxu1 }
 0x2ad   :  { %v2379_v21 = vrot.slane %v2124_v18, 4  ;;  %v2391_v22 = vrot.slane %v2206_v20, 4  ;;  %v2126_v32 = vpop.f32.mrb[5].mxu0  ;;  %v2208_v23 = vpop.f32.mrb[5].mxu1 }
 0x2ae   :  { %v2385_v24 = vrot.slane %v2126_v32, 4  ;;  %v2397_v25 = vrot.slane %v2208_v23, 4  ;;  %v2128_v26 = vpop.f32.mrb[6].mxu0  ;;  %v2210_v7 = vpop.f32.mrb[6].mxu1 }
 0x2af   :  { %v2380_v27 = vadd.f32 %v2379_v21, %v2124_v18  ;;  %v2392_v28 = vadd.f32 %v2391_v22, %v2206_v20  ;;  %v2129_v29 = vpop.f32.mrb[7].mxu0  ;;  %v2211_v31 = vpop.f32.mrb[7].mxu1 }
 0x2b0   :  { %v2386_v10 = vadd.f32 %v2385_v24, %v2126_v32  ;;  %v2398_v43 = vadd.f32 %v2397_v25, %v2208_v23 }
 0x2b1   :  { %v2381_v37 = vrot.slane %v2380_v27, 2  ;;  %v2393_v41 = vrot.slane %v2392_v28, 2 }
 0x2b2   :  { %v2387_v42 = vrot.slane %v2386_v10, 2  ;;  %v2399_v40 = vrot.slane %v2398_v43, 2 }
 0x2b3   :  { %v2382_v19 = vadd.f32 %v2381_v37, %v2380_v27  ;;  %v2394_v44 = vadd.f32 %v2393_v41, %v2392_v28  ;;  %v3431_v41 = vld [vmem:[#allocation9] sm:$0xff] }
 0x2b4   :  { %v2388_v45 = vadd.f32 %v2387_v42, %v2386_v10  ;;  %v2400_v39 = vadd.f32 %v2399_v40, %v2398_v43  ;;  %v2511_v42 = vrot.slane %v3431_v41, %v3379_v59  ;;  %v3435_v40 = vld [vmem:[#allocation10] sm:$0xff] }
 0x2b5   :  { %v2383_v46 = vrot.slane %v2382_v19, 1  ;;  %v2395_v30 = vrot.slane %v2394_v44, 1 }
 0x2b6   :  { %v2389_v47 = vrot.slane %v2388_v45, 1  ;;  %v2401_v48 = vrot.slane %v2400_v39, 1 }
 0x2b7   :  { %v2384_v33 = vadd.f32 %v2383_v46, %v2382_v19  ;;  %v2396_v50 = vadd.f32 %v2395_v30, %v2394_v44  ;;  %v2519_v19 = vrot.slane %v3431_v41, %v3370_v14  ;;  %v2515_v44 = vrot.slane %v3431_v41, %v3382_v61 }
 0x2b8   :  { %v2390_v51 = vadd.f32 %v2389_v47, %v2388_v45  ;;  %v2402_v52 = vadd.f32 %v2401_v48, %v2400_v39  ;;  %v2523_v45 = vrot.slane %v3431_v41, %v3389_v9  ;;  %v2584_v46 = vrot.slane %v3435_v40, %v3379_v59 }
 0x2b9   :  { %v2427_v53 = vmul.f32 0.125, %v2384_v33  ;;  %v2429_v54 = vmul.f32 0.125, %v2396_v50  ;;  %v2592_v48 = vrot.slane %v3435_v40, %v3370_v14 }
 0x2ba   :  { %v2428_v55 = vmul.f32 0.125, %v2390_v51  ;;  %v2430_v56 = vmul.f32 0.125, %v2402_v52  ;;  %v2588_v52 = vrot.slane %v3435_v40, %v3382_v61 }
 0x2bb   :  { %v2435_v57 = vsub.f32 %v2124_v18, %v2427_v53  ;;  %v2437_v58 = vsub.f32 %v2206_v20, %v2429_v54 }
 0x2bc   :  { %v2436_v34 = vsub.f32 %v2126_v32, %v2428_v55  ;;  %v2438_v35 = vsub.f32 %v2208_v23, %v2430_v56  ;;  %v2596_v56 = vrot.slane %v3435_v40, %v3389_v9 }
 0x2bd   :  { %v2443_v36 = vmul.f32 %v2435_v57, %v2435_v57  ;;  %v2445_v38 = vmul.f32 %v2437_v58, %v2437_v58  ;;  %v2548_v39 = vmul.f32 %v2511_v42, %v2435_v57  ;;  %v2550_v47 = vmul.f32 %v2519_v19, %v2437_v58 }
 0x2be   :  { %v2444_v60 = vmul.f32 %v2436_v34, %v2436_v34  ;;  %v2446_v62 = vmul.f32 %v2438_v35, %v2438_v35  ;;  %v2549_v51 = vmul.f32 %v2515_v44, %v2436_v34  ;;  %v2551_v55 = vmul.f32 %v2523_v45, %v2438_v35 }
 0x2bf   :  { %v2451_v63 = vrot.slane %v2443_v36, 4  ;;  %v2463_v0 = vrot.slane %v2445_v38, 4 }
 0x2c0   :  { %v2457_v1 = vrot.slane %v2444_v60, 4  ;;  %v2469_v49 = vrot.slane %v2446_v62, 4 }
 0x2c1   :  { %v2452_v2 = vadd.f32 %v2451_v63, %v2443_v36  ;;  %v2464_v3 = vadd.f32 %v2463_v0, %v2445_v38 }
 0x2c2   :  { %v2458_v4 = vadd.f32 %v2457_v1, %v2444_v60  ;;  %v2470_v5 = vadd.f32 %v2469_v49, %v2446_v62 }
 0x2c3   :  { %v2453_v6 = vrot.slane %v2452_v2, 2  ;;  %v2465_v11 = vrot.slane %v2464_v3, 2 }
 0x2c4   :  { %v2459_v12 = vrot.slane %v2458_v4, 2  ;;  %v2471_v13 = vrot.slane %v2470_v5, 2 }
 0x2c5   :  { %v2454_v15 = vadd.f32 %v2453_v6, %v2452_v2  ;;  %v2466_v16 = vadd.f32 %v2465_v11, %v2464_v3 }
 0x2c6   :  { %v2460_v17 = vadd.f32 %v2459_v12, %v2458_v4  ;;  %v2472_v18 = vadd.f32 %v2471_v13, %v2470_v5 }
 0x2c7   :  { %v2455_v20 = vrot.slane %v2454_v15, 1  ;;  %v2467_v21 = vrot.slane %v2466_v16, 1 }
 0x2c8   :  { %v2461_v22 = vrot.slane %v2460_v17, 1  ;;  %v2473_v32 = vrot.slane %v2472_v18, 1 }
 0x2c9   :  { %v2456_v23 = vadd.f32 %v2455_v20, %v2454_v15  ;;  %v2468_v24 = vadd.f32 %v2467_v21, %v2466_v16 }
 0x2ca   :  { %v2462_v25 = vadd.f32 %v2461_v22, %v2460_v17  ;;  %v2474_v26 = vadd.f32 %v2473_v32, %v2472_v18 }
 0x2cb   :  { %v2499_v7 = vmul.f32 0.125, %v2456_v23  ;;  %v2501_v27 = vmul.f32 0.125, %v2468_v24 }
 0x2cc   :  { %v2500_v28 = vmul.f32 0.125, %v2462_v25  ;;  %v2502_v29 = vmul.f32 0.125, %v2474_v26 }
 0x2cd   :  { %v2556_v31 = vadd.f32 1e-05, %v2499_v7  ;;  %v2558_v10 = vadd.f32 1e-05, %v2501_v27 }
 0x2ce   :  { %v2557_v43 = vadd.f32 1e-05, %v2500_v28  ;;  %v2559_v37 = vadd.f32 1e-05, %v2502_v29 }
 0x2cf   :  { %3060 = vrsqrt.f32 %v2556_v31 }
 0x2d0   :  { %3062 = vrsqrt.f32 %v2558_v10 }
 0x2d1   :  { %3064 = vrsqrt.f32 %v2557_v43 }
 0x2d2   :  { %3066 = vrsqrt.f32 %v2559_v37 }
 0x2d9   :  { %v3061_v30 = vpop.eup %3060 }
 0x2da   :  { %v3063_v33 = vpop.eup %3062  ;;  %v2572_v50 = vmul.f32 %v3061_v30, %v2548_v39 }
 0x2db   :  { %v3065_v53 = vpop.eup %3064  ;;  %v2574_v54 = vmul.f32 %v3063_v33, %v2550_v47 }
 0x2dc   :  { %v3067_v57 = vpop.eup %3066  ;;  %v2621_v36 = vadd.f32 %v2584_v46, %v2572_v50  ;;  %v2573_v59 = vmul.f32 %v3065_v53, %v2549_v51 }
 0x2dd   :  { %v2623_v38 = vadd.f32 %v2592_v48, %v2574_v54  ;;  %v2575_v58 = vmul.f32 %v3067_v57, %v2551_v55 }
 0x2de   :  { %v2629_v60 = vmax.f32 %v2621_v36, 0.0  ;;  %v2622_v62 = vadd.f32 %v2588_v52, %v2573_v59 }
 0x2df   :  { %v2631_v14 = vmax.f32 %v2623_v38, 0.0  ;;  %v2624_v63 = vadd.f32 %v2596_v56, %v2575_v58 }
 0x2e0   :  { %v2630_v0 = vmax.f32 %v2622_v62, 0.0 }
 0x2e1   :  { %v2632_v34 = vmax.f32 %v2624_v63, 0.0 }
 0x2e2   :  { %v2973_v1 = vpack.c.bf16 %v2630_v0, %v2629_v60 }
 0x2e3   :  { %v2974_v49 = vpack.c.bf16 %v2632_v34, %v2631_v14 }
 0x2e4   :  { %2669 = vst [vmem:[%s3482_s7] sm:$0xff] %v2973_v1 }
 0x2e5   :  { %2670 = vst [vmem:[%s3482_s7 + $0x8] sm:$0xff] %v2974_v49 }
 0x32c   :  { %v2288_v61 = vpop.f32.mrb[8].mxu0 }
 0x32d   :  { %v2403_v9 = vrot.slane %v2288_v61, 4  ;;  %v2370_v35 = vpop.f32.mrb[8].mxu1  ;;  %v2290_v2 = vpop.f32.mrb[9].mxu0 }
 0x32e   :  { %v2415_v3 = vrot.slane %v2370_v35, 4  ;;  %v2409_v4 = vrot.slane %v2290_v2, 4  ;;  %v2372_v5 = vpop.f32.mrb[9].mxu1  ;;  %v2292_v6 = vpop.f32.mrb[10].mxu0 }
 0x32f   :  { %v2404_v11 = vadd.f32 %v2403_v9, %v2288_v61  ;;  %v2421_v12 = vrot.slane %v2372_v5, 4  ;;  %v2374_v13 = vpop.f32.mrb[10].mxu1  ;;  %v2293_v15 = vpop.f32.mrb[11].mxu0 }
 0x330   :  { %v2416_v16 = vadd.f32 %v2415_v3, %v2370_v35  ;;  %v2410_v17 = vadd.f32 %v2409_v4, %v2290_v2  ;;  %v2375_v18 = vpop.f32.mrb[11].mxu1 }
 0x331   :  { %v2405_v20 = vrot.slane %v2404_v11, 2  ;;  %v2422_v21 = vadd.f32 %v2421_v12, %v2372_v5 }
 0x332   :  { %v2417_v22 = vrot.slane %v2416_v16, 2  ;;  %v2411_v32 = vrot.slane %v2410_v17, 2 }
 0x333   :  { %v2406_v23 = vadd.f32 %v2405_v20, %v2404_v11  ;;  %v2423_v24 = vrot.slane %v2422_v21, 2  ;;  %v2526_v20 = vsub.s32 4, %v3365_v8 }
 0x334   :  { %v2418_v25 = vadd.f32 %v2417_v22, %v2416_v16  ;;  %v2412_v26 = vadd.f32 %v2411_v32, %v2410_v17  ;;  %v2530_v22 = vsub.s32 5, %v3365_v8  ;;  %v2538_v32 = vsub.s32 7, %v3365_v8 }
 0x335   :  { %v2407_v7 = vrot.slane %v2406_v23, 1  ;;  %v2424_v27 = vadd.f32 %v2423_v24, %v2422_v21  ;;  %v2534_v21 = vsub.s32 6, %v3365_v8 }
 0x336   :  { %v2419_v28 = vrot.slane %v2418_v25, 1  ;;  %v2413_v29 = vrot.slane %v2412_v26, 1  ;;  %v2604_v8 = vrot.slane %v3435_v40, %v2530_v22 }
 0x337   :  { %v2408_v31 = vadd.f32 %v2407_v7, %v2406_v23  ;;  %v2425_v10 = vrot.slane %v2424_v27, 1  ;;  %v2527_v23 = vrot.slane %v3431_v41, %v2526_v20  ;;  %v2535_v24 = vrot.slane %v3431_v41, %v2534_v21 }
 0x338   :  { %v2420_v43 = vadd.f32 %v2419_v28, %v2418_v25  ;;  %v2414_v37 = vadd.f32 %v2413_v29, %v2412_v26  ;;  %v2531_v25 = vrot.slane %v3431_v41, %v2530_v22  ;;  %v2539_v26 = vrot.slane %v3431_v41, %v2538_v32 }
 0x339   :  { %v2431_v42 = vmul.f32 0.125, %v2408_v31  ;;  %v2426_v19 = vadd.f32 %v2425_v10, %v2424_v27  ;;  %v2600_v27 = vrot.slane %v3435_v40, %v2526_v20  ;;  %v2608_v31 = vrot.slane %v3435_v40, %v2534_v21 }
 0x33a   :  { %v2433_v44 = vmul.f32 0.125, %v2420_v43  ;;  %v2432_v45 = vmul.f32 0.125, %v2414_v37 }
 0x33b   :  { %v2439_v39 = vsub.f32 %v2288_v61, %v2431_v42  ;;  %v2434_v46 = vmul.f32 0.125, %v2426_v19 }
 0x33c   :  { %v2441_v30 = vsub.f32 %v2370_v35, %v2433_v44  ;;  %v2440_v47 = vsub.f32 %v2290_v2, %v2432_v45  ;;  %v2612_v45 = vrot.slane %v3435_v40, %v2538_v32 }
 0x33d   :  { %v2447_v48 = vmul.f32 %v2439_v39, %v2439_v39  ;;  %v2442_v33 = vsub.f32 %v2372_v5, %v2434_v46  ;;  %v2552_v7 = vmul.f32 %v2527_v23, %v2439_v39 }
 0x33e   :  { %v2449_v50 = vmul.f32 %v2441_v30, %v2441_v30  ;;  %v2448_v51 = vmul.f32 %v2440_v47, %v2440_v47  ;;  %v2554_v29 = vmul.f32 %v2535_v24, %v2441_v30  ;;  %v2553_v37 = vmul.f32 %v2531_v25, %v2440_v47 }
 0x33f   :  { %v2475_v52 = vrot.slane %v2447_v48, 4  ;;  %v2450_v53 = vmul.f32 %v2442_v33, %v2442_v33  ;;  %v2555_v44 = vmul.f32 %v2539_v26, %v2442_v33 }
 0x340   :  { %v2487_v54 = vrot.slane %v2449_v50, 4  ;;  %v2481_v55 = vrot.slane %v2448_v51, 4 }
 0x341   :  { %v2476_v56 = vadd.f32 %v2475_v52, %v2447_v48  ;;  %v2493_v57 = vrot.slane %v2450_v53, 4 }
 0x342   :  { %v2488_v36 = vadd.f32 %v2487_v54, %v2449_v50  ;;  %v2482_v59 = vadd.f32 %v2481_v55, %v2448_v51 }
 0x343   :  { %v2477_v38 = vrot.slane %v2476_v56, 2  ;;  %v2494_v58 = vadd.f32 %v2493_v57, %v2450_v53 }
 0x344   :  { %v2489_v60 = vrot.slane %v2488_v36, 2  ;;  %v2483_v62 = vrot.slane %v2482_v59, 2 }
 0x345   :  { %v2478_v14 = vadd.f32 %v2477_v38, %v2476_v56  ;;  %v2495_v63 = vrot.slane %v2494_v58, 2 }
 0x346   :  { %v2490_v0 = vadd.f32 %v2489_v60, %v2488_v36  ;;  %v2484_v34 = vadd.f32 %v2483_v62, %v2482_v59 }
 0x347   :  { %v2479_v1 = vrot.slane %v2478_v14, 1  ;;  %v2496_v49 = vadd.f32 %v2495_v63, %v2494_v58 }
 0x348   :  { %v2491_v61 = vrot.slane %v2490_v0, 1  ;;  %v2485_v9 = vrot.slane %v2484_v34, 1 }
 0x349   :  { %v2480_v35 = vadd.f32 %v2479_v1, %v2478_v14  ;;  %v2497_v2 = vrot.slane %v2496_v49, 1 }
 0x34a   :  { %v2492_v3 = vadd.f32 %v2491_v61, %v2490_v0  ;;  %v2486_v4 = vadd.f32 %v2485_v9, %v2484_v34 }
 0x34b   :  { %v2503_v5 = vmul.f32 0.125, %v2480_v35  ;;  %v2498_v6 = vadd.f32 %v2497_v2, %v2496_v49 }
 0x34c   :  { %v2505_v11 = vmul.f32 0.125, %v2492_v3  ;;  %v2504_v12 = vmul.f32 0.125, %v2486_v4 }
 0x34d   :  { %v2560_v13 = vadd.f32 1e-05, %v2503_v5  ;;  %v2506_v15 = vmul.f32 0.125, %v2498_v6 }
 0x34e   :  { %v2562_v16 = vadd.f32 1e-05, %v2505_v11  ;;  %v2561_v17 = vadd.f32 1e-05, %v2504_v12 }
 0x34f   :  { %3068 = vrsqrt.f32 %v2560_v13  ;;  %v2563_v18 = vadd.f32 1e-05, %v2506_v15 }
 0x350   :  { %3070 = vrsqrt.f32 %v2562_v16 }
 0x351   :  { %3072 = vrsqrt.f32 %v2561_v17 }
 0x352   :  { %3074 = vrsqrt.f32 %v2563_v18 }
 0x359   :  { %v3069_v28 = vpop.eup %3068 }
 0x35a   :  { %v3071_v10 = vpop.eup %3070  ;;  %v2576_v43 = vmul.f32 %v3069_v28, %v2552_v7 }
 0x35b   :  { %v3073_v42 = vpop.eup %3072  ;;  %v2578_v19 = vmul.f32 %v3071_v10, %v2554_v29 }
 0x35c   :  { %v3075_v46 = vpop.eup %3074  ;;  %v2625_v48 = vadd.f32 %v2600_v27, %v2576_v43  ;;  %v2577_v41 = vmul.f32 %v3073_v42, %v2553_v37 }
 0x35d   :  { %v2627_v39 = vadd.f32 %v2608_v31, %v2578_v19  ;;  %v2579_v50 = vmul.f32 %v3075_v46, %v2555_v44 }
 0x35e   :  { %v2633_v51 = vmax.f32 %v2625_v48, 0.0  ;;  %v2626_v52 = vadd.f32 %v2604_v8, %v2577_v41 }
 0x35f   :  { %v2635_v30 = vmax.f32 %v2627_v39, 0.0  ;;  %v2628_v53 = vadd.f32 %v2612_v45, %v2579_v50 }
 0x360   :  { %v2634_v54 = vmax.f32 %v2626_v52, 0.0 }
 0x361   :  { %v2636_v55 = vmax.f32 %v2628_v53, 0.0 }
 0x362   :  { %v2975_v56 = vpack.c.bf16 %v2634_v54, %v2633_v51 }
 0x363   :  { %v2976_v47 = vpack.c.bf16 %v2636_v55, %v2635_v30 }
 0x364   :  { %2671 = vst [vmem:[%s3482_s7 + $0x10] sm:$0xff] %v2975_v56 }
 0x365   :  { %2672 = vst [vmem:[%s3482_s7 + $0x18] sm:$0xff] %v2976_v47 }
 0x366   :  { %2677 = vsyncpa [#allocation3], 1 }
 0x367   :  { %2678 = vsyncpa [#allocation5], 1 }
 0x368   :  { %2679 = vsyncpa [#allocation8], 1 }
 0x369   :  { %2680 = vsyncpa [#allocation11], 1 }

// kernel: generator_forward.3
= control target key start
LH: loop header
LB: loop body
LE: loop exit
PB: predicated region body
PF: predicated region fallthrough
CT: control target
= control target key end

     0   :  { %9 = vsyncpa [#allocation3], 0  ;;  %s6759_s0 = inlined_call_operand.vmem [shape: bf16[8,1024], index: 0, kind: input, shape index: {}]   ;;  %s6760_s1 = inlined_call_operand.hbm [shape: s8[4,1024,3072], index: 1, kind: input, shape index: {}]   ;;  %s6761_s2 = inlined_call_operand.hbm [shape: f32[1,12288], index: 2, kind: input, shape index: {}]   ;;  %s6762_s3 = inlined_call_operand.hbm [shape: f32[1,12288], index: 3, kind: input, shape index: {}]   ;;  %s6763_s4 = inlined_call_operand.vmem [shape: f32[8,12288], index: 4, kind: output, shape index: {}]  }
   0x1   :  { %11 = vsyncpa [#allocation3 + $0x1], 0 }
   0x2   :  { %12 = vsyncpa [#allocation5], 0 }
   0x3   :  { %14 = vsyncpa [#allocation5 + $0x1], 0  ;;  %s5498_s15 = smov 0   ;;  %s5500_s16 = smov 0  }
   0x4   :  { %s5502_s17 = smov 0   ;;  %s5504_s18 = smov 0  }
   0x5 LB: > { %s5517_s19 = sadd.s32 4294967295, %s5466_s18   ;;  %s5520_s20 = sadd.s32 1, %s5466_s18   ;;  %s5466_s18 = sphi %s5504_s18, %s6779_s18   ;;  %s5462_s17 = sphi %s5502_s17, %s6778_s17   ;;  %s5458_s16 = sphi %s5500_s16, %s6777_s16   ;;  %s5454_s15 = sphi %s5498_s15, %s6776_s15  }
   0x6   : > { %s45_s21 = ssub.s32 %s5466_s18, %s5520_s20  ;;  %s48_s22 = sadd.s32 1, %s5462_s17 }
   0x7   : > { %p46_p0 = scmp.eq.s32.totalorder %s45_s21, 0  ;;  %p55_p1 = scmp.ne.s32.totalorder %s5462_s17, %s5458_s16 }
   0x8   : > { %p56_p2 = scmp.eq.s32.totalorder %s5466_s18, 0  ;;  %p61_p3 = scmp.ne.s32.totalorder %s5458_s16, %s5454_s15 }
   0x9   : > { %s5530_s23 = scalar_select %p46_p0, %s5462_s17, %s48_s22  }
   0xa   : > { %p57_p4 = por %p56_p2, %p55_p1  ;;  %p62_p5 = scmp.eq.s32.totalorder %s5517_s19, 0 }
   0xb   : > { %p5243_p6 = scmp.lt.s32.totalorder %s5466_s18, 4  ;;  %s5539_s25 = sand.u32 1, %s5462_s17  }
   0xc   : > { %p5534_p7 = por %p62_p5, %p61_p3  ;;  %s187_s27 = sand.u32 1, %s5466_s18  }
   0xd   : > { %p5541_p8 = pnand %p5243_p6, %p57_p4  ;;  %s5223_s28 = smul.u32 24, %s5539_s25 }
   0xe   : > { %s6766_s24 = scalar_select %p5534_p7, 1, 0 }
   0xf   : > { %s6767_s26 = scalar_select %p5541_p8, 1, 0 }
  0x10   : > { %s5075_s29 = smul.u32 384, %s5466_s18  ;;  %s191_s7 = scalar_lea.vmem [#allocation4], %s5223_s28 }
  0x11   : > { %s199_s8 = sshll.u32 %s191_s7, 4  ;;  %s5561_s9 = scalar_lea.sflag [#allocation5], %s187_s27  ;;  %s5558_s8 = int_to_ptr.vmem [resolvable:$true] %s199_s8 }
  0x12   : > { %s5554_s6 = scalar_lea.hbm %s6761_s2, %s5075_s29  ;;  %p5567_p12 = pneg %p5541_p8 }
  0x13   : > { %s5338_s10 = scalar_lea.hbm %s5554_s6, 384  ;;  %s5343_s14 = scalar_lea.hbm %s6761_s2, 1536 }
  0x14   : > { %p5339_p11 = scmp.ne.s32.totalorder %s5554_s6, %s5338_s10  ;;  %p5344_p1 = scmp.lt.u32.totalorder %s5554_s6, %s6761_s2 }
  0x15   : > { %p5345_p2 = scmp.lt.u32.totalorder %s5343_s14, %s5338_s10  ;;  %p5347_p4 = scmp.lt.u32.totalorder %s5338_s10, %s5554_s6 }
  0x16   : > { %p5341_p13 = pnand %p5567_p12, %p5339_p11 }
  0x17   : > { %p5346_p3 = por %p5345_p2, %p5344_p1 }
  0x18   : > { %p5342_p0 = pneg %p5341_p13 }
  0x19   : > { %p5348_p5 = por %p5347_p4, %p5346_p3 }
  0x1b   : > { %p5349_p6 = pnand %p5348_p5, %p5342_p0 }
  0x1d   : > { %5352 = shalt.err (!%p5349_p6)
}
  0x1e   : > { %s5353_s22 = scalar_lea.vmem %s5558_s8, 384  ;;  %s5468_s27 = smov [#allocation4]  }
  0x1f   : > { %p5354_p11 = scmp.ne.s32.totalorder %s5558_s8, %s5353_s22  ;;  %s5358_s30 = sshll.u32 %s5468_s27, 4  ;;  %s5359_s30 = int_to_ptr.vmem [resolvable:$false] %s5358_s30 }
  0x20   : > { %s5360_s5 = scalar_lea.vmem %s5359_s30, 768  ;;  %p5361_p10 = scmp.lt.s32.totalorder %s5558_s8, %s5359_s30 }
  0x21   : > { %p5356_p13 = pnand %p5354_p11, %p5567_p12  ;;  %p5362_p7 = scmp.lt.s32.totalorder %s5360_s5, %s5353_s22 }
  0x23   : > { %p5357_p9 = pneg %p5356_p13  ;;  %p5363_p1 = por %p5362_p7, %p5361_p10 }
  0x25   : > { %p5364_p2 = pnand %p5363_p1, %p5357_p9 }
  0x27   : > { %5367 = shalt.err (!%p5364_p2)
}
  0x28   : > { %5239 = dma.hbm_to_vmem [thread:$0]  (!%p5541_p8), %s5554_s6, 384, %s5558_s8, %s5561_s9  }
  0x29   : > { %p6769_p0 = scmp.lt.s32.totalorder %s5466_s18, 5  ;;  %p6770_p3 = scmp.ge.s32.totalorder %s5466_s18, 1 }
  0x2a   : > { %s5221_s10 = smul.u32 6144, %s5539_s25  ;;  %s5613_s27 = scalar_lea.hbm %s6762_s3, %s5075_s29 }
  0x2b   : > { %p5595_p4 = pnand %p6770_p3, %p6769_p0  ;;  %s5222_s12 = smul.u32 98304, %s5466_s18 }
  0x2c   : > { %s170_s21 = scalar_lea.vmem [#allocation2], %s5221_s10  ;;  %s167_s30 = scalar_lea.sflag [#allocation3], %s5539_s25 }
  0x2d   : > { %s6771_s7 = scalar_select %p5595_p4, 1, 0 }
  0x2e   : > { %s5604_s15 = scalar_lea.hbm %s6760_s1, %s5222_s12  ;;  %s177_s22 = sshll.u32 %s170_s21, 4  ;;  %s5606_s22 = int_to_ptr.vmem [resolvable:$true] %s177_s22 }
  0x2f   : > { %s5368_s5 = scalar_lea.hbm %s5604_s15, 98304  ;;  %s5373_s14 = scalar_lea.hbm %s6760_s1, 393216 }
  0x30   : > { %p5369_p7 = scmp.ne.s32.totalorder %s5604_s15, %s5368_s5  ;;  %p5374_p5 = scmp.lt.u32.totalorder %s5604_s15, %s6760_s1 }
  0x31   : > { %p5375_p6 = scmp.lt.u32.totalorder %s5373_s14, %s5368_s5  ;;  %p5377_p13 = scmp.lt.u32.totalorder %s5368_s5, %s5604_s15 }
  0x32   : > { %p5371_p9 = pnand %p5369_p7, %p5567_p12 }
  0x33   : > { %p5376_p11 = por %p5375_p6, %p5374_p5 }
  0x34   : > { %p5372_p10 = pneg %p5371_p9 }
  0x35   : > { %p5378_p1 = por %p5377_p13, %p5376_p11 }
  0x37   : > { %p5379_p2 = pnand %p5378_p1, %p5372_p10 }
  0x39   : > { %5382 = shalt.err (!%p5379_p2)
}
  0x3a   : > { %s5383_s18 = scalar_lea.vmem %s5606_s22, 98304  ;;  %s5469_s29 = smov [#allocation2]  }
  0x3b   : > { %p5384_p0 = scmp.ne.s32.totalorder %s5606_s22, %s5383_s18  ;;  %s5388_s6 = sshll.u32 %s5469_s29, 4  ;;  %s5389_s6 = int_to_ptr.vmem [resolvable:$false] %s5388_s6 }
  0x3c   : > { %s5390_s8 = scalar_lea.vmem %s5389_s6, 196608  ;;  %p5391_p9 = scmp.lt.s32.totalorder %s5606_s22, %s5389_s6 }
  0x3d   : > { %p5386_p3 = pnand %p5384_p0, %p5567_p12  ;;  %p5392_p4 = scmp.lt.s32.totalorder %s5390_s8, %s5383_s18 }
  0x3f   : > { %p5387_p7 = pneg %p5386_p3  ;;  %p5393_p5 = por %p5392_p4, %p5391_p9 }
  0x41   : > { %p5394_p6 = pnand %p5393_p5, %p5387_p7 }
  0x43   : > { %5397 = shalt.err (!%p5394_p6)
}
  0x44   : > { %s5470_s5 = smov 3072   ;;  %s5471_s12 = smov 192  }
  0x45   : > { %5236 = dma.hbm_to_vmem [thread:$0]  (!%p5541_p8), %s5604_s15, 98304, %s5606_s22, %s167_s30, %s5470_s5, %s5470_s5, %s5471_s12  }
  0x46   : > { %s210_s13 = scalar_lea.vmem [#allocation6], %s5223_s28  ;;  %s5398_s10 = scalar_lea.hbm %s5613_s27, 384 }
  0x47   : > { %s218_s14 = sshll.u32 %s210_s13, 4  ;;  %p5399_p4 = scmp.ne.s32.totalorder %s5613_s27, %s5398_s10  ;;  %s219_s14 = int_to_ptr.vmem [resolvable:$true] %s218_s14 }
  0x48   : > { %s5403_s29 = scalar_lea.hbm %s6762_s3, 1536  ;;  %p5404_p13 = scmp.lt.u32.totalorder %s5613_s27, %s6762_s3 }
  0x49   : > { %p5401_p10 = pnand %p5399_p4, %p5567_p12  ;;  %p5405_p1 = scmp.lt.u32.totalorder %s5403_s29, %s5398_s10 }
  0x4a   : > { %p5407_p0 = scmp.lt.u32.totalorder %s5398_s10, %s5613_s27 }
  0x4b   : > { %p5402_p11 = pneg %p5401_p10  ;;  %p5406_p2 = por %p5405_p1, %p5404_p13 }
  0x4d   : > { %p5408_p3 = por %p5407_p0, %p5406_p2 }
  0x4f   : > { %p5409_p7 = pnand %p5408_p3, %p5402_p11 }
  0x51   : > { %5412 = shalt.err (!%p5409_p7)
}
  0x52   : > { %s5413_s25 = scalar_lea.vmem %s219_s14, 384  ;;  %s5472_s28 = smov [#allocation6]  }
  0x53   : > { %p5414_p9 = scmp.ne.s32.totalorder %s219_s14, %s5413_s25  ;;  %s5418_s15 = sshll.u32 %s5472_s28, 4  ;;  %s5419_s15 = int_to_ptr.vmem [resolvable:$false] %s5418_s15 }
  0x54   : > { %s5420_s22 = scalar_lea.vmem %s5419_s15, 768  ;;  %p5421_p4 = scmp.lt.s32.totalorder %s219_s14, %s5419_s15 }
  0x55   : > { %p5416_p5 = pnand %p5414_p9, %p5567_p12  ;;  %p5422_p10 = scmp.lt.s32.totalorder %s5420_s22, %s5413_s25 }
  0x57   : > { %p5417_p6 = pneg %p5416_p5  ;;  %p5423_p8 = por %p5422_p10, %p5421_p4 }
  0x59   : > { %p5424_p1 = pnand %p5423_p8, %p5417_p6 }
  0x5b   : > { %5427 = shalt.err (!%p5424_p1)
}
  0x5c   : > { %p6772_p13 = scmp.ne.s32.totalorder %s6767_s26, 0  ;;  %p6773_p11 = scmp.ne.s32.totalorder %s6771_s7, 0 }
  0x5d   : > { %s5662_s11 = sand.u32 (!%p6773_p11), 1, %s5458_s16   ;;  %p6774_p8 = scmp.ne.s32.totalorder (!%p6773_p11), %s6766_s24, 0 }
  0x5e   : > { %5242 = dma.hbm_to_vmem [thread:$0]  (!%p6772_p13), %s5613_s27, 384, %s219_s14, %s5561_s9  }
  0x5f   : > { %227 = sbr.rel (%p6773_p11) target bundleno = 1877 (0x755), region = 36  ;;  %s230_s5 = scalar_lea.sflag (!%p6773_p11), [#allocation3], %s5662_s11 }
  0x60   : > { %s5225_s30 = smul.u32 (!%p6773_p11), 6144, %s5662_s11 }
  0x62   : > { %s5666_s12 = scalar_lea.vmem (!%p6773_p11), [#allocation2], %s5225_s30 }
  0x66   : > { %5445 = dma.done.wait (%p6774_p8), %s230_s5, 98304  }
  0x67   : > { %5447 = vsyncadd (%p6774_p8), %s230_s5, 4294868992  ;;  %s238_s26 = sand.u32 1, %s5517_s19   ;;  %s5226_s9 = smul.u32 24, %s5662_s11 }
  0x68   : > { %s239_s7 = scalar_lea.sflag [#allocation5], %s238_s26 }
  0x69   : > { %s5676_s27 = scalar_lea.vmem [#allocation4], %s5226_s9 }
  0x6a   : > { %5449 = dma.done.wait (%p6774_p8), %s239_s7, 768  }
  0x6b   : > { %5451 = vsyncadd (%p6774_p8), %s239_s7, 4294966528  ;;  %v295_v0 = vld [vmem:[%s5666_s12 + $0x8] sm:$0xff]  ;;  %v297_v1 = vld [vmem:[%s5666_s12 + $0x18] sm:$0xff]  ;;  %s6017_s8 = scalar_lea.vmem [#allocation6], %s5226_s9  ;;  %s288_s25 = smul.u32 24, %s5517_s19 }
  0x6c   : > { %v294_v2 = vld [vmem:[%s5666_s12] sm:$0xff]  ;;  %v1063_v3 = vunpack.c.l.s8.bf16 %v295_v0  ;;  %v1087_v4 = vunpack.c.h.s8.bf16 %v295_v0  ;;  %v1065_v5 = vunpack.c.l.s8.bf16 %v297_v1  ;;  %v1089_v6 = vunpack.c.h.s8.bf16 %v297_v1  ;;  %v296_v7 = vld [vmem:[%s5666_s12 + $0x10] sm:$0xff]  ;;  %v319_v10 = vld [vmem:[%s5666_s12 + $0xc8] sm:$0xff] }
  0x6d   : > { %v1062_v8 = vunpack.c.l.s8.bf16 %v294_v2  ;;  %v1064_v9 = vunpack.c.l.s8.bf16 %v296_v7  ;;  %v321_v11 = vld [vmem:[%s5666_s12 + $0xd8] sm:$0xff]  ;;  %v1086_v12 = vunpack.c.h.s8.bf16 %v294_v2  ;;  %v1088_v13 = vunpack.c.h.s8.bf16 %v296_v7  ;;  %v318_v16 = vld [vmem:[%s5666_s12 + $0xc0] sm:$0xff]  ;;  %v320_v17 = vld [vmem:[%s5666_s12 + $0xd0] sm:$0xff]  ;;  %p6035_p12 = scmp.lt.s32.totalorder %s288_s25, 95 }
  0x6e   : > { %2630 = vmatprep.subr.bf16.mxu0 %v1063_v3  ;;  %2794 = vmatprep.subr.bf16.mxu1 %v1065_v5  ;;  %v1111_v14 = vunpack.c.l.s8.bf16 %v319_v10  ;;  %v1113_v15 = vunpack.c.l.s8.bf16 %v321_v11  ;;  %v1110_v18 = vunpack.c.l.s8.bf16 %v318_v16  ;;  %v1112_v19 = vunpack.c.l.s8.bf16 %v320_v17  ;;  %v343_v22 = vld [vmem:[%s5666_s12 + $0x188] sm:$0xff]  ;;  %v345_v23 = vld [vmem:[%s5666_s12 + $0x198] sm:$0xff]  ;;  %v342_v28 = vld [vmem:[%s5666_s12 + $0x180] sm:$0xff] }
  0x6f   : > { %2631 = vmatpush1.bf16.msra.mxu0 %v1062_v8  ;;  %2795 = vmatpush1.bf16.msra.mxu1 %v1064_v9  ;;  %v1135_v20 = vunpack.c.h.s8.bf16 %v319_v10  ;;  %v1137_v21 = vunpack.c.h.s8.bf16 %v321_v11  ;;  %v1134_v24 = vunpack.c.h.s8.bf16 %v318_v16  ;;  %v1136_v25 = vunpack.c.h.s8.bf16 %v320_v17  ;;  %v344_v29 = vld [vmem:[%s5666_s12 + $0x190] sm:$0xff]  ;;  %v5697_v30 = vld [vmem:[%s6759_s0] sm:$0xff]  ;;  %v367_v36 = vld [vmem:[%s5666_s12 + $0x248] sm:$0xff]  ;;  %s6781_s25 = smov (!%p6035_p12, %s288_s25), 95 }
  0x70   : > { %2632 = vmatprep.subr.bf16.mxu0 %v1087_v4  ;;  %2796 = vmatprep.subr.bf16.mxu1 %v1089_v6  ;;  %v1159_v26 = vunpack.c.l.s8.bf16 %v343_v22  ;;  %v1161_v27 = vunpack.c.l.s8.bf16 %v345_v23  ;;  %v1158_v31 = vunpack.c.l.s8.bf16 %v342_v28  ;;  %v1160_v32 = vunpack.c.l.s8.bf16 %v344_v29  ;;  %v369_v37 = vld [vmem:[%s5666_s12 + $0x258] sm:$0xff]  ;;  %v366_v42 = vld [vmem:[%s5666_s12 + $0x240] sm:$0xff]  ;;  %v368_v43 = vld [vmem:[%s5666_s12 + $0x250] sm:$0xff]  ;;  %s5064_s15 = sshll.u32 %s6781_s25, 3 }
  0x71   : > { %v1183_v33 = vunpack.c.h.s8.bf16 %v343_v22  ;;  %v1185_v34 = vunpack.c.h.s8.bf16 %v345_v23  ;;  %v5701_v35 = vcombine.high %v5697_v30, %v5697_v30  ;;  %v1182_v38 = vunpack.c.h.s8.bf16 %v342_v28  ;;  %v391_v48 = vld [vmem:[%s5666_s12 + $0x308] sm:$0xff]  ;;  %v393_v49 = vld [vmem:[%s5666_s12 + $0x318] sm:$0xff]  ;;  %v390_v54 = vld [vmem:[%s5666_s12 + $0x300] sm:$0xff]  ;;  %s6052_s11 = scalar_lea.vmem %s6763_s4, %s5064_s15 }
  0x72   : > { %v1184_v39 = vunpack.c.h.s8.bf16 %v344_v29  ;;  %v1207_v40 = vunpack.c.l.s8.bf16 %v367_v36  ;;  %v1209_v41 = vunpack.c.l.s8.bf16 %v369_v37  ;;  %v1206_v44 = vunpack.c.l.s8.bf16 %v366_v42  ;;  %v392_v55 = vld [vmem:[%s5666_s12 + $0x310] sm:$0xff]  ;;  %v415_v60 = vld [vmem:[%s5666_s12 + $0x3c8] sm:$0xff]  ;;  %v417_v61 = vld [vmem:[%s5666_s12 + $0x3d8] sm:$0xff] }
  0x73   : > { %2633 = vmatpush1.bf16.msra.mxu0 %v1086_v12  ;;  %2797 = vmatpush1.bf16.msra.mxu1 %v1088_v13  ;;  %v1208_v45 = vunpack.c.l.s8.bf16 %v368_v43  ;;  %v1231_v46 = vunpack.c.h.s8.bf16 %v367_v36  ;;  %v1233_v47 = vunpack.c.h.s8.bf16 %v369_v37  ;;  %v1230_v50 = vunpack.c.h.s8.bf16 %v366_v42  ;;  %v414_v2 = vld [vmem:[%s5666_s12 + $0x3c0] sm:$0xff]  ;;  %v416_v3 = vld [vmem:[%s5666_s12 + $0x3d0] sm:$0xff]  ;;  %v439_v8 = vld [vmem:[%s5666_s12 + $0x488] sm:$0xff] }
  0x74   : > { %2634 = vmatprep.subr.bf16.mxu0 %v1111_v14  ;;  %2798 = vmatprep.subr.bf16.mxu1 %v1113_v15  ;;  %v1232_v51 = vunpack.c.h.s8.bf16 %v368_v43  ;;  %v1255_v52 = vunpack.c.l.s8.bf16 %v391_v48  ;;  %v1257_v53 = vunpack.c.l.s8.bf16 %v393_v49  ;;  %v1254_v56 = vunpack.c.l.s8.bf16 %v390_v54  ;;  %v441_v9 = vld [vmem:[%s5666_s12 + $0x498] sm:$0xff]  ;;  %v438_v14 = vld [vmem:[%s5666_s12 + $0x480] sm:$0xff]  ;;  %v440_v15 = vld [vmem:[%s5666_s12 + $0x490] sm:$0xff] }
  0x75   : > { %2662 = vmatprep.mubr.bf16.mxu0 %v5701_v35  ;;  %2826 = vmatprep.mubr.bf16.mxu1 %v5701_v35  ;;  %v1256_v57 = vunpack.c.l.s8.bf16 %v392_v55  ;;  %v1279_v58 = vunpack.c.h.s8.bf16 %v391_v48  ;;  %v1281_v59 = vunpack.c.h.s8.bf16 %v393_v49  ;;  %v1278_v62 = vunpack.c.h.s8.bf16 %v390_v54  ;;  %v5736_v43 = vld [vmem:[%s6759_s0 + $0x8] sm:$0xff]  ;;  %v513_v49 = vld [vmem:[%s5666_s12 + $0x6d8] sm:$0xff]  ;;  %v510_v54 = vld [vmem:[%s5666_s12 + $0x6c0] sm:$0xff] }
  0x76   : > { %v1280_v63 = vunpack.c.h.s8.bf16 %v392_v55  ;;  %v1303_v0 = vunpack.c.l.s8.bf16 %v415_v60  ;;  %v1305_v1 = vunpack.c.l.s8.bf16 %v417_v61  ;;  %v1302_v4 = vunpack.c.l.s8.bf16 %v414_v2  ;;  %v511_v48 = vld [vmem:[%s5666_s12 + $0x6c8] sm:$0xff]  ;;  %v512_v55 = vld [vmem:[%s5666_s12 + $0x6d0] sm:$0xff] }
  0x77   : > { %2635 = vmatpush1.bf16.msra.mxu0 %v1110_v18  ;;  %2799 = vmatpush1.bf16.msra.mxu1 %v1112_v19  ;;  %v1304_v5 = vunpack.c.l.s8.bf16 %v416_v3  ;;  %v1327_v6 = vunpack.c.h.s8.bf16 %v415_v60  ;;  %v1329_v7 = vunpack.c.h.s8.bf16 %v417_v61  ;;  %v1326_v10 = vunpack.c.h.s8.bf16 %v414_v2  ;;  %v535_v60 = vld [vmem:[%s5666_s12 + $0x788] sm:$0xff]  ;;  %v537_v61 = vld [vmem:[%s5666_s12 + $0x798] sm:$0xff]  ;;  %v534_v2 = vld [vmem:[%s5666_s12 + $0x780] sm:$0xff] }
  0x78   : > { %2636 = vmatprep.subr.bf16.mxu0 %v1135_v20  ;;  %2800 = vmatprep.subr.bf16.mxu1 %v1137_v21  ;;  %v1328_v11 = vunpack.c.h.s8.bf16 %v416_v3  ;;  %v1351_v12 = vunpack.c.l.s8.bf16 %v439_v8  ;;  %v1353_v13 = vunpack.c.l.s8.bf16 %v441_v9  ;;  %v1350_v16 = vunpack.c.l.s8.bf16 %v438_v14  ;;  %v463_v20 = vld [vmem:[%s5666_s12 + $0x548] sm:$0xff]  ;;  %v465_v21 = vld [vmem:[%s5666_s12 + $0x558] sm:$0xff]  ;;  %v536_v3 = vld [vmem:[%s5666_s12 + $0x790] sm:$0xff] }
  0x79   : > { %v1352_v17 = vunpack.c.l.s8.bf16 %v440_v15  ;;  %v1375_v18 = vunpack.c.h.s8.bf16 %v439_v8  ;;  %v1377_v19 = vunpack.c.h.s8.bf16 %v441_v9  ;;  %v1374_v22 = vunpack.c.h.s8.bf16 %v438_v14  ;;  %v559_v8 = vld [vmem:[%s5666_s12 + $0x848] sm:$0xff]  ;;  %v561_v9 = vld [vmem:[%s5666_s12 + $0x858] sm:$0xff]  ;;  %v558_v14 = vld [vmem:[%s5666_s12 + $0x840] sm:$0xff] }
  0x7a   : > { %v1376_v23 = vunpack.c.h.s8.bf16 %v440_v15  ;;  %v5731_v42 = vcombine.low %v5697_v30, %v5697_v30  ;;  %v5742_v30 = vcombine.high %v5736_v43, %v5736_v43  ;;  %v560_v15 = vld [vmem:[%s5666_s12 + $0x850] sm:$0xff] }
  0x7b   : > { %2637 = vmatpush1.bf16.msra.mxu0 %v1134_v24  ;;  %2801 = vmatpush1.bf16.msra.mxu1 %v1136_v25  ;;  %v1399_v24 = vunpack.c.l.s8.bf16 %v463_v20  ;;  %v1401_v25 = vunpack.c.l.s8.bf16 %v465_v21 }
  0x7c   : > { %2638 = vmatprep.subr.bf16.mxu0 %v1159_v26  ;;  %2802 = vmatprep.subr.bf16.mxu1 %v1161_v27  ;;  %v462_v26 = vld [vmem:[%s5666_s12 + $0x540] sm:$0xff]  ;;  %v464_v27 = vld [vmem:[%s5666_s12 + $0x550] sm:$0xff] }
  0x7d   : > { %v1398_v28 = vunpack.c.l.s8.bf16 %v462_v26  ;;  %v1400_v29 = vunpack.c.l.s8.bf16 %v464_v27  ;;  %v1422_v36 = vunpack.c.h.s8.bf16 %v462_v26  ;;  %v1424_v37 = vunpack.c.h.s8.bf16 %v464_v27  ;;  %v582_v26 = vld [vmem:[%s5666_s12 + $0x900] sm:$0xff]  ;;  %v584_v27 = vld [vmem:[%s5666_s12 + $0x910] sm:$0xff] }
  0x7f   : > { %2639 = vmatpush1.bf16.msra.mxu0 %v1158_v31  ;;  %2803 = vmatpush1.bf16.msra.mxu1 %v1160_v32  ;;  %v1423_v31 = vunpack.c.h.s8.bf16 %v463_v20  ;;  %v1425_v32 = vunpack.c.h.s8.bf16 %v465_v21  ;;  %v583_v20 = vld [vmem:[%s5666_s12 + $0x908] sm:$0xff]  ;;  %v585_v21 = vld [vmem:[%s5666_s12 + $0x918] sm:$0xff] }
  0x80   : > { %2640 = vmatprep.subr.bf16.mxu0 %v1183_v33  ;;  %2804 = vmatprep.subr.bf16.mxu1 %v1185_v34  ;;  %v487_v33 = vld [vmem:[%s5666_s12 + $0x608] sm:$0xff]  ;;  %v489_v34 = vld [vmem:[%s5666_s12 + $0x618] sm:$0xff] }
  0x83   : > { %2641 = vmatpush1.bf16.msra.mxu0 %v1182_v38  ;;  %2805 = vmatpush1.bf16.msra.mxu1 %v1184_v39  ;;  %v1447_v38 = vunpack.c.l.s8.bf16 %v487_v33  ;;  %v1449_v39 = vunpack.c.l.s8.bf16 %v489_v34 }
  0x84   : > { %2642 = vmatprep.subr.bf16.mxu0 %v1207_v40  ;;  %2806 = vmatprep.subr.bf16.mxu1 %v1209_v41  ;;  %v486_v40 = vld [vmem:[%s5666_s12 + $0x600] sm:$0xff]  ;;  %v488_v41 = vld [vmem:[%s5666_s12 + $0x610] sm:$0xff] }
  0x87   : > { %2643 = vmatpush1.bf16.msra.mxu0 %v1206_v44  ;;  %2807 = vmatpush1.bf16.msra.mxu1 %v1208_v45  ;;  %v1446_v44 = vunpack.c.l.s8.bf16 %v486_v40  ;;  %v1448_v45 = vunpack.c.l.s8.bf16 %v488_v41 }
  0x88   : > { %2644 = vmatprep.subr.bf16.mxu0 %v1231_v46  ;;  %2808 = vmatprep.subr.bf16.mxu1 %v1233_v47  ;;  %v1471_v46 = vunpack.c.h.s8.bf16 %v487_v33  ;;  %v1473_v47 = vunpack.c.h.s8.bf16 %v489_v34  ;;  %v607_v33 = vld [vmem:[%s5666_s12 + $0x9c8] sm:$0xff]  ;;  %v609_v34 = vld [vmem:[%s5666_s12 + $0x9d8] sm:$0xff] }
  0x8b   : > { %2645 = vmatpush1.bf16.msra.mxu0 %v1230_v50  ;;  %2809 = vmatpush1.bf16.msra.mxu1 %v1232_v51  ;;  %v1470_v50 = vunpack.c.h.s8.bf16 %v486_v40  ;;  %v1472_v51 = vunpack.c.h.s8.bf16 %v488_v41  ;;  %v606_v40 = vld [vmem:[%s5666_s12 + $0x9c0] sm:$0xff]  ;;  %v608_v41 = vld [vmem:[%s5666_s12 + $0x9d0] sm:$0xff] }
  0x8c   : > { %2646 = vmatprep.subr.bf16.mxu0 %v1255_v52  ;;  %2810 = vmatprep.subr.bf16.mxu1 %v1257_v53  ;;  %v1495_v52 = vunpack.c.l.s8.bf16 %v511_v48  ;;  %v1497_v53 = vunpack.c.l.s8.bf16 %v513_v49 }
  0x8f   : > { %2647 = vmatpush1.bf16.msra.mxu0 %v1254_v56  ;;  %2811 = vmatpush1.bf16.msra.mxu1 %v1256_v57  ;;  %v1494_v56 = vunpack.c.l.s8.bf16 %v510_v54  ;;  %v1496_v57 = vunpack.c.l.s8.bf16 %v512_v55 }
  0x90   : > { %2648 = vmatprep.subr.bf16.mxu0 %v1279_v58  ;;  %2812 = vmatprep.subr.bf16.mxu1 %v1281_v59  ;;  %v1519_v58 = vunpack.c.h.s8.bf16 %v511_v48  ;;  %v1521_v59 = vunpack.c.h.s8.bf16 %v513_v49  ;;  %v631_v48 = vld [vmem:[%s5666_s12 + $0xa88] sm:$0xff]  ;;  %v633_v49 = vld [vmem:[%s5666_s12 + $0xa98] sm:$0xff] }
  0x93   : > { %2649 = vmatpush1.bf16.msra.mxu0 %v1278_v62  ;;  %2813 = vmatpush1.bf16.msra.mxu1 %v1280_v63  ;;  %v1518_v62 = vunpack.c.h.s8.bf16 %v510_v54  ;;  %v1520_v63 = vunpack.c.h.s8.bf16 %v512_v55  ;;  %v630_v54 = vld [vmem:[%s5666_s12 + $0xa80] sm:$0xff]  ;;  %v632_v55 = vld [vmem:[%s5666_s12 + $0xa90] sm:$0xff] }
  0x94   : > { %2650 = vmatprep.subr.bf16.mxu0 %v1303_v0  ;;  %2814 = vmatprep.subr.bf16.mxu1 %v1305_v1  ;;  %v1543_v0 = vunpack.c.l.s8.bf16 %v535_v60  ;;  %v1545_v1 = vunpack.c.l.s8.bf16 %v537_v61 }
  0x97   : > { %2651 = vmatpush1.bf16.msra.mxu0 %v1302_v4  ;;  %2815 = vmatpush1.bf16.msra.mxu1 %v1304_v5  ;;  %v1542_v4 = vunpack.c.l.s8.bf16 %v534_v2  ;;  %v1544_v5 = vunpack.c.l.s8.bf16 %v536_v3 }
  0x98   : > { %2652 = vmatprep.subr.bf16.mxu0 %v1327_v6  ;;  %2816 = vmatprep.subr.bf16.mxu1 %v1329_v7  ;;  %v1567_v6 = vunpack.c.h.s8.bf16 %v535_v60  ;;  %v1569_v7 = vunpack.c.h.s8.bf16 %v537_v61  ;;  %v655_v60 = vld [vmem:[%s5666_s12 + $0xb48] sm:$0xff]  ;;  %v657_v61 = vld [vmem:[%s5666_s12 + $0xb58] sm:$0xff] }
  0x9b   : > { %2653 = vmatpush1.bf16.msra.mxu0 %v1326_v10  ;;  %2817 = vmatpush1.bf16.msra.mxu1 %v1328_v11  ;;  %v1566_v10 = vunpack.c.h.s8.bf16 %v534_v2  ;;  %v1568_v11 = vunpack.c.h.s8.bf16 %v536_v3  ;;  %v654_v2 = vld [vmem:[%s5666_s12 + $0xb40] sm:$0xff]  ;;  %v656_v3 = vld [vmem:[%s5666_s12 + $0xb50] sm:$0xff] }
  0x9c   : > { %2654 = vmatprep.subr.bf16.mxu0 %v1351_v12  ;;  %2818 = vmatprep.subr.bf16.mxu1 %v1353_v13  ;;  %v1591_v12 = vunpack.c.l.s8.bf16 %v559_v8  ;;  %v1593_v13 = vunpack.c.l.s8.bf16 %v561_v9 }
  0x9f   : > { %2655 = vmatpush1.bf16.msra.mxu0 %v1350_v16  ;;  %2819 = vmatpush1.bf16.msra.mxu1 %v1352_v17  ;;  %v1590_v16 = vunpack.c.l.s8.bf16 %v558_v14  ;;  %v1592_v17 = vunpack.c.l.s8.bf16 %v560_v15 }
  0xa0   : > { %2656 = vmatprep.subr.bf16.mxu0 %v1375_v18  ;;  %2820 = vmatprep.subr.bf16.mxu1 %v1377_v19  ;;  %v1615_v18 = vunpack.c.h.s8.bf16 %v559_v8  ;;  %v1617_v19 = vunpack.c.h.s8.bf16 %v561_v9  ;;  %v679_v8 = vld [vmem:[%s5666_s12 + $0xc08] sm:$0xff]  ;;  %v681_v9 = vld [vmem:[%s5666_s12 + $0xc18] sm:$0xff] }
  0xa3   : > { %2657 = vmatpush1.bf16.msra.mxu0 %v1374_v22  ;;  %2821 = vmatpush1.bf16.msra.mxu1 %v1376_v23  ;;  %v1614_v22 = vunpack.c.h.s8.bf16 %v558_v14  ;;  %v1616_v23 = vunpack.c.h.s8.bf16 %v560_v15  ;;  %v678_v14 = vld [vmem:[%s5666_s12 + $0xc00] sm:$0xff]  ;;  %v680_v15 = vld [vmem:[%s5666_s12 + $0xc10] sm:$0xff] }
  0xa4   : > { %2658 = vmatprep.subr.bf16.mxu0 %v1399_v24  ;;  %2822 = vmatprep.subr.bf16.mxu1 %v1401_v25  ;;  %v1639_v24 = vunpack.c.l.s8.bf16 %v583_v20  ;;  %v1641_v25 = vunpack.c.l.s8.bf16 %v585_v21 }
  0xa7   : > { %2659 = vmatpush1.bf16.msra.mxu0 %v1398_v28  ;;  %2823 = vmatpush1.bf16.msra.mxu1 %v1400_v29  ;;  %v1638_v28 = vunpack.c.l.s8.bf16 %v582_v26  ;;  %v1640_v29 = vunpack.c.l.s8.bf16 %v584_v27 }
  0xa8   : > { %2660 = vmatprep.subr.bf16.mxu0 %v1423_v31  ;;  %2824 = vmatprep.subr.bf16.mxu1 %v1425_v32  ;;  %v1663_v31 = vunpack.c.h.s8.bf16 %v583_v20  ;;  %v1665_v32 = vunpack.c.h.s8.bf16 %v585_v21  ;;  %v1855_v20 = vunpack.c.h.s8.bf16 %v679_v8  ;;  %v1857_v21 = vunpack.c.h.s8.bf16 %v681_v9 }
  0xab   : > { %2661 = vmatpush1.bf16.msra.mxu0 %v1422_v36  ;;  %2825 = vmatpush1.bf16.msra.mxu1 %v1424_v37  ;;  %v1662_v36 = vunpack.c.h.s8.bf16 %v582_v26  ;;  %v1664_v37 = vunpack.c.h.s8.bf16 %v584_v27 }
  0xac   : > { %2671 = vmatprep.subr.bf16.mxu0 %v1447_v38  ;;  %2835 = vmatprep.subr.bf16.mxu1 %v1449_v39  ;;  %v1687_v38 = vunpack.c.l.s8.bf16 %v607_v33  ;;  %v1689_v39 = vunpack.c.l.s8.bf16 %v609_v34 }
  0xae   : > { %2663 = vmatmul.mubr.bf16.vlgmr.msra.gmra.mrb[0].mxu0 %v5731_v42  ;;  %2827 = vmatmul.mubr.bf16.vlgmr.msra.gmra.mrb[0].mxu1 %v5731_v42 }
  0xaf   : > { %2672 = vmatpush1.bf16.msra.mxu0 %v1446_v44  ;;  %2836 = vmatpush1.bf16.msra.mxu1 %v1448_v45  ;;  %v1686_v44 = vunpack.c.l.s8.bf16 %v606_v40  ;;  %v1688_v45 = vunpack.c.l.s8.bf16 %v608_v41 }
  0xb0   : > { %2673 = vmatprep.subr.bf16.mxu0 %v1471_v46  ;;  %2837 = vmatprep.subr.bf16.mxu1 %v1473_v47  ;;  %v1711_v46 = vunpack.c.h.s8.bf16 %v607_v33  ;;  %v1713_v47 = vunpack.c.h.s8.bf16 %v609_v34 }
  0xb1   : > { %2703 = vmatprep.mubr.bf16.mxu0 %v5742_v30  ;;  %2867 = vmatprep.mubr.bf16.mxu1 %v5742_v30 }
  0xb3   : > { %2674 = vmatpush1.bf16.msra.mxu0 %v1470_v50  ;;  %2838 = vmatpush1.bf16.msra.mxu1 %v1472_v51  ;;  %v1710_v50 = vunpack.c.h.s8.bf16 %v606_v40  ;;  %v1712_v51 = vunpack.c.h.s8.bf16 %v608_v41 }
  0xb4   : > { %2675 = vmatprep.subr.bf16.mxu0 %v1495_v52  ;;  %2839 = vmatprep.subr.bf16.mxu1 %v1497_v53  ;;  %v1735_v52 = vunpack.c.l.s8.bf16 %v631_v48  ;;  %v1737_v53 = vunpack.c.l.s8.bf16 %v633_v49 }
  0xb7   : > { %2676 = vmatpush1.bf16.msra.mxu0 %v1494_v56  ;;  %2840 = vmatpush1.bf16.msra.mxu1 %v1496_v57  ;;  %v1734_v56 = vunpack.c.l.s8.bf16 %v630_v54  ;;  %v1736_v57 = vunpack.c.l.s8.bf16 %v632_v55 }
  0xb8   : > { %2677 = vmatprep.subr.bf16.mxu0 %v1519_v58  ;;  %2841 = vmatprep.subr.bf16.mxu1 %v1521_v59  ;;  %v1759_v58 = vunpack.c.h.s8.bf16 %v631_v48  ;;  %v1761_v59 = vunpack.c.h.s8.bf16 %v633_v49 }
  0xbb   : > { %2678 = vmatpush1.bf16.msra.mxu0 %v1518_v62  ;;  %2842 = vmatpush1.bf16.msra.mxu1 %v1520_v63  ;;  %v1758_v62 = vunpack.c.h.s8.bf16 %v630_v54  ;;  %v1760_v63 = vunpack.c.h.s8.bf16 %v632_v55 }
  0xbc   : > { %2679 = vmatprep.subr.bf16.mxu0 %v1543_v0  ;;  %2843 = vmatprep.subr.bf16.mxu1 %v1545_v1  ;;  %v1783_v0 = vunpack.c.l.s8.bf16 %v655_v60  ;;  %v1785_v1 = vunpack.c.l.s8.bf16 %v657_v61 }
  0xbf   : > { %2680 = vmatpush1.bf16.msra.mxu0 %v1542_v4  ;;  %2844 = vmatpush1.bf16.msra.mxu1 %v1544_v5  ;;  %v1782_v4 = vunpack.c.l.s8.bf16 %v654_v2  ;;  %v1784_v5 = vunpack.c.l.s8.bf16 %v656_v3 }
  0xc0   : > { %2681 = vmatprep.subr.bf16.mxu0 %v1567_v6  ;;  %2845 = vmatprep.subr.bf16.mxu1 %v1569_v7  ;;  %v1807_v6 = vunpack.c.h.s8.bf16 %v655_v60  ;;  %v1809_v7 = vunpack.c.h.s8.bf16 %v657_v61 }
  0xc3   : > { %2682 = vmatpush1.bf16.msra.mxu0 %v1566_v10  ;;  %2846 = vmatpush1.bf16.msra.mxu1 %v1568_v11  ;;  %v1806_v10 = vunpack.c.h.s8.bf16 %v654_v2  ;;  %v1808_v11 = vunpack.c.h.s8.bf16 %v656_v3 }
  0xc4   : > { %2683 = vmatprep.subr.bf16.mxu0 %v1591_v12  ;;  %2847 = vmatprep.subr.bf16.mxu1 %v1593_v13  ;;  %v1831_v12 = vunpack.c.l.s8.bf16 %v679_v8  ;;  %v1833_v13 = vunpack.c.l.s8.bf16 %v681_v9 }
  0xc7   : > { %2684 = vmatpush1.bf16.msra.mxu0 %v1590_v16  ;;  %2848 = vmatpush1.bf16.msra.mxu1 %v1592_v17  ;;  %v5780_v16 = vcombine.low %v5736_v43, %v5736_v43  ;;  %v5785_v17 = vld [vmem:[%s6759_s0 + $0x10] sm:$0xff] }
  0xc8   : > { %2685 = vmatprep.subr.bf16.mxu0 %v1615_v18  ;;  %2849 = vmatprep.subr.bf16.mxu1 %v1617_v19  ;;  %v1830_v18 = vunpack.c.l.s8.bf16 %v678_v14  ;;  %v1832_v19 = vunpack.c.l.s8.bf16 %v680_v15  ;;  %v5791_v43 = vcombine.high %v5785_v17, %v5785_v17 }
  0xcb   : > { %2686 = vmatpush1.bf16.msra.mxu0 %v1614_v22  ;;  %2850 = vmatpush1.bf16.msra.mxu1 %v1616_v23  ;;  %v703_v22 = vld [vmem:[%s5666_s12 + $0xcc8] sm:$0xff]  ;;  %v705_v23 = vld [vmem:[%s5666_s12 + $0xcd8] sm:$0xff] }
  0xcc   : > { %2687 = vmatprep.subr.bf16.mxu0 %v1639_v24  ;;  %2851 = vmatprep.subr.bf16.mxu1 %v1641_v25  ;;  %v1854_v24 = vunpack.c.h.s8.bf16 %v678_v14  ;;  %v1856_v25 = vunpack.c.h.s8.bf16 %v680_v15  ;;  %v1879_v26 = vunpack.c.l.s8.bf16 %v703_v22  ;;  %v1881_v27 = vunpack.c.l.s8.bf16 %v705_v23 }
  0xcd   : > { %v1903_v33 = vunpack.c.h.s8.bf16 %v703_v22  ;;  %v1905_v34 = vunpack.c.h.s8.bf16 %v705_v23 }
  0xcf   : > { %2688 = vmatpush1.bf16.msra.mxu0 %v1638_v28  ;;  %2852 = vmatpush1.bf16.msra.mxu1 %v1640_v29  ;;  %v702_v28 = vld [vmem:[%s5666_s12 + $0xcc0] sm:$0xff]  ;;  %v704_v29 = vld [vmem:[%s5666_s12 + $0xcd0] sm:$0xff] }
  0xd0   : > { %2689 = vmatprep.subr.bf16.mxu0 %v1663_v31  ;;  %2853 = vmatprep.subr.bf16.mxu1 %v1665_v32  ;;  %v1878_v31 = vunpack.c.l.s8.bf16 %v702_v28  ;;  %v1880_v32 = vunpack.c.l.s8.bf16 %v704_v29 }
  0xd3   : > { %2690 = vmatpush1.bf16.msra.mxu0 %v1662_v36  ;;  %2854 = vmatpush1.bf16.msra.mxu1 %v1664_v37  ;;  %v727_v36 = vld [vmem:[%s5666_s12 + $0xd88] sm:$0xff]  ;;  %v729_v37 = vld [vmem:[%s5666_s12 + $0xd98] sm:$0xff] }
  0xd4   : > { %2691 = vmatprep.subr.bf16.mxu0 %v1687_v38  ;;  %2855 = vmatprep.subr.bf16.mxu1 %v1689_v39  ;;  %v1902_v38 = vunpack.c.h.s8.bf16 %v702_v28  ;;  %v1904_v39 = vunpack.c.h.s8.bf16 %v704_v29  ;;  %v1927_v40 = vunpack.c.l.s8.bf16 %v727_v36  ;;  %v1929_v41 = vunpack.c.l.s8.bf16 %v729_v37 }
  0xd5   : > { %v1951_v48 = vunpack.c.h.s8.bf16 %v727_v36  ;;  %v1953_v49 = vunpack.c.h.s8.bf16 %v729_v37 }
  0xd7   : > { %2692 = vmatpush1.bf16.msra.mxu0 %v1686_v44  ;;  %2856 = vmatpush1.bf16.msra.mxu1 %v1688_v45  ;;  %v726_v44 = vld [vmem:[%s5666_s12 + $0xd80] sm:$0xff]  ;;  %v728_v45 = vld [vmem:[%s5666_s12 + $0xd90] sm:$0xff] }
  0xd8   : > { %2693 = vmatprep.subr.bf16.mxu0 %v1711_v46  ;;  %2857 = vmatprep.subr.bf16.mxu1 %v1713_v47  ;;  %v1926_v46 = vunpack.c.l.s8.bf16 %v726_v44  ;;  %v1928_v47 = vunpack.c.l.s8.bf16 %v728_v45 }
  0xdb   : > { %2694 = vmatpush1.bf16.msra.mxu0 %v1710_v50  ;;  %2858 = vmatpush1.bf16.msra.mxu1 %v1712_v51  ;;  %v751_v50 = vld [vmem:[%s5666_s12 + $0xe48] sm:$0xff]  ;;  %v753_v51 = vld [vmem:[%s5666_s12 + $0xe58] sm:$0xff] }
  0xdc   : > { %2695 = vmatprep.subr.bf16.mxu0 %v1735_v52  ;;  %2859 = vmatprep.subr.bf16.mxu1 %v1737_v53  ;;  %v1950_v52 = vunpack.c.h.s8.bf16 %v726_v44  ;;  %v1952_v53 = vunpack.c.h.s8.bf16 %v728_v45  ;;  %v1975_v54 = vunpack.c.l.s8.bf16 %v751_v50  ;;  %v1977_v55 = vunpack.c.l.s8.bf16 %v753_v51 }
  0xdd   : > { %v1999_v60 = vunpack.c.h.s8.bf16 %v751_v50  ;;  %v2001_v61 = vunpack.c.h.s8.bf16 %v753_v51 }
  0xdf   : > { %2696 = vmatpush1.bf16.msra.mxu0 %v1734_v56  ;;  %2860 = vmatpush1.bf16.msra.mxu1 %v1736_v57  ;;  %v750_v56 = vld [vmem:[%s5666_s12 + $0xe40] sm:$0xff]  ;;  %v752_v57 = vld [vmem:[%s5666_s12 + $0xe50] sm:$0xff] }
  0xe0   : > { %2697 = vmatprep.subr.bf16.mxu0 %v1759_v58  ;;  %2861 = vmatprep.subr.bf16.mxu1 %v1761_v59  ;;  %v1974_v58 = vunpack.c.l.s8.bf16 %v750_v56  ;;  %v1976_v59 = vunpack.c.l.s8.bf16 %v752_v57 }
  0xe3   : > { %2698 = vmatpush1.bf16.msra.mxu0 %v1758_v62  ;;  %2862 = vmatpush1.bf16.msra.mxu1 %v1760_v63  ;;  %v775_v62 = vld [vmem:[%s5666_s12 + $0xf08] sm:$0xff]  ;;  %v777_v63 = vld [vmem:[%s5666_s12 + $0xf18] sm:$0xff] }
  0xe4   : > { %2699 = vmatprep.subr.bf16.mxu0 %v1783_v0  ;;  %2863 = vmatprep.subr.bf16.mxu1 %v1785_v1  ;;  %v1998_v0 = vunpack.c.h.s8.bf16 %v750_v56  ;;  %v2000_v1 = vunpack.c.h.s8.bf16 %v752_v57  ;;  %v2023_v2 = vunpack.c.l.s8.bf16 %v775_v62  ;;  %v2025_v3 = vunpack.c.l.s8.bf16 %v777_v63 }
  0xe5   : > { %v2047_v8 = vunpack.c.h.s8.bf16 %v775_v62  ;;  %v2049_v9 = vunpack.c.h.s8.bf16 %v777_v63 }
  0xe7   : > { %2700 = vmatpush1.bf16.msra.mxu0 %v1782_v4  ;;  %2864 = vmatpush1.bf16.msra.mxu1 %v1784_v5  ;;  %v774_v4 = vld [vmem:[%s5666_s12 + $0xf00] sm:$0xff]  ;;  %v776_v5 = vld [vmem:[%s5666_s12 + $0xf10] sm:$0xff] }
  0xe8   : > { %2701 = vmatprep.subr.bf16.mxu0 %v1807_v6  ;;  %2865 = vmatprep.subr.bf16.mxu1 %v1809_v7  ;;  %v2022_v6 = vunpack.c.l.s8.bf16 %v774_v4  ;;  %v2024_v7 = vunpack.c.l.s8.bf16 %v776_v5 }
  0xeb   : > { %2702 = vmatpush1.bf16.msra.mxu0 %v1806_v10  ;;  %2866 = vmatpush1.bf16.msra.mxu1 %v1808_v11  ;;  %v799_v10 = vld [vmem:[%s5666_s12 + $0xfc8] sm:$0xff]  ;;  %v801_v11 = vld [vmem:[%s5666_s12 + $0xfd8] sm:$0xff] }
  0xec   : > { %2712 = vmatprep.subr.bf16.mxu0 %v1831_v12  ;;  %2876 = vmatprep.subr.bf16.mxu1 %v1833_v13  ;;  %v2046_v12 = vunpack.c.h.s8.bf16 %v774_v4  ;;  %v2048_v13 = vunpack.c.h.s8.bf16 %v776_v5  ;;  %v2071_v14 = vunpack.c.l.s8.bf16 %v799_v10  ;;  %v2073_v15 = vunpack.c.l.s8.bf16 %v801_v11 }
  0xed   : > { %v2095_v22 = vunpack.c.h.s8.bf16 %v799_v10  ;;  %v2097_v23 = vunpack.c.h.s8.bf16 %v801_v11 }
  0xee   : > { %2704 = vmatmul.mubr.bf16.vlgmr.msra.gmra.mrb[0].mxu0 %v5780_v16  ;;  %2868 = vmatmul.mubr.bf16.vlgmr.msra.gmra.mrb[0].mxu1 %v5780_v16 }
  0xef   : > { %2713 = vmatpush1.bf16.msra.mxu0 %v1830_v18  ;;  %2877 = vmatpush1.bf16.msra.mxu1 %v1832_v19  ;;  %v798_v18 = vld [vmem:[%s5666_s12 + $0xfc0] sm:$0xff]  ;;  %v800_v19 = vld [vmem:[%s5666_s12 + $0xfd0] sm:$0xff] }
  0xf0   : > { %2714 = vmatprep.subr.bf16.mxu0 %v1855_v20  ;;  %2878 = vmatprep.subr.bf16.mxu1 %v1857_v21  ;;  %v2070_v20 = vunpack.c.l.s8.bf16 %v798_v18  ;;  %v2072_v21 = vunpack.c.l.s8.bf16 %v800_v19 }
  0xf1   : > { %2744 = vmatprep.mubr.bf16.mxu0 %v5791_v43  ;;  %2908 = vmatprep.mubr.bf16.mxu1 %v5791_v43 }
  0xf3   : > { %2715 = vmatpush1.bf16.msra.mxu0 %v1854_v24  ;;  %2879 = vmatpush1.bf16.msra.mxu1 %v1856_v25  ;;  %v823_v24 = vld [vmem:[%s5666_s12 + $0x1088] sm:$0xff]  ;;  %v825_v25 = vld [vmem:[%s5666_s12 + $0x1098] sm:$0xff] }
  0xf4   : > { %2716 = vmatprep.subr.bf16.mxu0 %v1879_v26  ;;  %2880 = vmatprep.subr.bf16.mxu1 %v1881_v27  ;;  %v2094_v26 = vunpack.c.h.s8.bf16 %v798_v18  ;;  %v2096_v27 = vunpack.c.h.s8.bf16 %v800_v19  ;;  %v2119_v28 = vunpack.c.l.s8.bf16 %v823_v24  ;;  %v2121_v29 = vunpack.c.l.s8.bf16 %v825_v25 }
  0xf5   : > { %v2143_v36 = vunpack.c.h.s8.bf16 %v823_v24  ;;  %v2145_v37 = vunpack.c.h.s8.bf16 %v825_v25 }
  0xf7   : > { %2717 = vmatpush1.bf16.msra.mxu0 %v1878_v31  ;;  %2881 = vmatpush1.bf16.msra.mxu1 %v1880_v32  ;;  %v822_v31 = vld [vmem:[%s5666_s12 + $0x1080] sm:$0xff]  ;;  %v824_v32 = vld [vmem:[%s5666_s12 + $0x1090] sm:$0xff] }
  0xf8   : > { %2718 = vmatprep.subr.bf16.mxu0 %v1903_v33  ;;  %2882 = vmatprep.subr.bf16.mxu1 %v1905_v34  ;;  %v2118_v33 = vunpack.c.l.s8.bf16 %v822_v31  ;;  %v2120_v34 = vunpack.c.l.s8.bf16 %v824_v32 }
  0xfb   : > { %2719 = vmatpush1.bf16.msra.mxu0 %v1902_v38  ;;  %2883 = vmatpush1.bf16.msra.mxu1 %v1904_v39  ;;  %v847_v38 = vld [vmem:[%s5666_s12 + $0x1148] sm:$0xff]  ;;  %v849_v39 = vld [vmem:[%s5666_s12 + $0x1158] sm:$0xff] }
  0xfc   : > { %2720 = vmatprep.subr.bf16.mxu0 %v1927_v40  ;;  %2884 = vmatprep.subr.bf16.mxu1 %v1929_v41  ;;  %v2142_v40 = vunpack.c.h.s8.bf16 %v822_v31  ;;  %v2144_v41 = vunpack.c.h.s8.bf16 %v824_v32  ;;  %v2167_v44 = vunpack.c.l.s8.bf16 %v847_v38  ;;  %v2169_v45 = vunpack.c.l.s8.bf16 %v849_v39 }
  0xfd   : > { %v2191_v50 = vunpack.c.h.s8.bf16 %v847_v38  ;;  %v2193_v51 = vunpack.c.h.s8.bf16 %v849_v39 }
  0xff   : > { %2721 = vmatpush1.bf16.msra.mxu0 %v1926_v46  ;;  %2885 = vmatpush1.bf16.msra.mxu1 %v1928_v47  ;;  %v846_v46 = vld [vmem:[%s5666_s12 + $0x1140] sm:$0xff]  ;;  %v848_v47 = vld [vmem:[%s5666_s12 + $0x1150] sm:$0xff] }
 0x100   : > { %2722 = vmatprep.subr.bf16.mxu0 %v1951_v48  ;;  %2886 = vmatprep.subr.bf16.mxu1 %v1953_v49  ;;  %v2166_v48 = vunpack.c.l.s8.bf16 %v846_v46  ;;  %v2168_v49 = vunpack.c.l.s8.bf16 %v848_v47 }
 0x103   : > { %2723 = vmatpush1.bf16.msra.mxu0 %v1950_v52  ;;  %2887 = vmatpush1.bf16.msra.mxu1 %v1952_v53  ;;  %v871_v52 = vld [vmem:[%s5666_s12 + $0x1208] sm:$0xff]  ;;  %v873_v53 = vld [vmem:[%s5666_s12 + $0x1218] sm:$0xff] }
 0x104   : > { %2724 = vmatprep.subr.bf16.mxu0 %v1975_v54  ;;  %2888 = vmatprep.subr.bf16.mxu1 %v1977_v55  ;;  %v2190_v54 = vunpack.c.h.s8.bf16 %v846_v46  ;;  %v2192_v55 = vunpack.c.h.s8.bf16 %v848_v47  ;;  %v2215_v56 = vunpack.c.l.s8.bf16 %v871_v52  ;;  %v2217_v57 = vunpack.c.l.s8.bf16 %v873_v53 }
 0x107   : > { %2725 = vmatpush1.bf16.msra.mxu0 %v1974_v58  ;;  %2889 = vmatpush1.bf16.msra.mxu1 %v1976_v59  ;;  %v870_v58 = vld [vmem:[%s5666_s12 + $0x1200] sm:$0xff]  ;;  %v872_v59 = vld [vmem:[%s5666_s12 + $0x1210] sm:$0xff] }
 0x108   : > { %2726 = vmatprep.subr.bf16.mxu0 %v1999_v60  ;;  %2890 = vmatprep.subr.bf16.mxu1 %v2001_v61  ;;  %v5829_v60 = vcombine.low %v5785_v17, %v5785_v17  ;;  %v5834_v61 = vld [vmem:[%s6759_s0 + $0x18] sm:$0xff]  ;;  %v2214_v62 = vunpack.c.l.s8.bf16 %v870_v58  ;;  %v2216_v63 = vunpack.c.l.s8.bf16 %v872_v59  ;;  %v2238_v4 = vunpack.c.h.s8.bf16 %v870_v58 }
 0x109   : > { %v5840_v17 = vcombine.high %v5834_v61, %v5834_v61  ;;  %v2240_v5 = vunpack.c.h.s8.bf16 %v872_v59 }
 0x10b   : > { %2727 = vmatpush1.bf16.msra.mxu0 %v1998_v0  ;;  %2891 = vmatpush1.bf16.msra.mxu1 %v2000_v1  ;;  %v2239_v0 = vunpack.c.h.s8.bf16 %v871_v52  ;;  %v2241_v1 = vunpack.c.h.s8.bf16 %v873_v53 }
 0x10c   : > { %2728 = vmatprep.subr.bf16.mxu0 %v2023_v2  ;;  %2892 = vmatprep.subr.bf16.mxu1 %v2025_v3  ;;  %v895_v2 = vld [vmem:[%s5666_s12 + $0x12c8] sm:$0xff]  ;;  %v897_v3 = vld [vmem:[%s5666_s12 + $0x12d8] sm:$0xff] }
 0x10f   : > { %2729 = vmatpush1.bf16.msra.mxu0 %v2022_v6  ;;  %2893 = vmatpush1.bf16.msra.mxu1 %v2024_v7  ;;  %v2263_v6 = vunpack.c.l.s8.bf16 %v895_v2  ;;  %v2265_v7 = vunpack.c.l.s8.bf16 %v897_v3 }
 0x110   : > { %2730 = vmatprep.subr.bf16.mxu0 %v2047_v8  ;;  %2894 = vmatprep.subr.bf16.mxu1 %v2049_v9  ;;  %v894_v8 = vld [vmem:[%s5666_s12 + $0x12c0] sm:$0xff]  ;;  %v896_v9 = vld [vmem:[%s5666_s12 + $0x12d0] sm:$0xff] }
 0x111   : > { %v2262_v10 = vunpack.c.l.s8.bf16 %v894_v8  ;;  %v2264_v11 = vunpack.c.l.s8.bf16 %v896_v9  ;;  %v2286_v18 = vunpack.c.h.s8.bf16 %v894_v8  ;;  %v2288_v19 = vunpack.c.h.s8.bf16 %v896_v9 }
 0x113   : > { %2731 = vmatpush1.bf16.msra.mxu0 %v2046_v12  ;;  %2895 = vmatpush1.bf16.msra.mxu1 %v2048_v13  ;;  %v2287_v12 = vunpack.c.h.s8.bf16 %v895_v2  ;;  %v2289_v13 = vunpack.c.h.s8.bf16 %v897_v3 }
 0x114   : > { %2732 = vmatprep.subr.bf16.mxu0 %v2071_v14  ;;  %2896 = vmatprep.subr.bf16.mxu1 %v2073_v15  ;;  %v919_v14 = vld [vmem:[%s5666_s12 + $0x1388] sm:$0xff]  ;;  %v921_v15 = vld [vmem:[%s5666_s12 + $0x1398] sm:$0xff] }
 0x117   : > { %2733 = vmatpush1.bf16.msra.mxu0 %v2070_v20  ;;  %2897 = vmatpush1.bf16.msra.mxu1 %v2072_v21  ;;  %v2311_v20 = vunpack.c.l.s8.bf16 %v919_v14  ;;  %v2313_v21 = vunpack.c.l.s8.bf16 %v921_v15 }
 0x118   : > { %2734 = vmatprep.subr.bf16.mxu0 %v2095_v22  ;;  %2898 = vmatprep.subr.bf16.mxu1 %v2097_v23  ;;  %v918_v22 = vld [vmem:[%s5666_s12 + $0x1380] sm:$0xff]  ;;  %v920_v23 = vld [vmem:[%s5666_s12 + $0x1390] sm:$0xff] }
 0x119   : > { %v2310_v24 = vunpack.c.l.s8.bf16 %v918_v22  ;;  %v2312_v25 = vunpack.c.l.s8.bf16 %v920_v23  ;;  %v2334_v31 = vunpack.c.h.s8.bf16 %v918_v22  ;;  %v2336_v32 = vunpack.c.h.s8.bf16 %v920_v23 }
 0x11b   : > { %2735 = vmatpush1.bf16.msra.mxu0 %v2094_v26  ;;  %2899 = vmatpush1.bf16.msra.mxu1 %v2096_v27  ;;  %v2335_v26 = vunpack.c.h.s8.bf16 %v919_v14  ;;  %v2337_v27 = vunpack.c.h.s8.bf16 %v921_v15 }
 0x11c   : > { %2736 = vmatprep.subr.bf16.mxu0 %v2119_v28  ;;  %2900 = vmatprep.subr.bf16.mxu1 %v2121_v29  ;;  %v943_v28 = vld [vmem:[%s5666_s12 + $0x1448] sm:$0xff]  ;;  %v945_v29 = vld [vmem:[%s5666_s12 + $0x1458] sm:$0xff] }
 0x11f   : > { %2737 = vmatpush1.bf16.msra.mxu0 %v2118_v33  ;;  %2901 = vmatpush1.bf16.msra.mxu1 %v2120_v34  ;;  %v2359_v33 = vunpack.c.l.s8.bf16 %v943_v28  ;;  %v2361_v34 = vunpack.c.l.s8.bf16 %v945_v29 }
 0x120   : > { %2738 = vmatprep.subr.bf16.mxu0 %v2143_v36  ;;  %2902 = vmatprep.subr.bf16.mxu1 %v2145_v37  ;;  %v942_v36 = vld [vmem:[%s5666_s12 + $0x1440] sm:$0xff]  ;;  %v944_v37 = vld [vmem:[%s5666_s12 + $0x1450] sm:$0xff] }
 0x121   : > { %v2358_v38 = vunpack.c.l.s8.bf16 %v942_v36  ;;  %v2360_v39 = vunpack.c.l.s8.bf16 %v944_v37  ;;  %v2382_v46 = vunpack.c.h.s8.bf16 %v942_v36  ;;  %v2384_v47 = vunpack.c.h.s8.bf16 %v944_v37 }
 0x123   : > { %2739 = vmatpush1.bf16.msra.mxu0 %v2142_v40  ;;  %2903 = vmatpush1.bf16.msra.mxu1 %v2144_v41  ;;  %v2383_v40 = vunpack.c.h.s8.bf16 %v943_v28  ;;  %v2385_v41 = vunpack.c.h.s8.bf16 %v945_v29 }
 0x124   : > { %2740 = vmatprep.subr.bf16.mxu0 %v2167_v44  ;;  %2904 = vmatprep.subr.bf16.mxu1 %v2169_v45  ;;  %v967_v44 = vld [vmem:[%s5666_s12 + $0x1508] sm:$0xff]  ;;  %v969_v45 = vld [vmem:[%s5666_s12 + $0x1518] sm:$0xff] }
 0x127   : > { %2741 = vmatpush1.bf16.msra.mxu0 %v2166_v48  ;;  %2905 = vmatpush1.bf16.msra.mxu1 %v2168_v49  ;;  %v2407_v48 = vunpack.c.l.s8.bf16 %v967_v44  ;;  %v2409_v49 = vunpack.c.l.s8.bf16 %v969_v45 }
 0x128   : > { %2742 = vmatprep.subr.bf16.mxu0 %v2191_v50  ;;  %2906 = vmatprep.subr.bf16.mxu1 %v2193_v51  ;;  %v966_v50 = vld [vmem:[%s5666_s12 + $0x1500] sm:$0xff]  ;;  %v968_v51 = vld [vmem:[%s5666_s12 + $0x1510] sm:$0xff] }
 0x129   : > { %v2406_v52 = vunpack.c.l.s8.bf16 %v966_v50  ;;  %v2408_v53 = vunpack.c.l.s8.bf16 %v968_v51  ;;  %v2430_v58 = vunpack.c.h.s8.bf16 %v966_v50  ;;  %v2432_v59 = vunpack.c.h.s8.bf16 %v968_v51  ;;  %v325_v50 = vld [vmem:[%s5666_s12 + $0xf8] sm:$0xff] }
 0x12b   : > { %2743 = vmatpush1.bf16.msra.mxu0 %v2190_v54  ;;  %2907 = vmatpush1.bf16.msra.mxu1 %v2192_v55  ;;  %v2431_v54 = vunpack.c.h.s8.bf16 %v967_v44  ;;  %v2433_v55 = vunpack.c.h.s8.bf16 %v969_v45  ;;  %v5878_v44 = vcombine.low %v5834_v61, %v5834_v61 }
 0x12c   : > { %2753 = vmatprep.subr.bf16.mxu0 %v2215_v56  ;;  %2917 = vmatprep.subr.bf16.mxu1 %v2217_v57  ;;  %v991_v56 = vld [vmem:[%s5666_s12 + $0x15c8] sm:$0xff]  ;;  %v993_v57 = vld [vmem:[%s5666_s12 + $0x15d8] sm:$0xff] }
 0x12e   : > { %2745 = vmatmul.mubr.bf16.vlgmr.msra.gmra.mrb[0].mxu0 %v5829_v60  ;;  %2909 = vmatmul.mubr.bf16.vlgmr.msra.gmra.mrb[0].mxu1 %v5829_v60 }
 0x12f   : > { %2754 = vmatpush1.bf16.msra.mxu0 %v2214_v62  ;;  %2918 = vmatpush1.bf16.msra.mxu1 %v2216_v63  ;;  %v2455_v62 = vunpack.c.l.s8.bf16 %v991_v56  ;;  %v2457_v63 = vunpack.c.l.s8.bf16 %v993_v57 }
 0x130   : > { %2755 = vmatprep.subr.bf16.mxu0 %v2239_v0  ;;  %2919 = vmatprep.subr.bf16.mxu1 %v2241_v1  ;;  %v990_v0 = vld [vmem:[%s5666_s12 + $0x15c0] sm:$0xff]  ;;  %v992_v1 = vld [vmem:[%s5666_s12 + $0x15d0] sm:$0xff] }
 0x131   : > { %2785 = vmatprep.mubr.bf16.mxu0 %v5840_v17  ;;  %2949 = vmatprep.mubr.bf16.mxu1 %v5840_v17  ;;  %v2454_v2 = vunpack.c.l.s8.bf16 %v990_v0  ;;  %v2456_v3 = vunpack.c.l.s8.bf16 %v992_v1  ;;  %v2478_v8 = vunpack.c.h.s8.bf16 %v990_v0  ;;  %v2480_v9 = vunpack.c.h.s8.bf16 %v992_v1 }
 0x133   : > { %2756 = vmatpush1.bf16.msra.mxu0 %v2238_v4  ;;  %2920 = vmatpush1.bf16.msra.mxu1 %v2240_v5  ;;  %v2479_v4 = vunpack.c.h.s8.bf16 %v991_v56  ;;  %v2481_v5 = vunpack.c.h.s8.bf16 %v993_v57 }
 0x134   : > { %2757 = vmatprep.subr.bf16.mxu0 %v2263_v6  ;;  %2921 = vmatprep.subr.bf16.mxu1 %v2265_v7  ;;  %v1015_v6 = vld [vmem:[%s5666_s12 + $0x1688] sm:$0xff]  ;;  %v1017_v7 = vld [vmem:[%s5666_s12 + $0x1698] sm:$0xff] }
 0x137   : > { %2758 = vmatpush1.bf16.msra.mxu0 %v2262_v10  ;;  %2922 = vmatpush1.bf16.msra.mxu1 %v2264_v11  ;;  %v2503_v10 = vunpack.c.l.s8.bf16 %v1015_v6  ;;  %v2505_v11 = vunpack.c.l.s8.bf16 %v1017_v7 }
 0x138   : > { %2759 = vmatprep.subr.bf16.mxu0 %v2287_v12  ;;  %2923 = vmatprep.subr.bf16.mxu1 %v2289_v13  ;;  %v1014_v12 = vld [vmem:[%s5666_s12 + $0x1680] sm:$0xff]  ;;  %v1016_v13 = vld [vmem:[%s5666_s12 + $0x1690] sm:$0xff] }
 0x139   : > { %v2502_v14 = vunpack.c.l.s8.bf16 %v1014_v12  ;;  %v2504_v15 = vunpack.c.l.s8.bf16 %v1016_v13  ;;  %v2526_v22 = vunpack.c.h.s8.bf16 %v1014_v12  ;;  %v2528_v23 = vunpack.c.h.s8.bf16 %v1016_v13 }
 0x13b   : > { %2760 = vmatpush1.bf16.msra.mxu0 %v2286_v18  ;;  %2924 = vmatpush1.bf16.msra.mxu1 %v2288_v19  ;;  %v2527_v18 = vunpack.c.h.s8.bf16 %v1015_v6  ;;  %v2529_v19 = vunpack.c.h.s8.bf16 %v1017_v7 }
 0x13c   : > { %2761 = vmatprep.subr.bf16.mxu0 %v2311_v20  ;;  %2925 = vmatprep.subr.bf16.mxu1 %v2313_v21  ;;  %v1039_v20 = vld [vmem:[%s5666_s12 + $0x1748] sm:$0xff]  ;;  %v1041_v21 = vld [vmem:[%s5666_s12 + $0x1758] sm:$0xff] }
 0x13f   : > { %2762 = vmatpush1.bf16.msra.mxu0 %v2310_v24  ;;  %2926 = vmatpush1.bf16.msra.mxu1 %v2312_v25  ;;  %v2551_v24 = vunpack.c.l.s8.bf16 %v1039_v20  ;;  %v2553_v25 = vunpack.c.l.s8.bf16 %v1041_v21 }
 0x140   : > { %2763 = vmatprep.subr.bf16.mxu0 %v2335_v26  ;;  %2927 = vmatprep.subr.bf16.mxu1 %v2337_v27  ;;  %v1038_v26 = vld [vmem:[%s5666_s12 + $0x1740] sm:$0xff]  ;;  %v1040_v27 = vld [vmem:[%s5666_s12 + $0x1750] sm:$0xff] }
 0x141   : > { %v2550_v28 = vunpack.c.l.s8.bf16 %v1038_v26  ;;  %v2552_v29 = vunpack.c.l.s8.bf16 %v1040_v27  ;;  %v2574_v36 = vunpack.c.h.s8.bf16 %v1038_v26  ;;  %v2576_v37 = vunpack.c.h.s8.bf16 %v1040_v27 }
 0x143   : > { %2764 = vmatpush1.bf16.msra.mxu0 %v2334_v31  ;;  %2928 = vmatpush1.bf16.msra.mxu1 %v2336_v32  ;;  %v2575_v31 = vunpack.c.h.s8.bf16 %v1039_v20  ;;  %v2577_v32 = vunpack.c.h.s8.bf16 %v1041_v21 }
 0x144   : > { %2765 = vmatprep.subr.bf16.mxu0 %v2359_v33  ;;  %2929 = vmatprep.subr.bf16.mxu1 %v2361_v34  ;;  %v299_v33 = vld [vmem:[%s5666_s12 + $0x28] sm:$0xff]  ;;  %v301_v34 = vld [vmem:[%s5666_s12 + $0x38] sm:$0xff] }
 0x147   : > { %2766 = vmatpush1.bf16.msra.mxu0 %v2358_v38  ;;  %2930 = vmatpush1.bf16.msra.mxu1 %v2360_v39  ;;  %v1067_v38 = vunpack.c.l.s8.bf16 %v299_v33  ;;  %v1069_v39 = vunpack.c.l.s8.bf16 %v301_v34 }
 0x148   : > { %2767 = vmatprep.subr.bf16.mxu0 %v2383_v40  ;;  %2931 = vmatprep.subr.bf16.mxu1 %v2385_v41  ;;  %v298_v40 = vld [vmem:[%s5666_s12 + $0x20] sm:$0xff]  ;;  %v300_v41 = vld [vmem:[%s5666_s12 + $0x30] sm:$0xff] }
 0x149   : > { %v1066_v45 = vunpack.c.l.s8.bf16 %v298_v40  ;;  %v1090_v61 = vunpack.c.h.s8.bf16 %v298_v40  ;;  %v1092_v51 = vunpack.c.h.s8.bf16 %v300_v41 }
 0x14b   : > { %2768 = vmatpush1.bf16.msra.mxu0 %v2382_v46  ;;  %2932 = vmatpush1.bf16.msra.mxu1 %v2384_v47  ;;  %v1068_v46 = vunpack.c.l.s8.bf16 %v300_v41  ;;  %v1091_v47 = vunpack.c.h.s8.bf16 %v299_v33 }
 0x14c   : > { %2769 = vmatprep.subr.bf16.mxu0 %v2407_v48  ;;  %2933 = vmatprep.subr.bf16.mxu1 %v2409_v49  ;;  %v1093_v48 = vunpack.c.h.s8.bf16 %v301_v34  ;;  %v323_v49 = vld [vmem:[%s5666_s12 + $0xe8] sm:$0xff] }
 0x14f   : > { %2770 = vmatpush1.bf16.msra.mxu0 %v2406_v52  ;;  %2934 = vmatpush1.bf16.msra.mxu1 %v2408_v53  ;;  %v1115_v52 = vunpack.c.l.s8.bf16 %v323_v49  ;;  %v1117_v53 = vunpack.c.l.s8.bf16 %v325_v50 }
 0x150   : > { %2771 = vmatprep.subr.bf16.mxu0 %v2431_v54  ;;  %2935 = vmatprep.subr.bf16.mxu1 %v2433_v55  ;;  %v322_v54 = vld [vmem:[%s5666_s12 + $0xe0] sm:$0xff]  ;;  %v324_v55 = vld [vmem:[%s5666_s12 + $0xf0] sm:$0xff] }
 0x151   : > { %v1114_v56 = vunpack.c.l.s8.bf16 %v322_v54  ;;  %v1116_v57 = vunpack.c.l.s8.bf16 %v324_v55  ;;  %v1138_v0 = vunpack.c.h.s8.bf16 %v322_v54  ;;  %v1140_v1 = vunpack.c.h.s8.bf16 %v324_v55 }
 0x153   : > { %2772 = vmatpush1.bf16.msra.mxu0 %v2430_v58  ;;  %2936 = vmatpush1.bf16.msra.mxu1 %v2432_v59  ;;  %v1139_v58 = vunpack.c.h.s8.bf16 %v323_v49  ;;  %v1141_v59 = vunpack.c.h.s8.bf16 %v325_v50 }
 0x154   : > { %2773 = vmatprep.subr.bf16.mxu0 %v2455_v62  ;;  %2937 = vmatprep.subr.bf16.mxu1 %v2457_v63  ;;  %v347_v62 = vld [vmem:[%s5666_s12 + $0x1a8] sm:$0xff]  ;;  %v349_v63 = vld [vmem:[%s5666_s12 + $0x1b8] sm:$0xff] }
 0x157   : > { %2774 = vmatpush1.bf16.msra.mxu0 %v2454_v2  ;;  %2938 = vmatpush1.bf16.msra.mxu1 %v2456_v3  ;;  %v1163_v2 = vunpack.c.l.s8.bf16 %v347_v62  ;;  %v1165_v3 = vunpack.c.l.s8.bf16 %v349_v63 }
 0x158   : > { %2775 = vmatprep.subr.bf16.mxu0 %v2479_v4  ;;  %2939 = vmatprep.subr.bf16.mxu1 %v2481_v5  ;;  %v346_v4 = vld [vmem:[%s5666_s12 + $0x1a0] sm:$0xff]  ;;  %v348_v5 = vld [vmem:[%s5666_s12 + $0x1b0] sm:$0xff] }
 0x159   : > { %v1162_v6 = vunpack.c.l.s8.bf16 %v346_v4  ;;  %v1164_v7 = vunpack.c.l.s8.bf16 %v348_v5  ;;  %v1186_v12 = vunpack.c.h.s8.bf16 %v346_v4  ;;  %v1188_v13 = vunpack.c.h.s8.bf16 %v348_v5 }
 0x15b   : > { %2776 = vmatpush1.bf16.msra.mxu0 %v2478_v8  ;;  %2940 = vmatpush1.bf16.msra.mxu1 %v2480_v9  ;;  %v1187_v8 = vunpack.c.h.s8.bf16 %v347_v62  ;;  %v1189_v9 = vunpack.c.h.s8.bf16 %v349_v63 }
 0x15c   : > { %2777 = vmatprep.subr.bf16.mxu0 %v2503_v10  ;;  %2941 = vmatprep.subr.bf16.mxu1 %v2505_v11  ;;  %v371_v10 = vld [vmem:[%s5666_s12 + $0x268] sm:$0xff]  ;;  %v373_v11 = vld [vmem:[%s5666_s12 + $0x278] sm:$0xff] }
 0x15f   : > { %2778 = vmatpush1.bf16.msra.mxu0 %v2502_v14  ;;  %2942 = vmatpush1.bf16.msra.mxu1 %v2504_v15  ;;  %v1211_v14 = vunpack.c.l.s8.bf16 %v371_v10  ;;  %v1213_v15 = vunpack.c.l.s8.bf16 %v373_v11 }
 0x160   : > { %2779 = vmatprep.subr.bf16.mxu0 %v2527_v18  ;;  %2943 = vmatprep.subr.bf16.mxu1 %v2529_v19  ;;  %v370_v18 = vld [vmem:[%s5666_s12 + $0x260] sm:$0xff]  ;;  %v372_v19 = vld [vmem:[%s5666_s12 + $0x270] sm:$0xff] }
 0x161   : > { %v1210_v20 = vunpack.c.l.s8.bf16 %v370_v18  ;;  %v1212_v21 = vunpack.c.l.s8.bf16 %v372_v19  ;;  %v1234_v26 = vunpack.c.h.s8.bf16 %v370_v18  ;;  %v1236_v27 = vunpack.c.h.s8.bf16 %v372_v19 }
 0x163   : > { %2780 = vmatpush1.bf16.msra.mxu0 %v2526_v22  ;;  %2944 = vmatpush1.bf16.msra.mxu1 %v2528_v23  ;;  %v1235_v22 = vunpack.c.h.s8.bf16 %v371_v10  ;;  %v1237_v23 = vunpack.c.h.s8.bf16 %v373_v11 }
 0x164   : > { %2781 = vmatprep.subr.bf16.mxu0 %v2551_v24  ;;  %2945 = vmatprep.subr.bf16.mxu1 %v2553_v25  ;;  %v395_v24 = vld [vmem:[%s5666_s12 + $0x328] sm:$0xff]  ;;  %v397_v25 = vld [vmem:[%s5666_s12 + $0x338] sm:$0xff] }
 0x167   : > { %2782 = vmatpush1.bf16.msra.mxu0 %v2550_v28  ;;  %2946 = vmatpush1.bf16.msra.mxu1 %v2552_v29  ;;  %v1259_v28 = vunpack.c.l.s8.bf16 %v395_v24  ;;  %v1261_v29 = vunpack.c.l.s8.bf16 %v397_v25 }
 0x168   : > { %2783 = vmatprep.subr.bf16.mxu0 %v2575_v31  ;;  %2947 = vmatprep.subr.bf16.mxu1 %v2577_v32  ;;  %v394_v31 = vld [vmem:[%s5666_s12 + $0x320] sm:$0xff]  ;;  %v396_v32 = vld [vmem:[%s5666_s12 + $0x330] sm:$0xff] }
 0x169   : > { %v1258_v33 = vunpack.c.l.s8.bf16 %v394_v31  ;;  %v1260_v34 = vunpack.c.l.s8.bf16 %v396_v32  ;;  %v1282_v40 = vunpack.c.h.s8.bf16 %v394_v31  ;;  %v1284_v41 = vunpack.c.h.s8.bf16 %v396_v32 }
 0x16b   : > { %2784 = vmatpush1.bf16.msra.mxu0 %v2574_v36  ;;  %2948 = vmatpush1.bf16.msra.mxu1 %v2576_v37  ;;  %v1283_v36 = vunpack.c.h.s8.bf16 %v395_v24  ;;  %v1285_v37 = vunpack.c.h.s8.bf16 %v397_v25 }
 0x16c   : > { %2958 = vmatprep.subr.bf16.mxu0 %v1067_v38  ;;  %3122 = vmatprep.subr.bf16.mxu1 %v1069_v39  ;;  %v419_v38 = vld [vmem:[%s5666_s12 + $0x3e8] sm:$0xff]  ;;  %v421_v39 = vld [vmem:[%s5666_s12 + $0x3f8] sm:$0xff] }
 0x16e   : > { %2786 = vmatmul.mubr.bf16.vlgmr.msra.gmra.mrb[0].mxu0 %v5878_v44  ;;  %2950 = vmatmul.mubr.bf16.vlgmr.msra.gmra.mrb[0].mxu1 %v5878_v44 }
 0x16f   : > { %2959 = vmatpush1.bf16.msra.mxu0 %v1066_v45  ;;  %3123 = vmatpush1.bf16.msra.mxu1 %v1068_v46  ;;  %v1307_v45 = vunpack.c.l.s8.bf16 %v419_v38  ;;  %v1309_v46 = vunpack.c.l.s8.bf16 %v421_v39 }
 0x170   : > { %2960 = vmatprep.subr.bf16.mxu0 %v1091_v47  ;;  %3124 = vmatprep.subr.bf16.mxu1 %v1093_v48  ;;  %v418_v47 = vld [vmem:[%s5666_s12 + $0x3e0] sm:$0xff]  ;;  %v420_v48 = vld [vmem:[%s5666_s12 + $0x3f0] sm:$0xff] }
 0x171   : > { %2990 = vmatprep.mubr.bf16.mxu0 %v5701_v35  ;;  %3154 = vmatprep.mubr.bf16.mxu1 %v5701_v35  ;;  %v1306_v49 = vunpack.c.l.s8.bf16 %v418_v47  ;;  %v1308_v50 = vunpack.c.l.s8.bf16 %v420_v48  ;;  %v1330_v54 = vunpack.c.h.s8.bf16 %v418_v47  ;;  %v1332_v55 = vunpack.c.h.s8.bf16 %v420_v48 }
 0x173   : > { %2961 = vmatpush1.bf16.msra.mxu0 %v1090_v61  ;;  %3125 = vmatpush1.bf16.msra.mxu1 %v1092_v51  ;;  %v1331_v61 = vunpack.c.h.s8.bf16 %v419_v38  ;;  %v1333_v51 = vunpack.c.h.s8.bf16 %v421_v39 }
 0x174   : > { %2962 = vmatprep.subr.bf16.mxu0 %v1115_v52  ;;  %3126 = vmatprep.subr.bf16.mxu1 %v1117_v53  ;;  %v443_v52 = vld [vmem:[%s5666_s12 + $0x4a8] sm:$0xff]  ;;  %v445_v53 = vld [vmem:[%s5666_s12 + $0x4b8] sm:$0xff] }
 0x177   : > { %2963 = vmatpush1.bf16.msra.mxu0 %v1114_v56  ;;  %3127 = vmatpush1.bf16.msra.mxu1 %v1116_v57  ;;  %v1355_v56 = vunpack.c.l.s8.bf16 %v443_v52  ;;  %v1357_v57 = vunpack.c.l.s8.bf16 %v445_v53 }
 0x178   : > { %2964 = vmatprep.subr.bf16.mxu0 %v1139_v58  ;;  %3128 = vmatprep.subr.bf16.mxu1 %v1141_v59  ;;  %v442_v58 = vld [vmem:[%s5666_s12 + $0x4a0] sm:$0xff]  ;;  %v444_v59 = vld [vmem:[%s5666_s12 + $0x4b0] sm:$0xff] }
 0x179   : > { %v1354_v62 = vunpack.c.l.s8.bf16 %v442_v58  ;;  %v1356_v63 = vunpack.c.l.s8.bf16 %v444_v59  ;;  %v1378_v4 = vunpack.c.h.s8.bf16 %v442_v58  ;;  %v1380_v5 = vunpack.c.h.s8.bf16 %v444_v59 }
 0x17b   : > { %2965 = vmatpush1.bf16.msra.mxu0 %v1138_v0  ;;  %3129 = vmatpush1.bf16.msra.mxu1 %v1140_v1  ;;  %v1379_v0 = vunpack.c.h.s8.bf16 %v443_v52  ;;  %v1381_v1 = vunpack.c.h.s8.bf16 %v445_v53 }
 0x17c   : > { %2966 = vmatprep.subr.bf16.mxu0 %v1163_v2  ;;  %3130 = vmatprep.subr.bf16.mxu1 %v1165_v3  ;;  %v467_v2 = vld [vmem:[%s5666_s12 + $0x568] sm:$0xff]  ;;  %v469_v3 = vld [vmem:[%s5666_s12 + $0x578] sm:$0xff] }
 0x17f   : > { %2967 = vmatpush1.bf16.msra.mxu0 %v1162_v6  ;;  %3131 = vmatpush1.bf16.msra.mxu1 %v1164_v7  ;;  %v1403_v6 = vunpack.c.l.s8.bf16 %v467_v2  ;;  %v1405_v7 = vunpack.c.l.s8.bf16 %v469_v3 }
 0x180   : > { %2968 = vmatprep.subr.bf16.mxu0 %v1187_v8  ;;  %3132 = vmatprep.subr.bf16.mxu1 %v1189_v9  ;;  %v466_v8 = vld [vmem:[%s5666_s12 + $0x560] sm:$0xff]  ;;  %v468_v9 = vld [vmem:[%s5666_s12 + $0x570] sm:$0xff] }
 0x181   : > { %v1402_v10 = vunpack.c.l.s8.bf16 %v466_v8  ;;  %v1404_v11 = vunpack.c.l.s8.bf16 %v468_v9  ;;  %v1426_v18 = vunpack.c.h.s8.bf16 %v466_v8  ;;  %v1428_v19 = vunpack.c.h.s8.bf16 %v468_v9 }
 0x183   : > { %2969 = vmatpush1.bf16.msra.mxu0 %v1186_v12  ;;  %3133 = vmatpush1.bf16.msra.mxu1 %v1188_v13  ;;  %v1427_v12 = vunpack.c.h.s8.bf16 %v467_v2  ;;  %v1429_v13 = vunpack.c.h.s8.bf16 %v469_v3 }
 0x184   : > { %2970 = vmatprep.subr.bf16.mxu0 %v1211_v14  ;;  %3134 = vmatprep.subr.bf16.mxu1 %v1213_v15  ;;  %v491_v14 = vld [vmem:[%s5666_s12 + $0x628] sm:$0xff]  ;;  %v493_v15 = vld [vmem:[%s5666_s12 + $0x638] sm:$0xff] }
 0x187   : > { %2971 = vmatpush1.bf16.msra.mxu0 %v1210_v20  ;;  %3135 = vmatpush1.bf16.msra.mxu1 %v1212_v21  ;;  %v1451_v20 = vunpack.c.l.s8.bf16 %v491_v14  ;;  %v1453_v21 = vunpack.c.l.s8.bf16 %v493_v15 }
 0x188   : > { %2972 = vmatprep.subr.bf16.mxu0 %v1235_v22  ;;  %3136 = vmatprep.subr.bf16.mxu1 %v1237_v23  ;;  %v490_v22 = vld [vmem:[%s5666_s12 + $0x620] sm:$0xff]  ;;  %v492_v23 = vld [vmem:[%s5666_s12 + $0x630] sm:$0xff] }
 0x189   : > { %v1450_v24 = vunpack.c.l.s8.bf16 %v490_v22  ;;  %v1452_v25 = vunpack.c.l.s8.bf16 %v492_v23  ;;  %v1474_v31 = vunpack.c.h.s8.bf16 %v490_v22  ;;  %v1476_v32 = vunpack.c.h.s8.bf16 %v492_v23 }
 0x18b   : > { %2973 = vmatpush1.bf16.msra.mxu0 %v1234_v26  ;;  %3137 = vmatpush1.bf16.msra.mxu1 %v1236_v27  ;;  %v1475_v26 = vunpack.c.h.s8.bf16 %v491_v14  ;;  %v1477_v27 = vunpack.c.h.s8.bf16 %v493_v15 }
 0x18c   : > { %2974 = vmatprep.subr.bf16.mxu0 %v1259_v28  ;;  %3138 = vmatprep.subr.bf16.mxu1 %v1261_v29  ;;  %v515_v28 = vld [vmem:[%s5666_s12 + $0x6e8] sm:$0xff]  ;;  %v517_v29 = vld [vmem:[%s5666_s12 + $0x6f8] sm:$0xff] }
 0x18f   : > { %2975 = vmatpush1.bf16.msra.mxu0 %v1258_v33  ;;  %3139 = vmatpush1.bf16.msra.mxu1 %v1260_v34  ;;  %v1499_v33 = vunpack.c.l.s8.bf16 %v515_v28  ;;  %v1501_v34 = vunpack.c.l.s8.bf16 %v517_v29 }
 0x190   : > { %2976 = vmatprep.subr.bf16.mxu0 %v1283_v36  ;;  %3140 = vmatprep.subr.bf16.mxu1 %v1285_v37  ;;  %v514_v36 = vld [vmem:[%s5666_s12 + $0x6e0] sm:$0xff]  ;;  %v516_v37 = vld [vmem:[%s5666_s12 + $0x6f0] sm:$0xff] }
 0x191   : > { %v1498_v38 = vunpack.c.l.s8.bf16 %v514_v36  ;;  %v1500_v39 = vunpack.c.l.s8.bf16 %v516_v37  ;;  %v1522_v47 = vunpack.c.h.s8.bf16 %v514_v36  ;;  %v1524_v48 = vunpack.c.h.s8.bf16 %v516_v37 }
 0x193   : > { %2977 = vmatpush1.bf16.msra.mxu0 %v1282_v40  ;;  %3141 = vmatpush1.bf16.msra.mxu1 %v1284_v41  ;;  %v1523_v40 = vunpack.c.h.s8.bf16 %v515_v28  ;;  %v1525_v41 = vunpack.c.h.s8.bf16 %v517_v29 }
 0x194   : > { %2978 = vmatprep.subr.bf16.mxu0 %v1307_v45  ;;  %3142 = vmatprep.subr.bf16.mxu1 %v1309_v46  ;;  %v539_v45 = vld [vmem:[%s5666_s12 + $0x7a8] sm:$0xff]  ;;  %v541_v46 = vld [vmem:[%s5666_s12 + $0x7b8] sm:$0xff] }
 0x197   : > { %2979 = vmatpush1.bf16.msra.mxu0 %v1306_v49  ;;  %3143 = vmatpush1.bf16.msra.mxu1 %v1308_v50  ;;  %v1547_v49 = vunpack.c.l.s8.bf16 %v539_v45  ;;  %v1549_v50 = vunpack.c.l.s8.bf16 %v541_v46 }
 0x198   : > { %2980 = vmatprep.subr.bf16.mxu0 %v1331_v61  ;;  %3144 = vmatprep.subr.bf16.mxu1 %v1333_v51  ;;  %v538_v61 = vld [vmem:[%s5666_s12 + $0x7a0] sm:$0xff]  ;;  %v540_v51 = vld [vmem:[%s5666_s12 + $0x7b0] sm:$0xff] }
 0x199   : > { %v1546_v52 = vunpack.c.l.s8.bf16 %v538_v61  ;;  %v1548_v53 = vunpack.c.l.s8.bf16 %v540_v51  ;;  %v1570_v58 = vunpack.c.h.s8.bf16 %v538_v61  ;;  %v1572_v59 = vunpack.c.h.s8.bf16 %v540_v51 }
 0x19b   : > { %2981 = vmatpush1.bf16.msra.mxu0 %v1330_v54  ;;  %3145 = vmatpush1.bf16.msra.mxu1 %v1332_v55  ;;  %v1571_v54 = vunpack.c.h.s8.bf16 %v539_v45  ;;  %v1573_v55 = vunpack.c.h.s8.bf16 %v541_v46 }
 0x19c   : > { %2982 = vmatprep.subr.bf16.mxu0 %v1355_v56  ;;  %3146 = vmatprep.subr.bf16.mxu1 %v1357_v57  ;;  %v563_v56 = vld [vmem:[%s5666_s12 + $0x868] sm:$0xff]  ;;  %v565_v57 = vld [vmem:[%s5666_s12 + $0x878] sm:$0xff] }
 0x19f   : > { %2983 = vmatpush1.bf16.msra.mxu0 %v1354_v62  ;;  %3147 = vmatpush1.bf16.msra.mxu1 %v1356_v63  ;;  %v1595_v62 = vunpack.c.l.s8.bf16 %v563_v56  ;;  %v1597_v63 = vunpack.c.l.s8.bf16 %v565_v57 }
 0x1a0   : > { %2984 = vmatprep.subr.bf16.mxu0 %v1379_v0  ;;  %3148 = vmatprep.subr.bf16.mxu1 %v1381_v1  ;;  %v562_v0 = vld [vmem:[%s5666_s12 + $0x860] sm:$0xff]  ;;  %v564_v1 = vld [vmem:[%s5666_s12 + $0x870] sm:$0xff] }
 0x1a1   : > { %v1594_v2 = vunpack.c.l.s8.bf16 %v562_v0  ;;  %v1596_v3 = vunpack.c.l.s8.bf16 %v564_v1  ;;  %v1618_v8 = vunpack.c.h.s8.bf16 %v562_v0  ;;  %v1620_v9 = vunpack.c.h.s8.bf16 %v564_v1 }
 0x1a3   : > { %2985 = vmatpush1.bf16.msra.mxu0 %v1378_v4  ;;  %3149 = vmatpush1.bf16.msra.mxu1 %v1380_v5  ;;  %v1619_v4 = vunpack.c.h.s8.bf16 %v563_v56  ;;  %v1621_v5 = vunpack.c.h.s8.bf16 %v565_v57 }
 0x1a4   : > { %2986 = vmatprep.subr.bf16.mxu0 %v1403_v6  ;;  %3150 = vmatprep.subr.bf16.mxu1 %v1405_v7  ;;  %v587_v6 = vld [vmem:[%s5666_s12 + $0x928] sm:$0xff]  ;;  %v589_v7 = vld [vmem:[%s5666_s12 + $0x938] sm:$0xff] }
 0x1a7   : > { %2987 = vmatpush1.bf16.msra.mxu0 %v1402_v10  ;;  %3151 = vmatpush1.bf16.msra.mxu1 %v1404_v11  ;;  %v1643_v10 = vunpack.c.l.s8.bf16 %v587_v6  ;;  %v1645_v11 = vunpack.c.l.s8.bf16 %v589_v7 }
 0x1a8   : > { %2988 = vmatprep.subr.bf16.mxu0 %v1427_v12  ;;  %3152 = vmatprep.subr.bf16.mxu1 %v1429_v13  ;;  %v586_v12 = vld [vmem:[%s5666_s12 + $0x920] sm:$0xff]  ;;  %v588_v13 = vld [vmem:[%s5666_s12 + $0x930] sm:$0xff] }
 0x1a9   : > { %v1642_v14 = vunpack.c.l.s8.bf16 %v586_v12  ;;  %v1644_v15 = vunpack.c.l.s8.bf16 %v588_v13  ;;  %v1666_v22 = vunpack.c.h.s8.bf16 %v586_v12  ;;  %v1668_v23 = vunpack.c.h.s8.bf16 %v588_v13 }
 0x1ab   : > { %2989 = vmatpush1.bf16.msra.mxu0 %v1426_v18  ;;  %3153 = vmatpush1.bf16.msra.mxu1 %v1428_v19  ;;  %v1667_v18 = vunpack.c.h.s8.bf16 %v587_v6  ;;  %v1669_v19 = vunpack.c.h.s8.bf16 %v589_v7 }
 0x1ac   : > { %2999 = vmatprep.subr.bf16.mxu0 %v1451_v20  ;;  %3163 = vmatprep.subr.bf16.mxu1 %v1453_v21  ;;  %v611_v20 = vld [vmem:[%s5666_s12 + $0x9e8] sm:$0xff]  ;;  %v613_v21 = vld [vmem:[%s5666_s12 + $0x9f8] sm:$0xff] }
 0x1ae   : > { %2991 = vmatmul.mubr.bf16.vlgmr.msra.gmra.mrb[4].mxu0 %v5731_v42  ;;  %3155 = vmatmul.mubr.bf16.vlgmr.msra.gmra.mrb[4].mxu1 %v5731_v42 }
 0x1af   : > { %3000 = vmatpush1.bf16.msra.mxu0 %v1450_v24  ;;  %3164 = vmatpush1.bf16.msra.mxu1 %v1452_v25  ;;  %v1691_v24 = vunpack.c.l.s8.bf16 %v611_v20  ;;  %v1693_v25 = vunpack.c.l.s8.bf16 %v613_v21 }
 0x1b0   : > { %3001 = vmatprep.subr.bf16.mxu0 %v1475_v26  ;;  %3165 = vmatprep.subr.bf16.mxu1 %v1477_v27  ;;  %v610_v26 = vld [vmem:[%s5666_s12 + $0x9e0] sm:$0xff]  ;;  %v612_v27 = vld [vmem:[%s5666_s12 + $0x9f0] sm:$0xff] }
 0x1b1   : > { %3031 = vmatprep.mubr.bf16.mxu0 %v5742_v30  ;;  %3195 = vmatprep.mubr.bf16.mxu1 %v5742_v30  ;;  %v1690_v28 = vunpack.c.l.s8.bf16 %v610_v26  ;;  %v1692_v29 = vunpack.c.l.s8.bf16 %v612_v27  ;;  %v1714_v36 = vunpack.c.h.s8.bf16 %v610_v26  ;;  %v1716_v37 = vunpack.c.h.s8.bf16 %v612_v27 }
 0x1b3   : > { %3002 = vmatpush1.bf16.msra.mxu0 %v1474_v31  ;;  %3166 = vmatpush1.bf16.msra.mxu1 %v1476_v32  ;;  %v1715_v31 = vunpack.c.h.s8.bf16 %v611_v20  ;;  %v1717_v32 = vunpack.c.h.s8.bf16 %v613_v21 }
 0x1b4   : > { %3003 = vmatprep.subr.bf16.mxu0 %v1499_v33  ;;  %3167 = vmatprep.subr.bf16.mxu1 %v1501_v34  ;;  %v635_v33 = vld [vmem:[%s5666_s12 + $0xaa8] sm:$0xff]  ;;  %v637_v34 = vld [vmem:[%s5666_s12 + $0xab8] sm:$0xff] }
 0x1b7   : > { %3004 = vmatpush1.bf16.msra.mxu0 %v1498_v38  ;;  %3168 = vmatpush1.bf16.msra.mxu1 %v1500_v39  ;;  %v1739_v38 = vunpack.c.l.s8.bf16 %v635_v33  ;;  %v1741_v39 = vunpack.c.l.s8.bf16 %v637_v34 }
 0x1b8   : > { %3005 = vmatprep.subr.bf16.mxu0 %v1523_v40  ;;  %3169 = vmatprep.subr.bf16.mxu1 %v1525_v41  ;;  %v634_v40 = vld [vmem:[%s5666_s12 + $0xaa0] sm:$0xff]  ;;  %v636_v41 = vld [vmem:[%s5666_s12 + $0xab0] sm:$0xff] }
 0x1b9   : > { %v1738_v45 = vunpack.c.l.s8.bf16 %v634_v40  ;;  %v1740_v46 = vunpack.c.l.s8.bf16 %v636_v41  ;;  %v1762_v61 = vunpack.c.h.s8.bf16 %v634_v40  ;;  %v1764_v51 = vunpack.c.h.s8.bf16 %v636_v41 }
 0x1bb   : > { %3006 = vmatpush1.bf16.msra.mxu0 %v1522_v47  ;;  %3170 = vmatpush1.bf16.msra.mxu1 %v1524_v48  ;;  %v1763_v47 = vunpack.c.h.s8.bf16 %v635_v33  ;;  %v1765_v48 = vunpack.c.h.s8.bf16 %v637_v34 }
 0x1bc   : > { %3007 = vmatprep.subr.bf16.mxu0 %v1547_v49  ;;  %3171 = vmatprep.subr.bf16.mxu1 %v1549_v50  ;;  %v659_v49 = vld [vmem:[%s5666_s12 + $0xb68] sm:$0xff]  ;;  %v661_v50 = vld [vmem:[%s5666_s12 + $0xb78] sm:$0xff] }
 0x1bf   : > { %3008 = vmatpush1.bf16.msra.mxu0 %v1546_v52  ;;  %3172 = vmatpush1.bf16.msra.mxu1 %v1548_v53  ;;  %v1787_v52 = vunpack.c.l.s8.bf16 %v659_v49  ;;  %v1789_v53 = vunpack.c.l.s8.bf16 %v661_v50 }
 0x1c0   : > { %3009 = vmatprep.subr.bf16.mxu0 %v1571_v54  ;;  %3173 = vmatprep.subr.bf16.mxu1 %v1573_v55  ;;  %v658_v54 = vld [vmem:[%s5666_s12 + $0xb60] sm:$0xff]  ;;  %v660_v55 = vld [vmem:[%s5666_s12 + $0xb70] sm:$0xff] }
 0x1c1   : > { %v1786_v56 = vunpack.c.l.s8.bf16 %v658_v54  ;;  %v1788_v57 = vunpack.c.l.s8.bf16 %v660_v55  ;;  %v1810_v0 = vunpack.c.h.s8.bf16 %v658_v54  ;;  %v1812_v1 = vunpack.c.h.s8.bf16 %v660_v55 }
 0x1c3   : > { %3010 = vmatpush1.bf16.msra.mxu0 %v1570_v58  ;;  %3174 = vmatpush1.bf16.msra.mxu1 %v1572_v59  ;;  %v1811_v58 = vunpack.c.h.s8.bf16 %v659_v49  ;;  %v1813_v59 = vunpack.c.h.s8.bf16 %v661_v50 }
 0x1c4   : > { %3011 = vmatprep.subr.bf16.mxu0 %v1595_v62  ;;  %3175 = vmatprep.subr.bf16.mxu1 %v1597_v63  ;;  %v683_v62 = vld [vmem:[%s5666_s12 + $0xc28] sm:$0xff]  ;;  %v685_v63 = vld [vmem:[%s5666_s12 + $0xc38] sm:$0xff] }
 0x1c7   : > { %3012 = vmatpush1.bf16.msra.mxu0 %v1594_v2  ;;  %3176 = vmatpush1.bf16.msra.mxu1 %v1596_v3  ;;  %v1835_v2 = vunpack.c.l.s8.bf16 %v683_v62  ;;  %v1837_v3 = vunpack.c.l.s8.bf16 %v685_v63 }
 0x1c8   : > { %3013 = vmatprep.subr.bf16.mxu0 %v1619_v4  ;;  %3177 = vmatprep.subr.bf16.mxu1 %v1621_v5  ;;  %v682_v4 = vld [vmem:[%s5666_s12 + $0xc20] sm:$0xff]  ;;  %v684_v5 = vld [vmem:[%s5666_s12 + $0xc30] sm:$0xff] }
 0x1c9   : > { %v1834_v6 = vunpack.c.l.s8.bf16 %v682_v4  ;;  %v1836_v7 = vunpack.c.l.s8.bf16 %v684_v5  ;;  %v1858_v12 = vunpack.c.h.s8.bf16 %v682_v4  ;;  %v1860_v13 = vunpack.c.h.s8.bf16 %v684_v5 }
 0x1cb   : > { %3014 = vmatpush1.bf16.msra.mxu0 %v1618_v8  ;;  %3178 = vmatpush1.bf16.msra.mxu1 %v1620_v9  ;;  %v1859_v8 = vunpack.c.h.s8.bf16 %v683_v62  ;;  %v1861_v9 = vunpack.c.h.s8.bf16 %v685_v63 }
 0x1cc   : > { %3015 = vmatprep.subr.bf16.mxu0 %v1643_v10  ;;  %3179 = vmatprep.subr.bf16.mxu1 %v1645_v11  ;;  %v707_v10 = vld [vmem:[%s5666_s12 + $0xce8] sm:$0xff]  ;;  %v709_v11 = vld [vmem:[%s5666_s12 + $0xcf8] sm:$0xff] }
 0x1cf   : > { %3016 = vmatpush1.bf16.msra.mxu0 %v1642_v14  ;;  %3180 = vmatpush1.bf16.msra.mxu1 %v1644_v15  ;;  %v1883_v14 = vunpack.c.l.s8.bf16 %v707_v10  ;;  %v1885_v15 = vunpack.c.l.s8.bf16 %v709_v11 }
 0x1d0   : > { %3017 = vmatprep.subr.bf16.mxu0 %v1667_v18  ;;  %3181 = vmatprep.subr.bf16.mxu1 %v1669_v19  ;;  %v706_v18 = vld [vmem:[%s5666_s12 + $0xce0] sm:$0xff]  ;;  %v708_v19 = vld [vmem:[%s5666_s12 + $0xcf0] sm:$0xff] }
 0x1d1   : > { %v1882_v20 = vunpack.c.l.s8.bf16 %v706_v18  ;;  %v1884_v21 = vunpack.c.l.s8.bf16 %v708_v19  ;;  %v1906_v26 = vunpack.c.h.s8.bf16 %v706_v18  ;;  %v1908_v27 = vunpack.c.h.s8.bf16 %v708_v19 }
 0x1d3   : > { %3018 = vmatpush1.bf16.msra.mxu0 %v1666_v22  ;;  %3182 = vmatpush1.bf16.msra.mxu1 %v1668_v23  ;;  %v1907_v22 = vunpack.c.h.s8.bf16 %v707_v10  ;;  %v1909_v23 = vunpack.c.h.s8.bf16 %v709_v11 }
 0x1d4   : > { %3019 = vmatprep.subr.bf16.mxu0 %v1691_v24  ;;  %3183 = vmatprep.subr.bf16.mxu1 %v1693_v25  ;;  %v731_v24 = vld [vmem:[%s5666_s12 + $0xda8] sm:$0xff]  ;;  %v733_v25 = vld [vmem:[%s5666_s12 + $0xdb8] sm:$0xff] }
 0x1d7   : > { %3020 = vmatpush1.bf16.msra.mxu0 %v1690_v28  ;;  %3184 = vmatpush1.bf16.msra.mxu1 %v1692_v29  ;;  %v1931_v28 = vunpack.c.l.s8.bf16 %v731_v24  ;;  %v1933_v29 = vunpack.c.l.s8.bf16 %v733_v25 }
 0x1d8   : > { %3021 = vmatprep.subr.bf16.mxu0 %v1715_v31  ;;  %3185 = vmatprep.subr.bf16.mxu1 %v1717_v32  ;;  %v730_v31 = vld [vmem:[%s5666_s12 + $0xda0] sm:$0xff]  ;;  %v732_v32 = vld [vmem:[%s5666_s12 + $0xdb0] sm:$0xff] }
 0x1d9   : > { %v1930_v33 = vunpack.c.l.s8.bf16 %v730_v31  ;;  %v1932_v34 = vunpack.c.l.s8.bf16 %v732_v32  ;;  %v1954_v40 = vunpack.c.h.s8.bf16 %v730_v31  ;;  %v1956_v41 = vunpack.c.h.s8.bf16 %v732_v32 }
 0x1db   : > { %3022 = vmatpush1.bf16.msra.mxu0 %v1714_v36  ;;  %3186 = vmatpush1.bf16.msra.mxu1 %v1716_v37  ;;  %v1955_v36 = vunpack.c.h.s8.bf16 %v731_v24  ;;  %v1957_v37 = vunpack.c.h.s8.bf16 %v733_v25 }
 0x1dc   : > { %3023 = vmatprep.subr.bf16.mxu0 %v1739_v38  ;;  %3187 = vmatprep.subr.bf16.mxu1 %v1741_v39  ;;  %v755_v38 = vld [vmem:[%s5666_s12 + $0xe68] sm:$0xff]  ;;  %v757_v39 = vld [vmem:[%s5666_s12 + $0xe78] sm:$0xff] }
 0x1df   : > { %3024 = vmatpush1.bf16.msra.mxu0 %v1738_v45  ;;  %3188 = vmatpush1.bf16.msra.mxu1 %v1740_v46  ;;  %v1979_v45 = vunpack.c.l.s8.bf16 %v755_v38  ;;  %v1981_v46 = vunpack.c.l.s8.bf16 %v757_v39 }
 0x1e0   : > { %3025 = vmatprep.subr.bf16.mxu0 %v1763_v47  ;;  %3189 = vmatprep.subr.bf16.mxu1 %v1765_v48  ;;  %v754_v47 = vld [vmem:[%s5666_s12 + $0xe60] sm:$0xff]  ;;  %v756_v48 = vld [vmem:[%s5666_s12 + $0xe70] sm:$0xff] }
 0x1e1   : > { %v1978_v49 = vunpack.c.l.s8.bf16 %v754_v47  ;;  %v1980_v50 = vunpack.c.l.s8.bf16 %v756_v48  ;;  %v2002_v54 = vunpack.c.h.s8.bf16 %v754_v47  ;;  %v2004_v55 = vunpack.c.h.s8.bf16 %v756_v48 }
 0x1e3   : > { %3026 = vmatpush1.bf16.msra.mxu0 %v1762_v61  ;;  %3190 = vmatpush1.bf16.msra.mxu1 %v1764_v51  ;;  %v2003_v61 = vunpack.c.h.s8.bf16 %v755_v38  ;;  %v2005_v51 = vunpack.c.h.s8.bf16 %v757_v39 }
 0x1e4   : > { %3027 = vmatprep.subr.bf16.mxu0 %v1787_v52  ;;  %3191 = vmatprep.subr.bf16.mxu1 %v1789_v53  ;;  %v779_v52 = vld [vmem:[%s5666_s12 + $0xf28] sm:$0xff]  ;;  %v781_v53 = vld [vmem:[%s5666_s12 + $0xf38] sm:$0xff] }
 0x1e7   : > { %3028 = vmatpush1.bf16.msra.mxu0 %v1786_v56  ;;  %3192 = vmatpush1.bf16.msra.mxu1 %v1788_v57  ;;  %v2027_v56 = vunpack.c.l.s8.bf16 %v779_v52  ;;  %v2029_v57 = vunpack.c.l.s8.bf16 %v781_v53 }
 0x1e8   : > { %3029 = vmatprep.subr.bf16.mxu0 %v1811_v58  ;;  %3193 = vmatprep.subr.bf16.mxu1 %v1813_v59  ;;  %v778_v58 = vld [vmem:[%s5666_s12 + $0xf20] sm:$0xff]  ;;  %v780_v59 = vld [vmem:[%s5666_s12 + $0xf30] sm:$0xff] }
 0x1e9   : > { %v2026_v62 = vunpack.c.l.s8.bf16 %v778_v58  ;;  %v2028_v63 = vunpack.c.l.s8.bf16 %v780_v59  ;;  %v2050_v4 = vunpack.c.h.s8.bf16 %v778_v58  ;;  %v2052_v5 = vunpack.c.h.s8.bf16 %v780_v59 }
 0x1eb   : > { %3030 = vmatpush1.bf16.msra.mxu0 %v1810_v0  ;;  %3194 = vmatpush1.bf16.msra.mxu1 %v1812_v1  ;;  %v2051_v0 = vunpack.c.h.s8.bf16 %v779_v52  ;;  %v2053_v1 = vunpack.c.h.s8.bf16 %v781_v53 }
 0x1ec   : > { %3040 = vmatprep.subr.bf16.mxu0 %v1835_v2  ;;  %3204 = vmatprep.subr.bf16.mxu1 %v1837_v3  ;;  %v803_v2 = vld [vmem:[%s5666_s12 + $0xfe8] sm:$0xff]  ;;  %v805_v3 = vld [vmem:[%s5666_s12 + $0xff8] sm:$0xff] }
 0x1ee   : > { %3032 = vmatmul.mubr.bf16.vlgmr.msra.gmra.mrb[4].mxu0 %v5780_v16  ;;  %3196 = vmatmul.mubr.bf16.vlgmr.msra.gmra.mrb[4].mxu1 %v5780_v16 }
 0x1ef   : > { %3041 = vmatpush1.bf16.msra.mxu0 %v1834_v6  ;;  %3205 = vmatpush1.bf16.msra.mxu1 %v1836_v7  ;;  %v2075_v6 = vunpack.c.l.s8.bf16 %v803_v2  ;;  %v2077_v7 = vunpack.c.l.s8.bf16 %v805_v3 }
 0x1f0   : > { %3042 = vmatprep.subr.bf16.mxu0 %v1859_v8  ;;  %3206 = vmatprep.subr.bf16.mxu1 %v1861_v9  ;;  %v802_v8 = vld [vmem:[%s5666_s12 + $0xfe0] sm:$0xff]  ;;  %v804_v9 = vld [vmem:[%s5666_s12 + $0xff0] sm:$0xff] }
 0x1f1   : > { %3072 = vmatprep.mubr.bf16.mxu0 %v5791_v43  ;;  %3236 = vmatprep.mubr.bf16.mxu1 %v5791_v43  ;;  %v2074_v10 = vunpack.c.l.s8.bf16 %v802_v8  ;;  %v2076_v11 = vunpack.c.l.s8.bf16 %v804_v9  ;;  %v2098_v18 = vunpack.c.h.s8.bf16 %v802_v8  ;;  %v2100_v19 = vunpack.c.h.s8.bf16 %v804_v9  ;;  %v925_v8 = vld [vmem:[%s5666_s12 + $0x13b8] sm:$0xff] }
 0x1f3   : > { %3043 = vmatpush1.bf16.msra.mxu0 %v1858_v12  ;;  %3207 = vmatpush1.bf16.msra.mxu1 %v1860_v13  ;;  %v2099_v12 = vunpack.c.h.s8.bf16 %v803_v2  ;;  %v2101_v13 = vunpack.c.h.s8.bf16 %v805_v3  ;;  %v4604_v2 = vlaneseq }
 0x1f4   : > { %3044 = vmatprep.subr.bf16.mxu0 %v1883_v14  ;;  %3208 = vmatprep.subr.bf16.mxu1 %v1885_v15  ;;  %v827_v14 = vld [vmem:[%s5666_s12 + $0x10a8] sm:$0xff]  ;;  %v829_v15 = vld [vmem:[%s5666_s12 + $0x10b8] sm:$0xff] }
 0x1f5   : > { %v5998_v9 = vshrl.u32 %v4604_v2, 7 }
 0x1f7   : > { %3045 = vmatpush1.bf16.msra.mxu0 %v1882_v20  ;;  %3209 = vmatpush1.bf16.msra.mxu1 %v1884_v21  ;;  %v2123_v20 = vunpack.c.l.s8.bf16 %v827_v14  ;;  %v2125_v21 = vunpack.c.l.s8.bf16 %v829_v15 }
 0x1f8   : > { %3046 = vmatprep.subr.bf16.mxu0 %v1907_v22  ;;  %3210 = vmatprep.subr.bf16.mxu1 %v1909_v23  ;;  %v826_v22 = vld [vmem:[%s5666_s12 + $0x10a0] sm:$0xff]  ;;  %v828_v23 = vld [vmem:[%s5666_s12 + $0x10b0] sm:$0xff] }
 0x1f9   : > { %v2122_v24 = vunpack.c.l.s8.bf16 %v826_v22  ;;  %v2124_v25 = vunpack.c.l.s8.bf16 %v828_v23  ;;  %v2146_v31 = vunpack.c.h.s8.bf16 %v826_v22  ;;  %v2148_v32 = vunpack.c.h.s8.bf16 %v828_v23  ;;  %v4598_v22 = vld [vmem:[%s5676_s27] sm:$0xff] }
 0x1fa   : > { %v6010_v23 = vsub.s32 1, %v5998_v9 }
 0x1fb   : > { %3047 = vmatpush1.bf16.msra.mxu0 %v1906_v26  ;;  %3211 = vmatpush1.bf16.msra.mxu1 %v1908_v27  ;;  %v2147_v26 = vunpack.c.h.s8.bf16 %v827_v14  ;;  %v2149_v27 = vunpack.c.h.s8.bf16 %v829_v15  ;;  %v922_v14 = vld [vmem:[%s5666_s12 + $0x13a0] sm:$0xff]  ;;  %v924_v15 = vld [vmem:[%s5666_s12 + $0x13b0] sm:$0xff] }
 0x1fc   : > { %3048 = vmatprep.subr.bf16.mxu0 %v1931_v28  ;;  %3212 = vmatprep.subr.bf16.mxu1 %v1933_v29  ;;  %v851_v28 = vld [vmem:[%s5666_s12 + $0x1168] sm:$0xff]  ;;  %v853_v29 = vld [vmem:[%s5666_s12 + $0x1178] sm:$0xff] }
 0x1ff   : > { %3049 = vmatpush1.bf16.msra.mxu0 %v1930_v33  ;;  %3213 = vmatpush1.bf16.msra.mxu1 %v1932_v34  ;;  %v2171_v33 = vunpack.c.l.s8.bf16 %v851_v28  ;;  %v2173_v34 = vunpack.c.l.s8.bf16 %v853_v29 }
 0x200   : > { %3050 = vmatprep.subr.bf16.mxu0 %v1955_v36  ;;  %3214 = vmatprep.subr.bf16.mxu1 %v1957_v37  ;;  %v850_v36 = vld [vmem:[%s5666_s12 + $0x1160] sm:$0xff]  ;;  %v852_v37 = vld [vmem:[%s5666_s12 + $0x1170] sm:$0xff] }
 0x201   : > { %v2170_v38 = vunpack.c.l.s8.bf16 %v850_v36  ;;  %v2172_v39 = vunpack.c.l.s8.bf16 %v852_v37  ;;  %v2194_v47 = vunpack.c.h.s8.bf16 %v850_v36  ;;  %v2196_v48 = vunpack.c.h.s8.bf16 %v852_v37 }
 0x202   : > { %v2338_v36 = vunpack.c.h.s8.bf16 %v922_v14  ;;  %v2340_v37 = vunpack.c.h.s8.bf16 %v924_v15 }
 0x203   : > { %3051 = vmatpush1.bf16.msra.mxu0 %v1954_v40  ;;  %3215 = vmatpush1.bf16.msra.mxu1 %v1956_v41  ;;  %v2195_v40 = vunpack.c.h.s8.bf16 %v851_v28  ;;  %v2197_v41 = vunpack.c.h.s8.bf16 %v853_v29  ;;  %v947_v28 = vld [vmem:[%s5666_s12 + $0x1468] sm:$0xff]  ;;  %v949_v29 = vld [vmem:[%s5666_s12 + $0x1478] sm:$0xff] }
 0x204   : > { %3052 = vmatprep.subr.bf16.mxu0 %v1979_v45  ;;  %3216 = vmatprep.subr.bf16.mxu1 %v1981_v46  ;;  %v875_v45 = vld [vmem:[%s5666_s12 + $0x1228] sm:$0xff]  ;;  %v877_v46 = vld [vmem:[%s5666_s12 + $0x1238] sm:$0xff]  ;;  %v2387_v2 = vunpack.c.h.s8.bf16 %v947_v28 }
 0x207   : > { %3053 = vmatpush1.bf16.msra.mxu0 %v1978_v49  ;;  %3217 = vmatpush1.bf16.msra.mxu1 %v1980_v50  ;;  %v2219_v49 = vunpack.c.l.s8.bf16 %v875_v45  ;;  %v2221_v50 = vunpack.c.l.s8.bf16 %v877_v46 }
 0x208   : > { %3054 = vmatprep.subr.bf16.mxu0 %v2003_v61  ;;  %3218 = vmatprep.subr.bf16.mxu1 %v2005_v51  ;;  %v874_v61 = vld [vmem:[%s5666_s12 + $0x1220] sm:$0xff]  ;;  %v876_v51 = vld [vmem:[%s5666_s12 + $0x1230] sm:$0xff] }
 0x209   : > { %v2218_v52 = vunpack.c.l.s8.bf16 %v874_v61  ;;  %v2220_v53 = vunpack.c.l.s8.bf16 %v876_v51  ;;  %v2242_v58 = vunpack.c.h.s8.bf16 %v874_v61  ;;  %v2244_v59 = vunpack.c.h.s8.bf16 %v876_v51 }
 0x20b   : > { %3055 = vmatpush1.bf16.msra.mxu0 %v2002_v54  ;;  %3219 = vmatpush1.bf16.msra.mxu1 %v2004_v55  ;;  %v2243_v54 = vunpack.c.h.s8.bf16 %v875_v45  ;;  %v2245_v55 = vunpack.c.h.s8.bf16 %v877_v46  ;;  %v946_v45 = vld [vmem:[%s5666_s12 + $0x1460] sm:$0xff]  ;;  %v948_v46 = vld [vmem:[%s5666_s12 + $0x1470] sm:$0xff] }
 0x20c   : > { %3056 = vmatprep.subr.bf16.mxu0 %v2027_v56  ;;  %3220 = vmatprep.subr.bf16.mxu1 %v2029_v57  ;;  %v899_v56 = vld [vmem:[%s5666_s12 + $0x12e8] sm:$0xff]  ;;  %v901_v57 = vld [vmem:[%s5666_s12 + $0x12f8] sm:$0xff] }
 0x20f   : > { %3057 = vmatpush1.bf16.msra.mxu0 %v2026_v62  ;;  %3221 = vmatpush1.bf16.msra.mxu1 %v2028_v63  ;;  %v2267_v62 = vunpack.c.l.s8.bf16 %v899_v56  ;;  %v2269_v63 = vunpack.c.l.s8.bf16 %v901_v57 }
 0x210   : > { %3058 = vmatprep.subr.bf16.mxu0 %v2051_v0  ;;  %3222 = vmatprep.subr.bf16.mxu1 %v2053_v1  ;;  %v898_v0 = vld [vmem:[%s5666_s12 + $0x12e0] sm:$0xff]  ;;  %v900_v1 = vld [vmem:[%s5666_s12 + $0x12f0] sm:$0xff] }
 0x211   : > { %v2266_v3 = vunpack.c.l.s8.bf16 %v898_v0 }
 0x213   : > { %3059 = vmatpush1.bf16.msra.mxu0 %v2050_v4  ;;  %3223 = vmatpush1.bf16.msra.mxu1 %v2052_v5  ;;  %v2268_v4 = vunpack.c.l.s8.bf16 %v900_v1  ;;  %v2291_v5 = vunpack.c.h.s8.bf16 %v899_v56 }
 0x214   : > { %3060 = vmatprep.subr.bf16.mxu0 %v2075_v6  ;;  %3224 = vmatprep.subr.bf16.mxu1 %v2077_v7  ;;  %v2293_v6 = vunpack.c.h.s8.bf16 %v901_v57  ;;  %v923_v7 = vld [vmem:[%s5666_s12 + $0x13a8] sm:$0xff] }
 0x217   : > { %3061 = vmatpush1.bf16.msra.mxu0 %v2074_v10  ;;  %3225 = vmatpush1.bf16.msra.mxu1 %v2076_v11  ;;  %v2290_v10 = vunpack.c.h.s8.bf16 %v898_v0  ;;  %v2292_v11 = vunpack.c.h.s8.bf16 %v900_v1 }
 0x218   : > { %3062 = vmatprep.subr.bf16.mxu0 %v2099_v12  ;;  %3226 = vmatprep.subr.bf16.mxu1 %v2101_v13  ;;  %v2315_v12 = vunpack.c.l.s8.bf16 %v923_v7  ;;  %v2317_v13 = vunpack.c.l.s8.bf16 %v925_v8 }
 0x21b   : > { %3063 = vmatpush1.bf16.msra.mxu0 %v2098_v18  ;;  %3227 = vmatpush1.bf16.msra.mxu1 %v2100_v19  ;;  %v6003_v18 = vsub.s32 0, %v5998_v9  ;;  %v6006_v19 = vsub.s32 2, %v5998_v9 }
 0x21c   : > { %3064 = vmatprep.subr.bf16.mxu0 %v2123_v20  ;;  %3228 = vmatprep.subr.bf16.mxu1 %v2125_v21  ;;  %v2314_v20 = vunpack.c.l.s8.bf16 %v922_v14  ;;  %v2316_v21 = vunpack.c.l.s8.bf16 %v924_v15  ;;  %v972_v14 = vld [vmem:[%s5666_s12 + $0x1530] sm:$0xff] }
 0x21f   : > { %3065 = vmatpush1.bf16.msra.mxu0 %v2122_v24  ;;  %3229 = vmatpush1.bf16.msra.mxu1 %v2124_v25  ;;  %v6013_v24 = vsub.s32 3, %v5998_v9  ;;  %v2339_v25 = vunpack.c.h.s8.bf16 %v923_v7  ;;  %v973_v7 = vld [vmem:[%s5666_s12 + $0x1538] sm:$0xff] }
 0x220   : > { %3066 = vmatprep.subr.bf16.mxu0 %v2147_v26  ;;  %3230 = vmatprep.subr.bf16.mxu1 %v2149_v27  ;;  %v2341_v26 = vunpack.c.h.s8.bf16 %v925_v8  ;;  %v4748_v27 = vld [vmem:[%s6017_s8] sm:$0xff]  ;;  %v2386_v8 = vunpack.c.h.s8.bf16 %v946_v45 }
 0x223   : > { %3067 = vmatpush1.bf16.msra.mxu0 %v2146_v31  ;;  %3231 = vmatpush1.bf16.msra.mxu1 %v2148_v32  ;;  %v4607_v31 = vrot.slane %v4598_v22, %v6003_v18  ;;  %v4615_v32 = vrot.slane %v4598_v22, %v6006_v19 }
 0x224   : > { %3068 = vmatprep.subr.bf16.mxu0 %v2171_v33  ;;  %3232 = vmatprep.subr.bf16.mxu1 %v2173_v34  ;;  %v4611_v33 = vrot.slane %v4598_v22, %v6010_v23  ;;  %v4619_v34 = vrot.slane %v4598_v22, %v6013_v24  ;;  %v2437_v22 = vunpack.c.h.s8.bf16 %v973_v7 }
 0x227   : > { %3069 = vmatpush1.bf16.msra.mxu0 %v2170_v38  ;;  %3233 = vmatpush1.bf16.msra.mxu1 %v2172_v39  ;;  %v4757_v38 = vrot.slane %v4748_v27, %v6003_v18  ;;  %v4765_v39 = vrot.slane %v4748_v27, %v6006_v19 }
 0x228   : > { %3070 = vmatprep.subr.bf16.mxu0 %v2195_v40  ;;  %3234 = vmatprep.subr.bf16.mxu1 %v2197_v41  ;;  %v2363_v40 = vunpack.c.l.s8.bf16 %v947_v28  ;;  %v2365_v41 = vunpack.c.l.s8.bf16 %v949_v29  ;;  %v2436_v28 = vunpack.c.h.s8.bf16 %v972_v14 }
 0x22b   : > { %3071 = vmatpush1.bf16.msra.mxu0 %v2194_v47  ;;  %3235 = vmatpush1.bf16.msra.mxu1 %v2196_v48 }
 0x22c   : > { %3081 = vmatprep.subr.bf16.mxu0 %v2219_v49  ;;  %3245 = vmatprep.subr.bf16.mxu1 %v2221_v50  ;;  %v4761_v49 = vrot.slane %v4748_v27, %v6010_v23  ;;  %v4769_v50 = vrot.slane %v4748_v27, %v6013_v24 }
 0x22e   : > { %3073 = vmatmul.mubr.bf16.vlgmr.msra.gmra.mrb[4].mxu0 %v5829_v60  ;;  %3237 = vmatmul.mubr.bf16.vlgmr.msra.gmra.mrb[4].mxu1 %v5829_v60 }
 0x22f   : > { %3082 = vmatpush1.bf16.msra.mxu0 %v2218_v52  ;;  %3246 = vmatpush1.bf16.msra.mxu1 %v2220_v53 }
 0x230   : > { %3083 = vmatprep.subr.bf16.mxu0 %v2243_v54  ;;  %3247 = vmatprep.subr.bf16.mxu1 %v2245_v55 }
 0x231   : > { %3113 = vmatprep.mubr.bf16.mxu0 %v5840_v17  ;;  %3277 = vmatprep.mubr.bf16.mxu1 %v5840_v17 }
 0x233   : > { %3084 = vmatpush1.bf16.msra.mxu0 %v2242_v58  ;;  %3248 = vmatpush1.bf16.msra.mxu1 %v2244_v59  ;;  %v2362_v58 = vunpack.c.l.s8.bf16 %v946_v45  ;;  %v2364_v59 = vunpack.c.l.s8.bf16 %v948_v46 }
 0x234   : > { %3085 = vmatprep.subr.bf16.mxu0 %v2267_v62  ;;  %3249 = vmatprep.subr.bf16.mxu1 %v2269_v63 }
 0x237   : > { %3086 = vmatpush1.bf16.msra.mxu0 %v2266_v3  ;;  %3250 = vmatpush1.bf16.msra.mxu1 %v2268_v4  ;;  %v2389_v3 = vunpack.c.h.s8.bf16 %v949_v29 }
 0x238   : > { %3087 = vmatprep.subr.bf16.mxu0 %v2291_v5  ;;  %3251 = vmatprep.subr.bf16.mxu1 %v2293_v6  ;;  %v971_v6 = vld [vmem:[%s5666_s12 + $0x1528] sm:$0xff] }
 0x23b   : > { %3088 = vmatpush1.bf16.msra.mxu0 %v2290_v10  ;;  %3252 = vmatpush1.bf16.msra.mxu1 %v2292_v11  ;;  %v2388_v10 = vunpack.c.h.s8.bf16 %v948_v46  ;;  %v2411_v11 = vunpack.c.l.s8.bf16 %v971_v6  ;;  %v1019_v46 = vld [vmem:[%s5666_s12 + $0x16a8] sm:$0xff] }
 0x23c   : > { %3089 = vmatprep.subr.bf16.mxu0 %v2315_v12  ;;  %3253 = vmatprep.subr.bf16.mxu1 %v2317_v13  ;;  %v2413_v12 = vunpack.c.l.s8.bf16 %v973_v7  ;;  %v970_v13 = vld [vmem:[%s5666_s12 + $0x1520] sm:$0xff]  ;;  %v303_v7 = vld [vmem:[%s5666_s12 + $0x48] sm:$0xff] }
 0x23d   : > { %v2410_v15 = vunpack.c.l.s8.bf16 %v970_v13  ;;  %v2434_v27 = vunpack.c.h.s8.bf16 %v970_v13 }
 0x23f   : > { %3090 = vmatpush1.bf16.msra.mxu0 %v2314_v20  ;;  %3254 = vmatpush1.bf16.msra.mxu1 %v2316_v21  ;;  %v2412_v20 = vunpack.c.l.s8.bf16 %v972_v14  ;;  %v2435_v21 = vunpack.c.h.s8.bf16 %v971_v6  ;;  %v302_v14 = vld [vmem:[%s5666_s12 + $0x40] sm:$0xff] }
 0x240   : > { %3091 = vmatprep.subr.bf16.mxu0 %v2339_v25  ;;  %3255 = vmatprep.subr.bf16.mxu1 %v2341_v26  ;;  %v995_v25 = vld [vmem:[%s5666_s12 + $0x15e8] sm:$0xff]  ;;  %v997_v26 = vld [vmem:[%s5666_s12 + $0x15f8] sm:$0xff] }
 0x241   : > { %v2787_v47 = vpop.f32.mrb[0].mxu0  ;;  %v2951_v48 = vpop.f32.mrb[0].mxu1  ;;  %v2485_v45 = vunpack.c.h.s8.bf16 %v997_v26 }
 0x242   : > { %v4724_v61 = vmul.f32 %v4607_v31, %v2787_v47  ;;  %v4726_v51 = vmul.f32 %v4615_v32, %v2951_v48  ;;  %v2789_v52 = vpop.f32.mrb[1].mxu0  ;;  %v2953_v53 = vpop.f32.mrb[1].mxu1  ;;  %v2459_v31 = vunpack.c.l.s8.bf16 %v995_v25  ;;  %v2461_v32 = vunpack.c.l.s8.bf16 %v997_v26  ;;  %v1021_v47 = vld [vmem:[%s5666_s12 + $0x16b8] sm:$0xff]  ;;  %v327_v26 = vld [vmem:[%s5666_s12 + $0x108] sm:$0xff] }
 0x243   : > { %v4725_v54 = vmul.f32 %v4611_v33, %v2789_v52  ;;  %v4727_v55 = vmul.f32 %v4619_v34, %v2953_v53  ;;  %v2791_v56 = vpop.f32.mrb[2].mxu0  ;;  %v2955_v57 = vpop.f32.mrb[2].mxu1  ;;  %3092 = vmatpush1.bf16.msra.mxu0 %v2338_v36  ;;  %3256 = vmatpush1.bf16.msra.mxu1 %v2340_v37  ;;  %v994_v33 = vld [vmem:[%s5666_s12 + $0x15e0] sm:$0xff]  ;;  %v996_v34 = vld [vmem:[%s5666_s12 + $0x15f0] sm:$0xff] }
 0x244   : > { %v4874_v62 = vadd.f32 %v4757_v38, %v4724_v61  ;;  %v4876_v63 = vadd.f32 %v4765_v39, %v4726_v51  ;;  %v2792_v0 = vpop.f32.mrb[3].mxu0  ;;  %v2956_v1 = vpop.f32.mrb[3].mxu1  ;;  %3093 = vmatprep.subr.bf16.mxu0 %v2363_v40  ;;  %3257 = vmatprep.subr.bf16.mxu1 %v2365_v41  ;;  %v2458_v39 = vunpack.c.l.s8.bf16 %v994_v33  ;;  %v2460_v40 = vunpack.c.l.s8.bf16 %v996_v34  ;;  %v1018_v51 = vld [vmem:[%s5666_s12 + $0x16a0] sm:$0xff]  ;;  %v1020_v52 = vld [vmem:[%s5666_s12 + $0x16b0] sm:$0xff]  ;;  %v1043_v57 = vld [vmem:[%s5666_s12 + $0x1768] sm:$0xff] }
 0x245   : > { %v4875_v4 = vadd.f32 %v4761_v49, %v4725_v54  ;;  %v4877_v5 = vadd.f32 %v4769_v50, %v4727_v55  ;;  %v2483_v41 = vunpack.c.h.s8.bf16 %v995_v25  ;;  %v2482_v48 = vunpack.c.h.s8.bf16 %v994_v33  ;;  %v1042_v1 = vld [vmem:[%s5666_s12 + $0x1760] sm:$0xff] }
 0x246   : > { %5286 = vtanh.f32 %v4874_v62  ;;  %v2484_v49 = vunpack.c.h.s8.bf16 %v996_v34  ;;  %v2507_v50 = vunpack.c.l.s8.bf16 %v1019_v46  ;;  %v2509_v61 = vunpack.c.l.s8.bf16 %v1021_v47  ;;  %v326_v33 = vld [vmem:[%s5666_s12 + $0x100] sm:$0xff]  ;;  %v328_v34 = vld [vmem:[%s5666_s12 + $0x110] sm:$0xff] }
 0x247   : > { %5288 = vtanh.f32 %v4876_v63  ;;  %3094 = vmatpush1.bf16.msra.mxu0 %v2362_v58  ;;  %3258 = vmatpush1.bf16.msra.mxu1 %v2364_v59  ;;  %v2506_v53 = vunpack.c.l.s8.bf16 %v1018_v51  ;;  %v2508_v54 = vunpack.c.l.s8.bf16 %v1020_v52  ;;  %v2531_v55 = vunpack.c.h.s8.bf16 %v1019_v46  ;;  %v1045_v58 = vld [vmem:[%s5666_s12 + $0x1778] sm:$0xff] }
 0x248   : > { %5290 = vtanh.f32 %v4875_v4  ;;  %3095 = vmatprep.subr.bf16.mxu0 %v2387_v2  ;;  %3259 = vmatprep.subr.bf16.mxu1 %v2389_v3  ;;  %v2533_v56 = vunpack.c.h.s8.bf16 %v1021_v47  ;;  %v2530_v59 = vunpack.c.h.s8.bf16 %v1018_v51  ;;  %v2532_v62 = vunpack.c.h.s8.bf16 %v1020_v52  ;;  %v1044_v2 = vld [vmem:[%s5666_s12 + $0x1770] sm:$0xff] }
 0x249   : > { %5292 = vtanh.f32 %v4877_v5  ;;  %v2555_v63 = vunpack.c.l.s8.bf16 %v1043_v57  ;;  %v2557_v0 = vunpack.c.l.s8.bf16 %v1045_v58  ;;  %v2554_v3 = vunpack.c.l.s8.bf16 %v1042_v1 }
 0x24a   : > { %v2556_v4 = vunpack.c.l.s8.bf16 %v1044_v2  ;;  %v2579_v5 = vunpack.c.h.s8.bf16 %v1043_v57  ;;  %v2581_v6 = vunpack.c.h.s8.bf16 %v1045_v58  ;;  %v1144_v46 = vunpack.c.h.s8.bf16 %v328_v34 }
 0x24b   : > { %3096 = vmatpush1.bf16.msra.mxu0 %v2386_v8  ;;  %3260 = vmatpush1.bf16.msra.mxu1 %v2388_v10  ;;  %v305_v8 = vld [vmem:[%s5666_s12 + $0x58] sm:$0xff]  ;;  %v2578_v10 = vunpack.c.h.s8.bf16 %v1042_v1 }
 0x24c   : > { %3097 = vmatprep.subr.bf16.mxu0 %v2411_v11  ;;  %3261 = vmatprep.subr.bf16.mxu1 %v2413_v12  ;;  %v2580_v11 = vunpack.c.h.s8.bf16 %v1044_v2  ;;  %v1071_v12 = vunpack.c.l.s8.bf16 %v303_v7  ;;  %v1073_v13 = vunpack.c.l.s8.bf16 %v305_v8  ;;  %v1097_v25 = vunpack.c.h.s8.bf16 %v305_v8 }
 0x24f   : > { %3098 = vmatpush1.bf16.msra.mxu0 %v2410_v15  ;;  %3262 = vmatpush1.bf16.msra.mxu1 %v2412_v20  ;;  %v304_v15 = vld [vmem:[%s5666_s12 + $0x50] sm:$0xff]  ;;  %v1070_v20 = vunpack.c.l.s8.bf16 %v302_v14 }
 0x250   : > { %v5287_v29 = vpop.eup %5286  ;;  %3099 = vmatprep.subr.bf16.mxu0 %v2435_v21  ;;  %3263 = vmatprep.subr.bf16.mxu1 %v2437_v22  ;;  %v1072_v21 = vunpack.c.l.s8.bf16 %v304_v15  ;;  %v1095_v22 = vunpack.c.h.s8.bf16 %v303_v7 }
 0x251   : > { %v5289_v36 = vpop.eup %5288  ;;  %4922 = vst [vmem:[%s6052_s11] sm:$0xff] %v5287_v29  ;;  %v1096_v29 = vunpack.c.h.s8.bf16 %v304_v15 }
 0x252   : > { %v5291_v37 = vpop.eup %5290  ;;  %4924 = vst [vmem:[%s6052_s11 + $0x10] sm:$0xff] %v5289_v36  ;;  %v1118_v36 = vunpack.c.l.s8.bf16 %v326_v33 }
 0x253   : > { %v5293_v38 = vpop.eup %5292  ;;  %4923 = vst [vmem:[%s6052_s11 + $0x8] sm:$0xff] %v5291_v37  ;;  %3100 = vmatpush1.bf16.msra.mxu0 %v2434_v27  ;;  %3264 = vmatpush1.bf16.msra.mxu1 %v2436_v28  ;;  %v329_v27 = vld [vmem:[%s5666_s12 + $0x118] sm:$0xff]  ;;  %v1094_v28 = vunpack.c.h.s8.bf16 %v302_v14  ;;  %v1120_v37 = vunpack.c.l.s8.bf16 %v328_v34 }
 0x254   : > { %4925 = vst [vmem:[%s6052_s11 + $0x18] sm:$0xff] %v5293_v38  ;;  %3101 = vmatprep.subr.bf16.mxu0 %v2459_v31  ;;  %3265 = vmatprep.subr.bf16.mxu1 %v2461_v32  ;;  %v1119_v31 = vunpack.c.l.s8.bf16 %v327_v26  ;;  %v1121_v32 = vunpack.c.l.s8.bf16 %v329_v27  ;;  %v1143_v38 = vunpack.c.h.s8.bf16 %v327_v26 }
 0x257   : > { %3102 = vmatpush1.bf16.msra.mxu0 %v2458_v39  ;;  %3266 = vmatpush1.bf16.msra.mxu1 %v2460_v40  ;;  %v1145_v39 = vunpack.c.h.s8.bf16 %v329_v27  ;;  %v351_v40 = vld [vmem:[%s5666_s12 + $0x1c8] sm:$0xff] }
 0x258   : > { %3103 = vmatprep.subr.bf16.mxu0 %v2483_v41  ;;  %3267 = vmatprep.subr.bf16.mxu1 %v2485_v45  ;;  %v353_v41 = vld [vmem:[%s5666_s12 + $0x1d8] sm:$0xff]  ;;  %v1142_v45 = vunpack.c.h.s8.bf16 %v326_v33  ;;  %v1167_v47 = vunpack.c.l.s8.bf16 %v351_v40  ;;  %v1191_v52 = vunpack.c.h.s8.bf16 %v351_v40 }
 0x25b   : > { %3104 = vmatpush1.bf16.msra.mxu0 %v2482_v48  ;;  %3268 = vmatpush1.bf16.msra.mxu1 %v2484_v49  ;;  %v1169_v48 = vunpack.c.l.s8.bf16 %v353_v41  ;;  %v350_v49 = vld [vmem:[%s5666_s12 + $0x1c0] sm:$0xff] }
 0x25c   : > { %3105 = vmatprep.subr.bf16.mxu0 %v2507_v50  ;;  %3269 = vmatprep.subr.bf16.mxu1 %v2509_v61  ;;  %v352_v50 = vld [vmem:[%s5666_s12 + $0x1d0] sm:$0xff]  ;;  %v1166_v61 = vunpack.c.l.s8.bf16 %v350_v49 }
 0x25d   : > { %v1168_v51 = vunpack.c.l.s8.bf16 %v352_v50  ;;  %v1192_v57 = vunpack.c.h.s8.bf16 %v352_v50 }
 0x25f   : > { %3106 = vmatpush1.bf16.msra.mxu0 %v2506_v53  ;;  %3270 = vmatpush1.bf16.msra.mxu1 %v2508_v54  ;;  %v1193_v53 = vunpack.c.h.s8.bf16 %v353_v41  ;;  %v375_v54 = vld [vmem:[%s5666_s12 + $0x288] sm:$0xff] }
 0x260   : > { %3107 = vmatprep.subr.bf16.mxu0 %v2531_v55  ;;  %3271 = vmatprep.subr.bf16.mxu1 %v2533_v56  ;;  %v377_v55 = vld [vmem:[%s5666_s12 + $0x298] sm:$0xff]  ;;  %v1190_v56 = vunpack.c.h.s8.bf16 %v350_v49  ;;  %v1215_v58 = vunpack.c.l.s8.bf16 %v375_v54  ;;  %v1239_v2 = vunpack.c.h.s8.bf16 %v375_v54 }
 0x263   : > { %3108 = vmatpush1.bf16.msra.mxu0 %v2530_v59  ;;  %3272 = vmatpush1.bf16.msra.mxu1 %v2532_v62  ;;  %v1217_v59 = vunpack.c.l.s8.bf16 %v377_v55  ;;  %v374_v62 = vld [vmem:[%s5666_s12 + $0x280] sm:$0xff] }
 0x264   : > { %3109 = vmatprep.subr.bf16.mxu0 %v2555_v63  ;;  %3273 = vmatprep.subr.bf16.mxu1 %v2557_v0  ;;  %v376_v63 = vld [vmem:[%s5666_s12 + $0x290] sm:$0xff]  ;;  %v1214_v0 = vunpack.c.l.s8.bf16 %v374_v62 }
 0x265   : > { %v1216_v1 = vunpack.c.l.s8.bf16 %v376_v63  ;;  %v1240_v7 = vunpack.c.h.s8.bf16 %v376_v63 }
 0x267   : > { %3110 = vmatpush1.bf16.msra.mxu0 %v2554_v3  ;;  %3274 = vmatpush1.bf16.msra.mxu1 %v2556_v4  ;;  %v1241_v3 = vunpack.c.h.s8.bf16 %v377_v55  ;;  %v399_v4 = vld [vmem:[%s5666_s12 + $0x348] sm:$0xff] }
 0x268   : > { %3111 = vmatprep.subr.bf16.mxu0 %v2579_v5  ;;  %3275 = vmatprep.subr.bf16.mxu1 %v2581_v6  ;;  %v401_v5 = vld [vmem:[%s5666_s12 + $0x358] sm:$0xff]  ;;  %v1238_v6 = vunpack.c.h.s8.bf16 %v374_v62  ;;  %v1263_v8 = vunpack.c.l.s8.bf16 %v399_v4  ;;  %v1287_v15 = vunpack.c.h.s8.bf16 %v399_v4 }
 0x26b   : > { %3112 = vmatpush1.bf16.msra.mxu0 %v2578_v10  ;;  %3276 = vmatpush1.bf16.msra.mxu1 %v2580_v11  ;;  %v1265_v10 = vunpack.c.l.s8.bf16 %v401_v5  ;;  %v398_v11 = vld [vmem:[%s5666_s12 + $0x340] sm:$0xff] }
 0x26c   : > { %3286 = vmatprep.subr.bf16.mxu0 %v1071_v12  ;;  %3450 = vmatprep.subr.bf16.mxu1 %v1073_v13  ;;  %v400_v12 = vld [vmem:[%s5666_s12 + $0x350] sm:$0xff]  ;;  %v1262_v13 = vunpack.c.l.s8.bf16 %v398_v11 }
 0x26d   : > { %v1264_v14 = vunpack.c.l.s8.bf16 %v400_v12  ;;  %v1288_v26 = vunpack.c.h.s8.bf16 %v400_v12 }
 0x26e   : > { %3114 = vmatmul.mubr.bf16.vlgmr.msra.gmra.mrb[4].mxu0 %v5878_v44  ;;  %3278 = vmatmul.mubr.bf16.vlgmr.msra.gmra.mrb[4].mxu1 %v5878_v44 }
 0x26f   : > { %3287 = vmatpush1.bf16.msra.mxu0 %v1070_v20  ;;  %3451 = vmatpush1.bf16.msra.mxu1 %v1072_v21  ;;  %v1289_v20 = vunpack.c.h.s8.bf16 %v401_v5  ;;  %v423_v21 = vld [vmem:[%s5666_s12 + $0x408] sm:$0xff] }
 0x270   : > { %3288 = vmatprep.subr.bf16.mxu0 %v1095_v22  ;;  %3452 = vmatprep.subr.bf16.mxu1 %v1097_v25  ;;  %v425_v22 = vld [vmem:[%s5666_s12 + $0x418] sm:$0xff]  ;;  %v1286_v25 = vunpack.c.h.s8.bf16 %v398_v11  ;;  %v1311_v27 = vunpack.c.l.s8.bf16 %v423_v21  ;;  %v1335_v34 = vunpack.c.h.s8.bf16 %v423_v21 }
 0x271   : > { %3318 = vmatprep.mubr.bf16.mxu0 %v5701_v35  ;;  %3482 = vmatprep.mubr.bf16.mxu1 %v5701_v35 }
 0x273   : > { %3289 = vmatpush1.bf16.msra.mxu0 %v1094_v28  ;;  %3453 = vmatpush1.bf16.msra.mxu1 %v1096_v29  ;;  %v1313_v28 = vunpack.c.l.s8.bf16 %v425_v22  ;;  %v422_v29 = vld [vmem:[%s5666_s12 + $0x400] sm:$0xff] }
 0x274   : > { %3290 = vmatprep.subr.bf16.mxu0 %v1119_v31  ;;  %3454 = vmatprep.subr.bf16.mxu1 %v1121_v32  ;;  %v424_v31 = vld [vmem:[%s5666_s12 + $0x410] sm:$0xff]  ;;  %v1310_v32 = vunpack.c.l.s8.bf16 %v422_v29 }
 0x275   : > { %v1312_v33 = vunpack.c.l.s8.bf16 %v424_v31  ;;  %v1336_v40 = vunpack.c.h.s8.bf16 %v424_v31 }
 0x277   : > { %3291 = vmatpush1.bf16.msra.mxu0 %v1118_v36  ;;  %3455 = vmatpush1.bf16.msra.mxu1 %v1120_v37  ;;  %v1337_v36 = vunpack.c.h.s8.bf16 %v425_v22  ;;  %v447_v37 = vld [vmem:[%s5666_s12 + $0x4c8] sm:$0xff] }
 0x278   : > { %3292 = vmatprep.subr.bf16.mxu0 %v1143_v38  ;;  %3456 = vmatprep.subr.bf16.mxu1 %v1145_v39  ;;  %v449_v38 = vld [vmem:[%s5666_s12 + $0x4d8] sm:$0xff]  ;;  %v1334_v39 = vunpack.c.h.s8.bf16 %v422_v29  ;;  %v1359_v41 = vunpack.c.l.s8.bf16 %v447_v37  ;;  %v1383_v50 = vunpack.c.h.s8.bf16 %v447_v37 }
 0x27b   : > { %3293 = vmatpush1.bf16.msra.mxu0 %v1142_v45  ;;  %3457 = vmatpush1.bf16.msra.mxu1 %v1144_v46  ;;  %v1361_v45 = vunpack.c.l.s8.bf16 %v449_v38  ;;  %v446_v46 = vld [vmem:[%s5666_s12 + $0x4c0] sm:$0xff] }
 0x27c   : > { %3294 = vmatprep.subr.bf16.mxu0 %v1167_v47  ;;  %3458 = vmatprep.subr.bf16.mxu1 %v1169_v48  ;;  %v448_v47 = vld [vmem:[%s5666_s12 + $0x4d0] sm:$0xff]  ;;  %v1358_v48 = vunpack.c.l.s8.bf16 %v446_v46 }
 0x27d   : > { %v1360_v49 = vunpack.c.l.s8.bf16 %v448_v47  ;;  %v1384_v54 = vunpack.c.h.s8.bf16 %v448_v47 }
 0x27f   : > { %3295 = vmatpush1.bf16.msra.mxu0 %v1166_v61  ;;  %3459 = vmatpush1.bf16.msra.mxu1 %v1168_v51  ;;  %v1385_v61 = vunpack.c.h.s8.bf16 %v449_v38  ;;  %v471_v51 = vld [vmem:[%s5666_s12 + $0x588] sm:$0xff] }
 0x280   : > { %3296 = vmatprep.subr.bf16.mxu0 %v1191_v52  ;;  %3460 = vmatprep.subr.bf16.mxu1 %v1193_v53  ;;  %v473_v52 = vld [vmem:[%s5666_s12 + $0x598] sm:$0xff]  ;;  %v1382_v53 = vunpack.c.h.s8.bf16 %v446_v46  ;;  %v1407_v55 = vunpack.c.l.s8.bf16 %v471_v51  ;;  %v1431_v63 = vunpack.c.h.s8.bf16 %v471_v51 }
 0x283   : > { %3297 = vmatpush1.bf16.msra.mxu0 %v1190_v56  ;;  %3461 = vmatpush1.bf16.msra.mxu1 %v1192_v57  ;;  %v1409_v56 = vunpack.c.l.s8.bf16 %v473_v52  ;;  %v470_v57 = vld [vmem:[%s5666_s12 + $0x580] sm:$0xff] }
 0x284   : > { %3298 = vmatprep.subr.bf16.mxu0 %v1215_v58  ;;  %3462 = vmatprep.subr.bf16.mxu1 %v1217_v59  ;;  %v472_v58 = vld [vmem:[%s5666_s12 + $0x590] sm:$0xff]  ;;  %v1406_v59 = vunpack.c.l.s8.bf16 %v470_v57 }
 0x285   : > { %v1408_v62 = vunpack.c.l.s8.bf16 %v472_v58  ;;  %v1432_v4 = vunpack.c.h.s8.bf16 %v472_v58 }
 0x287   : > { %3299 = vmatpush1.bf16.msra.mxu0 %v1214_v0  ;;  %3463 = vmatpush1.bf16.msra.mxu1 %v1216_v1  ;;  %v1433_v0 = vunpack.c.h.s8.bf16 %v473_v52  ;;  %v495_v1 = vld [vmem:[%s5666_s12 + $0x648] sm:$0xff] }
 0x288   : > { %3300 = vmatprep.subr.bf16.mxu0 %v1239_v2  ;;  %3464 = vmatprep.subr.bf16.mxu1 %v1241_v3  ;;  %v497_v2 = vld [vmem:[%s5666_s12 + $0x658] sm:$0xff]  ;;  %v1430_v3 = vunpack.c.h.s8.bf16 %v470_v57  ;;  %v1455_v5 = vunpack.c.l.s8.bf16 %v495_v1  ;;  %v1479_v12 = vunpack.c.h.s8.bf16 %v495_v1 }
 0x28b   : > { %3301 = vmatpush1.bf16.msra.mxu0 %v1238_v6  ;;  %3465 = vmatpush1.bf16.msra.mxu1 %v1240_v7  ;;  %v1457_v6 = vunpack.c.l.s8.bf16 %v497_v2  ;;  %v494_v7 = vld [vmem:[%s5666_s12 + $0x640] sm:$0xff] }
 0x28c   : > { %3302 = vmatprep.subr.bf16.mxu0 %v1263_v8  ;;  %3466 = vmatprep.subr.bf16.mxu1 %v1265_v10  ;;  %v496_v8 = vld [vmem:[%s5666_s12 + $0x650] sm:$0xff]  ;;  %v1454_v10 = vunpack.c.l.s8.bf16 %v494_v7 }
 0x28d   : > { %v1456_v11 = vunpack.c.l.s8.bf16 %v496_v8  ;;  %v1480_v21 = vunpack.c.h.s8.bf16 %v496_v8 }
 0x28f   : > { %3303 = vmatpush1.bf16.msra.mxu0 %v1262_v13  ;;  %3467 = vmatpush1.bf16.msra.mxu1 %v1264_v14  ;;  %v1481_v13 = vunpack.c.h.s8.bf16 %v497_v2  ;;  %v519_v14 = vld [vmem:[%s5666_s12 + $0x708] sm:$0xff] }
 0x290   : > { %3304 = vmatprep.subr.bf16.mxu0 %v1287_v15  ;;  %3468 = vmatprep.subr.bf16.mxu1 %v1289_v20  ;;  %v521_v15 = vld [vmem:[%s5666_s12 + $0x718] sm:$0xff]  ;;  %v1478_v20 = vunpack.c.h.s8.bf16 %v494_v7  ;;  %v1503_v22 = vunpack.c.l.s8.bf16 %v519_v14  ;;  %v1527_v31 = vunpack.c.h.s8.bf16 %v519_v14 }
 0x293   : > { %3305 = vmatpush1.bf16.msra.mxu0 %v1286_v25  ;;  %3469 = vmatpush1.bf16.msra.mxu1 %v1288_v26  ;;  %v1505_v25 = vunpack.c.l.s8.bf16 %v521_v15  ;;  %v518_v26 = vld [vmem:[%s5666_s12 + $0x700] sm:$0xff] }
 0x294   : > { %3306 = vmatprep.subr.bf16.mxu0 %v1311_v27  ;;  %3470 = vmatprep.subr.bf16.mxu1 %v1313_v28  ;;  %v520_v27 = vld [vmem:[%s5666_s12 + $0x710] sm:$0xff]  ;;  %v1502_v28 = vunpack.c.l.s8.bf16 %v518_v26 }
 0x295   : > { %v1504_v29 = vunpack.c.l.s8.bf16 %v520_v27  ;;  %v1528_v37 = vunpack.c.h.s8.bf16 %v520_v27 }
 0x297   : > { %3307 = vmatpush1.bf16.msra.mxu0 %v1310_v32  ;;  %3471 = vmatpush1.bf16.msra.mxu1 %v1312_v33  ;;  %v1529_v32 = vunpack.c.h.s8.bf16 %v521_v15  ;;  %v543_v33 = vld [vmem:[%s5666_s12 + $0x7c8] sm:$0xff] }
 0x298   : > { %3308 = vmatprep.subr.bf16.mxu0 %v1335_v34  ;;  %3472 = vmatprep.subr.bf16.mxu1 %v1337_v36  ;;  %v545_v34 = vld [vmem:[%s5666_s12 + $0x7d8] sm:$0xff]  ;;  %v1526_v36 = vunpack.c.h.s8.bf16 %v518_v26  ;;  %v1551_v38 = vunpack.c.l.s8.bf16 %v543_v33  ;;  %v1575_v47 = vunpack.c.h.s8.bf16 %v543_v33 }
 0x29b   : > { %3309 = vmatpush1.bf16.msra.mxu0 %v1334_v39  ;;  %3473 = vmatpush1.bf16.msra.mxu1 %v1336_v40  ;;  %v1553_v39 = vunpack.c.l.s8.bf16 %v545_v34  ;;  %v542_v40 = vld [vmem:[%s5666_s12 + $0x7c0] sm:$0xff] }
 0x29c   : > { %3310 = vmatprep.subr.bf16.mxu0 %v1359_v41  ;;  %3474 = vmatprep.subr.bf16.mxu1 %v1361_v45  ;;  %v544_v41 = vld [vmem:[%s5666_s12 + $0x7d0] sm:$0xff]  ;;  %v1550_v45 = vunpack.c.l.s8.bf16 %v542_v40 }
 0x29d   : > { %v1552_v46 = vunpack.c.l.s8.bf16 %v544_v41  ;;  %v1576_v51 = vunpack.c.h.s8.bf16 %v544_v41 }
 0x29f   : > { %3311 = vmatpush1.bf16.msra.mxu0 %v1358_v48  ;;  %3475 = vmatpush1.bf16.msra.mxu1 %v1360_v49  ;;  %v1577_v48 = vunpack.c.h.s8.bf16 %v545_v34  ;;  %v567_v49 = vld [vmem:[%s5666_s12 + $0x888] sm:$0xff] }
 0x2a0   : > { %3312 = vmatprep.subr.bf16.mxu0 %v1383_v50  ;;  %3476 = vmatprep.subr.bf16.mxu1 %v1385_v61  ;;  %v569_v50 = vld [vmem:[%s5666_s12 + $0x898] sm:$0xff]  ;;  %v1574_v61 = vunpack.c.h.s8.bf16 %v542_v40  ;;  %v1599_v52 = vunpack.c.l.s8.bf16 %v567_v49  ;;  %v1623_v58 = vunpack.c.h.s8.bf16 %v567_v49 }
 0x2a3   : > { %3313 = vmatpush1.bf16.msra.mxu0 %v1382_v53  ;;  %3477 = vmatpush1.bf16.msra.mxu1 %v1384_v54  ;;  %v1601_v53 = vunpack.c.l.s8.bf16 %v569_v50  ;;  %v566_v54 = vld [vmem:[%s5666_s12 + $0x880] sm:$0xff] }
 0x2a4   : > { %3314 = vmatprep.subr.bf16.mxu0 %v1407_v55  ;;  %3478 = vmatprep.subr.bf16.mxu1 %v1409_v56  ;;  %v568_v55 = vld [vmem:[%s5666_s12 + $0x890] sm:$0xff]  ;;  %v1598_v56 = vunpack.c.l.s8.bf16 %v566_v54 }
 0x2a5   : > { %v1600_v57 = vunpack.c.l.s8.bf16 %v568_v55  ;;  %v1624_v1 = vunpack.c.h.s8.bf16 %v568_v55 }
 0x2a7   : > { %3315 = vmatpush1.bf16.msra.mxu0 %v1406_v59  ;;  %3479 = vmatpush1.bf16.msra.mxu1 %v1408_v62  ;;  %v1625_v59 = vunpack.c.h.s8.bf16 %v569_v50  ;;  %v591_v62 = vld [vmem:[%s5666_s12 + $0x948] sm:$0xff] }
 0x2a8   : > { %3316 = vmatprep.subr.bf16.mxu0 %v1431_v63  ;;  %3480 = vmatprep.subr.bf16.mxu1 %v1433_v0  ;;  %v593_v63 = vld [vmem:[%s5666_s12 + $0x958] sm:$0xff]  ;;  %v1622_v0 = vunpack.c.h.s8.bf16 %v566_v54  ;;  %v1647_v2 = vunpack.c.l.s8.bf16 %v591_v62  ;;  %v1671_v8 = vunpack.c.h.s8.bf16 %v591_v62 }
 0x2ab   : > { %3317 = vmatpush1.bf16.msra.mxu0 %v1430_v3  ;;  %3481 = vmatpush1.bf16.msra.mxu1 %v1432_v4  ;;  %v1649_v3 = vunpack.c.l.s8.bf16 %v593_v63  ;;  %v590_v4 = vld [vmem:[%s5666_s12 + $0x940] sm:$0xff] }
 0x2ac   : > { %3327 = vmatprep.subr.bf16.mxu0 %v1455_v5  ;;  %3491 = vmatprep.subr.bf16.mxu1 %v1457_v6  ;;  %v592_v5 = vld [vmem:[%s5666_s12 + $0x950] sm:$0xff]  ;;  %v1646_v6 = vunpack.c.l.s8.bf16 %v590_v4 }
 0x2ad   : > { %v1648_v7 = vunpack.c.l.s8.bf16 %v592_v5  ;;  %v1672_v14 = vunpack.c.h.s8.bf16 %v592_v5 }
 0x2ae   : > { %3319 = vmatmul.mubr.bf16.vlgmr.msra.gmra.mrb[8].mxu0 %v5731_v42  ;;  %3483 = vmatmul.mubr.bf16.vlgmr.msra.gmra.mrb[8].mxu1 %v5731_v42 }
 0x2af   : > { %3328 = vmatpush1.bf16.msra.mxu0 %v1454_v10  ;;  %3492 = vmatpush1.bf16.msra.mxu1 %v1456_v11  ;;  %v1673_v10 = vunpack.c.h.s8.bf16 %v593_v63  ;;  %v615_v11 = vld [vmem:[%s5666_s12 + $0xa08] sm:$0xff] }
 0x2b0   : > { %3329 = vmatprep.subr.bf16.mxu0 %v1479_v12  ;;  %3493 = vmatprep.subr.bf16.mxu1 %v1481_v13  ;;  %v617_v12 = vld [vmem:[%s5666_s12 + $0xa18] sm:$0xff]  ;;  %v1670_v13 = vunpack.c.h.s8.bf16 %v590_v4  ;;  %v1695_v15 = vunpack.c.l.s8.bf16 %v615_v11  ;;  %v1719_v27 = vunpack.c.h.s8.bf16 %v615_v11 }
 0x2b1   : > { %3359 = vmatprep.mubr.bf16.mxu0 %v5742_v30  ;;  %3523 = vmatprep.mubr.bf16.mxu1 %v5742_v30 }
 0x2b3   : > { %3330 = vmatpush1.bf16.msra.mxu0 %v1478_v20  ;;  %3494 = vmatpush1.bf16.msra.mxu1 %v1480_v21  ;;  %v1697_v20 = vunpack.c.l.s8.bf16 %v617_v12  ;;  %v614_v21 = vld [vmem:[%s5666_s12 + $0xa00] sm:$0xff] }
 0x2b4   : > { %3331 = vmatprep.subr.bf16.mxu0 %v1503_v22  ;;  %3495 = vmatprep.subr.bf16.mxu1 %v1505_v25  ;;  %v616_v22 = vld [vmem:[%s5666_s12 + $0xa10] sm:$0xff]  ;;  %v1694_v25 = vunpack.c.l.s8.bf16 %v614_v21 }
 0x2b5   : > { %v1696_v26 = vunpack.c.l.s8.bf16 %v616_v22  ;;  %v1720_v33 = vunpack.c.h.s8.bf16 %v616_v22 }
 0x2b7   : > { %3332 = vmatpush1.bf16.msra.mxu0 %v1502_v28  ;;  %3496 = vmatpush1.bf16.msra.mxu1 %v1504_v29  ;;  %v1721_v28 = vunpack.c.h.s8.bf16 %v617_v12  ;;  %v639_v29 = vld [vmem:[%s5666_s12 + $0xac8] sm:$0xff] }
 0x2b8   : > { %3333 = vmatprep.subr.bf16.mxu0 %v1527_v31  ;;  %3497 = vmatprep.subr.bf16.mxu1 %v1529_v32  ;;  %v641_v31 = vld [vmem:[%s5666_s12 + $0xad8] sm:$0xff]  ;;  %v1718_v32 = vunpack.c.h.s8.bf16 %v614_v21  ;;  %v1743_v34 = vunpack.c.l.s8.bf16 %v639_v29  ;;  %v1767_v41 = vunpack.c.h.s8.bf16 %v639_v29 }
 0x2bb   : > { %3334 = vmatpush1.bf16.msra.mxu0 %v1526_v36  ;;  %3498 = vmatpush1.bf16.msra.mxu1 %v1528_v37  ;;  %v1745_v36 = vunpack.c.l.s8.bf16 %v641_v31  ;;  %v638_v37 = vld [vmem:[%s5666_s12 + $0xac0] sm:$0xff] }
 0x2bc   : > { %3335 = vmatprep.subr.bf16.mxu0 %v1551_v38  ;;  %3499 = vmatprep.subr.bf16.mxu1 %v1553_v39  ;;  %v640_v38 = vld [vmem:[%s5666_s12 + $0xad0] sm:$0xff]  ;;  %v1742_v39 = vunpack.c.l.s8.bf16 %v638_v37 }
 0x2bd   : > { %v1744_v40 = vunpack.c.l.s8.bf16 %v640_v38  ;;  %v1768_v49 = vunpack.c.h.s8.bf16 %v640_v38 }
 0x2bf   : > { %3336 = vmatpush1.bf16.msra.mxu0 %v1550_v45  ;;  %3500 = vmatpush1.bf16.msra.mxu1 %v1552_v46  ;;  %v1769_v45 = vunpack.c.h.s8.bf16 %v641_v31  ;;  %v663_v46 = vld [vmem:[%s5666_s12 + $0xb88] sm:$0xff] }
 0x2c0   : > { %3337 = vmatprep.subr.bf16.mxu0 %v1575_v47  ;;  %3501 = vmatprep.subr.bf16.mxu1 %v1577_v48  ;;  %v665_v47 = vld [vmem:[%s5666_s12 + $0xb98] sm:$0xff]  ;;  %v1766_v48 = vunpack.c.h.s8.bf16 %v638_v37  ;;  %v1791_v50 = vunpack.c.l.s8.bf16 %v663_v46  ;;  %v1815_v55 = vunpack.c.h.s8.bf16 %v663_v46 }
 0x2c3   : > { %3338 = vmatpush1.bf16.msra.mxu0 %v1574_v61  ;;  %3502 = vmatpush1.bf16.msra.mxu1 %v1576_v51  ;;  %v1793_v61 = vunpack.c.l.s8.bf16 %v665_v47  ;;  %v662_v51 = vld [vmem:[%s5666_s12 + $0xb80] sm:$0xff] }
 0x2c4   : > { %3339 = vmatprep.subr.bf16.mxu0 %v1599_v52  ;;  %3503 = vmatprep.subr.bf16.mxu1 %v1601_v53  ;;  %v664_v52 = vld [vmem:[%s5666_s12 + $0xb90] sm:$0xff]  ;;  %v1790_v53 = vunpack.c.l.s8.bf16 %v662_v51 }
 0x2c5   : > { %v1792_v54 = vunpack.c.l.s8.bf16 %v664_v52  ;;  %v1816_v62 = vunpack.c.h.s8.bf16 %v664_v52 }
 0x2c7   : > { %3340 = vmatpush1.bf16.msra.mxu0 %v1598_v56  ;;  %3504 = vmatpush1.bf16.msra.mxu1 %v1600_v57  ;;  %v1817_v56 = vunpack.c.h.s8.bf16 %v665_v47  ;;  %v687_v57 = vld [vmem:[%s5666_s12 + $0xc48] sm:$0xff] }
 0x2c8   : > { %3341 = vmatprep.subr.bf16.mxu0 %v1623_v58  ;;  %3505 = vmatprep.subr.bf16.mxu1 %v1625_v59  ;;  %v689_v58 = vld [vmem:[%s5666_s12 + $0xc58] sm:$0xff]  ;;  %v1814_v59 = vunpack.c.h.s8.bf16 %v662_v51  ;;  %v1839_v63 = vunpack.c.l.s8.bf16 %v687_v57  ;;  %v1863_v5 = vunpack.c.h.s8.bf16 %v687_v57 }
 0x2cb   : > { %3342 = vmatpush1.bf16.msra.mxu0 %v1622_v0  ;;  %3506 = vmatpush1.bf16.msra.mxu1 %v1624_v1  ;;  %v1841_v0 = vunpack.c.l.s8.bf16 %v689_v58  ;;  %v686_v1 = vld [vmem:[%s5666_s12 + $0xc40] sm:$0xff] }
 0x2cc   : > { %3343 = vmatprep.subr.bf16.mxu0 %v1647_v2  ;;  %3507 = vmatprep.subr.bf16.mxu1 %v1649_v3  ;;  %v688_v2 = vld [vmem:[%s5666_s12 + $0xc50] sm:$0xff]  ;;  %v1838_v3 = vunpack.c.l.s8.bf16 %v686_v1 }
 0x2cd   : > { %v1840_v4 = vunpack.c.l.s8.bf16 %v688_v2  ;;  %v1864_v11 = vunpack.c.h.s8.bf16 %v688_v2 }
 0x2cf   : > { %3344 = vmatpush1.bf16.msra.mxu0 %v1646_v6  ;;  %3508 = vmatpush1.bf16.msra.mxu1 %v1648_v7  ;;  %v1865_v6 = vunpack.c.h.s8.bf16 %v689_v58  ;;  %v711_v7 = vld [vmem:[%s5666_s12 + $0xd08] sm:$0xff] }
 0x2d0   : > { %3345 = vmatprep.subr.bf16.mxu0 %v1671_v8  ;;  %3509 = vmatprep.subr.bf16.mxu1 %v1673_v10  ;;  %v713_v8 = vld [vmem:[%s5666_s12 + $0xd18] sm:$0xff]  ;;  %v1862_v10 = vunpack.c.h.s8.bf16 %v686_v1  ;;  %v1887_v12 = vunpack.c.l.s8.bf16 %v711_v7  ;;  %v1911_v22 = vunpack.c.h.s8.bf16 %v711_v7 }
 0x2d3   : > { %3346 = vmatpush1.bf16.msra.mxu0 %v1670_v13  ;;  %3510 = vmatpush1.bf16.msra.mxu1 %v1672_v14  ;;  %v1889_v13 = vunpack.c.l.s8.bf16 %v713_v8  ;;  %v710_v14 = vld [vmem:[%s5666_s12 + $0xd00] sm:$0xff] }
 0x2d4   : > { %3347 = vmatprep.subr.bf16.mxu0 %v1695_v15  ;;  %3511 = vmatprep.subr.bf16.mxu1 %v1697_v20  ;;  %v712_v15 = vld [vmem:[%s5666_s12 + $0xd10] sm:$0xff]  ;;  %v1886_v20 = vunpack.c.l.s8.bf16 %v710_v14 }
 0x2d5   : > { %v1888_v21 = vunpack.c.l.s8.bf16 %v712_v15  ;;  %v1912_v29 = vunpack.c.h.s8.bf16 %v712_v15 }
 0x2d7   : > { %3348 = vmatpush1.bf16.msra.mxu0 %v1694_v25  ;;  %3512 = vmatpush1.bf16.msra.mxu1 %v1696_v26  ;;  %v1913_v25 = vunpack.c.h.s8.bf16 %v713_v8  ;;  %v735_v26 = vld [vmem:[%s5666_s12 + $0xdc8] sm:$0xff] }
 0x2d8   : > { %3349 = vmatprep.subr.bf16.mxu0 %v1719_v27  ;;  %3513 = vmatprep.subr.bf16.mxu1 %v1721_v28  ;;  %v737_v27 = vld [vmem:[%s5666_s12 + $0xdd8] sm:$0xff]  ;;  %v1910_v28 = vunpack.c.h.s8.bf16 %v710_v14  ;;  %v1935_v31 = vunpack.c.l.s8.bf16 %v735_v26  ;;  %v1959_v38 = vunpack.c.h.s8.bf16 %v735_v26 }
 0x2db   : > { %3350 = vmatpush1.bf16.msra.mxu0 %v1718_v32  ;;  %3514 = vmatpush1.bf16.msra.mxu1 %v1720_v33  ;;  %v1937_v32 = vunpack.c.l.s8.bf16 %v737_v27  ;;  %v734_v33 = vld [vmem:[%s5666_s12 + $0xdc0] sm:$0xff] }
 0x2dc   : > { %3351 = vmatprep.subr.bf16.mxu0 %v1743_v34  ;;  %3515 = vmatprep.subr.bf16.mxu1 %v1745_v36  ;;  %v736_v34 = vld [vmem:[%s5666_s12 + $0xdd0] sm:$0xff]  ;;  %v1934_v36 = vunpack.c.l.s8.bf16 %v734_v33 }
 0x2dd   : > { %v1936_v37 = vunpack.c.l.s8.bf16 %v736_v34  ;;  %v1960_v46 = vunpack.c.h.s8.bf16 %v736_v34 }
 0x2df   : > { %3352 = vmatpush1.bf16.msra.mxu0 %v1742_v39  ;;  %3516 = vmatpush1.bf16.msra.mxu1 %v1744_v40  ;;  %v1961_v39 = vunpack.c.h.s8.bf16 %v737_v27  ;;  %v759_v40 = vld [vmem:[%s5666_s12 + $0xe88] sm:$0xff] }
 0x2e0   : > { %3353 = vmatprep.subr.bf16.mxu0 %v1767_v41  ;;  %3517 = vmatprep.subr.bf16.mxu1 %v1769_v45  ;;  %v761_v41 = vld [vmem:[%s5666_s12 + $0xe98] sm:$0xff]  ;;  %v1958_v45 = vunpack.c.h.s8.bf16 %v734_v33  ;;  %v1983_v47 = vunpack.c.l.s8.bf16 %v759_v40  ;;  %v2007_v52 = vunpack.c.h.s8.bf16 %v759_v40 }
 0x2e3   : > { %3354 = vmatpush1.bf16.msra.mxu0 %v1766_v48  ;;  %3518 = vmatpush1.bf16.msra.mxu1 %v1768_v49  ;;  %v1985_v48 = vunpack.c.l.s8.bf16 %v761_v41  ;;  %v758_v49 = vld [vmem:[%s5666_s12 + $0xe80] sm:$0xff] }
 0x2e4   : > { %3355 = vmatprep.subr.bf16.mxu0 %v1791_v50  ;;  %3519 = vmatprep.subr.bf16.mxu1 %v1793_v61  ;;  %v760_v50 = vld [vmem:[%s5666_s12 + $0xe90] sm:$0xff]  ;;  %v1982_v61 = vunpack.c.l.s8.bf16 %v758_v49 }
 0x2e5   : > { %v1984_v51 = vunpack.c.l.s8.bf16 %v760_v50  ;;  %v2008_v57 = vunpack.c.h.s8.bf16 %v760_v50 }
 0x2e7   : > { %3356 = vmatpush1.bf16.msra.mxu0 %v1790_v53  ;;  %3520 = vmatpush1.bf16.msra.mxu1 %v1792_v54  ;;  %v2009_v53 = vunpack.c.h.s8.bf16 %v761_v41  ;;  %v783_v54 = vld [vmem:[%s5666_s12 + $0xf48] sm:$0xff] }
 0x2e8   : > { %3357 = vmatprep.subr.bf16.mxu0 %v1815_v55  ;;  %3521 = vmatprep.subr.bf16.mxu1 %v1817_v56  ;;  %v785_v55 = vld [vmem:[%s5666_s12 + $0xf58] sm:$0xff]  ;;  %v2006_v56 = vunpack.c.h.s8.bf16 %v758_v49  ;;  %v2031_v58 = vunpack.c.l.s8.bf16 %v783_v54  ;;  %v2055_v2 = vunpack.c.h.s8.bf16 %v783_v54 }
 0x2eb   : > { %3358 = vmatpush1.bf16.msra.mxu0 %v1814_v59  ;;  %3522 = vmatpush1.bf16.msra.mxu1 %v1816_v62  ;;  %v2033_v59 = vunpack.c.l.s8.bf16 %v785_v55  ;;  %v782_v62 = vld [vmem:[%s5666_s12 + $0xf40] sm:$0xff] }
 0x2ec   : > { %3368 = vmatprep.subr.bf16.mxu0 %v1839_v63  ;;  %3532 = vmatprep.subr.bf16.mxu1 %v1841_v0  ;;  %v784_v63 = vld [vmem:[%s5666_s12 + $0xf50] sm:$0xff]  ;;  %v2030_v0 = vunpack.c.l.s8.bf16 %v782_v62 }
 0x2ed   : > { %v2032_v1 = vunpack.c.l.s8.bf16 %v784_v63  ;;  %v2056_v7 = vunpack.c.h.s8.bf16 %v784_v63 }
 0x2ee   : > { %3360 = vmatmul.mubr.bf16.vlgmr.msra.gmra.mrb[8].mxu0 %v5780_v16  ;;  %3524 = vmatmul.mubr.bf16.vlgmr.msra.gmra.mrb[8].mxu1 %v5780_v16 }
 0x2ef   : > { %3369 = vmatpush1.bf16.msra.mxu0 %v1838_v3  ;;  %3533 = vmatpush1.bf16.msra.mxu1 %v1840_v4  ;;  %v2057_v3 = vunpack.c.h.s8.bf16 %v785_v55  ;;  %v807_v4 = vld [vmem:[%s5666_s12 + $0x1008] sm:$0xff] }
 0x2f0   : > { %3370 = vmatprep.subr.bf16.mxu0 %v1863_v5  ;;  %3534 = vmatprep.subr.bf16.mxu1 %v1865_v6  ;;  %v809_v5 = vld [vmem:[%s5666_s12 + $0x1018] sm:$0xff]  ;;  %v2054_v6 = vunpack.c.h.s8.bf16 %v782_v62  ;;  %v2079_v8 = vunpack.c.l.s8.bf16 %v807_v4  ;;  %v2103_v15 = vunpack.c.h.s8.bf16 %v807_v4 }
 0x2f1   : > { %3400 = vmatprep.mubr.bf16.mxu0 %v5791_v43  ;;  %3564 = vmatprep.mubr.bf16.mxu1 %v5791_v43 }
 0x2f3   : > { %3371 = vmatpush1.bf16.msra.mxu0 %v1862_v10  ;;  %3535 = vmatpush1.bf16.msra.mxu1 %v1864_v11  ;;  %v2081_v10 = vunpack.c.l.s8.bf16 %v809_v5  ;;  %v806_v11 = vld [vmem:[%s5666_s12 + $0x1000] sm:$0xff] }
 0x2f4   : > { %3372 = vmatprep.subr.bf16.mxu0 %v1887_v12  ;;  %3536 = vmatprep.subr.bf16.mxu1 %v1889_v13  ;;  %v808_v12 = vld [vmem:[%s5666_s12 + $0x1010] sm:$0xff]  ;;  %v2078_v13 = vunpack.c.l.s8.bf16 %v806_v11 }
 0x2f5   : > { %v2080_v14 = vunpack.c.l.s8.bf16 %v808_v12  ;;  %v2104_v26 = vunpack.c.h.s8.bf16 %v808_v12 }
 0x2f7   : > { %3373 = vmatpush1.bf16.msra.mxu0 %v1886_v20  ;;  %3537 = vmatpush1.bf16.msra.mxu1 %v1888_v21  ;;  %v2105_v20 = vunpack.c.h.s8.bf16 %v809_v5  ;;  %v831_v21 = vld [vmem:[%s5666_s12 + $0x10c8] sm:$0xff] }
 0x2f8   : > { %3374 = vmatprep.subr.bf16.mxu0 %v1911_v22  ;;  %3538 = vmatprep.subr.bf16.mxu1 %v1913_v25  ;;  %v833_v22 = vld [vmem:[%s5666_s12 + $0x10d8] sm:$0xff]  ;;  %v2102_v25 = vunpack.c.h.s8.bf16 %v806_v11  ;;  %v2127_v27 = vunpack.c.l.s8.bf16 %v831_v21  ;;  %v2151_v34 = vunpack.c.h.s8.bf16 %v831_v21 }
 0x2fb   : > { %3375 = vmatpush1.bf16.msra.mxu0 %v1910_v28  ;;  %3539 = vmatpush1.bf16.msra.mxu1 %v1912_v29  ;;  %v2129_v28 = vunpack.c.l.s8.bf16 %v833_v22  ;;  %v830_v29 = vld [vmem:[%s5666_s12 + $0x10c0] sm:$0xff] }
 0x2fc   : > { %3376 = vmatprep.subr.bf16.mxu0 %v1935_v31  ;;  %3540 = vmatprep.subr.bf16.mxu1 %v1937_v32  ;;  %v832_v31 = vld [vmem:[%s5666_s12 + $0x10d0] sm:$0xff]  ;;  %v2126_v32 = vunpack.c.l.s8.bf16 %v830_v29 }
 0x2fd   : > { %v2128_v33 = vunpack.c.l.s8.bf16 %v832_v31  ;;  %v2152_v40 = vunpack.c.h.s8.bf16 %v832_v31 }
 0x2ff   : > { %3377 = vmatpush1.bf16.msra.mxu0 %v1934_v36  ;;  %3541 = vmatpush1.bf16.msra.mxu1 %v1936_v37  ;;  %v2153_v36 = vunpack.c.h.s8.bf16 %v833_v22  ;;  %v855_v37 = vld [vmem:[%s5666_s12 + $0x1188] sm:$0xff] }
 0x300   : > { %3378 = vmatprep.subr.bf16.mxu0 %v1959_v38  ;;  %3542 = vmatprep.subr.bf16.mxu1 %v1961_v39  ;;  %v857_v38 = vld [vmem:[%s5666_s12 + $0x1198] sm:$0xff]  ;;  %v2150_v39 = vunpack.c.h.s8.bf16 %v830_v29  ;;  %v2175_v41 = vunpack.c.l.s8.bf16 %v855_v37  ;;  %v2199_v50 = vunpack.c.h.s8.bf16 %v855_v37  ;;  %v6196_v29 = vsub.s32 6, %v5998_v9 }
 0x303   : > { %3379 = vmatpush1.bf16.msra.mxu0 %v1958_v45  ;;  %3543 = vmatpush1.bf16.msra.mxu1 %v1960_v46  ;;  %v2177_v45 = vunpack.c.l.s8.bf16 %v857_v38  ;;  %v854_v46 = vld [vmem:[%s5666_s12 + $0x1180] sm:$0xff] }
 0x304   : > { %3380 = vmatprep.subr.bf16.mxu0 %v1983_v47  ;;  %3544 = vmatprep.subr.bf16.mxu1 %v1985_v48  ;;  %v856_v47 = vld [vmem:[%s5666_s12 + $0x1190] sm:$0xff]  ;;  %v2174_v48 = vunpack.c.l.s8.bf16 %v854_v46 }
 0x305   : > { %v2176_v49 = vunpack.c.l.s8.bf16 %v856_v47  ;;  %v2200_v54 = vunpack.c.h.s8.bf16 %v856_v47 }
 0x307   : > { %3381 = vmatpush1.bf16.msra.mxu0 %v1982_v61  ;;  %3545 = vmatpush1.bf16.msra.mxu1 %v1984_v51  ;;  %v2201_v61 = vunpack.c.h.s8.bf16 %v857_v38  ;;  %v879_v51 = vld [vmem:[%s5666_s12 + $0x1248] sm:$0xff] }
 0x308   : > { %3382 = vmatprep.subr.bf16.mxu0 %v2007_v52  ;;  %3546 = vmatprep.subr.bf16.mxu1 %v2009_v53  ;;  %v881_v52 = vld [vmem:[%s5666_s12 + $0x1258] sm:$0xff]  ;;  %v2198_v53 = vunpack.c.h.s8.bf16 %v854_v46  ;;  %v2223_v55 = vunpack.c.l.s8.bf16 %v879_v51  ;;  %v2247_v63 = vunpack.c.h.s8.bf16 %v879_v51  ;;  %v951_v38 = vld [vmem:[%s5666_s12 + $0x1488] sm:$0xff] }
 0x309   : > { %v2367_v51 = vunpack.c.l.s8.bf16 %v951_v38 }
 0x30b   : > { %3383 = vmatpush1.bf16.msra.mxu0 %v2006_v56  ;;  %3547 = vmatpush1.bf16.msra.mxu1 %v2008_v57  ;;  %v2225_v56 = vunpack.c.l.s8.bf16 %v881_v52  ;;  %v878_v57 = vld [vmem:[%s5666_s12 + $0x1240] sm:$0xff] }
 0x30c   : > { %3384 = vmatprep.subr.bf16.mxu0 %v2031_v58  ;;  %3548 = vmatprep.subr.bf16.mxu1 %v2033_v59  ;;  %v880_v58 = vld [vmem:[%s5666_s12 + $0x1250] sm:$0xff]  ;;  %v2222_v59 = vunpack.c.l.s8.bf16 %v878_v57 }
 0x30d   : > { %v2224_v62 = vunpack.c.l.s8.bf16 %v880_v58  ;;  %v2248_v4 = vunpack.c.h.s8.bf16 %v880_v58 }
 0x30f   : > { %3385 = vmatpush1.bf16.msra.mxu0 %v2030_v0  ;;  %3549 = vmatpush1.bf16.msra.mxu1 %v2032_v1  ;;  %v2249_v0 = vunpack.c.h.s8.bf16 %v881_v52  ;;  %v903_v1 = vld [vmem:[%s5666_s12 + $0x1308] sm:$0xff] }
 0x310   : > { %3386 = vmatprep.subr.bf16.mxu0 %v2055_v2  ;;  %3550 = vmatprep.subr.bf16.mxu1 %v2057_v3  ;;  %v905_v2 = vld [vmem:[%s5666_s12 + $0x1318] sm:$0xff]  ;;  %v2246_v3 = vunpack.c.h.s8.bf16 %v878_v57  ;;  %v2271_v5 = vunpack.c.l.s8.bf16 %v903_v1  ;;  %v2295_v12 = vunpack.c.h.s8.bf16 %v903_v1 }
 0x313   : > { %3387 = vmatpush1.bf16.msra.mxu0 %v2054_v6  ;;  %3551 = vmatpush1.bf16.msra.mxu1 %v2056_v7  ;;  %v2273_v6 = vunpack.c.l.s8.bf16 %v905_v2  ;;  %v902_v7 = vld [vmem:[%s5666_s12 + $0x1300] sm:$0xff] }
 0x314   : > { %3388 = vmatprep.subr.bf16.mxu0 %v2079_v8  ;;  %3552 = vmatprep.subr.bf16.mxu1 %v2081_v10  ;;  %v904_v8 = vld [vmem:[%s5666_s12 + $0x1310] sm:$0xff]  ;;  %v2270_v10 = vunpack.c.l.s8.bf16 %v902_v7 }
 0x315   : > { %v2272_v11 = vunpack.c.l.s8.bf16 %v904_v8  ;;  %v2296_v21 = vunpack.c.h.s8.bf16 %v904_v8 }
 0x317   : > { %3389 = vmatpush1.bf16.msra.mxu0 %v2078_v13  ;;  %3553 = vmatpush1.bf16.msra.mxu1 %v2080_v14  ;;  %v2297_v13 = vunpack.c.h.s8.bf16 %v905_v2  ;;  %v927_v14 = vld [vmem:[%s5666_s12 + $0x13c8] sm:$0xff] }
 0x318   : > { %3390 = vmatprep.subr.bf16.mxu0 %v2103_v15  ;;  %3554 = vmatprep.subr.bf16.mxu1 %v2105_v20  ;;  %v929_v15 = vld [vmem:[%s5666_s12 + $0x13d8] sm:$0xff]  ;;  %v2294_v20 = vunpack.c.h.s8.bf16 %v902_v7  ;;  %v2319_v22 = vunpack.c.l.s8.bf16 %v927_v14 }
 0x319   : > { %v2345_v37 = vunpack.c.h.s8.bf16 %v929_v15 }
 0x31b   : > { %3391 = vmatpush1.bf16.msra.mxu0 %v2102_v25  ;;  %3555 = vmatpush1.bf16.msra.mxu1 %v2104_v26  ;;  %v2321_v25 = vunpack.c.l.s8.bf16 %v929_v15  ;;  %v926_v26 = vld [vmem:[%s5666_s12 + $0x13c0] sm:$0xff] }
 0x31c   : > { %3392 = vmatprep.subr.bf16.mxu0 %v2127_v27  ;;  %3556 = vmatprep.subr.bf16.mxu1 %v2129_v28  ;;  %v928_v27 = vld [vmem:[%s5666_s12 + $0x13d0] sm:$0xff]  ;;  %v6193_v28 = vsub.s32 4, %v5998_v9  ;;  %v2318_v31 = vunpack.c.l.s8.bf16 %v926_v26  ;;  %v2342_v47 = vunpack.c.h.s8.bf16 %v926_v26 }
 0x31f   : > { %3393 = vmatpush1.bf16.msra.mxu0 %v2126_v32  ;;  %3557 = vmatpush1.bf16.msra.mxu1 %v2128_v33  ;;  %v2320_v32 = vunpack.c.l.s8.bf16 %v928_v27  ;;  %v6199_v33 = vsub.s32 5, %v5998_v9 }
 0x320   : > { %3394 = vmatprep.subr.bf16.mxu0 %v2151_v34  ;;  %3558 = vmatprep.subr.bf16.mxu1 %v2153_v36  ;;  %v6202_v34 = vsub.s32 7, %v5998_v9  ;;  %v2343_v36 = vunpack.c.h.s8.bf16 %v927_v14 }
 0x323   : > { %3395 = vmatpush1.bf16.msra.mxu0 %v2150_v39  ;;  %3559 = vmatpush1.bf16.msra.mxu1 %v2152_v40  ;;  %v953_v39 = vld [vmem:[%s5666_s12 + $0x1498] sm:$0xff] }
 0x324   : > { %3396 = vmatprep.subr.bf16.mxu0 %v2175_v41  ;;  %3560 = vmatprep.subr.bf16.mxu1 %v2177_v45  ;;  %v5334_v40 = vld [vmem:[%s5676_s27] sm:$0xff]  ;;  %v2369_v52 = vunpack.c.l.s8.bf16 %v953_v39 }
 0x325   : > { %v4623_v41 = vrot.slane %v5334_v40, %v6193_v28  ;;  %v4631_v45 = vrot.slane %v5334_v40, %v6196_v29  ;;  %v4627_v46 = vrot.slane %v5334_v40, %v6199_v33  ;;  %v4635_v9 = vrot.slane %v5334_v40, %v6202_v34  ;;  %v999_v40 = vld [vmem:[%s5666_s12 + $0x1608] sm:$0xff] }
 0x327   : > { %3397 = vmatpush1.bf16.msra.mxu0 %v2174_v48  ;;  %3561 = vmatpush1.bf16.msra.mxu1 %v2176_v49  ;;  %v2344_v48 = vunpack.c.h.s8.bf16 %v928_v27  ;;  %v5335_v49 = vld [vmem:[%s6017_s8] sm:$0xff] }
 0x328   : > { %3398 = vmatprep.subr.bf16.mxu0 %v2199_v50  ;;  %3562 = vmatprep.subr.bf16.mxu1 %v2201_v61  ;;  %v4773_v50 = vrot.slane %v5335_v49, %v6193_v28  ;;  %v4781_v61 = vrot.slane %v5335_v49, %v6196_v29  ;;  %v4777_v57 = vrot.slane %v5335_v49, %v6199_v33 }
 0x329   : > { %v4785_v58 = vrot.slane %v5335_v49, %v6202_v34  ;;  %v998_v49 = vld [vmem:[%s5666_s12 + $0x1600] sm:$0xff] }
 0x32b   : > { %3399 = vmatpush1.bf16.msra.mxu0 %v2198_v53  ;;  %3563 = vmatpush1.bf16.msra.mxu1 %v2200_v54  ;;  %v950_v53 = vld [vmem:[%s5666_s12 + $0x1480] sm:$0xff]  ;;  %v952_v54 = vld [vmem:[%s5666_s12 + $0x1490] sm:$0xff] }
 0x32c   : > { %3409 = vmatprep.subr.bf16.mxu0 %v2223_v55  ;;  %3573 = vmatprep.subr.bf16.mxu1 %v2225_v56 }
 0x32e   : > { %3401 = vmatmul.mubr.bf16.vlgmr.msra.gmra.mrb[8].mxu0 %v5829_v60  ;;  %3565 = vmatmul.mubr.bf16.vlgmr.msra.gmra.mrb[8].mxu1 %v5829_v60 }
 0x32f   : > { %3410 = vmatpush1.bf16.msra.mxu0 %v2222_v59  ;;  %3574 = vmatpush1.bf16.msra.mxu1 %v2224_v62 }
 0x330   : > { %3411 = vmatprep.subr.bf16.mxu0 %v2247_v63  ;;  %3575 = vmatprep.subr.bf16.mxu1 %v2249_v0 }
 0x331   : > { %3441 = vmatprep.mubr.bf16.mxu0 %v5840_v17  ;;  %3605 = vmatprep.mubr.bf16.mxu1 %v5840_v17 }
 0x333   : > { %3412 = vmatpush1.bf16.msra.mxu0 %v2246_v3  ;;  %3576 = vmatpush1.bf16.msra.mxu1 %v2248_v4 }
 0x334   : > { %3413 = vmatprep.subr.bf16.mxu0 %v2271_v5  ;;  %3577 = vmatprep.subr.bf16.mxu1 %v2273_v6  ;;  %v2366_v5 = vunpack.c.l.s8.bf16 %v950_v53  ;;  %v2368_v6 = vunpack.c.l.s8.bf16 %v952_v54 }
 0x337   : > { %3414 = vmatpush1.bf16.msra.mxu0 %v2270_v10  ;;  %3578 = vmatpush1.bf16.msra.mxu1 %v2272_v11 }
 0x338   : > { %3415 = vmatprep.subr.bf16.mxu0 %v2295_v12  ;;  %3579 = vmatprep.subr.bf16.mxu1 %v2297_v13  ;;  %v2391_v12 = vunpack.c.h.s8.bf16 %v951_v38  ;;  %v2393_v13 = vunpack.c.h.s8.bf16 %v953_v39 }
 0x33b   : > { %3416 = vmatpush1.bf16.msra.mxu0 %v2294_v20  ;;  %3580 = vmatpush1.bf16.msra.mxu1 %v2296_v21  ;;  %v975_v20 = vld [vmem:[%s5666_s12 + $0x1548] sm:$0xff]  ;;  %v977_v21 = vld [vmem:[%s5666_s12 + $0x1558] sm:$0xff] }
 0x33c   : > { %3417 = vmatprep.subr.bf16.mxu0 %v2319_v22  ;;  %3581 = vmatprep.subr.bf16.mxu1 %v2321_v25  ;;  %v2390_v22 = vunpack.c.h.s8.bf16 %v950_v53  ;;  %v2392_v25 = vunpack.c.h.s8.bf16 %v952_v54  ;;  %v2415_v26 = vunpack.c.l.s8.bf16 %v975_v20  ;;  %v2417_v27 = vunpack.c.l.s8.bf16 %v977_v21 }
 0x33d   : > { %v2439_v38 = vunpack.c.h.s8.bf16 %v975_v20  ;;  %v2441_v39 = vunpack.c.h.s8.bf16 %v977_v21  ;;  %v2462_v53 = vunpack.c.l.s8.bf16 %v998_v49 }
 0x33f   : > { %3418 = vmatpush1.bf16.msra.mxu0 %v2318_v31  ;;  %3582 = vmatpush1.bf16.msra.mxu1 %v2320_v32  ;;  %v974_v31 = vld [vmem:[%s5666_s12 + $0x1540] sm:$0xff]  ;;  %v976_v32 = vld [vmem:[%s5666_s12 + $0x1550] sm:$0xff] }
 0x340   : > { %3419 = vmatprep.subr.bf16.mxu0 %v2343_v36  ;;  %3583 = vmatprep.subr.bf16.mxu1 %v2345_v37  ;;  %v2414_v36 = vunpack.c.l.s8.bf16 %v974_v31  ;;  %v2416_v37 = vunpack.c.l.s8.bf16 %v976_v32 }
 0x341   : > { %v3115_v55 = vpop.f32.mrb[4].mxu0  ;;  %v3279_v56 = vpop.f32.mrb[4].mxu1 }
 0x342   : > { %v4728_v59 = vmul.f32 %v4623_v41, %v3115_v55  ;;  %v4730_v62 = vmul.f32 %v4631_v45, %v3279_v56  ;;  %v3117_v63 = vpop.f32.mrb[5].mxu0  ;;  %v3281_v0 = vpop.f32.mrb[5].mxu1  ;;  %v1001_v41 = vld [vmem:[%s5666_s12 + $0x1618] sm:$0xff]  ;;  %v2438_v45 = vunpack.c.h.s8.bf16 %v974_v31  ;;  %v2487_v55 = vunpack.c.h.s8.bf16 %v999_v40 }
 0x343   : > { %v4729_v1 = vmul.f32 %v4627_v46, %v3117_v63  ;;  %v4731_v2 = vmul.f32 %v4635_v9, %v3281_v0  ;;  %v3119_v3 = vpop.f32.mrb[6].mxu0  ;;  %v3283_v4 = vpop.f32.mrb[6].mxu1  ;;  %3420 = vmatpush1.bf16.msra.mxu0 %v2342_v47  ;;  %3584 = vmatpush1.bf16.msra.mxu1 %v2344_v48  ;;  %v2440_v46 = vunpack.c.h.s8.bf16 %v976_v32  ;;  %v2463_v47 = vunpack.c.l.s8.bf16 %v999_v40 }
 0x344   : > { %v4878_v7 = vadd.f32 %v4773_v50, %v4728_v59  ;;  %v4880_v8 = vadd.f32 %v4781_v61, %v4730_v62  ;;  %v3120_v10 = vpop.f32.mrb[7].mxu0  ;;  %v3284_v11 = vpop.f32.mrb[7].mxu1  ;;  %3421 = vmatprep.subr.bf16.mxu0 %v2367_v51  ;;  %3585 = vmatprep.subr.bf16.mxu1 %v2369_v52  ;;  %v2465_v48 = vunpack.c.l.s8.bf16 %v1001_v41  ;;  %v1000_v50 = vld [vmem:[%s5666_s12 + $0x1610] sm:$0xff]  ;;  %v2489_v56 = vunpack.c.h.s8.bf16 %v1001_v41 }
 0x345   : > { %v4879_v14 = vadd.f32 %v4777_v57, %v4729_v1  ;;  %v4881_v15 = vadd.f32 %v4785_v58, %v4731_v2  ;;  %v2464_v54 = vunpack.c.l.s8.bf16 %v1000_v50  ;;  %v1023_v57 = vld [vmem:[%s5666_s12 + $0x16c8] sm:$0xff]  ;;  %v1025_v58 = vld [vmem:[%s5666_s12 + $0x16d8] sm:$0xff]  ;;  %v2486_v59 = vunpack.c.h.s8.bf16 %v998_v49  ;;  %v1022_v1 = vld [vmem:[%s5666_s12 + $0x16c0] sm:$0xff] }
 0x346   : > { %5294 = vtanh.f32 %v4878_v7  ;;  %v2488_v62 = vunpack.c.h.s8.bf16 %v1000_v50  ;;  %v2511_v63 = vunpack.c.l.s8.bf16 %v1023_v57  ;;  %v2513_v0 = vunpack.c.l.s8.bf16 %v1025_v58  ;;  %v1024_v2 = vld [vmem:[%s5666_s12 + $0x16d0] sm:$0xff]  ;;  %v1047_v7 = vld [vmem:[%s5666_s12 + $0x1788] sm:$0xff] }
 0x347   : > { %5296 = vtanh.f32 %v4880_v8  ;;  %3422 = vmatpush1.bf16.msra.mxu0 %v2366_v5  ;;  %3586 = vmatpush1.bf16.msra.mxu1 %v2368_v6  ;;  %v2510_v3 = vunpack.c.l.s8.bf16 %v1022_v1  ;;  %v2512_v4 = vunpack.c.l.s8.bf16 %v1024_v2  ;;  %v2535_v5 = vunpack.c.h.s8.bf16 %v1023_v57  ;;  %v1049_v8 = vld [vmem:[%s5666_s12 + $0x1798] sm:$0xff]  ;;  %v355_v57 = vld [vmem:[%s5666_s12 + $0x1e8] sm:$0xff] }
 0x348   : > { %5298 = vtanh.f32 %v4879_v14  ;;  %3423 = vmatprep.subr.bf16.mxu0 %v2391_v12  ;;  %3587 = vmatprep.subr.bf16.mxu1 %v2393_v13  ;;  %v2537_v6 = vunpack.c.h.s8.bf16 %v1025_v58  ;;  %v2534_v10 = vunpack.c.h.s8.bf16 %v1022_v1  ;;  %v2536_v11 = vunpack.c.h.s8.bf16 %v1024_v2  ;;  %v1046_v14 = vld [vmem:[%s5666_s12 + $0x1780] sm:$0xff]  ;;  %v357_v58 = vld [vmem:[%s5666_s12 + $0x1f8] sm:$0xff]  ;;  %v356_v2 = vld [vmem:[%s5666_s12 + $0x1f0] sm:$0xff] }
 0x349   : > { %5300 = vtanh.f32 %v4881_v15  ;;  %v2559_v12 = vunpack.c.l.s8.bf16 %v1047_v7  ;;  %v2561_v13 = vunpack.c.l.s8.bf16 %v1049_v8  ;;  %v1048_v15 = vld [vmem:[%s5666_s12 + $0x1790] sm:$0xff]  ;;  %v2558_v20 = vunpack.c.l.s8.bf16 %v1046_v14  ;;  %v354_v1 = vld [vmem:[%s5666_s12 + $0x1e0] sm:$0xff] }
 0x34a   : > { %v2560_v21 = vunpack.c.l.s8.bf16 %v1048_v15  ;;  %v2582_v31 = vunpack.c.h.s8.bf16 %v1046_v14  ;;  %v2584_v32 = vunpack.c.h.s8.bf16 %v1048_v15  ;;  %v378_v14 = vld [vmem:[%s5666_s12 + $0x2a0] sm:$0xff]  ;;  %v380_v15 = vld [vmem:[%s5666_s12 + $0x2b0] sm:$0xff] }
 0x34b   : > { %3424 = vmatpush1.bf16.msra.mxu0 %v2390_v22  ;;  %3588 = vmatpush1.bf16.msra.mxu1 %v2392_v25  ;;  %v2583_v22 = vunpack.c.h.s8.bf16 %v1047_v7  ;;  %v2585_v25 = vunpack.c.h.s8.bf16 %v1049_v8  ;;  %v379_v7 = vld [vmem:[%s5666_s12 + $0x2a8] sm:$0xff]  ;;  %v381_v8 = vld [vmem:[%s5666_s12 + $0x2b8] sm:$0xff] }
 0x34c   : > { %3425 = vmatprep.subr.bf16.mxu0 %v2415_v26  ;;  %3589 = vmatprep.subr.bf16.mxu1 %v2417_v27  ;;  %v307_v26 = vld [vmem:[%s5666_s12 + $0x68] sm:$0xff]  ;;  %v309_v27 = vld [vmem:[%s5666_s12 + $0x78] sm:$0xff] }
 0x34f   : > { %3426 = vmatpush1.bf16.msra.mxu0 %v2414_v36  ;;  %3590 = vmatpush1.bf16.msra.mxu1 %v2416_v37  ;;  %v1075_v36 = vunpack.c.l.s8.bf16 %v307_v26  ;;  %v1077_v37 = vunpack.c.l.s8.bf16 %v309_v27 }
 0x350   : > { %v5295_v9 = vpop.eup %5294  ;;  %3427 = vmatprep.subr.bf16.mxu0 %v2439_v38  ;;  %3591 = vmatprep.subr.bf16.mxu1 %v2441_v39  ;;  %v306_v38 = vld [vmem:[%s5666_s12 + $0x60] sm:$0xff]  ;;  %v308_v39 = vld [vmem:[%s5666_s12 + $0x70] sm:$0xff] }
 0x351   : > { %v5297_v61 = vpop.eup %5296  ;;  %4926 = vst [vmem:[%s6052_s11 + $0x20] sm:$0xff] %v5295_v9  ;;  %v1074_v40 = vunpack.c.l.s8.bf16 %v306_v38  ;;  %v1076_v41 = vunpack.c.l.s8.bf16 %v308_v39  ;;  %v331_v9 = vld [vmem:[%s5666_s12 + $0x128] sm:$0xff]  ;;  %v1100_v49 = vunpack.c.h.s8.bf16 %v308_v39  ;;  %v404_v39 = vld [vmem:[%s5666_s12 + $0x370] sm:$0xff] }
 0x352   : > { %v5299_v51 = vpop.eup %5298  ;;  %4928 = vst [vmem:[%s6052_s11 + $0x30] sm:$0xff] %v5297_v61  ;;  %v1123_v50 = vunpack.c.l.s8.bf16 %v331_v9 }
 0x353   : > { %v5301_v52 = vpop.eup %5300  ;;  %4927 = vst [vmem:[%s6052_s11 + $0x28] sm:$0xff] %v5299_v51  ;;  %3428 = vmatpush1.bf16.msra.mxu0 %v2438_v45  ;;  %3592 = vmatpush1.bf16.msra.mxu1 %v2440_v46  ;;  %v1099_v45 = vunpack.c.h.s8.bf16 %v307_v26  ;;  %v1101_v46 = vunpack.c.h.s8.bf16 %v309_v27  ;;  %v330_v51 = vld [vmem:[%s5666_s12 + $0x120] sm:$0xff]  ;;  %v403_v26 = vld [vmem:[%s5666_s12 + $0x368] sm:$0xff]  ;;  %v405_v27 = vld [vmem:[%s5666_s12 + $0x378] sm:$0xff] }
 0x354   : > { %4929 = vst [vmem:[%s6052_s11 + $0x38] sm:$0xff] %v5301_v52  ;;  %3429 = vmatprep.subr.bf16.mxu0 %v2463_v47  ;;  %3593 = vmatprep.subr.bf16.mxu1 %v2465_v48  ;;  %v333_v47 = vld [vmem:[%s5666_s12 + $0x138] sm:$0xff]  ;;  %v1098_v48 = vunpack.c.h.s8.bf16 %v306_v38  ;;  %v332_v52 = vld [vmem:[%s5666_s12 + $0x130] sm:$0xff]  ;;  %v402_v38 = vld [vmem:[%s5666_s12 + $0x360] sm:$0xff] }
 0x355   : > { %v1125_v61 = vunpack.c.l.s8.bf16 %v333_v47 }
 0x357   : > { %3430 = vmatpush1.bf16.msra.mxu0 %v2462_v53  ;;  %3594 = vmatpush1.bf16.msra.mxu1 %v2464_v54  ;;  %v1122_v53 = vunpack.c.l.s8.bf16 %v330_v51  ;;  %v1124_v54 = vunpack.c.l.s8.bf16 %v332_v52 }
 0x358   : > { %3431 = vmatprep.subr.bf16.mxu0 %v2487_v55  ;;  %3595 = vmatprep.subr.bf16.mxu1 %v2489_v56  ;;  %v1147_v55 = vunpack.c.h.s8.bf16 %v331_v9  ;;  %v1149_v56 = vunpack.c.h.s8.bf16 %v333_v47  ;;  %v427_v9 = vld [vmem:[%s5666_s12 + $0x428] sm:$0xff]  ;;  %v429_v47 = vld [vmem:[%s5666_s12 + $0x438] sm:$0xff] }
 0x35b   : > { %3432 = vmatpush1.bf16.msra.mxu0 %v2486_v59  ;;  %3596 = vmatpush1.bf16.msra.mxu1 %v2488_v62  ;;  %v1146_v59 = vunpack.c.h.s8.bf16 %v330_v51  ;;  %v1148_v62 = vunpack.c.h.s8.bf16 %v332_v52  ;;  %v426_v51 = vld [vmem:[%s5666_s12 + $0x420] sm:$0xff]  ;;  %v428_v52 = vld [vmem:[%s5666_s12 + $0x430] sm:$0xff] }
 0x35c   : > { %3433 = vmatprep.subr.bf16.mxu0 %v2511_v63  ;;  %3597 = vmatprep.subr.bf16.mxu1 %v2513_v0  ;;  %v1171_v63 = vunpack.c.l.s8.bf16 %v355_v57  ;;  %v1173_v0 = vunpack.c.l.s8.bf16 %v357_v58 }
 0x35f   : > { %3434 = vmatpush1.bf16.msra.mxu0 %v2510_v3  ;;  %3598 = vmatpush1.bf16.msra.mxu1 %v2512_v4  ;;  %v1170_v3 = vunpack.c.l.s8.bf16 %v354_v1  ;;  %v1172_v4 = vunpack.c.l.s8.bf16 %v356_v2 }
 0x360   : > { %3435 = vmatprep.subr.bf16.mxu0 %v2535_v5  ;;  %3599 = vmatprep.subr.bf16.mxu1 %v2537_v6  ;;  %v1195_v5 = vunpack.c.h.s8.bf16 %v355_v57  ;;  %v1197_v6 = vunpack.c.h.s8.bf16 %v357_v58  ;;  %v451_v57 = vld [vmem:[%s5666_s12 + $0x4e8] sm:$0xff]  ;;  %v453_v58 = vld [vmem:[%s5666_s12 + $0x4f8] sm:$0xff] }
 0x363   : > { %3436 = vmatpush1.bf16.msra.mxu0 %v2534_v10  ;;  %3600 = vmatpush1.bf16.msra.mxu1 %v2536_v11  ;;  %v1194_v10 = vunpack.c.h.s8.bf16 %v354_v1  ;;  %v1196_v11 = vunpack.c.h.s8.bf16 %v356_v2  ;;  %v450_v1 = vld [vmem:[%s5666_s12 + $0x4e0] sm:$0xff]  ;;  %v452_v2 = vld [vmem:[%s5666_s12 + $0x4f0] sm:$0xff] }
 0x364   : > { %3437 = vmatprep.subr.bf16.mxu0 %v2559_v12  ;;  %3601 = vmatprep.subr.bf16.mxu1 %v2561_v13  ;;  %v1219_v12 = vunpack.c.l.s8.bf16 %v379_v7  ;;  %v1221_v13 = vunpack.c.l.s8.bf16 %v381_v8 }
 0x367   : > { %3438 = vmatpush1.bf16.msra.mxu0 %v2558_v20  ;;  %3602 = vmatpush1.bf16.msra.mxu1 %v2560_v21  ;;  %v1218_v20 = vunpack.c.l.s8.bf16 %v378_v14  ;;  %v1220_v21 = vunpack.c.l.s8.bf16 %v380_v15 }
 0x368   : > { %3439 = vmatprep.subr.bf16.mxu0 %v2583_v22  ;;  %3603 = vmatprep.subr.bf16.mxu1 %v2585_v25  ;;  %v1243_v22 = vunpack.c.h.s8.bf16 %v379_v7  ;;  %v1245_v25 = vunpack.c.h.s8.bf16 %v381_v8  ;;  %v475_v7 = vld [vmem:[%s5666_s12 + $0x5a8] sm:$0xff]  ;;  %v477_v8 = vld [vmem:[%s5666_s12 + $0x5b8] sm:$0xff] }
 0x36b   : > { %3440 = vmatpush1.bf16.msra.mxu0 %v2582_v31  ;;  %3604 = vmatpush1.bf16.msra.mxu1 %v2584_v32  ;;  %v1242_v31 = vunpack.c.h.s8.bf16 %v378_v14  ;;  %v1244_v32 = vunpack.c.h.s8.bf16 %v380_v15  ;;  %v474_v14 = vld [vmem:[%s5666_s12 + $0x5a0] sm:$0xff]  ;;  %v476_v15 = vld [vmem:[%s5666_s12 + $0x5b0] sm:$0xff] }
 0x36c   : > { %3614 = vmatprep.subr.bf16.mxu0 %v1075_v36  ;;  %3778 = vmatprep.subr.bf16.mxu1 %v1077_v37  ;;  %v1267_v36 = vunpack.c.l.s8.bf16 %v403_v26  ;;  %v1269_v37 = vunpack.c.l.s8.bf16 %v405_v27 }
 0x36e   : > { %3442 = vmatmul.mubr.bf16.vlgmr.msra.gmra.mrb[8].mxu0 %v5878_v44  ;;  %3606 = vmatmul.mubr.bf16.vlgmr.msra.gmra.mrb[8].mxu1 %v5878_v44 }
 0x36f   : > { %3615 = vmatpush1.bf16.msra.mxu0 %v1074_v40  ;;  %3779 = vmatpush1.bf16.msra.mxu1 %v1076_v41  ;;  %v1266_v40 = vunpack.c.l.s8.bf16 %v402_v38  ;;  %v1268_v41 = vunpack.c.l.s8.bf16 %v404_v39 }
 0x370   : > { %3616 = vmatprep.subr.bf16.mxu0 %v1099_v45  ;;  %3780 = vmatprep.subr.bf16.mxu1 %v1101_v46  ;;  %v1291_v45 = vunpack.c.h.s8.bf16 %v403_v26  ;;  %v1293_v46 = vunpack.c.h.s8.bf16 %v405_v27  ;;  %v499_v26 = vld [vmem:[%s5666_s12 + $0x668] sm:$0xff]  ;;  %v501_v27 = vld [vmem:[%s5666_s12 + $0x678] sm:$0xff] }
 0x371   : > { %3646 = vmatprep.mubr.bf16.mxu0 %v5701_v35  ;;  %3810 = vmatprep.mubr.bf16.mxu1 %v5701_v35 }
 0x373   : > { %3617 = vmatpush1.bf16.msra.mxu0 %v1098_v48  ;;  %3781 = vmatpush1.bf16.msra.mxu1 %v1100_v49  ;;  %v1290_v48 = vunpack.c.h.s8.bf16 %v402_v38  ;;  %v1292_v49 = vunpack.c.h.s8.bf16 %v404_v39  ;;  %v498_v38 = vld [vmem:[%s5666_s12 + $0x660] sm:$0xff]  ;;  %v500_v39 = vld [vmem:[%s5666_s12 + $0x670] sm:$0xff] }
 0x374   : > { %3618 = vmatprep.subr.bf16.mxu0 %v1123_v50  ;;  %3782 = vmatprep.subr.bf16.mxu1 %v1125_v61  ;;  %v1315_v50 = vunpack.c.l.s8.bf16 %v427_v9  ;;  %v1317_v61 = vunpack.c.l.s8.bf16 %v429_v47 }
 0x377   : > { %3619 = vmatpush1.bf16.msra.mxu0 %v1122_v53  ;;  %3783 = vmatpush1.bf16.msra.mxu1 %v1124_v54  ;;  %v1314_v53 = vunpack.c.l.s8.bf16 %v426_v51  ;;  %v1316_v54 = vunpack.c.l.s8.bf16 %v428_v52 }
 0x378   : > { %3620 = vmatprep.subr.bf16.mxu0 %v1147_v55  ;;  %3784 = vmatprep.subr.bf16.mxu1 %v1149_v56  ;;  %v1339_v55 = vunpack.c.h.s8.bf16 %v427_v9  ;;  %v1341_v56 = vunpack.c.h.s8.bf16 %v429_v47  ;;  %v523_v9 = vld [vmem:[%s5666_s12 + $0x728] sm:$0xff]  ;;  %v525_v47 = vld [vmem:[%s5666_s12 + $0x738] sm:$0xff] }
 0x37b   : > { %3621 = vmatpush1.bf16.msra.mxu0 %v1146_v59  ;;  %3785 = vmatpush1.bf16.msra.mxu1 %v1148_v62  ;;  %v1338_v59 = vunpack.c.h.s8.bf16 %v426_v51  ;;  %v1340_v62 = vunpack.c.h.s8.bf16 %v428_v52  ;;  %v522_v51 = vld [vmem:[%s5666_s12 + $0x720] sm:$0xff]  ;;  %v524_v52 = vld [vmem:[%s5666_s12 + $0x730] sm:$0xff] }
 0x37c   : > { %3622 = vmatprep.subr.bf16.mxu0 %v1171_v63  ;;  %3786 = vmatprep.subr.bf16.mxu1 %v1173_v0  ;;  %v1363_v63 = vunpack.c.l.s8.bf16 %v451_v57  ;;  %v1365_v0 = vunpack.c.l.s8.bf16 %v453_v58 }
 0x37f   : > { %3623 = vmatpush1.bf16.msra.mxu0 %v1170_v3  ;;  %3787 = vmatpush1.bf16.msra.mxu1 %v1172_v4  ;;  %v1362_v3 = vunpack.c.l.s8.bf16 %v450_v1  ;;  %v1364_v4 = vunpack.c.l.s8.bf16 %v452_v2 }
 0x380   : > { %3624 = vmatprep.subr.bf16.mxu0 %v1195_v5  ;;  %3788 = vmatprep.subr.bf16.mxu1 %v1197_v6  ;;  %v1387_v5 = vunpack.c.h.s8.bf16 %v451_v57  ;;  %v1389_v6 = vunpack.c.h.s8.bf16 %v453_v58  ;;  %v547_v57 = vld [vmem:[%s5666_s12 + $0x7e8] sm:$0xff]  ;;  %v549_v58 = vld [vmem:[%s5666_s12 + $0x7f8] sm:$0xff] }
 0x383   : > { %3625 = vmatpush1.bf16.msra.mxu0 %v1194_v10  ;;  %3789 = vmatpush1.bf16.msra.mxu1 %v1196_v11  ;;  %v1386_v10 = vunpack.c.h.s8.bf16 %v450_v1  ;;  %v1388_v11 = vunpack.c.h.s8.bf16 %v452_v2  ;;  %v546_v1 = vld [vmem:[%s5666_s12 + $0x7e0] sm:$0xff]  ;;  %v548_v2 = vld [vmem:[%s5666_s12 + $0x7f0] sm:$0xff] }
 0x384   : > { %3626 = vmatprep.subr.bf16.mxu0 %v1219_v12  ;;  %3790 = vmatprep.subr.bf16.mxu1 %v1221_v13  ;;  %v1411_v12 = vunpack.c.l.s8.bf16 %v475_v7  ;;  %v1413_v13 = vunpack.c.l.s8.bf16 %v477_v8 }
 0x387   : > { %3627 = vmatpush1.bf16.msra.mxu0 %v1218_v20  ;;  %3791 = vmatpush1.bf16.msra.mxu1 %v1220_v21  ;;  %v1410_v20 = vunpack.c.l.s8.bf16 %v474_v14  ;;  %v1412_v21 = vunpack.c.l.s8.bf16 %v476_v15 }
 0x388   : > { %3628 = vmatprep.subr.bf16.mxu0 %v1243_v22  ;;  %3792 = vmatprep.subr.bf16.mxu1 %v1245_v25  ;;  %v1435_v22 = vunpack.c.h.s8.bf16 %v475_v7  ;;  %v1437_v25 = vunpack.c.h.s8.bf16 %v477_v8  ;;  %v571_v7 = vld [vmem:[%s5666_s12 + $0x8a8] sm:$0xff]  ;;  %v573_v8 = vld [vmem:[%s5666_s12 + $0x8b8] sm:$0xff] }
 0x38b   : > { %3629 = vmatpush1.bf16.msra.mxu0 %v1242_v31  ;;  %3793 = vmatpush1.bf16.msra.mxu1 %v1244_v32  ;;  %v1434_v31 = vunpack.c.h.s8.bf16 %v474_v14  ;;  %v1436_v32 = vunpack.c.h.s8.bf16 %v476_v15  ;;  %v570_v14 = vld [vmem:[%s5666_s12 + $0x8a0] sm:$0xff]  ;;  %v572_v15 = vld [vmem:[%s5666_s12 + $0x8b0] sm:$0xff] }
 0x38c   : > { %3630 = vmatprep.subr.bf16.mxu0 %v1267_v36  ;;  %3794 = vmatprep.subr.bf16.mxu1 %v1269_v37  ;;  %v1459_v36 = vunpack.c.l.s8.bf16 %v499_v26  ;;  %v1461_v37 = vunpack.c.l.s8.bf16 %v501_v27 }
 0x38f   : > { %3631 = vmatpush1.bf16.msra.mxu0 %v1266_v40  ;;  %3795 = vmatpush1.bf16.msra.mxu1 %v1268_v41  ;;  %v1458_v40 = vunpack.c.l.s8.bf16 %v498_v38  ;;  %v1460_v41 = vunpack.c.l.s8.bf16 %v500_v39 }
 0x390   : > { %3632 = vmatprep.subr.bf16.mxu0 %v1291_v45  ;;  %3796 = vmatprep.subr.bf16.mxu1 %v1293_v46  ;;  %v1483_v45 = vunpack.c.h.s8.bf16 %v499_v26  ;;  %v1485_v46 = vunpack.c.h.s8.bf16 %v501_v27  ;;  %v595_v26 = vld [vmem:[%s5666_s12 + $0x968] sm:$0xff]  ;;  %v597_v27 = vld [vmem:[%s5666_s12 + $0x978] sm:$0xff] }
 0x393   : > { %3633 = vmatpush1.bf16.msra.mxu0 %v1290_v48  ;;  %3797 = vmatpush1.bf16.msra.mxu1 %v1292_v49  ;;  %v1482_v48 = vunpack.c.h.s8.bf16 %v498_v38  ;;  %v1484_v49 = vunpack.c.h.s8.bf16 %v500_v39  ;;  %v594_v38 = vld [vmem:[%s5666_s12 + $0x960] sm:$0xff]  ;;  %v596_v39 = vld [vmem:[%s5666_s12 + $0x970] sm:$0xff] }
 0x394   : > { %3634 = vmatprep.subr.bf16.mxu0 %v1315_v50  ;;  %3798 = vmatprep.subr.bf16.mxu1 %v1317_v61  ;;  %v1507_v50 = vunpack.c.l.s8.bf16 %v523_v9  ;;  %v1509_v61 = vunpack.c.l.s8.bf16 %v525_v47 }
 0x397   : > { %3635 = vmatpush1.bf16.msra.mxu0 %v1314_v53  ;;  %3799 = vmatpush1.bf16.msra.mxu1 %v1316_v54  ;;  %v1506_v53 = vunpack.c.l.s8.bf16 %v522_v51  ;;  %v1508_v54 = vunpack.c.l.s8.bf16 %v524_v52 }
 0x398   : > { %3636 = vmatprep.subr.bf16.mxu0 %v1339_v55  ;;  %3800 = vmatprep.subr.bf16.mxu1 %v1341_v56  ;;  %v1531_v55 = vunpack.c.h.s8.bf16 %v523_v9  ;;  %v1533_v56 = vunpack.c.h.s8.bf16 %v525_v47  ;;  %v619_v9 = vld [vmem:[%s5666_s12 + $0xa28] sm:$0xff]  ;;  %v621_v47 = vld [vmem:[%s5666_s12 + $0xa38] sm:$0xff] }
 0x39b   : > { %3637 = vmatpush1.bf16.msra.mxu0 %v1338_v59  ;;  %3801 = vmatpush1.bf16.msra.mxu1 %v1340_v62  ;;  %v1530_v59 = vunpack.c.h.s8.bf16 %v522_v51  ;;  %v1532_v62 = vunpack.c.h.s8.bf16 %v524_v52  ;;  %v618_v51 = vld [vmem:[%s5666_s12 + $0xa20] sm:$0xff]  ;;  %v620_v52 = vld [vmem:[%s5666_s12 + $0xa30] sm:$0xff] }
 0x39c   : > { %3638 = vmatprep.subr.bf16.mxu0 %v1363_v63  ;;  %3802 = vmatprep.subr.bf16.mxu1 %v1365_v0  ;;  %v1555_v63 = vunpack.c.l.s8.bf16 %v547_v57  ;;  %v1557_v0 = vunpack.c.l.s8.bf16 %v549_v58 }
 0x39f   : > { %3639 = vmatpush1.bf16.msra.mxu0 %v1362_v3  ;;  %3803 = vmatpush1.bf16.msra.mxu1 %v1364_v4  ;;  %v1554_v3 = vunpack.c.l.s8.bf16 %v546_v1  ;;  %v1556_v4 = vunpack.c.l.s8.bf16 %v548_v2 }
 0x3a0   : > { %3640 = vmatprep.subr.bf16.mxu0 %v1387_v5  ;;  %3804 = vmatprep.subr.bf16.mxu1 %v1389_v6  ;;  %v1579_v5 = vunpack.c.h.s8.bf16 %v547_v57  ;;  %v1581_v6 = vunpack.c.h.s8.bf16 %v549_v58  ;;  %v643_v57 = vld [vmem:[%s5666_s12 + $0xae8] sm:$0xff]  ;;  %v645_v58 = vld [vmem:[%s5666_s12 + $0xaf8] sm:$0xff] }
 0x3a3   : > { %3641 = vmatpush1.bf16.msra.mxu0 %v1386_v10  ;;  %3805 = vmatpush1.bf16.msra.mxu1 %v1388_v11  ;;  %v1578_v10 = vunpack.c.h.s8.bf16 %v546_v1  ;;  %v1580_v11 = vunpack.c.h.s8.bf16 %v548_v2  ;;  %v642_v1 = vld [vmem:[%s5666_s12 + $0xae0] sm:$0xff]  ;;  %v644_v2 = vld [vmem:[%s5666_s12 + $0xaf0] sm:$0xff] }
 0x3a4   : > { %3642 = vmatprep.subr.bf16.mxu0 %v1411_v12  ;;  %3806 = vmatprep.subr.bf16.mxu1 %v1413_v13  ;;  %v1603_v12 = vunpack.c.l.s8.bf16 %v571_v7  ;;  %v1605_v13 = vunpack.c.l.s8.bf16 %v573_v8 }
 0x3a7   : > { %3643 = vmatpush1.bf16.msra.mxu0 %v1410_v20  ;;  %3807 = vmatpush1.bf16.msra.mxu1 %v1412_v21  ;;  %v1602_v20 = vunpack.c.l.s8.bf16 %v570_v14  ;;  %v1604_v21 = vunpack.c.l.s8.bf16 %v572_v15 }
 0x3a8   : > { %3644 = vmatprep.subr.bf16.mxu0 %v1435_v22  ;;  %3808 = vmatprep.subr.bf16.mxu1 %v1437_v25  ;;  %v1627_v22 = vunpack.c.h.s8.bf16 %v571_v7  ;;  %v1629_v25 = vunpack.c.h.s8.bf16 %v573_v8  ;;  %v667_v7 = vld [vmem:[%s5666_s12 + $0xba8] sm:$0xff]  ;;  %v669_v8 = vld [vmem:[%s5666_s12 + $0xbb8] sm:$0xff] }
 0x3ab   : > { %3645 = vmatpush1.bf16.msra.mxu0 %v1434_v31  ;;  %3809 = vmatpush1.bf16.msra.mxu1 %v1436_v32  ;;  %v1626_v31 = vunpack.c.h.s8.bf16 %v570_v14  ;;  %v1628_v32 = vunpack.c.h.s8.bf16 %v572_v15  ;;  %v666_v14 = vld [vmem:[%s5666_s12 + $0xba0] sm:$0xff]  ;;  %v668_v15 = vld [vmem:[%s5666_s12 + $0xbb0] sm:$0xff] }
 0x3ac   : > { %3655 = vmatprep.subr.bf16.mxu0 %v1459_v36  ;;  %3819 = vmatprep.subr.bf16.mxu1 %v1461_v37  ;;  %v1651_v36 = vunpack.c.l.s8.bf16 %v595_v26  ;;  %v1653_v37 = vunpack.c.l.s8.bf16 %v597_v27 }
 0x3ae   : > { %3647 = vmatmul.mubr.bf16.vlgmr.msra.gmra.mrb[12].mxu0 %v5731_v42  ;;  %3811 = vmatmul.mubr.bf16.vlgmr.msra.gmra.mrb[12].mxu1 %v5731_v42 }
 0x3af   : > { %3656 = vmatpush1.bf16.msra.mxu0 %v1458_v40  ;;  %3820 = vmatpush1.bf16.msra.mxu1 %v1460_v41  ;;  %v1650_v40 = vunpack.c.l.s8.bf16 %v594_v38  ;;  %v1652_v41 = vunpack.c.l.s8.bf16 %v596_v39 }
 0x3b0   : > { %3657 = vmatprep.subr.bf16.mxu0 %v1483_v45  ;;  %3821 = vmatprep.subr.bf16.mxu1 %v1485_v46  ;;  %v1675_v45 = vunpack.c.h.s8.bf16 %v595_v26  ;;  %v1677_v46 = vunpack.c.h.s8.bf16 %v597_v27  ;;  %v691_v26 = vld [vmem:[%s5666_s12 + $0xc68] sm:$0xff]  ;;  %v693_v27 = vld [vmem:[%s5666_s12 + $0xc78] sm:$0xff] }
 0x3b1   : > { %3687 = vmatprep.mubr.bf16.mxu0 %v5742_v30  ;;  %3851 = vmatprep.mubr.bf16.mxu1 %v5742_v30 }
 0x3b3   : > { %3658 = vmatpush1.bf16.msra.mxu0 %v1482_v48  ;;  %3822 = vmatpush1.bf16.msra.mxu1 %v1484_v49  ;;  %v1674_v48 = vunpack.c.h.s8.bf16 %v594_v38  ;;  %v1676_v49 = vunpack.c.h.s8.bf16 %v596_v39  ;;  %v690_v38 = vld [vmem:[%s5666_s12 + $0xc60] sm:$0xff]  ;;  %v692_v39 = vld [vmem:[%s5666_s12 + $0xc70] sm:$0xff] }
 0x3b4   : > { %3659 = vmatprep.subr.bf16.mxu0 %v1507_v50  ;;  %3823 = vmatprep.subr.bf16.mxu1 %v1509_v61  ;;  %v1699_v50 = vunpack.c.l.s8.bf16 %v619_v9  ;;  %v1701_v61 = vunpack.c.l.s8.bf16 %v621_v47 }
 0x3b7   : > { %3660 = vmatpush1.bf16.msra.mxu0 %v1506_v53  ;;  %3824 = vmatpush1.bf16.msra.mxu1 %v1508_v54  ;;  %v1698_v53 = vunpack.c.l.s8.bf16 %v618_v51  ;;  %v1700_v54 = vunpack.c.l.s8.bf16 %v620_v52 }
 0x3b8   : > { %3661 = vmatprep.subr.bf16.mxu0 %v1531_v55  ;;  %3825 = vmatprep.subr.bf16.mxu1 %v1533_v56  ;;  %v1723_v55 = vunpack.c.h.s8.bf16 %v619_v9  ;;  %v1725_v56 = vunpack.c.h.s8.bf16 %v621_v47  ;;  %v715_v9 = vld [vmem:[%s5666_s12 + $0xd28] sm:$0xff]  ;;  %v717_v47 = vld [vmem:[%s5666_s12 + $0xd38] sm:$0xff] }
 0x3bb   : > { %3662 = vmatpush1.bf16.msra.mxu0 %v1530_v59  ;;  %3826 = vmatpush1.bf16.msra.mxu1 %v1532_v62  ;;  %v1722_v59 = vunpack.c.h.s8.bf16 %v618_v51  ;;  %v1724_v62 = vunpack.c.h.s8.bf16 %v620_v52  ;;  %v714_v51 = vld [vmem:[%s5666_s12 + $0xd20] sm:$0xff]  ;;  %v716_v52 = vld [vmem:[%s5666_s12 + $0xd30] sm:$0xff] }
 0x3bc   : > { %3663 = vmatprep.subr.bf16.mxu0 %v1555_v63  ;;  %3827 = vmatprep.subr.bf16.mxu1 %v1557_v0  ;;  %v1747_v63 = vunpack.c.l.s8.bf16 %v643_v57  ;;  %v1749_v0 = vunpack.c.l.s8.bf16 %v645_v58 }
 0x3bf   : > { %3664 = vmatpush1.bf16.msra.mxu0 %v1554_v3  ;;  %3828 = vmatpush1.bf16.msra.mxu1 %v1556_v4  ;;  %v1746_v3 = vunpack.c.l.s8.bf16 %v642_v1  ;;  %v1748_v4 = vunpack.c.l.s8.bf16 %v644_v2 }
 0x3c0   : > { %3665 = vmatprep.subr.bf16.mxu0 %v1579_v5  ;;  %3829 = vmatprep.subr.bf16.mxu1 %v1581_v6  ;;  %v1771_v5 = vunpack.c.h.s8.bf16 %v643_v57  ;;  %v1773_v6 = vunpack.c.h.s8.bf16 %v645_v58  ;;  %v739_v57 = vld [vmem:[%s5666_s12 + $0xde8] sm:$0xff]  ;;  %v741_v58 = vld [vmem:[%s5666_s12 + $0xdf8] sm:$0xff] }
 0x3c3   : > { %3666 = vmatpush1.bf16.msra.mxu0 %v1578_v10  ;;  %3830 = vmatpush1.bf16.msra.mxu1 %v1580_v11  ;;  %v1770_v10 = vunpack.c.h.s8.bf16 %v642_v1  ;;  %v1772_v11 = vunpack.c.h.s8.bf16 %v644_v2  ;;  %v738_v1 = vld [vmem:[%s5666_s12 + $0xde0] sm:$0xff]  ;;  %v740_v2 = vld [vmem:[%s5666_s12 + $0xdf0] sm:$0xff] }
 0x3c4   : > { %3667 = vmatprep.subr.bf16.mxu0 %v1603_v12  ;;  %3831 = vmatprep.subr.bf16.mxu1 %v1605_v13  ;;  %v1795_v12 = vunpack.c.l.s8.bf16 %v667_v7  ;;  %v1797_v13 = vunpack.c.l.s8.bf16 %v669_v8 }
 0x3c7   : > { %3668 = vmatpush1.bf16.msra.mxu0 %v1602_v20  ;;  %3832 = vmatpush1.bf16.msra.mxu1 %v1604_v21  ;;  %v1794_v20 = vunpack.c.l.s8.bf16 %v666_v14  ;;  %v1796_v21 = vunpack.c.l.s8.bf16 %v668_v15 }
 0x3c8   : > { %3669 = vmatprep.subr.bf16.mxu0 %v1627_v22  ;;  %3833 = vmatprep.subr.bf16.mxu1 %v1629_v25  ;;  %v1819_v22 = vunpack.c.h.s8.bf16 %v667_v7  ;;  %v1821_v25 = vunpack.c.h.s8.bf16 %v669_v8  ;;  %v763_v7 = vld [vmem:[%s5666_s12 + $0xea8] sm:$0xff]  ;;  %v765_v8 = vld [vmem:[%s5666_s12 + $0xeb8] sm:$0xff] }
 0x3cb   : > { %3670 = vmatpush1.bf16.msra.mxu0 %v1626_v31  ;;  %3834 = vmatpush1.bf16.msra.mxu1 %v1628_v32  ;;  %v1818_v31 = vunpack.c.h.s8.bf16 %v666_v14  ;;  %v1820_v32 = vunpack.c.h.s8.bf16 %v668_v15  ;;  %v762_v14 = vld [vmem:[%s5666_s12 + $0xea0] sm:$0xff]  ;;  %v764_v15 = vld [vmem:[%s5666_s12 + $0xeb0] sm:$0xff] }
 0x3cc   : > { %3671 = vmatprep.subr.bf16.mxu0 %v1651_v36  ;;  %3835 = vmatprep.subr.bf16.mxu1 %v1653_v37  ;;  %v1843_v36 = vunpack.c.l.s8.bf16 %v691_v26  ;;  %v1845_v37 = vunpack.c.l.s8.bf16 %v693_v27 }
 0x3cf   : > { %3672 = vmatpush1.bf16.msra.mxu0 %v1650_v40  ;;  %3836 = vmatpush1.bf16.msra.mxu1 %v1652_v41  ;;  %v1842_v40 = vunpack.c.l.s8.bf16 %v690_v38  ;;  %v1844_v41 = vunpack.c.l.s8.bf16 %v692_v39 }
 0x3d0   : > { %3673 = vmatprep.subr.bf16.mxu0 %v1675_v45  ;;  %3837 = vmatprep.subr.bf16.mxu1 %v1677_v46  ;;  %v1867_v45 = vunpack.c.h.s8.bf16 %v691_v26  ;;  %v1869_v46 = vunpack.c.h.s8.bf16 %v693_v27  ;;  %v787_v26 = vld [vmem:[%s5666_s12 + $0xf68] sm:$0xff]  ;;  %v789_v27 = vld [vmem:[%s5666_s12 + $0xf78] sm:$0xff] }
 0x3d3   : > { %3674 = vmatpush1.bf16.msra.mxu0 %v1674_v48  ;;  %3838 = vmatpush1.bf16.msra.mxu1 %v1676_v49  ;;  %v1866_v48 = vunpack.c.h.s8.bf16 %v690_v38  ;;  %v1868_v49 = vunpack.c.h.s8.bf16 %v692_v39  ;;  %v786_v38 = vld [vmem:[%s5666_s12 + $0xf60] sm:$0xff]  ;;  %v788_v39 = vld [vmem:[%s5666_s12 + $0xf70] sm:$0xff] }
 0x3d4   : > { %3675 = vmatprep.subr.bf16.mxu0 %v1699_v50  ;;  %3839 = vmatprep.subr.bf16.mxu1 %v1701_v61  ;;  %v1891_v50 = vunpack.c.l.s8.bf16 %v715_v9  ;;  %v1893_v61 = vunpack.c.l.s8.bf16 %v717_v47 }
 0x3d7   : > { %3676 = vmatpush1.bf16.msra.mxu0 %v1698_v53  ;;  %3840 = vmatpush1.bf16.msra.mxu1 %v1700_v54  ;;  %v1890_v53 = vunpack.c.l.s8.bf16 %v714_v51  ;;  %v1892_v54 = vunpack.c.l.s8.bf16 %v716_v52 }
 0x3d8   : > { %3677 = vmatprep.subr.bf16.mxu0 %v1723_v55  ;;  %3841 = vmatprep.subr.bf16.mxu1 %v1725_v56  ;;  %v1915_v55 = vunpack.c.h.s8.bf16 %v715_v9  ;;  %v1917_v56 = vunpack.c.h.s8.bf16 %v717_v47  ;;  %v811_v9 = vld [vmem:[%s5666_s12 + $0x1028] sm:$0xff]  ;;  %v813_v47 = vld [vmem:[%s5666_s12 + $0x1038] sm:$0xff] }
 0x3db   : > { %3678 = vmatpush1.bf16.msra.mxu0 %v1722_v59  ;;  %3842 = vmatpush1.bf16.msra.mxu1 %v1724_v62  ;;  %v1914_v59 = vunpack.c.h.s8.bf16 %v714_v51  ;;  %v1916_v62 = vunpack.c.h.s8.bf16 %v716_v52  ;;  %v810_v51 = vld [vmem:[%s5666_s12 + $0x1020] sm:$0xff]  ;;  %v812_v52 = vld [vmem:[%s5666_s12 + $0x1030] sm:$0xff] }
 0x3dc   : > { %3679 = vmatprep.subr.bf16.mxu0 %v1747_v63  ;;  %3843 = vmatprep.subr.bf16.mxu1 %v1749_v0  ;;  %v1939_v63 = vunpack.c.l.s8.bf16 %v739_v57  ;;  %v1941_v0 = vunpack.c.l.s8.bf16 %v741_v58 }
 0x3df   : > { %3680 = vmatpush1.bf16.msra.mxu0 %v1746_v3  ;;  %3844 = vmatpush1.bf16.msra.mxu1 %v1748_v4  ;;  %v1938_v3 = vunpack.c.l.s8.bf16 %v738_v1  ;;  %v1940_v4 = vunpack.c.l.s8.bf16 %v740_v2 }
 0x3e0   : > { %3681 = vmatprep.subr.bf16.mxu0 %v1771_v5  ;;  %3845 = vmatprep.subr.bf16.mxu1 %v1773_v6  ;;  %v1963_v5 = vunpack.c.h.s8.bf16 %v739_v57  ;;  %v1965_v6 = vunpack.c.h.s8.bf16 %v741_v58  ;;  %v835_v57 = vld [vmem:[%s5666_s12 + $0x10e8] sm:$0xff]  ;;  %v837_v58 = vld [vmem:[%s5666_s12 + $0x10f8] sm:$0xff] }
 0x3e3   : > { %3682 = vmatpush1.bf16.msra.mxu0 %v1770_v10  ;;  %3846 = vmatpush1.bf16.msra.mxu1 %v1772_v11  ;;  %v1962_v10 = vunpack.c.h.s8.bf16 %v738_v1  ;;  %v1964_v11 = vunpack.c.h.s8.bf16 %v740_v2  ;;  %v834_v1 = vld [vmem:[%s5666_s12 + $0x10e0] sm:$0xff]  ;;  %v836_v2 = vld [vmem:[%s5666_s12 + $0x10f0] sm:$0xff] }
 0x3e4   : > { %3683 = vmatprep.subr.bf16.mxu0 %v1795_v12  ;;  %3847 = vmatprep.subr.bf16.mxu1 %v1797_v13  ;;  %v1987_v12 = vunpack.c.l.s8.bf16 %v763_v7  ;;  %v1989_v13 = vunpack.c.l.s8.bf16 %v765_v8 }
 0x3e7   : > { %3684 = vmatpush1.bf16.msra.mxu0 %v1794_v20  ;;  %3848 = vmatpush1.bf16.msra.mxu1 %v1796_v21  ;;  %v1986_v20 = vunpack.c.l.s8.bf16 %v762_v14  ;;  %v1988_v21 = vunpack.c.l.s8.bf16 %v764_v15 }
 0x3e8   : > { %3685 = vmatprep.subr.bf16.mxu0 %v1819_v22  ;;  %3849 = vmatprep.subr.bf16.mxu1 %v1821_v25  ;;  %v2011_v22 = vunpack.c.h.s8.bf16 %v763_v7  ;;  %v2013_v25 = vunpack.c.h.s8.bf16 %v765_v8  ;;  %v859_v7 = vld [vmem:[%s5666_s12 + $0x11a8] sm:$0xff]  ;;  %v861_v8 = vld [vmem:[%s5666_s12 + $0x11b8] sm:$0xff] }
 0x3eb   : > { %3686 = vmatpush1.bf16.msra.mxu0 %v1818_v31  ;;  %3850 = vmatpush1.bf16.msra.mxu1 %v1820_v32  ;;  %v2010_v31 = vunpack.c.h.s8.bf16 %v762_v14  ;;  %v2012_v32 = vunpack.c.h.s8.bf16 %v764_v15  ;;  %v858_v14 = vld [vmem:[%s5666_s12 + $0x11a0] sm:$0xff]  ;;  %v860_v15 = vld [vmem:[%s5666_s12 + $0x11b0] sm:$0xff] }
 0x3ec   : > { %3696 = vmatprep.subr.bf16.mxu0 %v1843_v36  ;;  %3860 = vmatprep.subr.bf16.mxu1 %v1845_v37  ;;  %v2035_v36 = vunpack.c.l.s8.bf16 %v787_v26  ;;  %v2037_v37 = vunpack.c.l.s8.bf16 %v789_v27 }
 0x3ee   : > { %3688 = vmatmul.mubr.bf16.vlgmr.msra.gmra.mrb[12].mxu0 %v5780_v16  ;;  %3852 = vmatmul.mubr.bf16.vlgmr.msra.gmra.mrb[12].mxu1 %v5780_v16 }
 0x3ef   : > { %3697 = vmatpush1.bf16.msra.mxu0 %v1842_v40  ;;  %3861 = vmatpush1.bf16.msra.mxu1 %v1844_v41  ;;  %v2034_v40 = vunpack.c.l.s8.bf16 %v786_v38  ;;  %v2036_v41 = vunpack.c.l.s8.bf16 %v788_v39 }
 0x3f0   : > { %3698 = vmatprep.subr.bf16.mxu0 %v1867_v45  ;;  %3862 = vmatprep.subr.bf16.mxu1 %v1869_v46  ;;  %v2059_v45 = vunpack.c.h.s8.bf16 %v787_v26  ;;  %v2061_v46 = vunpack.c.h.s8.bf16 %v789_v27  ;;  %v883_v26 = vld [vmem:[%s5666_s12 + $0x1268] sm:$0xff]  ;;  %v885_v27 = vld [vmem:[%s5666_s12 + $0x1278] sm:$0xff] }
 0x3f1   : > { %3728 = vmatprep.mubr.bf16.mxu0 %v5791_v43  ;;  %3892 = vmatprep.mubr.bf16.mxu1 %v5791_v43 }
 0x3f3   : > { %3699 = vmatpush1.bf16.msra.mxu0 %v1866_v48  ;;  %3863 = vmatpush1.bf16.msra.mxu1 %v1868_v49  ;;  %v2058_v48 = vunpack.c.h.s8.bf16 %v786_v38  ;;  %v2060_v49 = vunpack.c.h.s8.bf16 %v788_v39  ;;  %v882_v38 = vld [vmem:[%s5666_s12 + $0x1260] sm:$0xff]  ;;  %v884_v39 = vld [vmem:[%s5666_s12 + $0x1270] sm:$0xff] }
 0x3f4   : > { %3700 = vmatprep.subr.bf16.mxu0 %v1891_v50  ;;  %3864 = vmatprep.subr.bf16.mxu1 %v1893_v61  ;;  %v2083_v50 = vunpack.c.l.s8.bf16 %v811_v9  ;;  %v2085_v61 = vunpack.c.l.s8.bf16 %v813_v47 }
 0x3f7   : > { %3701 = vmatpush1.bf16.msra.mxu0 %v1890_v53  ;;  %3865 = vmatpush1.bf16.msra.mxu1 %v1892_v54  ;;  %v2082_v53 = vunpack.c.l.s8.bf16 %v810_v51  ;;  %v2084_v54 = vunpack.c.l.s8.bf16 %v812_v52 }
 0x3f8   : > { %3702 = vmatprep.subr.bf16.mxu0 %v1915_v55  ;;  %3866 = vmatprep.subr.bf16.mxu1 %v1917_v56  ;;  %v2107_v55 = vunpack.c.h.s8.bf16 %v811_v9  ;;  %v2109_v56 = vunpack.c.h.s8.bf16 %v813_v47  ;;  %v907_v9 = vld [vmem:[%s5666_s12 + $0x1328] sm:$0xff]  ;;  %v909_v47 = vld [vmem:[%s5666_s12 + $0x1338] sm:$0xff] }
 0x3fb   : > { %3703 = vmatpush1.bf16.msra.mxu0 %v1914_v59  ;;  %3867 = vmatpush1.bf16.msra.mxu1 %v1916_v62  ;;  %v2106_v59 = vunpack.c.h.s8.bf16 %v810_v51  ;;  %v2108_v62 = vunpack.c.h.s8.bf16 %v812_v52  ;;  %v906_v51 = vld [vmem:[%s5666_s12 + $0x1320] sm:$0xff]  ;;  %v908_v52 = vld [vmem:[%s5666_s12 + $0x1330] sm:$0xff] }
 0x3fc   : > { %3704 = vmatprep.subr.bf16.mxu0 %v1939_v63  ;;  %3868 = vmatprep.subr.bf16.mxu1 %v1941_v0  ;;  %v2131_v63 = vunpack.c.l.s8.bf16 %v835_v57  ;;  %v2133_v0 = vunpack.c.l.s8.bf16 %v837_v58 }
 0x3ff   : > { %3705 = vmatpush1.bf16.msra.mxu0 %v1938_v3  ;;  %3869 = vmatpush1.bf16.msra.mxu1 %v1940_v4  ;;  %v2130_v3 = vunpack.c.l.s8.bf16 %v834_v1  ;;  %v2132_v4 = vunpack.c.l.s8.bf16 %v836_v2 }
 0x400   : > { %3706 = vmatprep.subr.bf16.mxu0 %v1963_v5  ;;  %3870 = vmatprep.subr.bf16.mxu1 %v1965_v6  ;;  %v2155_v5 = vunpack.c.h.s8.bf16 %v835_v57  ;;  %v2157_v6 = vunpack.c.h.s8.bf16 %v837_v58  ;;  %v931_v57 = vld [vmem:[%s5666_s12 + $0x13e8] sm:$0xff]  ;;  %v933_v58 = vld [vmem:[%s5666_s12 + $0x13f8] sm:$0xff] }
 0x403   : > { %3707 = vmatpush1.bf16.msra.mxu0 %v1962_v10  ;;  %3871 = vmatpush1.bf16.msra.mxu1 %v1964_v11  ;;  %v2154_v10 = vunpack.c.h.s8.bf16 %v834_v1  ;;  %v2156_v11 = vunpack.c.h.s8.bf16 %v836_v2  ;;  %v930_v1 = vld [vmem:[%s5666_s12 + $0x13e0] sm:$0xff]  ;;  %v932_v2 = vld [vmem:[%s5666_s12 + $0x13f0] sm:$0xff] }
 0x404   : > { %3708 = vmatprep.subr.bf16.mxu0 %v1987_v12  ;;  %3872 = vmatprep.subr.bf16.mxu1 %v1989_v13  ;;  %v2179_v12 = vunpack.c.l.s8.bf16 %v859_v7  ;;  %v2181_v13 = vunpack.c.l.s8.bf16 %v861_v8 }
 0x407   : > { %3709 = vmatpush1.bf16.msra.mxu0 %v1986_v20  ;;  %3873 = vmatpush1.bf16.msra.mxu1 %v1988_v21  ;;  %v2178_v20 = vunpack.c.l.s8.bf16 %v858_v14  ;;  %v2180_v21 = vunpack.c.l.s8.bf16 %v860_v15 }
 0x408   : > { %3710 = vmatprep.subr.bf16.mxu0 %v2011_v22  ;;  %3874 = vmatprep.subr.bf16.mxu1 %v2013_v25  ;;  %v2203_v22 = vunpack.c.h.s8.bf16 %v859_v7  ;;  %v2205_v25 = vunpack.c.h.s8.bf16 %v861_v8  ;;  %v2349_v7 = vunpack.c.h.s8.bf16 %v933_v58  ;;  %v4749_v8 = vld [vmem:[%s6017_s8 + $0x8] sm:$0xff] }
 0x40b   : > { %3711 = vmatpush1.bf16.msra.mxu0 %v2010_v31  ;;  %3875 = vmatpush1.bf16.msra.mxu1 %v2012_v32  ;;  %v2202_v31 = vunpack.c.h.s8.bf16 %v858_v14  ;;  %v2204_v32 = vunpack.c.h.s8.bf16 %v860_v15 }
 0x40c   : > { %3712 = vmatprep.subr.bf16.mxu0 %v2035_v36  ;;  %3876 = vmatprep.subr.bf16.mxu1 %v2037_v37  ;;  %v2227_v36 = vunpack.c.l.s8.bf16 %v883_v26  ;;  %v2229_v37 = vunpack.c.l.s8.bf16 %v885_v27 }
 0x40f   : > { %3713 = vmatpush1.bf16.msra.mxu0 %v2034_v40  ;;  %3877 = vmatpush1.bf16.msra.mxu1 %v2036_v41  ;;  %v2226_v40 = vunpack.c.l.s8.bf16 %v882_v38  ;;  %v2228_v41 = vunpack.c.l.s8.bf16 %v884_v39 }
 0x410   : > { %3714 = vmatprep.subr.bf16.mxu0 %v2059_v45  ;;  %3878 = vmatprep.subr.bf16.mxu1 %v2061_v46  ;;  %v2251_v45 = vunpack.c.h.s8.bf16 %v883_v26  ;;  %v2253_v46 = vunpack.c.h.s8.bf16 %v885_v27 }
 0x413   : > { %3715 = vmatpush1.bf16.msra.mxu0 %v2058_v48  ;;  %3879 = vmatpush1.bf16.msra.mxu1 %v2060_v49  ;;  %v2250_v48 = vunpack.c.h.s8.bf16 %v882_v38  ;;  %v2252_v49 = vunpack.c.h.s8.bf16 %v884_v39  ;;  %v4793_v38 = vrot.slane %v4749_v8, %v6010_v23  ;;  %v4801_v39 = vrot.slane %v4749_v8, %v6013_v24 }
 0x414   : > { %3716 = vmatprep.subr.bf16.mxu0 %v2083_v50  ;;  %3880 = vmatprep.subr.bf16.mxu1 %v2085_v61  ;;  %v2275_v50 = vunpack.c.l.s8.bf16 %v907_v9  ;;  %v2277_v61 = vunpack.c.l.s8.bf16 %v909_v47 }
 0x417   : > { %3717 = vmatpush1.bf16.msra.mxu0 %v2082_v53  ;;  %3881 = vmatpush1.bf16.msra.mxu1 %v2084_v54  ;;  %v2274_v53 = vunpack.c.l.s8.bf16 %v906_v51  ;;  %v2276_v54 = vunpack.c.l.s8.bf16 %v908_v52 }
 0x418   : > { %3718 = vmatprep.subr.bf16.mxu0 %v2107_v55  ;;  %3882 = vmatprep.subr.bf16.mxu1 %v2109_v56  ;;  %v2299_v55 = vunpack.c.h.s8.bf16 %v907_v9  ;;  %v2301_v56 = vunpack.c.h.s8.bf16 %v909_v47 }
 0x41b   : > { %3719 = vmatpush1.bf16.msra.mxu0 %v2106_v59  ;;  %3883 = vmatpush1.bf16.msra.mxu1 %v2108_v62  ;;  %v2298_v59 = vunpack.c.h.s8.bf16 %v906_v51  ;;  %v2300_v62 = vunpack.c.h.s8.bf16 %v908_v52 }
 0x41c   : > { %3720 = vmatprep.subr.bf16.mxu0 %v2131_v63  ;;  %3884 = vmatprep.subr.bf16.mxu1 %v2133_v0  ;;  %v2323_v63 = vunpack.c.l.s8.bf16 %v931_v57  ;;  %v2325_v0 = vunpack.c.l.s8.bf16 %v933_v58 }
 0x41f   : > { %3721 = vmatpush1.bf16.msra.mxu0 %v2130_v3  ;;  %3885 = vmatpush1.bf16.msra.mxu1 %v2132_v4  ;;  %v2322_v3 = vunpack.c.l.s8.bf16 %v930_v1  ;;  %v2324_v4 = vunpack.c.l.s8.bf16 %v932_v2 }
 0x420   : > { %3722 = vmatprep.subr.bf16.mxu0 %v2155_v5  ;;  %3886 = vmatprep.subr.bf16.mxu1 %v2157_v6  ;;  %v4599_v5 = vld [vmem:[%s5676_s27 + $0x8] sm:$0xff]  ;;  %v2347_v6 = vunpack.c.h.s8.bf16 %v931_v57 }
 0x421   : > { %v4643_v14 = vrot.slane %v4599_v5, %v6010_v23  ;;  %v4651_v15 = vrot.slane %v4599_v5, %v6013_v24 }
 0x423   : > { %3723 = vmatpush1.bf16.msra.mxu0 %v2154_v10  ;;  %3887 = vmatpush1.bf16.msra.mxu1 %v2156_v11  ;;  %v955_v10 = vld [vmem:[%s5666_s12 + $0x14a8] sm:$0xff]  ;;  %v957_v11 = vld [vmem:[%s5666_s12 + $0x14b8] sm:$0xff] }
 0x424   : > { %3724 = vmatprep.subr.bf16.mxu0 %v2179_v12  ;;  %3888 = vmatprep.subr.bf16.mxu1 %v2181_v13  ;;  %v4639_v12 = vrot.slane %v4599_v5, %v6003_v18  ;;  %v4647_v13 = vrot.slane %v4599_v5, %v6006_v19  ;;  %v2371_v26 = vunpack.c.l.s8.bf16 %v955_v10  ;;  %v2373_v27 = vunpack.c.l.s8.bf16 %v957_v11 }
 0x427   : > { %3725 = vmatpush1.bf16.msra.mxu0 %v2178_v20  ;;  %3889 = vmatpush1.bf16.msra.mxu1 %v2180_v21  ;;  %v2346_v20 = vunpack.c.h.s8.bf16 %v930_v1  ;;  %v2348_v21 = vunpack.c.h.s8.bf16 %v932_v2 }
 0x428   : > { %3726 = vmatprep.subr.bf16.mxu0 %v2203_v22  ;;  %3890 = vmatprep.subr.bf16.mxu1 %v2205_v25  ;;  %v4789_v22 = vrot.slane %v4749_v8, %v6003_v18  ;;  %v4797_v25 = vrot.slane %v4749_v8, %v6006_v19 }
 0x42b   : > { %3727 = vmatpush1.bf16.msra.mxu0 %v2202_v31  ;;  %3891 = vmatpush1.bf16.msra.mxu1 %v2204_v32  ;;  %v954_v31 = vld [vmem:[%s5666_s12 + $0x14a0] sm:$0xff]  ;;  %v956_v32 = vld [vmem:[%s5666_s12 + $0x14b0] sm:$0xff] }
 0x42c   : > { %3737 = vmatprep.subr.bf16.mxu0 %v2227_v36  ;;  %3901 = vmatprep.subr.bf16.mxu1 %v2229_v37 }
 0x42e   : > { %3729 = vmatmul.mubr.bf16.vlgmr.msra.gmra.mrb[12].mxu0 %v5829_v60  ;;  %3893 = vmatmul.mubr.bf16.vlgmr.msra.gmra.mrb[12].mxu1 %v5829_v60 }
 0x42f   : > { %3738 = vmatpush1.bf16.msra.mxu0 %v2226_v40  ;;  %3902 = vmatpush1.bf16.msra.mxu1 %v2228_v41 }
 0x430   : > { %3739 = vmatprep.subr.bf16.mxu0 %v2251_v45  ;;  %3903 = vmatprep.subr.bf16.mxu1 %v2253_v46 }
 0x431   : > { %3769 = vmatprep.mubr.bf16.mxu0 %v5840_v17  ;;  %3933 = vmatprep.mubr.bf16.mxu1 %v5840_v17 }
 0x433   : > { %3740 = vmatpush1.bf16.msra.mxu0 %v2250_v48  ;;  %3904 = vmatpush1.bf16.msra.mxu1 %v2252_v49 }
 0x434   : > { %3741 = vmatprep.subr.bf16.mxu0 %v2275_v50  ;;  %3905 = vmatprep.subr.bf16.mxu1 %v2277_v61  ;;  %v2370_v50 = vunpack.c.l.s8.bf16 %v954_v31  ;;  %v2372_v61 = vunpack.c.l.s8.bf16 %v956_v32 }
 0x437   : > { %3742 = vmatpush1.bf16.msra.mxu0 %v2274_v53  ;;  %3906 = vmatpush1.bf16.msra.mxu1 %v2276_v54 }
 0x438   : > { %3743 = vmatprep.subr.bf16.mxu0 %v2299_v55  ;;  %3907 = vmatprep.subr.bf16.mxu1 %v2301_v56  ;;  %v2395_v55 = vunpack.c.h.s8.bf16 %v955_v10  ;;  %v2397_v56 = vunpack.c.h.s8.bf16 %v957_v11  ;;  %v1003_v10 = vld [vmem:[%s5666_s12 + $0x1628] sm:$0xff]  ;;  %v1005_v11 = vld [vmem:[%s5666_s12 + $0x1638] sm:$0xff] }
 0x43b   : > { %3744 = vmatpush1.bf16.msra.mxu0 %v2298_v59  ;;  %3908 = vmatpush1.bf16.msra.mxu1 %v2300_v62  ;;  %v979_v59 = vld [vmem:[%s5666_s12 + $0x1568] sm:$0xff]  ;;  %v981_v62 = vld [vmem:[%s5666_s12 + $0x1578] sm:$0xff] }
 0x43c   : > { %3745 = vmatprep.subr.bf16.mxu0 %v2323_v63  ;;  %3909 = vmatprep.subr.bf16.mxu1 %v2325_v0  ;;  %v2394_v63 = vunpack.c.h.s8.bf16 %v954_v31  ;;  %v2396_v0 = vunpack.c.h.s8.bf16 %v956_v32  ;;  %v2419_v1 = vunpack.c.l.s8.bf16 %v979_v59  ;;  %v2421_v2 = vunpack.c.l.s8.bf16 %v981_v62 }
 0x43d   : > { %v2445_v8 = vunpack.c.h.s8.bf16 %v981_v62 }
 0x43f   : > { %3746 = vmatpush1.bf16.msra.mxu0 %v2322_v3  ;;  %3910 = vmatpush1.bf16.msra.mxu1 %v2324_v4  ;;  %v978_v3 = vld [vmem:[%s5666_s12 + $0x1560] sm:$0xff]  ;;  %v980_v4 = vld [vmem:[%s5666_s12 + $0x1570] sm:$0xff] }
 0x440   : > { %3747 = vmatprep.subr.bf16.mxu0 %v2347_v6  ;;  %3911 = vmatprep.subr.bf16.mxu1 %v2349_v7  ;;  %v2418_v5 = vunpack.c.l.s8.bf16 %v978_v3  ;;  %v2420_v6 = vunpack.c.l.s8.bf16 %v980_v4  ;;  %v2443_v7 = vunpack.c.h.s8.bf16 %v979_v59 }
 0x441   : > { %v3443_v36 = vpop.f32.mrb[8].mxu0  ;;  %v3607_v37 = vpop.f32.mrb[8].mxu1 }
 0x442   : > { %v4732_v40 = vmul.f32 %v4639_v12, %v3443_v36  ;;  %v4734_v41 = vmul.f32 %v4647_v13, %v3607_v37  ;;  %v3445_v45 = vpop.f32.mrb[9].mxu0  ;;  %v3609_v46 = vpop.f32.mrb[9].mxu1  ;;  %v2442_v12 = vunpack.c.h.s8.bf16 %v978_v3  ;;  %v2444_v13 = vunpack.c.h.s8.bf16 %v980_v4 }
 0x443   : > { %v4733_v9 = vmul.f32 %v4643_v14, %v3445_v45  ;;  %v4735_v47 = vmul.f32 %v4651_v15, %v3609_v46  ;;  %v3447_v48 = vpop.f32.mrb[10].mxu0  ;;  %v3611_v49 = vpop.f32.mrb[10].mxu1  ;;  %3748 = vmatpush1.bf16.msra.mxu0 %v2346_v20  ;;  %3912 = vmatpush1.bf16.msra.mxu1 %v2348_v21  ;;  %v2467_v15 = vunpack.c.l.s8.bf16 %v1003_v10  ;;  %v2469_v20 = vunpack.c.l.s8.bf16 %v1005_v11  ;;  %v1002_v21 = vld [vmem:[%s5666_s12 + $0x1620] sm:$0xff] }
 0x444   : > { %v4882_v51 = vadd.f32 %v4789_v22, %v4732_v40  ;;  %v4884_v52 = vadd.f32 %v4797_v25, %v4734_v41  ;;  %v3448_v53 = vpop.f32.mrb[11].mxu0  ;;  %v3612_v54 = vpop.f32.mrb[11].mxu1  ;;  %3749 = vmatprep.subr.bf16.mxu0 %v2371_v26  ;;  %3913 = vmatprep.subr.bf16.mxu1 %v2373_v27  ;;  %v1004_v22 = vld [vmem:[%s5666_s12 + $0x1630] sm:$0xff]  ;;  %v2466_v31 = vunpack.c.l.s8.bf16 %v1002_v21  ;;  %v2491_v36 = vunpack.c.h.s8.bf16 %v1003_v10 }
 0x445   : > { %v4883_v57 = vadd.f32 %v4793_v38, %v4733_v9  ;;  %v4885_v58 = vadd.f32 %v4801_v39, %v4735_v47  ;;  %v2468_v32 = vunpack.c.l.s8.bf16 %v1004_v22  ;;  %v2493_v37 = vunpack.c.h.s8.bf16 %v1005_v11  ;;  %v1027_v38 = vld [vmem:[%s5666_s12 + $0x16e8] sm:$0xff]  ;;  %v1029_v39 = vld [vmem:[%s5666_s12 + $0x16f8] sm:$0xff]  ;;  %v1026_v9 = vld [vmem:[%s5666_s12 + $0x16e0] sm:$0xff] }
 0x446   : > { %5302 = vtanh.f32 %v4882_v51  ;;  %v2490_v40 = vunpack.c.h.s8.bf16 %v1002_v21  ;;  %v2492_v41 = vunpack.c.h.s8.bf16 %v1004_v22  ;;  %v2515_v45 = vunpack.c.l.s8.bf16 %v1027_v38  ;;  %v1028_v47 = vld [vmem:[%s5666_s12 + $0x16f0] sm:$0xff]  ;;  %v1051_v51 = vld [vmem:[%s5666_s12 + $0x17a8] sm:$0xff] }
 0x447   : > { %5304 = vtanh.f32 %v4884_v52  ;;  %3750 = vmatpush1.bf16.msra.mxu0 %v2370_v50  ;;  %3914 = vmatpush1.bf16.msra.mxu1 %v2372_v61  ;;  %v2517_v46 = vunpack.c.l.s8.bf16 %v1029_v39  ;;  %v2514_v48 = vunpack.c.l.s8.bf16 %v1026_v9  ;;  %v2516_v49 = vunpack.c.l.s8.bf16 %v1028_v47  ;;  %v1053_v52 = vld [vmem:[%s5666_s12 + $0x17b8] sm:$0xff] }
 0x448   : > { %5306 = vtanh.f32 %v4883_v57  ;;  %3751 = vmatprep.subr.bf16.mxu0 %v2395_v55  ;;  %3915 = vmatprep.subr.bf16.mxu1 %v2397_v56  ;;  %v2539_v50 = vunpack.c.h.s8.bf16 %v1027_v38  ;;  %v2541_v61 = vunpack.c.h.s8.bf16 %v1029_v39  ;;  %v2538_v53 = vunpack.c.h.s8.bf16 %v1026_v9  ;;  %v1050_v57 = vld [vmem:[%s5666_s12 + $0x17a0] sm:$0xff]  ;;  %v359_v38 = vld [vmem:[%s5666_s12 + $0x208] sm:$0xff]  ;;  %v361_v39 = vld [vmem:[%s5666_s12 + $0x218] sm:$0xff] }
 0x449   : > { %5308 = vtanh.f32 %v4885_v58  ;;  %v2540_v54 = vunpack.c.h.s8.bf16 %v1028_v47  ;;  %v2563_v55 = vunpack.c.l.s8.bf16 %v1051_v51  ;;  %v2565_v56 = vunpack.c.l.s8.bf16 %v1053_v52  ;;  %v1052_v58 = vld [vmem:[%s5666_s12 + $0x17b0] sm:$0xff]  ;;  %v358_v9 = vld [vmem:[%s5666_s12 + $0x200] sm:$0xff] }
 0x44a   : > { %v2562_v59 = vunpack.c.l.s8.bf16 %v1050_v57  ;;  %v2564_v62 = vunpack.c.l.s8.bf16 %v1052_v58  ;;  %v2586_v3 = vunpack.c.h.s8.bf16 %v1050_v57  ;;  %v2588_v4 = vunpack.c.h.s8.bf16 %v1052_v58  ;;  %v360_v47 = vld [vmem:[%s5666_s12 + $0x210] sm:$0xff]  ;;  %v382_v57 = vld [vmem:[%s5666_s12 + $0x2c0] sm:$0xff] }
 0x44b   : > { %3752 = vmatpush1.bf16.msra.mxu0 %v2394_v63  ;;  %3916 = vmatpush1.bf16.msra.mxu1 %v2396_v0  ;;  %v2587_v63 = vunpack.c.h.s8.bf16 %v1051_v51  ;;  %v2589_v0 = vunpack.c.h.s8.bf16 %v1053_v52  ;;  %v383_v51 = vld [vmem:[%s5666_s12 + $0x2c8] sm:$0xff]  ;;  %v385_v52 = vld [vmem:[%s5666_s12 + $0x2d8] sm:$0xff]  ;;  %v384_v58 = vld [vmem:[%s5666_s12 + $0x2d0] sm:$0xff] }
 0x44c   : > { %3753 = vmatprep.subr.bf16.mxu0 %v2419_v1  ;;  %3917 = vmatprep.subr.bf16.mxu1 %v2421_v2  ;;  %v311_v1 = vld [vmem:[%s5666_s12 + $0x88] sm:$0xff]  ;;  %v313_v2 = vld [vmem:[%s5666_s12 + $0x98] sm:$0xff] }
 0x44f   : > { %3754 = vmatpush1.bf16.msra.mxu0 %v2418_v5  ;;  %3918 = vmatpush1.bf16.msra.mxu1 %v2420_v6  ;;  %v1079_v5 = vunpack.c.l.s8.bf16 %v311_v1  ;;  %v1081_v6 = vunpack.c.l.s8.bf16 %v313_v2 }
 0x450   : > { %v5303_v14 = vpop.eup %5302  ;;  %3755 = vmatprep.subr.bf16.mxu0 %v2443_v7  ;;  %3919 = vmatprep.subr.bf16.mxu1 %v2445_v8  ;;  %v310_v7 = vld [vmem:[%s5666_s12 + $0x80] sm:$0xff]  ;;  %v312_v8 = vld [vmem:[%s5666_s12 + $0x90] sm:$0xff] }
 0x451   : > { %v5305_v25 = vpop.eup %5304  ;;  %4930 = vst [vmem:[%s6052_s11 + $0x40] sm:$0xff] %v5303_v14  ;;  %v1078_v10 = vunpack.c.l.s8.bf16 %v310_v7  ;;  %v1080_v11 = vunpack.c.l.s8.bf16 %v312_v8  ;;  %v335_v14 = vld [vmem:[%s5666_s12 + $0x148] sm:$0xff]  ;;  %v1104_v21 = vunpack.c.h.s8.bf16 %v312_v8  ;;  %v408_v8 = vld [vmem:[%s5666_s12 + $0x390] sm:$0xff] }
 0x452   : > { %v5307_v26 = vpop.eup %5306  ;;  %4932 = vst [vmem:[%s6052_s11 + $0x50] sm:$0xff] %v5305_v25  ;;  %v1127_v22 = vunpack.c.l.s8.bf16 %v335_v14 }
 0x453   : > { %v5309_v27 = vpop.eup %5308  ;;  %4931 = vst [vmem:[%s6052_s11 + $0x48] sm:$0xff] %v5307_v26  ;;  %3756 = vmatpush1.bf16.msra.mxu0 %v2442_v12  ;;  %3920 = vmatpush1.bf16.msra.mxu1 %v2444_v13  ;;  %v1103_v12 = vunpack.c.h.s8.bf16 %v311_v1  ;;  %v1105_v13 = vunpack.c.h.s8.bf16 %v313_v2  ;;  %v334_v26 = vld [vmem:[%s5666_s12 + $0x140] sm:$0xff]  ;;  %v407_v1 = vld [vmem:[%s5666_s12 + $0x388] sm:$0xff]  ;;  %v409_v2 = vld [vmem:[%s5666_s12 + $0x398] sm:$0xff] }
 0x454   : > { %4933 = vst [vmem:[%s6052_s11 + $0x58] sm:$0xff] %v5309_v27  ;;  %3757 = vmatprep.subr.bf16.mxu0 %v2467_v15  ;;  %3921 = vmatprep.subr.bf16.mxu1 %v2469_v20  ;;  %v337_v15 = vld [vmem:[%s5666_s12 + $0x158] sm:$0xff]  ;;  %v1102_v20 = vunpack.c.h.s8.bf16 %v310_v7  ;;  %v336_v27 = vld [vmem:[%s5666_s12 + $0x150] sm:$0xff]  ;;  %v406_v7 = vld [vmem:[%s5666_s12 + $0x380] sm:$0xff] }
 0x455   : > { %v1129_v25 = vunpack.c.l.s8.bf16 %v337_v15 }
 0x457   : > { %3758 = vmatpush1.bf16.msra.mxu0 %v2466_v31  ;;  %3922 = vmatpush1.bf16.msra.mxu1 %v2468_v32  ;;  %v1126_v31 = vunpack.c.l.s8.bf16 %v334_v26  ;;  %v1128_v32 = vunpack.c.l.s8.bf16 %v336_v27 }
 0x458   : > { %3759 = vmatprep.subr.bf16.mxu0 %v2491_v36  ;;  %3923 = vmatprep.subr.bf16.mxu1 %v2493_v37  ;;  %v1151_v36 = vunpack.c.h.s8.bf16 %v335_v14  ;;  %v1153_v37 = vunpack.c.h.s8.bf16 %v337_v15  ;;  %v431_v14 = vld [vmem:[%s5666_s12 + $0x448] sm:$0xff]  ;;  %v433_v15 = vld [vmem:[%s5666_s12 + $0x458] sm:$0xff] }
 0x45b   : > { %3760 = vmatpush1.bf16.msra.mxu0 %v2490_v40  ;;  %3924 = vmatpush1.bf16.msra.mxu1 %v2492_v41  ;;  %v1150_v40 = vunpack.c.h.s8.bf16 %v334_v26  ;;  %v1152_v41 = vunpack.c.h.s8.bf16 %v336_v27  ;;  %v430_v26 = vld [vmem:[%s5666_s12 + $0x440] sm:$0xff]  ;;  %v432_v27 = vld [vmem:[%s5666_s12 + $0x450] sm:$0xff] }
 0x45c   : > { %3761 = vmatprep.subr.bf16.mxu0 %v2515_v45  ;;  %3925 = vmatprep.subr.bf16.mxu1 %v2517_v46  ;;  %v1175_v45 = vunpack.c.l.s8.bf16 %v359_v38  ;;  %v1177_v46 = vunpack.c.l.s8.bf16 %v361_v39 }
 0x45f   : > { %3762 = vmatpush1.bf16.msra.mxu0 %v2514_v48  ;;  %3926 = vmatpush1.bf16.msra.mxu1 %v2516_v49  ;;  %v1174_v48 = vunpack.c.l.s8.bf16 %v358_v9  ;;  %v1176_v49 = vunpack.c.l.s8.bf16 %v360_v47 }
 0x460   : > { %3763 = vmatprep.subr.bf16.mxu0 %v2539_v50  ;;  %3927 = vmatprep.subr.bf16.mxu1 %v2541_v61  ;;  %v1199_v50 = vunpack.c.h.s8.bf16 %v359_v38  ;;  %v1201_v61 = vunpack.c.h.s8.bf16 %v361_v39  ;;  %v455_v38 = vld [vmem:[%s5666_s12 + $0x508] sm:$0xff]  ;;  %v457_v39 = vld [vmem:[%s5666_s12 + $0x518] sm:$0xff] }
 0x463   : > { %3764 = vmatpush1.bf16.msra.mxu0 %v2538_v53  ;;  %3928 = vmatpush1.bf16.msra.mxu1 %v2540_v54  ;;  %v1198_v53 = vunpack.c.h.s8.bf16 %v358_v9  ;;  %v1200_v54 = vunpack.c.h.s8.bf16 %v360_v47  ;;  %v454_v9 = vld [vmem:[%s5666_s12 + $0x500] sm:$0xff]  ;;  %v456_v47 = vld [vmem:[%s5666_s12 + $0x510] sm:$0xff] }
 0x464   : > { %3765 = vmatprep.subr.bf16.mxu0 %v2563_v55  ;;  %3929 = vmatprep.subr.bf16.mxu1 %v2565_v56  ;;  %v1223_v55 = vunpack.c.l.s8.bf16 %v383_v51  ;;  %v1225_v56 = vunpack.c.l.s8.bf16 %v385_v52 }
 0x467   : > { %3766 = vmatpush1.bf16.msra.mxu0 %v2562_v59  ;;  %3930 = vmatpush1.bf16.msra.mxu1 %v2564_v62  ;;  %v1222_v59 = vunpack.c.l.s8.bf16 %v382_v57  ;;  %v1224_v62 = vunpack.c.l.s8.bf16 %v384_v58 }
 0x468   : > { %3767 = vmatprep.subr.bf16.mxu0 %v2587_v63  ;;  %3931 = vmatprep.subr.bf16.mxu1 %v2589_v0  ;;  %v1247_v63 = vunpack.c.h.s8.bf16 %v383_v51  ;;  %v1249_v0 = vunpack.c.h.s8.bf16 %v385_v52  ;;  %v479_v51 = vld [vmem:[%s5666_s12 + $0x5c8] sm:$0xff]  ;;  %v481_v52 = vld [vmem:[%s5666_s12 + $0x5d8] sm:$0xff] }
 0x46b   : > { %3768 = vmatpush1.bf16.msra.mxu0 %v2586_v3  ;;  %3932 = vmatpush1.bf16.msra.mxu1 %v2588_v4  ;;  %v1246_v3 = vunpack.c.h.s8.bf16 %v382_v57  ;;  %v1248_v4 = vunpack.c.h.s8.bf16 %v384_v58  ;;  %v478_v57 = vld [vmem:[%s5666_s12 + $0x5c0] sm:$0xff]  ;;  %v480_v58 = vld [vmem:[%s5666_s12 + $0x5d0] sm:$0xff] }
 0x46c   : > { %3942 = vmatprep.subr.bf16.mxu0 %v1079_v5  ;;  %4106 = vmatprep.subr.bf16.mxu1 %v1081_v6  ;;  %v1271_v5 = vunpack.c.l.s8.bf16 %v407_v1  ;;  %v1273_v6 = vunpack.c.l.s8.bf16 %v409_v2 }
 0x46e   : > { %3770 = vmatmul.mubr.bf16.vlgmr.msra.gmra.mrb[12].mxu0 %v5878_v44  ;;  %3934 = vmatmul.mubr.bf16.vlgmr.msra.gmra.mrb[12].mxu1 %v5878_v44 }
 0x46f   : > { %3943 = vmatpush1.bf16.msra.mxu0 %v1078_v10  ;;  %4107 = vmatpush1.bf16.msra.mxu1 %v1080_v11  ;;  %v1270_v10 = vunpack.c.l.s8.bf16 %v406_v7  ;;  %v1272_v11 = vunpack.c.l.s8.bf16 %v408_v8 }
 0x470   : > { %3944 = vmatprep.subr.bf16.mxu0 %v1103_v12  ;;  %4108 = vmatprep.subr.bf16.mxu1 %v1105_v13  ;;  %v1295_v12 = vunpack.c.h.s8.bf16 %v407_v1  ;;  %v1297_v13 = vunpack.c.h.s8.bf16 %v409_v2  ;;  %v503_v1 = vld [vmem:[%s5666_s12 + $0x688] sm:$0xff]  ;;  %v505_v2 = vld [vmem:[%s5666_s12 + $0x698] sm:$0xff] }
 0x471   : > { %3974 = vmatprep.mubr.bf16.mxu0 %v5701_v35  ;;  %4138 = vmatprep.mubr.bf16.mxu1 %v5701_v35 }
 0x473   : > { %3945 = vmatpush1.bf16.msra.mxu0 %v1102_v20  ;;  %4109 = vmatpush1.bf16.msra.mxu1 %v1104_v21  ;;  %v1294_v20 = vunpack.c.h.s8.bf16 %v406_v7  ;;  %v1296_v21 = vunpack.c.h.s8.bf16 %v408_v8  ;;  %v502_v7 = vld [vmem:[%s5666_s12 + $0x680] sm:$0xff]  ;;  %v504_v8 = vld [vmem:[%s5666_s12 + $0x690] sm:$0xff] }
 0x474   : > { %3946 = vmatprep.subr.bf16.mxu0 %v1127_v22  ;;  %4110 = vmatprep.subr.bf16.mxu1 %v1129_v25  ;;  %v1319_v22 = vunpack.c.l.s8.bf16 %v431_v14  ;;  %v1321_v25 = vunpack.c.l.s8.bf16 %v433_v15 }
 0x477   : > { %3947 = vmatpush1.bf16.msra.mxu0 %v1126_v31  ;;  %4111 = vmatpush1.bf16.msra.mxu1 %v1128_v32  ;;  %v1318_v31 = vunpack.c.l.s8.bf16 %v430_v26  ;;  %v1320_v32 = vunpack.c.l.s8.bf16 %v432_v27 }
 0x478   : > { %3948 = vmatprep.subr.bf16.mxu0 %v1151_v36  ;;  %4112 = vmatprep.subr.bf16.mxu1 %v1153_v37  ;;  %v1343_v36 = vunpack.c.h.s8.bf16 %v431_v14  ;;  %v1345_v37 = vunpack.c.h.s8.bf16 %v433_v15  ;;  %v527_v14 = vld [vmem:[%s5666_s12 + $0x748] sm:$0xff]  ;;  %v529_v15 = vld [vmem:[%s5666_s12 + $0x758] sm:$0xff] }
 0x47b   : > { %3949 = vmatpush1.bf16.msra.mxu0 %v1150_v40  ;;  %4113 = vmatpush1.bf16.msra.mxu1 %v1152_v41  ;;  %v1342_v40 = vunpack.c.h.s8.bf16 %v430_v26  ;;  %v1344_v41 = vunpack.c.h.s8.bf16 %v432_v27  ;;  %v526_v26 = vld [vmem:[%s5666_s12 + $0x740] sm:$0xff]  ;;  %v528_v27 = vld [vmem:[%s5666_s12 + $0x750] sm:$0xff] }
 0x47c   : > { %3950 = vmatprep.subr.bf16.mxu0 %v1175_v45  ;;  %4114 = vmatprep.subr.bf16.mxu1 %v1177_v46  ;;  %v1367_v45 = vunpack.c.l.s8.bf16 %v455_v38  ;;  %v1369_v46 = vunpack.c.l.s8.bf16 %v457_v39 }
 0x47f   : > { %3951 = vmatpush1.bf16.msra.mxu0 %v1174_v48  ;;  %4115 = vmatpush1.bf16.msra.mxu1 %v1176_v49  ;;  %v1366_v48 = vunpack.c.l.s8.bf16 %v454_v9  ;;  %v1368_v49 = vunpack.c.l.s8.bf16 %v456_v47 }
 0x480   : > { %3952 = vmatprep.subr.bf16.mxu0 %v1199_v50  ;;  %4116 = vmatprep.subr.bf16.mxu1 %v1201_v61  ;;  %v1391_v50 = vunpack.c.h.s8.bf16 %v455_v38  ;;  %v1393_v61 = vunpack.c.h.s8.bf16 %v457_v39  ;;  %v551_v38 = vld [vmem:[%s5666_s12 + $0x808] sm:$0xff]  ;;  %v553_v39 = vld [vmem:[%s5666_s12 + $0x818] sm:$0xff] }
 0x483   : > { %3953 = vmatpush1.bf16.msra.mxu0 %v1198_v53  ;;  %4117 = vmatpush1.bf16.msra.mxu1 %v1200_v54  ;;  %v1390_v53 = vunpack.c.h.s8.bf16 %v454_v9  ;;  %v1392_v54 = vunpack.c.h.s8.bf16 %v456_v47  ;;  %v550_v9 = vld [vmem:[%s5666_s12 + $0x800] sm:$0xff]  ;;  %v552_v47 = vld [vmem:[%s5666_s12 + $0x810] sm:$0xff] }
 0x484   : > { %3954 = vmatprep.subr.bf16.mxu0 %v1223_v55  ;;  %4118 = vmatprep.subr.bf16.mxu1 %v1225_v56  ;;  %v1415_v55 = vunpack.c.l.s8.bf16 %v479_v51  ;;  %v1417_v56 = vunpack.c.l.s8.bf16 %v481_v52 }
 0x487   : > { %3955 = vmatpush1.bf16.msra.mxu0 %v1222_v59  ;;  %4119 = vmatpush1.bf16.msra.mxu1 %v1224_v62  ;;  %v1414_v59 = vunpack.c.l.s8.bf16 %v478_v57  ;;  %v1416_v62 = vunpack.c.l.s8.bf16 %v480_v58 }
 0x488   : > { %3956 = vmatprep.subr.bf16.mxu0 %v1247_v63  ;;  %4120 = vmatprep.subr.bf16.mxu1 %v1249_v0  ;;  %v1439_v63 = vunpack.c.h.s8.bf16 %v479_v51  ;;  %v1441_v0 = vunpack.c.h.s8.bf16 %v481_v52  ;;  %v575_v51 = vld [vmem:[%s5666_s12 + $0x8c8] sm:$0xff]  ;;  %v577_v52 = vld [vmem:[%s5666_s12 + $0x8d8] sm:$0xff] }
 0x48b   : > { %3957 = vmatpush1.bf16.msra.mxu0 %v1246_v3  ;;  %4121 = vmatpush1.bf16.msra.mxu1 %v1248_v4  ;;  %v1438_v3 = vunpack.c.h.s8.bf16 %v478_v57  ;;  %v1440_v4 = vunpack.c.h.s8.bf16 %v480_v58  ;;  %v574_v57 = vld [vmem:[%s5666_s12 + $0x8c0] sm:$0xff]  ;;  %v576_v58 = vld [vmem:[%s5666_s12 + $0x8d0] sm:$0xff] }
 0x48c   : > { %3958 = vmatprep.subr.bf16.mxu0 %v1271_v5  ;;  %4122 = vmatprep.subr.bf16.mxu1 %v1273_v6  ;;  %v1463_v5 = vunpack.c.l.s8.bf16 %v503_v1  ;;  %v1465_v6 = vunpack.c.l.s8.bf16 %v505_v2 }
 0x48f   : > { %3959 = vmatpush1.bf16.msra.mxu0 %v1270_v10  ;;  %4123 = vmatpush1.bf16.msra.mxu1 %v1272_v11  ;;  %v1462_v10 = vunpack.c.l.s8.bf16 %v502_v7  ;;  %v1464_v11 = vunpack.c.l.s8.bf16 %v504_v8 }
 0x490   : > { %3960 = vmatprep.subr.bf16.mxu0 %v1295_v12  ;;  %4124 = vmatprep.subr.bf16.mxu1 %v1297_v13  ;;  %v1487_v12 = vunpack.c.h.s8.bf16 %v503_v1  ;;  %v1489_v13 = vunpack.c.h.s8.bf16 %v505_v2  ;;  %v599_v1 = vld [vmem:[%s5666_s12 + $0x988] sm:$0xff]  ;;  %v601_v2 = vld [vmem:[%s5666_s12 + $0x998] sm:$0xff] }
 0x493   : > { %3961 = vmatpush1.bf16.msra.mxu0 %v1294_v20  ;;  %4125 = vmatpush1.bf16.msra.mxu1 %v1296_v21  ;;  %v1486_v20 = vunpack.c.h.s8.bf16 %v502_v7  ;;  %v1488_v21 = vunpack.c.h.s8.bf16 %v504_v8  ;;  %v598_v7 = vld [vmem:[%s5666_s12 + $0x980] sm:$0xff]  ;;  %v600_v8 = vld [vmem:[%s5666_s12 + $0x990] sm:$0xff] }
 0x494   : > { %3962 = vmatprep.subr.bf16.mxu0 %v1319_v22  ;;  %4126 = vmatprep.subr.bf16.mxu1 %v1321_v25  ;;  %v1511_v22 = vunpack.c.l.s8.bf16 %v527_v14  ;;  %v1513_v25 = vunpack.c.l.s8.bf16 %v529_v15 }
 0x497   : > { %3963 = vmatpush1.bf16.msra.mxu0 %v1318_v31  ;;  %4127 = vmatpush1.bf16.msra.mxu1 %v1320_v32  ;;  %v1510_v31 = vunpack.c.l.s8.bf16 %v526_v26  ;;  %v1512_v32 = vunpack.c.l.s8.bf16 %v528_v27 }
 0x498   : > { %3964 = vmatprep.subr.bf16.mxu0 %v1343_v36  ;;  %4128 = vmatprep.subr.bf16.mxu1 %v1345_v37  ;;  %v1535_v36 = vunpack.c.h.s8.bf16 %v527_v14  ;;  %v1537_v37 = vunpack.c.h.s8.bf16 %v529_v15  ;;  %v623_v14 = vld [vmem:[%s5666_s12 + $0xa48] sm:$0xff]  ;;  %v625_v15 = vld [vmem:[%s5666_s12 + $0xa58] sm:$0xff] }
 0x49b   : > { %3965 = vmatpush1.bf16.msra.mxu0 %v1342_v40  ;;  %4129 = vmatpush1.bf16.msra.mxu1 %v1344_v41  ;;  %v1534_v40 = vunpack.c.h.s8.bf16 %v526_v26  ;;  %v1536_v41 = vunpack.c.h.s8.bf16 %v528_v27  ;;  %v622_v26 = vld [vmem:[%s5666_s12 + $0xa40] sm:$0xff]  ;;  %v624_v27 = vld [vmem:[%s5666_s12 + $0xa50] sm:$0xff] }
 0x49c   : > { %3966 = vmatprep.subr.bf16.mxu0 %v1367_v45  ;;  %4130 = vmatprep.subr.bf16.mxu1 %v1369_v46  ;;  %v1559_v45 = vunpack.c.l.s8.bf16 %v551_v38  ;;  %v1561_v46 = vunpack.c.l.s8.bf16 %v553_v39 }
 0x49f   : > { %3967 = vmatpush1.bf16.msra.mxu0 %v1366_v48  ;;  %4131 = vmatpush1.bf16.msra.mxu1 %v1368_v49  ;;  %v1558_v48 = vunpack.c.l.s8.bf16 %v550_v9  ;;  %v1560_v49 = vunpack.c.l.s8.bf16 %v552_v47 }
 0x4a0   : > { %3968 = vmatprep.subr.bf16.mxu0 %v1391_v50  ;;  %4132 = vmatprep.subr.bf16.mxu1 %v1393_v61  ;;  %v1583_v50 = vunpack.c.h.s8.bf16 %v551_v38  ;;  %v1585_v61 = vunpack.c.h.s8.bf16 %v553_v39  ;;  %v647_v38 = vld [vmem:[%s5666_s12 + $0xb08] sm:$0xff]  ;;  %v649_v39 = vld [vmem:[%s5666_s12 + $0xb18] sm:$0xff] }
 0x4a3   : > { %3969 = vmatpush1.bf16.msra.mxu0 %v1390_v53  ;;  %4133 = vmatpush1.bf16.msra.mxu1 %v1392_v54  ;;  %v1582_v53 = vunpack.c.h.s8.bf16 %v550_v9  ;;  %v1584_v54 = vunpack.c.h.s8.bf16 %v552_v47  ;;  %v646_v9 = vld [vmem:[%s5666_s12 + $0xb00] sm:$0xff]  ;;  %v648_v47 = vld [vmem:[%s5666_s12 + $0xb10] sm:$0xff] }
 0x4a4   : > { %3970 = vmatprep.subr.bf16.mxu0 %v1415_v55  ;;  %4134 = vmatprep.subr.bf16.mxu1 %v1417_v56  ;;  %v1607_v55 = vunpack.c.l.s8.bf16 %v575_v51  ;;  %v1609_v56 = vunpack.c.l.s8.bf16 %v577_v52 }
 0x4a7   : > { %3971 = vmatpush1.bf16.msra.mxu0 %v1414_v59  ;;  %4135 = vmatpush1.bf16.msra.mxu1 %v1416_v62  ;;  %v1606_v59 = vunpack.c.l.s8.bf16 %v574_v57  ;;  %v1608_v62 = vunpack.c.l.s8.bf16 %v576_v58 }
 0x4a8   : > { %3972 = vmatprep.subr.bf16.mxu0 %v1439_v63  ;;  %4136 = vmatprep.subr.bf16.mxu1 %v1441_v0  ;;  %v1631_v63 = vunpack.c.h.s8.bf16 %v575_v51  ;;  %v1633_v0 = vunpack.c.h.s8.bf16 %v577_v52  ;;  %v671_v51 = vld [vmem:[%s5666_s12 + $0xbc8] sm:$0xff]  ;;  %v673_v52 = vld [vmem:[%s5666_s12 + $0xbd8] sm:$0xff] }
 0x4ab   : > { %3973 = vmatpush1.bf16.msra.mxu0 %v1438_v3  ;;  %4137 = vmatpush1.bf16.msra.mxu1 %v1440_v4  ;;  %v1630_v3 = vunpack.c.h.s8.bf16 %v574_v57  ;;  %v1632_v4 = vunpack.c.h.s8.bf16 %v576_v58  ;;  %v670_v57 = vld [vmem:[%s5666_s12 + $0xbc0] sm:$0xff]  ;;  %v672_v58 = vld [vmem:[%s5666_s12 + $0xbd0] sm:$0xff] }
 0x4ac   : > { %3983 = vmatprep.subr.bf16.mxu0 %v1463_v5  ;;  %4147 = vmatprep.subr.bf16.mxu1 %v1465_v6  ;;  %v1655_v5 = vunpack.c.l.s8.bf16 %v599_v1  ;;  %v1657_v6 = vunpack.c.l.s8.bf16 %v601_v2 }
 0x4ae   : > { %3975 = vmatmul.mubr.bf16.vlgmr.msra.gmra.mrb[16].mxu0 %v5731_v42  ;;  %4139 = vmatmul.mubr.bf16.vlgmr.msra.gmra.mrb[16].mxu1 %v5731_v42 }
 0x4af   : > { %3984 = vmatpush1.bf16.msra.mxu0 %v1462_v10  ;;  %4148 = vmatpush1.bf16.msra.mxu1 %v1464_v11  ;;  %v1654_v10 = vunpack.c.l.s8.bf16 %v598_v7  ;;  %v1656_v11 = vunpack.c.l.s8.bf16 %v600_v8 }
 0x4b0   : > { %3985 = vmatprep.subr.bf16.mxu0 %v1487_v12  ;;  %4149 = vmatprep.subr.bf16.mxu1 %v1489_v13  ;;  %v1679_v12 = vunpack.c.h.s8.bf16 %v599_v1  ;;  %v1681_v13 = vunpack.c.h.s8.bf16 %v601_v2  ;;  %v695_v1 = vld [vmem:[%s5666_s12 + $0xc88] sm:$0xff]  ;;  %v697_v2 = vld [vmem:[%s5666_s12 + $0xc98] sm:$0xff] }
 0x4b1   : > { %4015 = vmatprep.mubr.bf16.mxu0 %v5742_v30  ;;  %4179 = vmatprep.mubr.bf16.mxu1 %v5742_v30 }
 0x4b3   : > { %3986 = vmatpush1.bf16.msra.mxu0 %v1486_v20  ;;  %4150 = vmatpush1.bf16.msra.mxu1 %v1488_v21  ;;  %v1678_v20 = vunpack.c.h.s8.bf16 %v598_v7  ;;  %v1680_v21 = vunpack.c.h.s8.bf16 %v600_v8  ;;  %v694_v7 = vld [vmem:[%s5666_s12 + $0xc80] sm:$0xff]  ;;  %v696_v8 = vld [vmem:[%s5666_s12 + $0xc90] sm:$0xff] }
 0x4b4   : > { %3987 = vmatprep.subr.bf16.mxu0 %v1511_v22  ;;  %4151 = vmatprep.subr.bf16.mxu1 %v1513_v25  ;;  %v1703_v22 = vunpack.c.l.s8.bf16 %v623_v14  ;;  %v1705_v25 = vunpack.c.l.s8.bf16 %v625_v15 }
 0x4b7   : > { %3988 = vmatpush1.bf16.msra.mxu0 %v1510_v31  ;;  %4152 = vmatpush1.bf16.msra.mxu1 %v1512_v32  ;;  %v1702_v31 = vunpack.c.l.s8.bf16 %v622_v26  ;;  %v1704_v32 = vunpack.c.l.s8.bf16 %v624_v27 }
 0x4b8   : > { %3989 = vmatprep.subr.bf16.mxu0 %v1535_v36  ;;  %4153 = vmatprep.subr.bf16.mxu1 %v1537_v37  ;;  %v1727_v36 = vunpack.c.h.s8.bf16 %v623_v14  ;;  %v1729_v37 = vunpack.c.h.s8.bf16 %v625_v15  ;;  %v719_v14 = vld [vmem:[%s5666_s12 + $0xd48] sm:$0xff]  ;;  %v721_v15 = vld [vmem:[%s5666_s12 + $0xd58] sm:$0xff] }
 0x4bb   : > { %3990 = vmatpush1.bf16.msra.mxu0 %v1534_v40  ;;  %4154 = vmatpush1.bf16.msra.mxu1 %v1536_v41  ;;  %v1726_v40 = vunpack.c.h.s8.bf16 %v622_v26  ;;  %v1728_v41 = vunpack.c.h.s8.bf16 %v624_v27  ;;  %v718_v26 = vld [vmem:[%s5666_s12 + $0xd40] sm:$0xff]  ;;  %v720_v27 = vld [vmem:[%s5666_s12 + $0xd50] sm:$0xff] }
 0x4bc   : > { %3991 = vmatprep.subr.bf16.mxu0 %v1559_v45  ;;  %4155 = vmatprep.subr.bf16.mxu1 %v1561_v46  ;;  %v1751_v45 = vunpack.c.l.s8.bf16 %v647_v38  ;;  %v1753_v46 = vunpack.c.l.s8.bf16 %v649_v39 }
 0x4bf   : > { %3992 = vmatpush1.bf16.msra.mxu0 %v1558_v48  ;;  %4156 = vmatpush1.bf16.msra.mxu1 %v1560_v49  ;;  %v1750_v48 = vunpack.c.l.s8.bf16 %v646_v9  ;;  %v1752_v49 = vunpack.c.l.s8.bf16 %v648_v47 }
 0x4c0   : > { %3993 = vmatprep.subr.bf16.mxu0 %v1583_v50  ;;  %4157 = vmatprep.subr.bf16.mxu1 %v1585_v61  ;;  %v1775_v50 = vunpack.c.h.s8.bf16 %v647_v38  ;;  %v1777_v61 = vunpack.c.h.s8.bf16 %v649_v39  ;;  %v743_v38 = vld [vmem:[%s5666_s12 + $0xe08] sm:$0xff]  ;;  %v745_v39 = vld [vmem:[%s5666_s12 + $0xe18] sm:$0xff] }
 0x4c3   : > { %3994 = vmatpush1.bf16.msra.mxu0 %v1582_v53  ;;  %4158 = vmatpush1.bf16.msra.mxu1 %v1584_v54  ;;  %v1774_v53 = vunpack.c.h.s8.bf16 %v646_v9  ;;  %v1776_v54 = vunpack.c.h.s8.bf16 %v648_v47  ;;  %v742_v9 = vld [vmem:[%s5666_s12 + $0xe00] sm:$0xff]  ;;  %v744_v47 = vld [vmem:[%s5666_s12 + $0xe10] sm:$0xff] }
 0x4c4   : > { %3995 = vmatprep.subr.bf16.mxu0 %v1607_v55  ;;  %4159 = vmatprep.subr.bf16.mxu1 %v1609_v56  ;;  %v1799_v55 = vunpack.c.l.s8.bf16 %v671_v51  ;;  %v1801_v56 = vunpack.c.l.s8.bf16 %v673_v52 }
 0x4c7   : > { %3996 = vmatpush1.bf16.msra.mxu0 %v1606_v59  ;;  %4160 = vmatpush1.bf16.msra.mxu1 %v1608_v62  ;;  %v1798_v59 = vunpack.c.l.s8.bf16 %v670_v57  ;;  %v1800_v62 = vunpack.c.l.s8.bf16 %v672_v58 }
 0x4c8   : > { %3997 = vmatprep.subr.bf16.mxu0 %v1631_v63  ;;  %4161 = vmatprep.subr.bf16.mxu1 %v1633_v0  ;;  %v1823_v63 = vunpack.c.h.s8.bf16 %v671_v51  ;;  %v1825_v0 = vunpack.c.h.s8.bf16 %v673_v52  ;;  %v767_v51 = vld [vmem:[%s5666_s12 + $0xec8] sm:$0xff]  ;;  %v769_v52 = vld [vmem:[%s5666_s12 + $0xed8] sm:$0xff] }
 0x4cb   : > { %3998 = vmatpush1.bf16.msra.mxu0 %v1630_v3  ;;  %4162 = vmatpush1.bf16.msra.mxu1 %v1632_v4  ;;  %v1822_v3 = vunpack.c.h.s8.bf16 %v670_v57  ;;  %v1824_v4 = vunpack.c.h.s8.bf16 %v672_v58  ;;  %v766_v57 = vld [vmem:[%s5666_s12 + $0xec0] sm:$0xff]  ;;  %v768_v58 = vld [vmem:[%s5666_s12 + $0xed0] sm:$0xff] }
 0x4cc   : > { %3999 = vmatprep.subr.bf16.mxu0 %v1655_v5  ;;  %4163 = vmatprep.subr.bf16.mxu1 %v1657_v6  ;;  %v1847_v5 = vunpack.c.l.s8.bf16 %v695_v1  ;;  %v1849_v6 = vunpack.c.l.s8.bf16 %v697_v2 }
 0x4cf   : > { %4000 = vmatpush1.bf16.msra.mxu0 %v1654_v10  ;;  %4164 = vmatpush1.bf16.msra.mxu1 %v1656_v11  ;;  %v1846_v10 = vunpack.c.l.s8.bf16 %v694_v7  ;;  %v1848_v11 = vunpack.c.l.s8.bf16 %v696_v8 }
 0x4d0   : > { %4001 = vmatprep.subr.bf16.mxu0 %v1679_v12  ;;  %4165 = vmatprep.subr.bf16.mxu1 %v1681_v13  ;;  %v1871_v12 = vunpack.c.h.s8.bf16 %v695_v1  ;;  %v1873_v13 = vunpack.c.h.s8.bf16 %v697_v2  ;;  %v791_v1 = vld [vmem:[%s5666_s12 + $0xf88] sm:$0xff]  ;;  %v793_v2 = vld [vmem:[%s5666_s12 + $0xf98] sm:$0xff] }
 0x4d3   : > { %4002 = vmatpush1.bf16.msra.mxu0 %v1678_v20  ;;  %4166 = vmatpush1.bf16.msra.mxu1 %v1680_v21  ;;  %v1870_v20 = vunpack.c.h.s8.bf16 %v694_v7  ;;  %v1872_v21 = vunpack.c.h.s8.bf16 %v696_v8  ;;  %v790_v7 = vld [vmem:[%s5666_s12 + $0xf80] sm:$0xff]  ;;  %v792_v8 = vld [vmem:[%s5666_s12 + $0xf90] sm:$0xff] }
 0x4d4   : > { %4003 = vmatprep.subr.bf16.mxu0 %v1703_v22  ;;  %4167 = vmatprep.subr.bf16.mxu1 %v1705_v25  ;;  %v1895_v22 = vunpack.c.l.s8.bf16 %v719_v14  ;;  %v1897_v25 = vunpack.c.l.s8.bf16 %v721_v15 }
 0x4d7   : > { %4004 = vmatpush1.bf16.msra.mxu0 %v1702_v31  ;;  %4168 = vmatpush1.bf16.msra.mxu1 %v1704_v32  ;;  %v1894_v31 = vunpack.c.l.s8.bf16 %v718_v26  ;;  %v1896_v32 = vunpack.c.l.s8.bf16 %v720_v27 }
 0x4d8   : > { %4005 = vmatprep.subr.bf16.mxu0 %v1727_v36  ;;  %4169 = vmatprep.subr.bf16.mxu1 %v1729_v37  ;;  %v1919_v36 = vunpack.c.h.s8.bf16 %v719_v14  ;;  %v1921_v37 = vunpack.c.h.s8.bf16 %v721_v15  ;;  %v815_v14 = vld [vmem:[%s5666_s12 + $0x1048] sm:$0xff]  ;;  %v817_v15 = vld [vmem:[%s5666_s12 + $0x1058] sm:$0xff] }
 0x4db   : > { %4006 = vmatpush1.bf16.msra.mxu0 %v1726_v40  ;;  %4170 = vmatpush1.bf16.msra.mxu1 %v1728_v41  ;;  %v1918_v40 = vunpack.c.h.s8.bf16 %v718_v26  ;;  %v1920_v41 = vunpack.c.h.s8.bf16 %v720_v27  ;;  %v814_v26 = vld [vmem:[%s5666_s12 + $0x1040] sm:$0xff]  ;;  %v816_v27 = vld [vmem:[%s5666_s12 + $0x1050] sm:$0xff] }
 0x4dc   : > { %4007 = vmatprep.subr.bf16.mxu0 %v1751_v45  ;;  %4171 = vmatprep.subr.bf16.mxu1 %v1753_v46  ;;  %v1943_v45 = vunpack.c.l.s8.bf16 %v743_v38  ;;  %v1945_v46 = vunpack.c.l.s8.bf16 %v745_v39 }
 0x4df   : > { %4008 = vmatpush1.bf16.msra.mxu0 %v1750_v48  ;;  %4172 = vmatpush1.bf16.msra.mxu1 %v1752_v49  ;;  %v1942_v48 = vunpack.c.l.s8.bf16 %v742_v9  ;;  %v1944_v49 = vunpack.c.l.s8.bf16 %v744_v47 }
 0x4e0   : > { %4009 = vmatprep.subr.bf16.mxu0 %v1775_v50  ;;  %4173 = vmatprep.subr.bf16.mxu1 %v1777_v61  ;;  %v1967_v50 = vunpack.c.h.s8.bf16 %v743_v38  ;;  %v1969_v61 = vunpack.c.h.s8.bf16 %v745_v39  ;;  %v839_v38 = vld [vmem:[%s5666_s12 + $0x1108] sm:$0xff]  ;;  %v841_v39 = vld [vmem:[%s5666_s12 + $0x1118] sm:$0xff] }
 0x4e3   : > { %4010 = vmatpush1.bf16.msra.mxu0 %v1774_v53  ;;  %4174 = vmatpush1.bf16.msra.mxu1 %v1776_v54  ;;  %v1966_v53 = vunpack.c.h.s8.bf16 %v742_v9  ;;  %v1968_v54 = vunpack.c.h.s8.bf16 %v744_v47  ;;  %v838_v9 = vld [vmem:[%s5666_s12 + $0x1100] sm:$0xff]  ;;  %v840_v47 = vld [vmem:[%s5666_s12 + $0x1110] sm:$0xff] }
 0x4e4   : > { %4011 = vmatprep.subr.bf16.mxu0 %v1799_v55  ;;  %4175 = vmatprep.subr.bf16.mxu1 %v1801_v56  ;;  %v1991_v55 = vunpack.c.l.s8.bf16 %v767_v51  ;;  %v1993_v56 = vunpack.c.l.s8.bf16 %v769_v52 }
 0x4e7   : > { %4012 = vmatpush1.bf16.msra.mxu0 %v1798_v59  ;;  %4176 = vmatpush1.bf16.msra.mxu1 %v1800_v62  ;;  %v1990_v59 = vunpack.c.l.s8.bf16 %v766_v57  ;;  %v1992_v62 = vunpack.c.l.s8.bf16 %v768_v58 }
 0x4e8   : > { %4013 = vmatprep.subr.bf16.mxu0 %v1823_v63  ;;  %4177 = vmatprep.subr.bf16.mxu1 %v1825_v0  ;;  %v2015_v63 = vunpack.c.h.s8.bf16 %v767_v51  ;;  %v2017_v0 = vunpack.c.h.s8.bf16 %v769_v52  ;;  %v863_v51 = vld [vmem:[%s5666_s12 + $0x11c8] sm:$0xff]  ;;  %v865_v52 = vld [vmem:[%s5666_s12 + $0x11d8] sm:$0xff] }
 0x4eb   : > { %4014 = vmatpush1.bf16.msra.mxu0 %v1822_v3  ;;  %4178 = vmatpush1.bf16.msra.mxu1 %v1824_v4  ;;  %v2014_v3 = vunpack.c.h.s8.bf16 %v766_v57  ;;  %v2016_v4 = vunpack.c.h.s8.bf16 %v768_v58  ;;  %v862_v57 = vld [vmem:[%s5666_s12 + $0x11c0] sm:$0xff]  ;;  %v864_v58 = vld [vmem:[%s5666_s12 + $0x11d0] sm:$0xff] }
 0x4ec   : > { %4024 = vmatprep.subr.bf16.mxu0 %v1847_v5  ;;  %4188 = vmatprep.subr.bf16.mxu1 %v1849_v6  ;;  %v2039_v5 = vunpack.c.l.s8.bf16 %v791_v1  ;;  %v2041_v6 = vunpack.c.l.s8.bf16 %v793_v2 }
 0x4ee   : > { %4016 = vmatmul.mubr.bf16.vlgmr.msra.gmra.mrb[16].mxu0 %v5780_v16  ;;  %4180 = vmatmul.mubr.bf16.vlgmr.msra.gmra.mrb[16].mxu1 %v5780_v16 }
 0x4ef   : > { %4025 = vmatpush1.bf16.msra.mxu0 %v1846_v10  ;;  %4189 = vmatpush1.bf16.msra.mxu1 %v1848_v11  ;;  %v2038_v10 = vunpack.c.l.s8.bf16 %v790_v7  ;;  %v2040_v11 = vunpack.c.l.s8.bf16 %v792_v8 }
 0x4f0   : > { %4026 = vmatprep.subr.bf16.mxu0 %v1871_v12  ;;  %4190 = vmatprep.subr.bf16.mxu1 %v1873_v13  ;;  %v2063_v12 = vunpack.c.h.s8.bf16 %v791_v1  ;;  %v2065_v13 = vunpack.c.h.s8.bf16 %v793_v2  ;;  %v887_v1 = vld [vmem:[%s5666_s12 + $0x1288] sm:$0xff]  ;;  %v889_v2 = vld [vmem:[%s5666_s12 + $0x1298] sm:$0xff] }
 0x4f1   : > { %4056 = vmatprep.mubr.bf16.mxu0 %v5791_v43  ;;  %4220 = vmatprep.mubr.bf16.mxu1 %v5791_v43 }
 0x4f3   : > { %4027 = vmatpush1.bf16.msra.mxu0 %v1870_v20  ;;  %4191 = vmatpush1.bf16.msra.mxu1 %v1872_v21  ;;  %v2062_v20 = vunpack.c.h.s8.bf16 %v790_v7  ;;  %v2064_v21 = vunpack.c.h.s8.bf16 %v792_v8  ;;  %v886_v7 = vld [vmem:[%s5666_s12 + $0x1280] sm:$0xff]  ;;  %v888_v8 = vld [vmem:[%s5666_s12 + $0x1290] sm:$0xff] }
 0x4f4   : > { %4028 = vmatprep.subr.bf16.mxu0 %v1895_v22  ;;  %4192 = vmatprep.subr.bf16.mxu1 %v1897_v25  ;;  %v2087_v22 = vunpack.c.l.s8.bf16 %v815_v14  ;;  %v2089_v25 = vunpack.c.l.s8.bf16 %v817_v15 }
 0x4f7   : > { %4029 = vmatpush1.bf16.msra.mxu0 %v1894_v31  ;;  %4193 = vmatpush1.bf16.msra.mxu1 %v1896_v32  ;;  %v2086_v31 = vunpack.c.l.s8.bf16 %v814_v26  ;;  %v2088_v32 = vunpack.c.l.s8.bf16 %v816_v27 }
 0x4f8   : > { %4030 = vmatprep.subr.bf16.mxu0 %v1919_v36  ;;  %4194 = vmatprep.subr.bf16.mxu1 %v1921_v37  ;;  %v2111_v36 = vunpack.c.h.s8.bf16 %v815_v14  ;;  %v2113_v37 = vunpack.c.h.s8.bf16 %v817_v15  ;;  %v911_v14 = vld [vmem:[%s5666_s12 + $0x1348] sm:$0xff]  ;;  %v913_v15 = vld [vmem:[%s5666_s12 + $0x1358] sm:$0xff] }
 0x4fb   : > { %4031 = vmatpush1.bf16.msra.mxu0 %v1918_v40  ;;  %4195 = vmatpush1.bf16.msra.mxu1 %v1920_v41  ;;  %v2110_v40 = vunpack.c.h.s8.bf16 %v814_v26  ;;  %v2112_v41 = vunpack.c.h.s8.bf16 %v816_v27  ;;  %v910_v26 = vld [vmem:[%s5666_s12 + $0x1340] sm:$0xff]  ;;  %v912_v27 = vld [vmem:[%s5666_s12 + $0x1350] sm:$0xff] }
 0x4fc   : > { %4032 = vmatprep.subr.bf16.mxu0 %v1943_v45  ;;  %4196 = vmatprep.subr.bf16.mxu1 %v1945_v46  ;;  %v2135_v45 = vunpack.c.l.s8.bf16 %v839_v38  ;;  %v2137_v46 = vunpack.c.l.s8.bf16 %v841_v39 }
 0x4ff   : > { %4033 = vmatpush1.bf16.msra.mxu0 %v1942_v48  ;;  %4197 = vmatpush1.bf16.msra.mxu1 %v1944_v49  ;;  %v2134_v48 = vunpack.c.l.s8.bf16 %v838_v9  ;;  %v2136_v49 = vunpack.c.l.s8.bf16 %v840_v47 }
 0x500   : > { %4034 = vmatprep.subr.bf16.mxu0 %v1967_v50  ;;  %4198 = vmatprep.subr.bf16.mxu1 %v1969_v61  ;;  %v2159_v50 = vunpack.c.h.s8.bf16 %v839_v38  ;;  %v2161_v61 = vunpack.c.h.s8.bf16 %v841_v39  ;;  %v935_v38 = vld [vmem:[%s5666_s12 + $0x1408] sm:$0xff]  ;;  %v937_v39 = vld [vmem:[%s5666_s12 + $0x1418] sm:$0xff] }
 0x503   : > { %4035 = vmatpush1.bf16.msra.mxu0 %v1966_v53  ;;  %4199 = vmatpush1.bf16.msra.mxu1 %v1968_v54  ;;  %v2158_v53 = vunpack.c.h.s8.bf16 %v838_v9  ;;  %v2160_v54 = vunpack.c.h.s8.bf16 %v840_v47  ;;  %v934_v9 = vld [vmem:[%s5666_s12 + $0x1400] sm:$0xff]  ;;  %v936_v47 = vld [vmem:[%s5666_s12 + $0x1410] sm:$0xff] }
 0x504   : > { %4036 = vmatprep.subr.bf16.mxu0 %v1991_v55  ;;  %4200 = vmatprep.subr.bf16.mxu1 %v1993_v56  ;;  %v2183_v55 = vunpack.c.l.s8.bf16 %v863_v51  ;;  %v2185_v56 = vunpack.c.l.s8.bf16 %v865_v52 }
 0x507   : > { %4037 = vmatpush1.bf16.msra.mxu0 %v1990_v59  ;;  %4201 = vmatpush1.bf16.msra.mxu1 %v1992_v62  ;;  %v2182_v59 = vunpack.c.l.s8.bf16 %v862_v57  ;;  %v2184_v62 = vunpack.c.l.s8.bf16 %v864_v58 }
 0x508   : > { %4038 = vmatprep.subr.bf16.mxu0 %v2015_v63  ;;  %4202 = vmatprep.subr.bf16.mxu1 %v2017_v0  ;;  %v2207_v63 = vunpack.c.h.s8.bf16 %v863_v51  ;;  %v2209_v0 = vunpack.c.h.s8.bf16 %v865_v52  ;;  %v959_v51 = vld [vmem:[%s5666_s12 + $0x14c8] sm:$0xff]  ;;  %v961_v52 = vld [vmem:[%s5666_s12 + $0x14d8] sm:$0xff] }
 0x50b   : > { %4039 = vmatpush1.bf16.msra.mxu0 %v2014_v3  ;;  %4203 = vmatpush1.bf16.msra.mxu1 %v2016_v4  ;;  %v2206_v3 = vunpack.c.h.s8.bf16 %v862_v57  ;;  %v2208_v4 = vunpack.c.h.s8.bf16 %v864_v58  ;;  %v2350_v58 = vunpack.c.h.s8.bf16 %v934_v9 }
 0x50c   : > { %4040 = vmatprep.subr.bf16.mxu0 %v2039_v5  ;;  %4204 = vmatprep.subr.bf16.mxu1 %v2041_v6  ;;  %v2231_v5 = vunpack.c.l.s8.bf16 %v887_v1  ;;  %v2233_v6 = vunpack.c.l.s8.bf16 %v889_v2 }
 0x50f   : > { %4041 = vmatpush1.bf16.msra.mxu0 %v2038_v10  ;;  %4205 = vmatpush1.bf16.msra.mxu1 %v2040_v11  ;;  %v2230_v10 = vunpack.c.l.s8.bf16 %v886_v7  ;;  %v2232_v11 = vunpack.c.l.s8.bf16 %v888_v8 }
 0x510   : > { %4042 = vmatprep.subr.bf16.mxu0 %v2063_v12  ;;  %4206 = vmatprep.subr.bf16.mxu1 %v2065_v13  ;;  %v2255_v12 = vunpack.c.h.s8.bf16 %v887_v1  ;;  %v2257_v13 = vunpack.c.h.s8.bf16 %v889_v2  ;;  %v2375_v1 = vunpack.c.l.s8.bf16 %v959_v51  ;;  %v2377_v2 = vunpack.c.l.s8.bf16 %v961_v52 }
 0x513   : > { %4043 = vmatpush1.bf16.msra.mxu0 %v2062_v20  ;;  %4207 = vmatpush1.bf16.msra.mxu1 %v2064_v21  ;;  %v2254_v20 = vunpack.c.h.s8.bf16 %v886_v7  ;;  %v2256_v21 = vunpack.c.h.s8.bf16 %v888_v8 }
 0x514   : > { %4044 = vmatprep.subr.bf16.mxu0 %v2087_v22  ;;  %4208 = vmatprep.subr.bf16.mxu1 %v2089_v25  ;;  %v2279_v22 = vunpack.c.l.s8.bf16 %v911_v14  ;;  %v2281_v25 = vunpack.c.l.s8.bf16 %v913_v15 }
 0x517   : > { %4045 = vmatpush1.bf16.msra.mxu0 %v2086_v31  ;;  %4209 = vmatpush1.bf16.msra.mxu1 %v2088_v32  ;;  %v2278_v31 = vunpack.c.l.s8.bf16 %v910_v26  ;;  %v2280_v32 = vunpack.c.l.s8.bf16 %v912_v27 }
 0x518   : > { %4046 = vmatprep.subr.bf16.mxu0 %v2111_v36  ;;  %4210 = vmatprep.subr.bf16.mxu1 %v2113_v37  ;;  %v2303_v36 = vunpack.c.h.s8.bf16 %v911_v14  ;;  %v2305_v37 = vunpack.c.h.s8.bf16 %v913_v15 }
 0x51b   : > { %4047 = vmatpush1.bf16.msra.mxu0 %v2110_v40  ;;  %4211 = vmatpush1.bf16.msra.mxu1 %v2112_v41  ;;  %v2302_v40 = vunpack.c.h.s8.bf16 %v910_v26  ;;  %v2304_v41 = vunpack.c.h.s8.bf16 %v912_v27 }
 0x51c   : > { %4048 = vmatprep.subr.bf16.mxu0 %v2135_v45  ;;  %4212 = vmatprep.subr.bf16.mxu1 %v2137_v46  ;;  %v2327_v45 = vunpack.c.l.s8.bf16 %v935_v38  ;;  %v2329_v46 = vunpack.c.l.s8.bf16 %v937_v39 }
 0x51f   : > { %4049 = vmatpush1.bf16.msra.mxu0 %v2134_v48  ;;  %4213 = vmatpush1.bf16.msra.mxu1 %v2136_v49  ;;  %v2326_v48 = vunpack.c.l.s8.bf16 %v934_v9  ;;  %v2328_v49 = vunpack.c.l.s8.bf16 %v936_v47 }
 0x520   : > { %4050 = vmatprep.subr.bf16.mxu0 %v2159_v50  ;;  %4214 = vmatprep.subr.bf16.mxu1 %v2161_v61  ;;  %v2351_v50 = vunpack.c.h.s8.bf16 %v935_v38  ;;  %v2353_v61 = vunpack.c.h.s8.bf16 %v937_v39 }
 0x523   : > { %4051 = vmatpush1.bf16.msra.mxu0 %v2158_v53  ;;  %4215 = vmatpush1.bf16.msra.mxu1 %v2160_v54  ;;  %v5336_v53 = vld [vmem:[%s5676_s27 + $0x8] sm:$0xff] }
 0x524   : > { %4052 = vmatprep.subr.bf16.mxu0 %v2183_v55  ;;  %4216 = vmatprep.subr.bf16.mxu1 %v2185_v56  ;;  %v4655_v54 = vrot.slane %v5336_v53, %v6193_v28  ;;  %v4663_v55 = vrot.slane %v5336_v53, %v6196_v29  ;;  %v4659_v56 = vrot.slane %v5336_v53, %v6199_v33 }
 0x525   : > { %v4667_v57 = vrot.slane %v5336_v53, %v6202_v34  ;;  %v1007_v53 = vld [vmem:[%s5666_s12 + $0x1648] sm:$0xff] }
 0x527   : > { %4053 = vmatpush1.bf16.msra.mxu0 %v2182_v59  ;;  %4217 = vmatpush1.bf16.msra.mxu1 %v2184_v62  ;;  %v2352_v59 = vunpack.c.h.s8.bf16 %v936_v47  ;;  %v5337_v62 = vld [vmem:[%s6017_s8 + $0x8] sm:$0xff] }
 0x528   : > { %4054 = vmatprep.subr.bf16.mxu0 %v2207_v63  ;;  %4218 = vmatprep.subr.bf16.mxu1 %v2209_v0  ;;  %v4805_v63 = vrot.slane %v5337_v62, %v6193_v28  ;;  %v4813_v0 = vrot.slane %v5337_v62, %v6196_v29  ;;  %v4809_v7 = vrot.slane %v5337_v62, %v6199_v33 }
 0x529   : > { %v4817_v8 = vrot.slane %v5337_v62, %v6202_v34  ;;  %v1006_v62 = vld [vmem:[%s5666_s12 + $0x1640] sm:$0xff] }
 0x52b   : > { %4055 = vmatpush1.bf16.msra.mxu0 %v2206_v3  ;;  %4219 = vmatpush1.bf16.msra.mxu1 %v2208_v4  ;;  %v958_v3 = vld [vmem:[%s5666_s12 + $0x14c0] sm:$0xff]  ;;  %v960_v4 = vld [vmem:[%s5666_s12 + $0x14d0] sm:$0xff] }
 0x52c   : > { %4065 = vmatprep.subr.bf16.mxu0 %v2231_v5  ;;  %4229 = vmatprep.subr.bf16.mxu1 %v2233_v6 }
 0x52e   : > { %4057 = vmatmul.mubr.bf16.vlgmr.msra.gmra.mrb[16].mxu0 %v5829_v60  ;;  %4221 = vmatmul.mubr.bf16.vlgmr.msra.gmra.mrb[16].mxu1 %v5829_v60 }
 0x52f   : > { %4066 = vmatpush1.bf16.msra.mxu0 %v2230_v10  ;;  %4230 = vmatpush1.bf16.msra.mxu1 %v2232_v11 }
 0x530   : > { %4067 = vmatprep.subr.bf16.mxu0 %v2255_v12  ;;  %4231 = vmatprep.subr.bf16.mxu1 %v2257_v13 }
 0x531   : > { %4097 = vmatprep.mubr.bf16.mxu0 %v5840_v17  ;;  %4261 = vmatprep.mubr.bf16.mxu1 %v5840_v17 }
 0x533   : > { %4068 = vmatpush1.bf16.msra.mxu0 %v2254_v20  ;;  %4232 = vmatpush1.bf16.msra.mxu1 %v2256_v21 }
 0x534   : > { %4069 = vmatprep.subr.bf16.mxu0 %v2279_v22  ;;  %4233 = vmatprep.subr.bf16.mxu1 %v2281_v25  ;;  %v2374_v22 = vunpack.c.l.s8.bf16 %v958_v3  ;;  %v2376_v25 = vunpack.c.l.s8.bf16 %v960_v4 }
 0x537   : > { %4070 = vmatpush1.bf16.msra.mxu0 %v2278_v31  ;;  %4234 = vmatpush1.bf16.msra.mxu1 %v2280_v32 }
 0x538   : > { %4071 = vmatprep.subr.bf16.mxu0 %v2303_v36  ;;  %4235 = vmatprep.subr.bf16.mxu1 %v2305_v37  ;;  %v2399_v36 = vunpack.c.h.s8.bf16 %v959_v51  ;;  %v2401_v37 = vunpack.c.h.s8.bf16 %v961_v52 }
 0x53b   : > { %4072 = vmatpush1.bf16.msra.mxu0 %v2302_v40  ;;  %4236 = vmatpush1.bf16.msra.mxu1 %v2304_v41  ;;  %v983_v40 = vld [vmem:[%s5666_s12 + $0x1588] sm:$0xff]  ;;  %v985_v41 = vld [vmem:[%s5666_s12 + $0x1598] sm:$0xff] }
 0x53c   : > { %4073 = vmatprep.subr.bf16.mxu0 %v2327_v45  ;;  %4237 = vmatprep.subr.bf16.mxu1 %v2329_v46  ;;  %v2398_v45 = vunpack.c.h.s8.bf16 %v958_v3  ;;  %v2400_v46 = vunpack.c.h.s8.bf16 %v960_v4  ;;  %v2423_v9 = vunpack.c.l.s8.bf16 %v983_v40  ;;  %v2425_v47 = vunpack.c.l.s8.bf16 %v985_v41 }
 0x53d   : > { %v2447_v51 = vunpack.c.h.s8.bf16 %v983_v40  ;;  %v2449_v52 = vunpack.c.h.s8.bf16 %v985_v41  ;;  %v2470_v3 = vunpack.c.l.s8.bf16 %v1006_v62 }
 0x53f   : > { %4074 = vmatpush1.bf16.msra.mxu0 %v2326_v48  ;;  %4238 = vmatpush1.bf16.msra.mxu1 %v2328_v49  ;;  %v982_v48 = vld [vmem:[%s5666_s12 + $0x1580] sm:$0xff]  ;;  %v984_v49 = vld [vmem:[%s5666_s12 + $0x1590] sm:$0xff] }
 0x540   : > { %4075 = vmatprep.subr.bf16.mxu0 %v2351_v50  ;;  %4239 = vmatprep.subr.bf16.mxu1 %v2353_v61  ;;  %v2422_v50 = vunpack.c.l.s8.bf16 %v982_v48  ;;  %v2424_v61 = vunpack.c.l.s8.bf16 %v984_v49 }
 0x541   : > { %v3771_v5 = vpop.f32.mrb[12].mxu0  ;;  %v3935_v6 = vpop.f32.mrb[12].mxu1 }
 0x542   : > { %v4736_v10 = vmul.f32 %v4655_v54, %v3771_v5  ;;  %v4738_v11 = vmul.f32 %v4663_v55, %v3935_v6  ;;  %v3773_v12 = vpop.f32.mrb[13].mxu0  ;;  %v3937_v13 = vpop.f32.mrb[13].mxu1  ;;  %v1009_v54 = vld [vmem:[%s5666_s12 + $0x1658] sm:$0xff]  ;;  %v2446_v55 = vunpack.c.h.s8.bf16 %v982_v48  ;;  %v2495_v5 = vunpack.c.h.s8.bf16 %v1007_v53 }
 0x543   : > { %v4737_v14 = vmul.f32 %v4659_v56, %v3773_v12  ;;  %v4739_v15 = vmul.f32 %v4667_v57, %v3937_v13  ;;  %v3775_v20 = vpop.f32.mrb[14].mxu0  ;;  %v3939_v21 = vpop.f32.mrb[14].mxu1  ;;  %4076 = vmatpush1.bf16.msra.mxu0 %v2350_v58  ;;  %4240 = vmatpush1.bf16.msra.mxu1 %v2352_v59  ;;  %v2448_v56 = vunpack.c.h.s8.bf16 %v984_v49  ;;  %v2471_v58 = vunpack.c.l.s8.bf16 %v1007_v53 }
 0x544   : > { %v4886_v26 = vadd.f32 %v4805_v63, %v4736_v10  ;;  %v4888_v27 = vadd.f32 %v4813_v0, %v4738_v11  ;;  %v3776_v31 = vpop.f32.mrb[15].mxu0  ;;  %v3940_v32 = vpop.f32.mrb[15].mxu1  ;;  %4077 = vmatprep.subr.bf16.mxu0 %v2375_v1  ;;  %4241 = vmatprep.subr.bf16.mxu1 %v2377_v2  ;;  %v2473_v59 = vunpack.c.l.s8.bf16 %v1009_v54  ;;  %v1008_v63 = vld [vmem:[%s5666_s12 + $0x1650] sm:$0xff]  ;;  %v2497_v6 = vunpack.c.h.s8.bf16 %v1009_v54 }
 0x545   : > { %v4887_v38 = vadd.f32 %v4809_v7, %v4737_v14  ;;  %v4889_v39 = vadd.f32 %v4817_v8, %v4739_v15  ;;  %v2472_v4 = vunpack.c.l.s8.bf16 %v1008_v63  ;;  %v1031_v7 = vld [vmem:[%s5666_s12 + $0x1708] sm:$0xff]  ;;  %v1033_v8 = vld [vmem:[%s5666_s12 + $0x1718] sm:$0xff]  ;;  %v2494_v10 = vunpack.c.h.s8.bf16 %v1006_v62  ;;  %v1030_v14 = vld [vmem:[%s5666_s12 + $0x1700] sm:$0xff] }
 0x546   : > { %5310 = vtanh.f32 %v4886_v26  ;;  %v2496_v11 = vunpack.c.h.s8.bf16 %v1008_v63  ;;  %v2519_v12 = vunpack.c.l.s8.bf16 %v1031_v7  ;;  %v2521_v13 = vunpack.c.l.s8.bf16 %v1033_v8  ;;  %v1032_v15 = vld [vmem:[%s5666_s12 + $0x1710] sm:$0xff]  ;;  %v1055_v26 = vld [vmem:[%s5666_s12 + $0x17c8] sm:$0xff] }
 0x547   : > { %5312 = vtanh.f32 %v4888_v27  ;;  %4078 = vmatpush1.bf16.msra.mxu0 %v2374_v22  ;;  %4242 = vmatpush1.bf16.msra.mxu1 %v2376_v25  ;;  %v2518_v20 = vunpack.c.l.s8.bf16 %v1030_v14  ;;  %v2520_v21 = vunpack.c.l.s8.bf16 %v1032_v15  ;;  %v2543_v22 = vunpack.c.h.s8.bf16 %v1031_v7  ;;  %v1057_v27 = vld [vmem:[%s5666_s12 + $0x17d8] sm:$0xff]  ;;  %v363_v7 = vld [vmem:[%s5666_s12 + $0x228] sm:$0xff] }
 0x548   : > { %5314 = vtanh.f32 %v4887_v38  ;;  %4079 = vmatprep.subr.bf16.mxu0 %v2399_v36  ;;  %4243 = vmatprep.subr.bf16.mxu1 %v2401_v37  ;;  %v2545_v25 = vunpack.c.h.s8.bf16 %v1033_v8  ;;  %v2542_v31 = vunpack.c.h.s8.bf16 %v1030_v14  ;;  %v2544_v32 = vunpack.c.h.s8.bf16 %v1032_v15  ;;  %v1054_v38 = vld [vmem:[%s5666_s12 + $0x17c0] sm:$0xff]  ;;  %v365_v8 = vld [vmem:[%s5666_s12 + $0x238] sm:$0xff]  ;;  %v364_v14 = vld [vmem:[%s5666_s12 + $0x230] sm:$0xff] }
 0x549   : > { %5316 = vtanh.f32 %v4889_v39  ;;  %v2567_v36 = vunpack.c.l.s8.bf16 %v1055_v26  ;;  %v2569_v37 = vunpack.c.l.s8.bf16 %v1057_v27  ;;  %v1056_v39 = vld [vmem:[%s5666_s12 + $0x17d0] sm:$0xff]  ;;  %v2566_v40 = vunpack.c.l.s8.bf16 %v1054_v38 }
 0x54a   : > { %v2568_v41 = vunpack.c.l.s8.bf16 %v1056_v39  ;;  %v2590_v48 = vunpack.c.h.s8.bf16 %v1054_v38  ;;  %v2592_v49 = vunpack.c.h.s8.bf16 %v1056_v39  ;;  %v388_v38 = vld [vmem:[%s5666_s12 + $0x2f0] sm:$0xff] }
 0x54b   : > { %4080 = vmatpush1.bf16.msra.mxu0 %v2398_v45  ;;  %4244 = vmatpush1.bf16.msra.mxu1 %v2400_v46  ;;  %v2591_v45 = vunpack.c.h.s8.bf16 %v1055_v26  ;;  %v2593_v46 = vunpack.c.h.s8.bf16 %v1057_v27  ;;  %v389_v26 = vld [vmem:[%s5666_s12 + $0x2f8] sm:$0xff] }
 0x54c   : > { %4081 = vmatprep.subr.bf16.mxu0 %v2423_v9  ;;  %4245 = vmatprep.subr.bf16.mxu1 %v2425_v47  ;;  %v315_v9 = vld [vmem:[%s5666_s12 + $0xa8] sm:$0xff]  ;;  %v317_v47 = vld [vmem:[%s5666_s12 + $0xb8] sm:$0xff] }
 0x54f   : > { %4082 = vmatpush1.bf16.msra.mxu0 %v2422_v50  ;;  %4246 = vmatpush1.bf16.msra.mxu1 %v2424_v61  ;;  %v1083_v50 = vunpack.c.l.s8.bf16 %v315_v9  ;;  %v1085_v61 = vunpack.c.l.s8.bf16 %v317_v47 }
 0x550   : > { %v5311_v57 = vpop.eup %5310  ;;  %4083 = vmatprep.subr.bf16.mxu0 %v2447_v51  ;;  %4247 = vmatprep.subr.bf16.mxu1 %v2449_v52  ;;  %v314_v51 = vld [vmem:[%s5666_s12 + $0xa0] sm:$0xff]  ;;  %v316_v52 = vld [vmem:[%s5666_s12 + $0xb0] sm:$0xff] }
 0x551   : > { %v5313_v0 = vpop.eup %5312  ;;  %4934 = vst [vmem:[%s6052_s11 + $0x60] sm:$0xff] %v5311_v57  ;;  %v1082_v53 = vunpack.c.l.s8.bf16 %v314_v51  ;;  %v1084_v54 = vunpack.c.l.s8.bf16 %v316_v52  ;;  %v339_v57 = vld [vmem:[%s5666_s12 + $0x168] sm:$0xff]  ;;  %v1108_v62 = vunpack.c.h.s8.bf16 %v316_v52 }
 0x552   : > { %v5315_v1 = vpop.eup %5314  ;;  %4936 = vst [vmem:[%s6052_s11 + $0x70] sm:$0xff] %v5313_v0  ;;  %v1131_v63 = vunpack.c.l.s8.bf16 %v339_v57 }
 0x553   : > { %v5317_v2 = vpop.eup %5316  ;;  %4935 = vst [vmem:[%s6052_s11 + $0x68] sm:$0xff] %v5315_v1  ;;  %4084 = vmatpush1.bf16.msra.mxu0 %v2446_v55  ;;  %4248 = vmatpush1.bf16.msra.mxu1 %v2448_v56  ;;  %v1107_v55 = vunpack.c.h.s8.bf16 %v315_v9  ;;  %v1109_v56 = vunpack.c.h.s8.bf16 %v317_v47  ;;  %v338_v1 = vld [vmem:[%s5666_s12 + $0x160] sm:$0xff]  ;;  %v413_v9 = vld [vmem:[%s5666_s12 + $0x3b8] sm:$0xff] }
 0x554   : > { %4937 = vst [vmem:[%s6052_s11 + $0x78] sm:$0xff] %v5317_v2  ;;  %4085 = vmatprep.subr.bf16.mxu0 %v2471_v58  ;;  %4249 = vmatprep.subr.bf16.mxu1 %v2473_v59  ;;  %v341_v58 = vld [vmem:[%s5666_s12 + $0x178] sm:$0xff]  ;;  %v1106_v59 = vunpack.c.h.s8.bf16 %v314_v51  ;;  %v340_v2 = vld [vmem:[%s5666_s12 + $0x170] sm:$0xff] }
 0x555   : > { %v1133_v0 = vunpack.c.l.s8.bf16 %v341_v58  ;;  %v412_v51 = vld [vmem:[%s5666_s12 + $0x3b0] sm:$0xff] }
 0x557   : > { %4086 = vmatpush1.bf16.msra.mxu0 %v2470_v3  ;;  %4250 = vmatpush1.bf16.msra.mxu1 %v2472_v4  ;;  %v1130_v3 = vunpack.c.l.s8.bf16 %v338_v1  ;;  %v1132_v4 = vunpack.c.l.s8.bf16 %v340_v2 }
 0x558   : > { %4087 = vmatprep.subr.bf16.mxu0 %v2495_v5  ;;  %4251 = vmatprep.subr.bf16.mxu1 %v2497_v6  ;;  %v1155_v5 = vunpack.c.h.s8.bf16 %v339_v57  ;;  %v1157_v6 = vunpack.c.h.s8.bf16 %v341_v58  ;;  %v437_v57 = vld [vmem:[%s5666_s12 + $0x478] sm:$0xff] }
 0x55b   : > { %4088 = vmatpush1.bf16.msra.mxu0 %v2494_v10  ;;  %4252 = vmatpush1.bf16.msra.mxu1 %v2496_v11  ;;  %v1154_v10 = vunpack.c.h.s8.bf16 %v338_v1  ;;  %v1156_v11 = vunpack.c.h.s8.bf16 %v340_v2  ;;  %v436_v1 = vld [vmem:[%s5666_s12 + $0x470] sm:$0xff] }
 0x55c   : > { %4089 = vmatprep.subr.bf16.mxu0 %v2519_v12  ;;  %4253 = vmatprep.subr.bf16.mxu1 %v2521_v13  ;;  %v1181_v12 = vunpack.c.l.s8.bf16 %v365_v8  ;;  %v362_v13 = vld [vmem:[%s5666_s12 + $0x220] sm:$0xff] }
 0x55d   : > { %v1178_v15 = vunpack.c.l.s8.bf16 %v362_v13  ;;  %v1202_v27 = vunpack.c.h.s8.bf16 %v362_v13  ;;  %v460_v13 = vld [vmem:[%s5666_s12 + $0x530] sm:$0xff] }
 0x55f   : > { %4090 = vmatpush1.bf16.msra.mxu0 %v2518_v20  ;;  %4254 = vmatpush1.bf16.msra.mxu1 %v2520_v21  ;;  %v1180_v20 = vunpack.c.l.s8.bf16 %v364_v14  ;;  %v1203_v21 = vunpack.c.h.s8.bf16 %v363_v7 }
 0x560   : > { %4091 = vmatprep.subr.bf16.mxu0 %v2543_v22  ;;  %4255 = vmatprep.subr.bf16.mxu1 %v2545_v25  ;;  %v1205_v22 = vunpack.c.h.s8.bf16 %v365_v8  ;;  %v387_v25 = vld [vmem:[%s5666_s12 + $0x2e8] sm:$0xff] }
 0x563   : > { %4092 = vmatpush1.bf16.msra.mxu0 %v2542_v31  ;;  %4256 = vmatpush1.bf16.msra.mxu1 %v2544_v32  ;;  %v1204_v31 = vunpack.c.h.s8.bf16 %v364_v14  ;;  %v1227_v32 = vunpack.c.l.s8.bf16 %v387_v25 }
 0x564   : > { %4093 = vmatprep.subr.bf16.mxu0 %v2567_v36  ;;  %4257 = vmatprep.subr.bf16.mxu1 %v2569_v37  ;;  %v1229_v36 = vunpack.c.l.s8.bf16 %v389_v26  ;;  %v386_v37 = vld [vmem:[%s5666_s12 + $0x2e0] sm:$0xff] }
 0x565   : > { %v1226_v39 = vunpack.c.l.s8.bf16 %v386_v37  ;;  %v1250_v47 = vunpack.c.h.s8.bf16 %v386_v37  ;;  %v484_v37 = vld [vmem:[%s5666_s12 + $0x5f0] sm:$0xff] }
 0x567   : > { %4094 = vmatpush1.bf16.msra.mxu0 %v2566_v40  ;;  %4258 = vmatpush1.bf16.msra.mxu1 %v2568_v41  ;;  %v1228_v40 = vunpack.c.l.s8.bf16 %v388_v38  ;;  %v1251_v41 = vunpack.c.h.s8.bf16 %v387_v25  ;;  %v485_v25 = vld [vmem:[%s5666_s12 + $0x5f8] sm:$0xff] }
 0x568   : > { %4095 = vmatprep.subr.bf16.mxu0 %v2591_v45  ;;  %4259 = vmatprep.subr.bf16.mxu1 %v2593_v46  ;;  %v1253_v45 = vunpack.c.h.s8.bf16 %v389_v26  ;;  %v411_v46 = vld [vmem:[%s5666_s12 + $0x3a8] sm:$0xff] }
 0x56b   : > { %4096 = vmatpush1.bf16.msra.mxu0 %v2590_v48  ;;  %4260 = vmatpush1.bf16.msra.mxu1 %v2592_v49  ;;  %v1252_v48 = vunpack.c.h.s8.bf16 %v388_v38  ;;  %v1275_v49 = vunpack.c.l.s8.bf16 %v411_v46 }
 0x56c   : > { %4270 = vmatprep.subr.bf16.mxu0 %v1083_v50  ;;  %4434 = vmatprep.subr.bf16.mxu1 %v1085_v61  ;;  %v1277_v50 = vunpack.c.l.s8.bf16 %v413_v9  ;;  %v410_v61 = vld [vmem:[%s5666_s12 + $0x3a0] sm:$0xff] }
 0x56d   : > { %v1274_v52 = vunpack.c.l.s8.bf16 %v410_v61  ;;  %v1298_v58 = vunpack.c.h.s8.bf16 %v410_v61  ;;  %v508_v61 = vld [vmem:[%s5666_s12 + $0x6b0] sm:$0xff] }
 0x56e   : > { %4098 = vmatmul.mubr.bf16.vlgmr.msra.gmra.mrb[16].mxu0 %v5878_v44  ;;  %4262 = vmatmul.mubr.bf16.vlgmr.msra.gmra.mrb[16].mxu1 %v5878_v44 }
 0x56f   : > { %4271 = vmatpush1.bf16.msra.mxu0 %v1082_v53  ;;  %4435 = vmatpush1.bf16.msra.mxu1 %v1084_v54  ;;  %v1276_v53 = vunpack.c.l.s8.bf16 %v412_v51  ;;  %v1299_v54 = vunpack.c.h.s8.bf16 %v411_v46  ;;  %v509_v46 = vld [vmem:[%s5666_s12 + $0x6b8] sm:$0xff] }
 0x570   : > { %4272 = vmatprep.subr.bf16.mxu0 %v1107_v55  ;;  %4436 = vmatprep.subr.bf16.mxu1 %v1109_v56  ;;  %v1301_v55 = vunpack.c.h.s8.bf16 %v413_v9  ;;  %v435_v56 = vld [vmem:[%s5666_s12 + $0x468] sm:$0xff] }
 0x571   : > { %4302 = vmatprep.mubr.bf16.mxu0 %v5701_v35  ;;  %4466 = vmatprep.mubr.bf16.mxu1 %v5701_v35  ;;  %v1179_v35 = vunpack.c.l.s8.bf16 %v363_v7  ;;  %v461_v7 = vld [vmem:[%s5666_s12 + $0x538] sm:$0xff] }
 0x573   : > { %4273 = vmatpush1.bf16.msra.mxu0 %v1106_v59  ;;  %4437 = vmatpush1.bf16.msra.mxu1 %v1108_v62  ;;  %v1300_v59 = vunpack.c.h.s8.bf16 %v412_v51  ;;  %v1323_v62 = vunpack.c.l.s8.bf16 %v435_v56 }
 0x574   : > { %4274 = vmatprep.subr.bf16.mxu0 %v1131_v63  ;;  %4438 = vmatprep.subr.bf16.mxu1 %v1133_v0  ;;  %v1325_v63 = vunpack.c.l.s8.bf16 %v437_v57  ;;  %v434_v0 = vld [vmem:[%s5666_s12 + $0x460] sm:$0xff] }
 0x575   : > { %v1322_v2 = vunpack.c.l.s8.bf16 %v434_v0  ;;  %v1346_v8 = vunpack.c.h.s8.bf16 %v434_v0  ;;  %v532_v0 = vld [vmem:[%s5666_s12 + $0x770] sm:$0xff] }
 0x577   : > { %4275 = vmatpush1.bf16.msra.mxu0 %v1130_v3  ;;  %4439 = vmatpush1.bf16.msra.mxu1 %v1132_v4  ;;  %v1324_v3 = vunpack.c.l.s8.bf16 %v436_v1  ;;  %v1347_v4 = vunpack.c.h.s8.bf16 %v435_v56  ;;  %v533_v56 = vld [vmem:[%s5666_s12 + $0x778] sm:$0xff] }
 0x578   : > { %4276 = vmatprep.subr.bf16.mxu0 %v1155_v5  ;;  %4440 = vmatprep.subr.bf16.mxu1 %v1157_v6  ;;  %v1349_v5 = vunpack.c.h.s8.bf16 %v437_v57  ;;  %v459_v6 = vld [vmem:[%s5666_s12 + $0x528] sm:$0xff] }
 0x57b   : > { %4277 = vmatpush1.bf16.msra.mxu0 %v1154_v10  ;;  %4441 = vmatpush1.bf16.msra.mxu1 %v1156_v11  ;;  %v1348_v10 = vunpack.c.h.s8.bf16 %v436_v1  ;;  %v1371_v11 = vunpack.c.l.s8.bf16 %v459_v6 }
 0x57c   : > { %4278 = vmatprep.subr.bf16.mxu0 %v1179_v35  ;;  %4442 = vmatprep.subr.bf16.mxu1 %v1181_v12  ;;  %v1373_v35 = vunpack.c.l.s8.bf16 %v461_v7  ;;  %v458_v12 = vld [vmem:[%s5666_s12 + $0x520] sm:$0xff] }
 0x57d   : > { %v1370_v14 = vunpack.c.l.s8.bf16 %v458_v12  ;;  %v1394_v26 = vunpack.c.h.s8.bf16 %v458_v12 }
 0x57f   : > { %4279 = vmatpush1.bf16.msra.mxu0 %v1178_v15  ;;  %4443 = vmatpush1.bf16.msra.mxu1 %v1180_v20  ;;  %v1372_v15 = vunpack.c.l.s8.bf16 %v460_v13  ;;  %v1395_v20 = vunpack.c.h.s8.bf16 %v459_v6 }
 0x580   : > { %4280 = vmatprep.subr.bf16.mxu0 %v1203_v21  ;;  %4444 = vmatprep.subr.bf16.mxu1 %v1205_v22  ;;  %v1397_v21 = vunpack.c.h.s8.bf16 %v461_v7  ;;  %v483_v22 = vld [vmem:[%s5666_s12 + $0x5e8] sm:$0xff]  ;;  %v1540_v7 = vunpack.c.h.s8.bf16 %v532_v0 }
 0x583   : > { %4281 = vmatpush1.bf16.msra.mxu0 %v1202_v27  ;;  %4445 = vmatpush1.bf16.msra.mxu1 %v1204_v31  ;;  %v1396_v27 = vunpack.c.h.s8.bf16 %v460_v13  ;;  %v1419_v31 = vunpack.c.l.s8.bf16 %v483_v22 }
 0x584   : > { %4282 = vmatprep.subr.bf16.mxu0 %v1227_v32  ;;  %4446 = vmatprep.subr.bf16.mxu1 %v1229_v36  ;;  %v1421_v32 = vunpack.c.l.s8.bf16 %v485_v25  ;;  %v482_v36 = vld [vmem:[%s5666_s12 + $0x5e0] sm:$0xff] }
 0x585   : > { %v1418_v38 = vunpack.c.l.s8.bf16 %v482_v36  ;;  %v1442_v9 = vunpack.c.h.s8.bf16 %v482_v36 }
 0x587   : > { %4283 = vmatpush1.bf16.msra.mxu0 %v1226_v39  ;;  %4447 = vmatpush1.bf16.msra.mxu1 %v1228_v40  ;;  %v1420_v39 = vunpack.c.l.s8.bf16 %v484_v37  ;;  %v1443_v40 = vunpack.c.h.s8.bf16 %v483_v22 }
 0x588   : > { %4284 = vmatprep.subr.bf16.mxu0 %v1251_v41  ;;  %4448 = vmatprep.subr.bf16.mxu1 %v1253_v45  ;;  %v1445_v41 = vunpack.c.h.s8.bf16 %v485_v25  ;;  %v507_v45 = vld [vmem:[%s5666_s12 + $0x6a8] sm:$0xff] }
 0x58b   : > { %4285 = vmatpush1.bf16.msra.mxu0 %v1250_v47  ;;  %4449 = vmatpush1.bf16.msra.mxu1 %v1252_v48  ;;  %v1444_v47 = vunpack.c.h.s8.bf16 %v484_v37  ;;  %v1467_v48 = vunpack.c.l.s8.bf16 %v507_v45 }
 0x58c   : > { %4286 = vmatprep.subr.bf16.mxu0 %v1275_v49  ;;  %4450 = vmatprep.subr.bf16.mxu1 %v1277_v50  ;;  %v1469_v49 = vunpack.c.l.s8.bf16 %v509_v46  ;;  %v506_v50 = vld [vmem:[%s5666_s12 + $0x6a0] sm:$0xff] }
 0x58d   : > { %v1466_v51 = vunpack.c.l.s8.bf16 %v506_v50  ;;  %v1490_v57 = vunpack.c.h.s8.bf16 %v506_v50 }
 0x58f   : > { %4287 = vmatpush1.bf16.msra.mxu0 %v1274_v52  ;;  %4451 = vmatpush1.bf16.msra.mxu1 %v1276_v53  ;;  %v1468_v52 = vunpack.c.l.s8.bf16 %v508_v61  ;;  %v1491_v53 = vunpack.c.h.s8.bf16 %v507_v45 }
 0x590   : > { %4288 = vmatprep.subr.bf16.mxu0 %v1299_v54  ;;  %4452 = vmatprep.subr.bf16.mxu1 %v1301_v55  ;;  %v1493_v54 = vunpack.c.h.s8.bf16 %v509_v46  ;;  %v531_v55 = vld [vmem:[%s5666_s12 + $0x768] sm:$0xff] }
 0x593   : > { %4289 = vmatpush1.bf16.msra.mxu0 %v1298_v58  ;;  %4453 = vmatpush1.bf16.msra.mxu1 %v1300_v59  ;;  %v1492_v58 = vunpack.c.h.s8.bf16 %v508_v61  ;;  %v1515_v59 = vunpack.c.l.s8.bf16 %v531_v55 }
 0x594   : > { %4290 = vmatprep.subr.bf16.mxu0 %v1323_v62  ;;  %4454 = vmatprep.subr.bf16.mxu1 %v1325_v63  ;;  %v1517_v62 = vunpack.c.l.s8.bf16 %v533_v56  ;;  %v530_v63 = vld [vmem:[%s5666_s12 + $0x760] sm:$0xff] }
 0x595   : > { %v1514_v1 = vunpack.c.l.s8.bf16 %v530_v63  ;;  %v1538_v6 = vunpack.c.h.s8.bf16 %v530_v63 }
 0x597   : > { %4291 = vmatpush1.bf16.msra.mxu0 %v1322_v2  ;;  %4455 = vmatpush1.bf16.msra.mxu1 %v1324_v3  ;;  %v1539_v2 = vunpack.c.h.s8.bf16 %v531_v55  ;;  %v1541_v3 = vunpack.c.h.s8.bf16 %v533_v56 }
 0x598   : > { %4292 = vmatprep.subr.bf16.mxu0 %v1347_v4  ;;  %4456 = vmatprep.subr.bf16.mxu1 %v1349_v5  ;;  %v555_v4 = vld [vmem:[%s5666_s12 + $0x828] sm:$0xff]  ;;  %v557_v5 = vld [vmem:[%s5666_s12 + $0x838] sm:$0xff] }
 0x599   : > { %v1587_v13 = vunpack.c.h.s8.bf16 %v555_v4 }
 0x59b   : > { %4293 = vmatpush1.bf16.msra.mxu0 %v1346_v8  ;;  %4457 = vmatpush1.bf16.msra.mxu1 %v1348_v10  ;;  %v1565_v8 = vunpack.c.l.s8.bf16 %v557_v5  ;;  %v554_v10 = vld [vmem:[%s5666_s12 + $0x820] sm:$0xff] }
 0x59c   : > { %4294 = vmatprep.subr.bf16.mxu0 %v1371_v11  ;;  %4458 = vmatprep.subr.bf16.mxu1 %v1373_v35  ;;  %v556_v11 = vld [vmem:[%s5666_s12 + $0x830] sm:$0xff]  ;;  %v1562_v35 = vunpack.c.l.s8.bf16 %v554_v10 }
 0x59d   : > { %v1564_v12 = vunpack.c.l.s8.bf16 %v556_v11  ;;  %v1588_v22 = vunpack.c.h.s8.bf16 %v556_v11 }
 0x59f   : > { %4295 = vmatpush1.bf16.msra.mxu0 %v1370_v14  ;;  %4459 = vmatpush1.bf16.msra.mxu1 %v1372_v15  ;;  %v1589_v14 = vunpack.c.h.s8.bf16 %v557_v5  ;;  %v579_v15 = vld [vmem:[%s5666_s12 + $0x8e8] sm:$0xff] }
 0x5a0   : > { %4296 = vmatprep.subr.bf16.mxu0 %v1395_v20  ;;  %4460 = vmatprep.subr.bf16.mxu1 %v1397_v21  ;;  %v581_v20 = vld [vmem:[%s5666_s12 + $0x8f8] sm:$0xff]  ;;  %v1586_v21 = vunpack.c.h.s8.bf16 %v554_v10  ;;  %v1611_v25 = vunpack.c.l.s8.bf16 %v579_v15  ;;  %v1635_v37 = vunpack.c.h.s8.bf16 %v579_v15 }
 0x5a3   : > { %4297 = vmatpush1.bf16.msra.mxu0 %v1394_v26  ;;  %4461 = vmatpush1.bf16.msra.mxu1 %v1396_v27  ;;  %v1613_v26 = vunpack.c.l.s8.bf16 %v581_v20  ;;  %v578_v27 = vld [vmem:[%s5666_s12 + $0x8e0] sm:$0xff] }
 0x5a4   : > { %4298 = vmatprep.subr.bf16.mxu0 %v1419_v31  ;;  %4462 = vmatprep.subr.bf16.mxu1 %v1421_v32  ;;  %v580_v31 = vld [vmem:[%s5666_s12 + $0x8f0] sm:$0xff]  ;;  %v1610_v32 = vunpack.c.l.s8.bf16 %v578_v27 }
 0x5a5   : > { %v1612_v36 = vunpack.c.l.s8.bf16 %v580_v31  ;;  %v1636_v45 = vunpack.c.h.s8.bf16 %v580_v31 }
 0x5a7   : > { %4299 = vmatpush1.bf16.msra.mxu0 %v1418_v38  ;;  %4463 = vmatpush1.bf16.msra.mxu1 %v1420_v39  ;;  %v1637_v38 = vunpack.c.h.s8.bf16 %v581_v20  ;;  %v603_v39 = vld [vmem:[%s5666_s12 + $0x9a8] sm:$0xff] }
 0x5a8   : > { %4300 = vmatprep.subr.bf16.mxu0 %v1443_v40  ;;  %4464 = vmatprep.subr.bf16.mxu1 %v1445_v41  ;;  %v605_v40 = vld [vmem:[%s5666_s12 + $0x9b8] sm:$0xff]  ;;  %v1634_v41 = vunpack.c.h.s8.bf16 %v578_v27  ;;  %v1659_v46 = vunpack.c.l.s8.bf16 %v603_v39  ;;  %v1683_v61 = vunpack.c.h.s8.bf16 %v603_v39 }
 0x5ab   : > { %4301 = vmatpush1.bf16.msra.mxu0 %v1442_v9  ;;  %4465 = vmatpush1.bf16.msra.mxu1 %v1444_v47  ;;  %v1661_v9 = vunpack.c.l.s8.bf16 %v605_v40  ;;  %v602_v47 = vld [vmem:[%s5666_s12 + $0x9a0] sm:$0xff] }
 0x5ac   : > { %4311 = vmatprep.subr.bf16.mxu0 %v1467_v48  ;;  %4475 = vmatprep.subr.bf16.mxu1 %v1469_v49  ;;  %v604_v48 = vld [vmem:[%s5666_s12 + $0x9b0] sm:$0xff]  ;;  %v1658_v49 = vunpack.c.l.s8.bf16 %v602_v47 }
 0x5ad   : > { %v1660_v50 = vunpack.c.l.s8.bf16 %v604_v48  ;;  %v1684_v55 = vunpack.c.h.s8.bf16 %v604_v48 }
 0x5ae   : > { %4303 = vmatmul.mubr.bf16.vlgmr.msra.gmra.mrb[20].mxu0 %v5731_v42  ;;  %4467 = vmatmul.mubr.bf16.vlgmr.msra.gmra.mrb[20].mxu1 %v5731_v42  ;;  %v1516_v42 = vunpack.c.l.s8.bf16 %v532_v0 }
 0x5af   : > { %4312 = vmatpush1.bf16.msra.mxu0 %v1466_v51  ;;  %4476 = vmatpush1.bf16.msra.mxu1 %v1468_v52  ;;  %v1685_v51 = vunpack.c.h.s8.bf16 %v605_v40  ;;  %v627_v52 = vld [vmem:[%s5666_s12 + $0xa68] sm:$0xff] }
 0x5b0   : > { %4313 = vmatprep.subr.bf16.mxu0 %v1491_v53  ;;  %4477 = vmatprep.subr.bf16.mxu1 %v1493_v54  ;;  %v629_v53 = vld [vmem:[%s5666_s12 + $0xa78] sm:$0xff]  ;;  %v1682_v54 = vunpack.c.h.s8.bf16 %v602_v47  ;;  %v1707_v56 = vunpack.c.l.s8.bf16 %v627_v52  ;;  %v1731_v0 = vunpack.c.h.s8.bf16 %v627_v52 }
 0x5b1   : > { %4343 = vmatprep.mubr.bf16.mxu0 %v5742_v30  ;;  %4507 = vmatprep.mubr.bf16.mxu1 %v5742_v30  ;;  %v1563_v30 = vunpack.c.l.s8.bf16 %v555_v4 }
 0x5b3   : > { %4314 = vmatpush1.bf16.msra.mxu0 %v1490_v57  ;;  %4478 = vmatpush1.bf16.msra.mxu1 %v1492_v58  ;;  %v1709_v57 = vunpack.c.l.s8.bf16 %v629_v53  ;;  %v626_v58 = vld [vmem:[%s5666_s12 + $0xa60] sm:$0xff] }
 0x5b4   : > { %4315 = vmatprep.subr.bf16.mxu0 %v1515_v59  ;;  %4479 = vmatprep.subr.bf16.mxu1 %v1517_v62  ;;  %v628_v59 = vld [vmem:[%s5666_s12 + $0xa70] sm:$0xff]  ;;  %v1706_v62 = vunpack.c.l.s8.bf16 %v626_v58 }
 0x5b5   : > { %v1708_v63 = vunpack.c.l.s8.bf16 %v628_v59  ;;  %v1732_v4 = vunpack.c.h.s8.bf16 %v628_v59 }
 0x5b7   : > { %4316 = vmatpush1.bf16.msra.mxu0 %v1514_v1  ;;  %4480 = vmatpush1.bf16.msra.mxu1 %v1516_v42  ;;  %v1733_v1 = vunpack.c.h.s8.bf16 %v629_v53  ;;  %v651_v42 = vld [vmem:[%s5666_s12 + $0xb28] sm:$0xff] }
 0x5b8   : > { %4317 = vmatprep.subr.bf16.mxu0 %v1539_v2  ;;  %4481 = vmatprep.subr.bf16.mxu1 %v1541_v3  ;;  %v653_v2 = vld [vmem:[%s5666_s12 + $0xb38] sm:$0xff]  ;;  %v1730_v3 = vunpack.c.h.s8.bf16 %v626_v58  ;;  %v1755_v5 = vunpack.c.l.s8.bf16 %v651_v42  ;;  %v1779_v11 = vunpack.c.h.s8.bf16 %v651_v42 }
 0x5bb   : > { %4318 = vmatpush1.bf16.msra.mxu0 %v1538_v6  ;;  %4482 = vmatpush1.bf16.msra.mxu1 %v1540_v7  ;;  %v1757_v6 = vunpack.c.l.s8.bf16 %v653_v2  ;;  %v650_v7 = vld [vmem:[%s5666_s12 + $0xb20] sm:$0xff] }
 0x5bc   : > { %4319 = vmatprep.subr.bf16.mxu0 %v1563_v30  ;;  %4483 = vmatprep.subr.bf16.mxu1 %v1565_v8  ;;  %v652_v30 = vld [vmem:[%s5666_s12 + $0xb30] sm:$0xff]  ;;  %v1754_v8 = vunpack.c.l.s8.bf16 %v650_v7 }
 0x5bd   : > { %v1756_v10 = vunpack.c.l.s8.bf16 %v652_v30  ;;  %v1780_v15 = vunpack.c.h.s8.bf16 %v652_v30  ;;  %v771_v30 = vld [vmem:[%s5666_s12 + $0xee8] sm:$0xff] }
 0x5bf   : > { %4320 = vmatpush1.bf16.msra.mxu0 %v1562_v35  ;;  %4484 = vmatpush1.bf16.msra.mxu1 %v1564_v12  ;;  %v1781_v35 = vunpack.c.h.s8.bf16 %v653_v2  ;;  %v675_v12 = vld [vmem:[%s5666_s12 + $0xbe8] sm:$0xff]  ;;  %v746_v2 = vld [vmem:[%s5666_s12 + $0xe20] sm:$0xff] }
 0x5c0   : > { %4321 = vmatprep.subr.bf16.mxu0 %v1587_v13  ;;  %4485 = vmatprep.subr.bf16.mxu1 %v1589_v14  ;;  %v677_v13 = vld [vmem:[%s5666_s12 + $0xbf8] sm:$0xff]  ;;  %v1778_v14 = vunpack.c.h.s8.bf16 %v650_v7  ;;  %v1803_v20 = vunpack.c.l.s8.bf16 %v675_v12  ;;  %v1827_v31 = vunpack.c.h.s8.bf16 %v675_v12 }
 0x5c3   : > { %4322 = vmatpush1.bf16.msra.mxu0 %v1586_v21  ;;  %4486 = vmatpush1.bf16.msra.mxu1 %v1588_v22  ;;  %v1805_v21 = vunpack.c.l.s8.bf16 %v677_v13  ;;  %v674_v22 = vld [vmem:[%s5666_s12 + $0xbe0] sm:$0xff] }
 0x5c4   : > { %4323 = vmatprep.subr.bf16.mxu0 %v1611_v25  ;;  %4487 = vmatprep.subr.bf16.mxu1 %v1613_v26  ;;  %v676_v25 = vld [vmem:[%s5666_s12 + $0xbf0] sm:$0xff]  ;;  %v1802_v26 = vunpack.c.l.s8.bf16 %v674_v22 }
 0x5c5   : > { %v1804_v27 = vunpack.c.l.s8.bf16 %v676_v25  ;;  %v1828_v39 = vunpack.c.h.s8.bf16 %v676_v25  ;;  %v795_v25 = vld [vmem:[%s5666_s12 + $0xfa8] sm:$0xff] }
 0x5c7   : > { %4324 = vmatpush1.bf16.msra.mxu0 %v1610_v32  ;;  %4488 = vmatpush1.bf16.msra.mxu1 %v1612_v36  ;;  %v1829_v32 = vunpack.c.h.s8.bf16 %v677_v13  ;;  %v699_v36 = vld [vmem:[%s5666_s12 + $0xca8] sm:$0xff]  ;;  %v770_v13 = vld [vmem:[%s5666_s12 + $0xee0] sm:$0xff] }
 0x5c8   : > { %4325 = vmatprep.subr.bf16.mxu0 %v1635_v37  ;;  %4489 = vmatprep.subr.bf16.mxu1 %v1637_v38  ;;  %v701_v37 = vld [vmem:[%s5666_s12 + $0xcb8] sm:$0xff]  ;;  %v1826_v38 = vunpack.c.h.s8.bf16 %v674_v22  ;;  %v1851_v40 = vunpack.c.l.s8.bf16 %v699_v36  ;;  %v1875_v48 = vunpack.c.h.s8.bf16 %v699_v36 }
 0x5cb   : > { %4326 = vmatpush1.bf16.msra.mxu0 %v1634_v41  ;;  %4490 = vmatpush1.bf16.msra.mxu1 %v1636_v45  ;;  %v1853_v41 = vunpack.c.l.s8.bf16 %v701_v37  ;;  %v698_v45 = vld [vmem:[%s5666_s12 + $0xca0] sm:$0xff] }
 0x5cc   : > { %4327 = vmatprep.subr.bf16.mxu0 %v1659_v46  ;;  %4491 = vmatprep.subr.bf16.mxu1 %v1661_v9  ;;  %v700_v46 = vld [vmem:[%s5666_s12 + $0xcb0] sm:$0xff]  ;;  %v1850_v9 = vunpack.c.l.s8.bf16 %v698_v45 }
 0x5cd   : > { %v1852_v47 = vunpack.c.l.s8.bf16 %v700_v46  ;;  %v1876_v52 = vunpack.c.h.s8.bf16 %v700_v46  ;;  %v819_v46 = vld [vmem:[%s5666_s12 + $0x1068] sm:$0xff] }
 0x5cf   : > { %4328 = vmatpush1.bf16.msra.mxu0 %v1658_v49  ;;  %4492 = vmatpush1.bf16.msra.mxu1 %v1660_v50  ;;  %v1877_v49 = vunpack.c.h.s8.bf16 %v701_v37  ;;  %v723_v50 = vld [vmem:[%s5666_s12 + $0xd68] sm:$0xff]  ;;  %v794_v37 = vld [vmem:[%s5666_s12 + $0xfa0] sm:$0xff] }
 0x5d0   : > { %4329 = vmatprep.subr.bf16.mxu0 %v1683_v61  ;;  %4493 = vmatprep.subr.bf16.mxu1 %v1685_v51  ;;  %v725_v61 = vld [vmem:[%s5666_s12 + $0xd78] sm:$0xff]  ;;  %v1874_v51 = vunpack.c.h.s8.bf16 %v698_v45  ;;  %v1899_v53 = vunpack.c.l.s8.bf16 %v723_v50  ;;  %v1923_v58 = vunpack.c.h.s8.bf16 %v723_v50 }
 0x5d1   : > { %v1925_v59 = vunpack.c.h.s8.bf16 %v725_v61 }
 0x5d3   : > { %4330 = vmatpush1.bf16.msra.mxu0 %v1682_v54  ;;  %4494 = vmatpush1.bf16.msra.mxu1 %v1684_v55  ;;  %v1901_v54 = vunpack.c.l.s8.bf16 %v725_v61  ;;  %v722_v55 = vld [vmem:[%s5666_s12 + $0xd60] sm:$0xff] }
 0x5d4   : > { %4331 = vmatprep.subr.bf16.mxu0 %v1707_v56  ;;  %4495 = vmatprep.subr.bf16.mxu1 %v1709_v57  ;;  %v724_v56 = vld [vmem:[%s5666_s12 + $0xd70] sm:$0xff]  ;;  %v1898_v57 = vunpack.c.l.s8.bf16 %v722_v55  ;;  %v818_v61 = vld [vmem:[%s5666_s12 + $0x1060] sm:$0xff] }
 0x5d7   : > { %4332 = vmatpush1.bf16.msra.mxu0 %v1706_v62  ;;  %4496 = vmatpush1.bf16.msra.mxu1 %v1708_v63  ;;  %v747_v62 = vld [vmem:[%s5666_s12 + $0xe28] sm:$0xff]  ;;  %v749_v63 = vld [vmem:[%s5666_s12 + $0xe38] sm:$0xff] }
 0x5d8   : > { %4333 = vmatprep.subr.bf16.mxu0 %v1731_v0  ;;  %4497 = vmatprep.subr.bf16.mxu1 %v1733_v1  ;;  %v1922_v0 = vunpack.c.h.s8.bf16 %v722_v55  ;;  %v1924_v1 = vunpack.c.h.s8.bf16 %v724_v56  ;;  %v1949_v42 = vunpack.c.l.s8.bf16 %v749_v63  ;;  %v1973_v7 = vunpack.c.h.s8.bf16 %v749_v63  ;;  %v842_v63 = vld [vmem:[%s5666_s12 + $0x1120] sm:$0xff] }
 0x5db   : > { %4334 = vmatpush1.bf16.msra.mxu0 %v1730_v3  ;;  %4498 = vmatpush1.bf16.msra.mxu1 %v1732_v4  ;;  %v748_v3 = vld [vmem:[%s5666_s12 + $0xe30] sm:$0xff]  ;;  %v1946_v4 = vunpack.c.l.s8.bf16 %v746_v2 }
 0x5dc   : > { %4335 = vmatprep.subr.bf16.mxu0 %v1755_v5  ;;  %4499 = vmatprep.subr.bf16.mxu1 %v1757_v6  ;;  %v1948_v5 = vunpack.c.l.s8.bf16 %v748_v3  ;;  %v1971_v6 = vunpack.c.h.s8.bf16 %v747_v62 }
 0x5df   : > { %4336 = vmatpush1.bf16.msra.mxu0 %v1754_v8  ;;  %4500 = vmatpush1.bf16.msra.mxu1 %v1756_v10  ;;  %v773_v8 = vld [vmem:[%s5666_s12 + $0xef8] sm:$0xff]  ;;  %v1970_v10 = vunpack.c.h.s8.bf16 %v746_v2 }
 0x5e0   : > { %4337 = vmatprep.subr.bf16.mxu0 %v1779_v11  ;;  %4501 = vmatprep.subr.bf16.mxu1 %v1781_v35  ;;  %v1972_v11 = vunpack.c.h.s8.bf16 %v748_v3  ;;  %v1995_v35 = vunpack.c.l.s8.bf16 %v771_v30  ;;  %v1997_v12 = vunpack.c.l.s8.bf16 %v773_v8  ;;  %v2021_v22 = vunpack.c.h.s8.bf16 %v773_v8  ;;  %v867_v3 = vld [vmem:[%s5666_s12 + $0x11e8] sm:$0xff]  ;;  %v866_v8 = vld [vmem:[%s5666_s12 + $0x11e0] sm:$0xff] }
 0x5e3   : > { %4338 = vmatpush1.bf16.msra.mxu0 %v1778_v14  ;;  %4502 = vmatpush1.bf16.msra.mxu1 %v1780_v15  ;;  %v772_v14 = vld [vmem:[%s5666_s12 + $0xef0] sm:$0xff]  ;;  %v1994_v15 = vunpack.c.l.s8.bf16 %v770_v13 }
 0x5e4   : > { %4339 = vmatprep.subr.bf16.mxu0 %v1803_v20  ;;  %4503 = vmatprep.subr.bf16.mxu1 %v1805_v21  ;;  %v1996_v20 = vunpack.c.l.s8.bf16 %v772_v14  ;;  %v2019_v21 = vunpack.c.h.s8.bf16 %v771_v30 }
 0x5e7   : > { %4340 = vmatpush1.bf16.msra.mxu0 %v1802_v26  ;;  %4504 = vmatpush1.bf16.msra.mxu1 %v1804_v27  ;;  %v797_v26 = vld [vmem:[%s5666_s12 + $0xfb8] sm:$0xff]  ;;  %v2018_v27 = vunpack.c.h.s8.bf16 %v770_v13 }
 0x5e8   : > { %4341 = vmatprep.subr.bf16.mxu0 %v1827_v31  ;;  %4505 = vmatprep.subr.bf16.mxu1 %v1829_v32  ;;  %v2020_v31 = vunpack.c.h.s8.bf16 %v772_v14  ;;  %v2043_v32 = vunpack.c.l.s8.bf16 %v795_v25  ;;  %v2045_v36 = vunpack.c.l.s8.bf16 %v797_v26  ;;  %v2069_v45 = vunpack.c.h.s8.bf16 %v797_v26  ;;  %v891_v14 = vld [vmem:[%s5666_s12 + $0x12a8] sm:$0xff]  ;;  %v890_v26 = vld [vmem:[%s5666_s12 + $0x12a0] sm:$0xff] }
 0x5eb   : > { %4342 = vmatpush1.bf16.msra.mxu0 %v1826_v38  ;;  %4506 = vmatpush1.bf16.msra.mxu1 %v1828_v39  ;;  %v796_v38 = vld [vmem:[%s5666_s12 + $0xfb0] sm:$0xff]  ;;  %v2042_v39 = vunpack.c.l.s8.bf16 %v794_v37 }
 0x5ec   : > { %4352 = vmatprep.subr.bf16.mxu0 %v1851_v40  ;;  %4516 = vmatprep.subr.bf16.mxu1 %v1853_v41  ;;  %v2044_v40 = vunpack.c.l.s8.bf16 %v796_v38  ;;  %v2067_v41 = vunpack.c.h.s8.bf16 %v795_v25 }
 0x5ee   : > { %4344 = vmatmul.mubr.bf16.vlgmr.msra.gmra.mrb[20].mxu0 %v5780_v16  ;;  %4508 = vmatmul.mubr.bf16.vlgmr.msra.gmra.mrb[20].mxu1 %v5780_v16  ;;  %v1900_v16 = vunpack.c.l.s8.bf16 %v724_v56  ;;  %v843_v56 = vld [vmem:[%s5666_s12 + $0x1128] sm:$0xff] }
 0x5ef   : > { %4353 = vmatpush1.bf16.msra.mxu0 %v1850_v9  ;;  %4517 = vmatpush1.bf16.msra.mxu1 %v1852_v47  ;;  %v821_v9 = vld [vmem:[%s5666_s12 + $0x1078] sm:$0xff]  ;;  %v2066_v47 = vunpack.c.h.s8.bf16 %v794_v37 }
 0x5f0   : > { %4354 = vmatprep.subr.bf16.mxu0 %v1875_v48  ;;  %4518 = vmatprep.subr.bf16.mxu1 %v1877_v49  ;;  %v2068_v48 = vunpack.c.h.s8.bf16 %v796_v38  ;;  %v2091_v49 = vunpack.c.l.s8.bf16 %v819_v46  ;;  %v2093_v50 = vunpack.c.l.s8.bf16 %v821_v9  ;;  %v2117_v55 = vunpack.c.h.s8.bf16 %v821_v9  ;;  %v915_v38 = vld [vmem:[%s5666_s12 + $0x1368] sm:$0xff]  ;;  %v914_v9 = vld [vmem:[%s5666_s12 + $0x1360] sm:$0xff] }
 0x5f1   : > { %4384 = vmatprep.mubr.bf16.mxu0 %v5791_v43  ;;  %4548 = vmatprep.mubr.bf16.mxu1 %v5791_v43  ;;  %v1947_v43 = vunpack.c.l.s8.bf16 %v747_v62 }
 0x5f3   : > { %4355 = vmatpush1.bf16.msra.mxu0 %v1874_v51  ;;  %4519 = vmatpush1.bf16.msra.mxu1 %v1876_v52  ;;  %v820_v51 = vld [vmem:[%s5666_s12 + $0x1070] sm:$0xff]  ;;  %v2090_v52 = vunpack.c.l.s8.bf16 %v818_v61 }
 0x5f4   : > { %4356 = vmatprep.subr.bf16.mxu0 %v1899_v53  ;;  %4520 = vmatprep.subr.bf16.mxu1 %v1901_v54  ;;  %v2092_v53 = vunpack.c.l.s8.bf16 %v820_v51  ;;  %v2115_v54 = vunpack.c.h.s8.bf16 %v819_v46 }
 0x5f7   : > { %4357 = vmatpush1.bf16.msra.mxu0 %v1898_v57  ;;  %4521 = vmatpush1.bf16.msra.mxu1 %v1900_v16  ;;  %v845_v57 = vld [vmem:[%s5666_s12 + $0x1138] sm:$0xff]  ;;  %v2114_v16 = vunpack.c.h.s8.bf16 %v818_v61  ;;  %v939_v61 = vld [vmem:[%s5666_s12 + $0x1428] sm:$0xff] }
 0x5f8   : > { %4358 = vmatprep.subr.bf16.mxu0 %v1923_v58  ;;  %4522 = vmatprep.subr.bf16.mxu1 %v1925_v59  ;;  %v2116_v58 = vunpack.c.h.s8.bf16 %v820_v51  ;;  %v2139_v59 = vunpack.c.l.s8.bf16 %v843_v56  ;;  %v2141_v62 = vunpack.c.l.s8.bf16 %v845_v57  ;;  %v2165_v2 = vunpack.c.h.s8.bf16 %v845_v57  ;;  %v941_v51 = vld [vmem:[%s5666_s12 + $0x1438] sm:$0xff] }
 0x5fb   : > { %4359 = vmatpush1.bf16.msra.mxu0 %v1922_v0  ;;  %4523 = vmatpush1.bf16.msra.mxu1 %v1924_v1  ;;  %v844_v0 = vld [vmem:[%s5666_s12 + $0x1130] sm:$0xff]  ;;  %v2138_v1 = vunpack.c.l.s8.bf16 %v842_v63 }
 0x5fc   : > { %4360 = vmatprep.subr.bf16.mxu0 %v1947_v43  ;;  %4524 = vmatprep.subr.bf16.mxu1 %v1949_v42  ;;  %v2140_v43 = vunpack.c.l.s8.bf16 %v844_v0  ;;  %v2163_v42 = vunpack.c.h.s8.bf16 %v843_v56  ;;  %v940_v56 = vld [vmem:[%s5666_s12 + $0x1430] sm:$0xff] }
 0x5ff   : > { %4361 = vmatpush1.bf16.msra.mxu0 %v1946_v4  ;;  %4525 = vmatpush1.bf16.msra.mxu1 %v1948_v5  ;;  %v869_v4 = vld [vmem:[%s5666_s12 + $0x11f8] sm:$0xff]  ;;  %v2162_v5 = vunpack.c.h.s8.bf16 %v842_v63 }
 0x600   : > { %4362 = vmatprep.subr.bf16.mxu0 %v1971_v6  ;;  %4526 = vmatprep.subr.bf16.mxu1 %v1973_v7  ;;  %v2164_v6 = vunpack.c.h.s8.bf16 %v844_v0  ;;  %v2187_v7 = vunpack.c.l.s8.bf16 %v867_v3  ;;  %v2189_v30 = vunpack.c.l.s8.bf16 %v869_v4  ;;  %v2213_v13 = vunpack.c.h.s8.bf16 %v869_v4  ;;  %v6682_v63 = vld [vmem:[%s6017_s8 + $0x10] sm:$0xff]  ;;  %v963_v0 = vld [vmem:[%s5666_s12 + $0x14e8] sm:$0xff] }
 0x603   : > { %4363 = vmatpush1.bf16.msra.mxu0 %v1970_v10  ;;  %4527 = vmatpush1.bf16.msra.mxu1 %v1972_v11  ;;  %v868_v10 = vld [vmem:[%s5666_s12 + $0x11f0] sm:$0xff]  ;;  %v2186_v11 = vunpack.c.l.s8.bf16 %v866_v8 }
 0x604   : > { %4364 = vmatprep.subr.bf16.mxu0 %v1995_v35  ;;  %4528 = vmatprep.subr.bf16.mxu1 %v1997_v12  ;;  %v2188_v35 = vunpack.c.l.s8.bf16 %v868_v10  ;;  %v2211_v12 = vunpack.c.h.s8.bf16 %v867_v3 }
 0x607   : > { %4365 = vmatpush1.bf16.msra.mxu0 %v1994_v15  ;;  %4529 = vmatpush1.bf16.msra.mxu1 %v1996_v20  ;;  %v893_v15 = vld [vmem:[%s5666_s12 + $0x12b8] sm:$0xff]  ;;  %v2210_v20 = vunpack.c.h.s8.bf16 %v866_v8 }
 0x608   : > { %4366 = vmatprep.subr.bf16.mxu0 %v2019_v21  ;;  %4530 = vmatprep.subr.bf16.mxu1 %v2021_v22  ;;  %v2212_v21 = vunpack.c.h.s8.bf16 %v868_v10  ;;  %v2235_v22 = vunpack.c.l.s8.bf16 %v891_v14  ;;  %v2237_v25 = vunpack.c.l.s8.bf16 %v893_v15  ;;  %v2261_v37 = vunpack.c.h.s8.bf16 %v893_v15  ;;  %v962_v10 = vld [vmem:[%s5666_s12 + $0x14e0] sm:$0xff] }
 0x60b   : > { %4367 = vmatpush1.bf16.msra.mxu0 %v2018_v27  ;;  %4531 = vmatpush1.bf16.msra.mxu1 %v2020_v31  ;;  %v892_v27 = vld [vmem:[%s5666_s12 + $0x12b0] sm:$0xff]  ;;  %v2234_v31 = vunpack.c.l.s8.bf16 %v890_v26 }
 0x60c   : > { %4368 = vmatprep.subr.bf16.mxu0 %v2043_v32  ;;  %4532 = vmatprep.subr.bf16.mxu1 %v2045_v36  ;;  %v2236_v32 = vunpack.c.l.s8.bf16 %v892_v27  ;;  %v2259_v36 = vunpack.c.h.s8.bf16 %v891_v14  ;;  %v4833_v14 = vrot.slane %v6682_v63, %v6013_v24 }
 0x60f   : > { %4369 = vmatpush1.bf16.msra.mxu0 %v2042_v39  ;;  %4533 = vmatpush1.bf16.msra.mxu1 %v2044_v40  ;;  %v917_v39 = vld [vmem:[%s5666_s12 + $0x1378] sm:$0xff]  ;;  %v2258_v40 = vunpack.c.h.s8.bf16 %v890_v26 }
 0x610   : > { %4370 = vmatprep.subr.bf16.mxu0 %v2067_v41  ;;  %4534 = vmatprep.subr.bf16.mxu1 %v2069_v45  ;;  %v2260_v41 = vunpack.c.h.s8.bf16 %v892_v27  ;;  %v2283_v45 = vunpack.c.l.s8.bf16 %v915_v38  ;;  %v2285_v46 = vunpack.c.l.s8.bf16 %v917_v39  ;;  %v2378_v27 = vunpack.c.l.s8.bf16 %v962_v10 }
 0x613   : > { %4371 = vmatpush1.bf16.msra.mxu0 %v2066_v47  ;;  %4535 = vmatpush1.bf16.msra.mxu1 %v2068_v48  ;;  %v916_v47 = vld [vmem:[%s5666_s12 + $0x1370] sm:$0xff]  ;;  %v2282_v48 = vunpack.c.l.s8.bf16 %v914_v9 }
 0x614   : > { %4372 = vmatprep.subr.bf16.mxu0 %v2091_v49  ;;  %4536 = vmatprep.subr.bf16.mxu1 %v2093_v50  ;;  %v2307_v49 = vunpack.c.h.s8.bf16 %v915_v38  ;;  %v2309_v50 = vunpack.c.h.s8.bf16 %v917_v39 }
 0x617   : > { %4373 = vmatpush1.bf16.msra.mxu0 %v2090_v52  ;;  %4537 = vmatpush1.bf16.msra.mxu1 %v2092_v53  ;;  %v2306_v52 = vunpack.c.h.s8.bf16 %v914_v9  ;;  %v2308_v53 = vunpack.c.h.s8.bf16 %v916_v47 }
 0x618   : > { %4374 = vmatprep.subr.bf16.mxu0 %v2115_v54  ;;  %4538 = vmatprep.subr.bf16.mxu1 %v2117_v55  ;;  %v2333_v54 = vunpack.c.l.s8.bf16 %v941_v51  ;;  %v938_v55 = vld [vmem:[%s5666_s12 + $0x1420] sm:$0xff] }
 0x619   : > { %v2330_v57 = vunpack.c.l.s8.bf16 %v938_v55  ;;  %v2354_v4 = vunpack.c.h.s8.bf16 %v938_v55 }
 0x61b   : > { %4375 = vmatpush1.bf16.msra.mxu0 %v2114_v16  ;;  %4539 = vmatpush1.bf16.msra.mxu1 %v2116_v58  ;;  %v2332_v16 = vunpack.c.l.s8.bf16 %v940_v56  ;;  %v6679_v58 = vld [vmem:[%s5676_s27 + $0x10] sm:$0xff] }
 0x61c   : > { %4376 = vmatprep.subr.bf16.mxu0 %v2139_v59  ;;  %4540 = vmatprep.subr.bf16.mxu1 %v2141_v62  ;;  %v2355_v59 = vunpack.c.h.s8.bf16 %v939_v61  ;;  %v2357_v62 = vunpack.c.h.s8.bf16 %v941_v51  ;;  %v4683_v3 = vrot.slane %v6679_v58, %v6013_v24  ;;  %v2403_v24 = vunpack.c.h.s8.bf16 %v963_v0 }
 0x61f   : > { %4377 = vmatpush1.bf16.msra.mxu0 %v2138_v1  ;;  %4541 = vmatpush1.bf16.msra.mxu1 %v2140_v43  ;;  %v965_v1 = vld [vmem:[%s5666_s12 + $0x14f8] sm:$0xff]  ;;  %v4671_v43 = vrot.slane %v6679_v58, %v6003_v18 }
 0x620   : > { %4378 = vmatprep.subr.bf16.mxu0 %v2163_v42  ;;  %4542 = vmatprep.subr.bf16.mxu1 %v2165_v2  ;;  %v4679_v42 = vrot.slane %v6679_v58, %v6006_v19  ;;  %v4675_v2 = vrot.slane %v6679_v58, %v6010_v23  ;;  %v2381_v8 = vunpack.c.l.s8.bf16 %v965_v1  ;;  %v2405_v38 = vunpack.c.h.s8.bf16 %v965_v1 }
 0x623   : > { %4379 = vmatpush1.bf16.msra.mxu0 %v2162_v5  ;;  %4543 = vmatpush1.bf16.msra.mxu1 %v2164_v6  ;;  %v2356_v5 = vunpack.c.h.s8.bf16 %v940_v56  ;;  %v4821_v6 = vrot.slane %v6682_v63, %v6003_v18 }
 0x624   : > { %4380 = vmatprep.subr.bf16.mxu0 %v2187_v7  ;;  %4544 = vmatprep.subr.bf16.mxu1 %v2189_v30  ;;  %v4829_v7 = vrot.slane %v6682_v63, %v6006_v19  ;;  %v2379_v30 = vunpack.c.l.s8.bf16 %v963_v0 }
 0x627   : > { %4381 = vmatpush1.bf16.msra.mxu0 %v2186_v11  ;;  %4545 = vmatpush1.bf16.msra.mxu1 %v2188_v35  ;;  %v964_v11 = vld [vmem:[%s5666_s12 + $0x14f0] sm:$0xff] }
 0x628   : > { %4382 = vmatprep.subr.bf16.mxu0 %v2211_v12  ;;  %4546 = vmatprep.subr.bf16.mxu1 %v2213_v13  ;;  %v4825_v13 = vrot.slane %v6682_v63, %v6010_v23  ;;  %v2404_v9 = vunpack.c.h.s8.bf16 %v964_v11 }
 0x62b   : > { %4383 = vmatpush1.bf16.msra.mxu0 %v2210_v20  ;;  %4547 = vmatpush1.bf16.msra.mxu1 %v2212_v21 }
 0x62c   : > { %4393 = vmatprep.subr.bf16.mxu0 %v2235_v22  ;;  %4557 = vmatprep.subr.bf16.mxu1 %v2237_v25 }
 0x62e   : > { %4385 = vmatmul.mubr.bf16.vlgmr.msra.gmra.mrb[20].mxu0 %v5829_v60  ;;  %4549 = vmatmul.mubr.bf16.vlgmr.msra.gmra.mrb[20].mxu1 %v5829_v60  ;;  %v2284_v60 = vunpack.c.l.s8.bf16 %v916_v47 }
 0x62f   : > { %4394 = vmatpush1.bf16.msra.mxu0 %v2234_v31  ;;  %4558 = vmatpush1.bf16.msra.mxu1 %v2236_v32  ;;  %v2380_v31 = vunpack.c.l.s8.bf16 %v964_v11  ;;  %v1034_v11 = vld [vmem:[%s5666_s12 + $0x1720] sm:$0xff] }
 0x630   : > { %4395 = vmatprep.subr.bf16.mxu0 %v2259_v36  ;;  %4559 = vmatprep.subr.bf16.mxu1 %v2261_v37 }
 0x631   : > { %4425 = vmatprep.mubr.bf16.mxu0 %v5840_v17  ;;  %4589 = vmatprep.mubr.bf16.mxu1 %v5840_v17  ;;  %v2331_v17 = vunpack.c.l.s8.bf16 %v939_v61 }
 0x633   : > { %4396 = vmatpush1.bf16.msra.mxu0 %v2258_v40  ;;  %4560 = vmatpush1.bf16.msra.mxu1 %v2260_v41  ;;  %v987_v41 = vld [vmem:[%s5666_s12 + $0x15a8] sm:$0xff] }
 0x634   : > { %4397 = vmatprep.subr.bf16.mxu0 %v2283_v45  ;;  %4561 = vmatprep.subr.bf16.mxu1 %v2285_v46  ;;  %v989_v45 = vld [vmem:[%s5666_s12 + $0x15b8] sm:$0xff]  ;;  %v2402_v46 = vunpack.c.h.s8.bf16 %v962_v10  ;;  %v2427_v47 = vunpack.c.l.s8.bf16 %v987_v41  ;;  %v2451_v51 = vunpack.c.h.s8.bf16 %v987_v41  ;;  %v4699_v41 = vrot.slane %v6679_v58, %v6202_v34 }
 0x637   : > { %4398 = vmatpush1.bf16.msra.mxu0 %v2282_v48  ;;  %4562 = vmatpush1.bf16.msra.mxu1 %v2284_v60  ;;  %v2429_v48 = vunpack.c.l.s8.bf16 %v989_v45  ;;  %v986_v60 = vld [vmem:[%s5666_s12 + $0x15a0] sm:$0xff] }
 0x638   : > { %4399 = vmatprep.subr.bf16.mxu0 %v2307_v49  ;;  %4563 = vmatprep.subr.bf16.mxu1 %v2309_v50  ;;  %v988_v49 = vld [vmem:[%s5666_s12 + $0x15b0] sm:$0xff]  ;;  %v2426_v50 = vunpack.c.l.s8.bf16 %v986_v60 }
 0x639   : > { %v2428_v61 = vunpack.c.l.s8.bf16 %v988_v49  ;;  %v2452_v55 = vunpack.c.h.s8.bf16 %v988_v49 }
 0x63b   : > { %4400 = vmatpush1.bf16.msra.mxu0 %v2306_v52  ;;  %4564 = vmatpush1.bf16.msra.mxu1 %v2308_v53  ;;  %v2453_v52 = vunpack.c.h.s8.bf16 %v989_v45  ;;  %v1011_v53 = vld [vmem:[%s5666_s12 + $0x1668] sm:$0xff]  ;;  %v4837_v45 = vrot.slane %v6682_v63, %v6193_v28 }
 0x63c   : > { %4401 = vmatprep.subr.bf16.mxu0 %v2331_v17  ;;  %4565 = vmatprep.subr.bf16.mxu1 %v2333_v54  ;;  %v1013_v17 = vld [vmem:[%s5666_s12 + $0x1678] sm:$0xff]  ;;  %v2450_v54 = vunpack.c.h.s8.bf16 %v986_v60 }
 0x63f   : > { %4402 = vmatpush1.bf16.msra.mxu0 %v2330_v57  ;;  %4566 = vmatpush1.bf16.msra.mxu1 %v2332_v16  ;;  %v2475_v57 = vunpack.c.l.s8.bf16 %v1011_v53  ;;  %v2477_v16 = vunpack.c.l.s8.bf16 %v1013_v17 }
 0x640   : > { %4403 = vmatprep.subr.bf16.mxu0 %v2355_v59  ;;  %4567 = vmatprep.subr.bf16.mxu1 %v2357_v62  ;;  %v1010_v59 = vld [vmem:[%s5666_s12 + $0x1660] sm:$0xff]  ;;  %v1012_v62 = vld [vmem:[%s5666_s12 + $0x1670] sm:$0xff] }
 0x641   : > { %v4099_v35 = vpop.f32.mrb[16].mxu0  ;;  %v4263_v12 = vpop.f32.mrb[16].mxu1 }
 0x642   : > { %v4740_v15 = vmul.f32 %v4671_v43, %v4099_v35  ;;  %v4742_v20 = vmul.f32 %v4679_v42, %v4263_v12  ;;  %v4101_v18 = vpop.f32.mrb[17].mxu0  ;;  %v4265_v21 = vpop.f32.mrb[17].mxu1  ;;  %v2474_v42 = vunpack.c.l.s8.bf16 %v1010_v59  ;;  %v1036_v35 = vld [vmem:[%s5666_s12 + $0x1730] sm:$0xff]  ;;  %v2522_v12 = vunpack.c.l.s8.bf16 %v1034_v11 }
 0x643   : > { %v4741_v22 = vmul.f32 %v4675_v2, %v4101_v18  ;;  %v4743_v19 = vmul.f32 %v4683_v3, %v4265_v21  ;;  %v4103_v25 = vpop.f32.mrb[18].mxu0  ;;  %v4267_v26 = vpop.f32.mrb[18].mxu1  ;;  %4404 = vmatpush1.bf16.msra.mxu0 %v2354_v4  ;;  %4568 = vmatpush1.bf16.msra.mxu1 %v2356_v5  ;;  %v2476_v2 = vunpack.c.l.s8.bf16 %v1012_v62  ;;  %v2499_v3 = vunpack.c.h.s8.bf16 %v1011_v53  ;;  %v1035_v5 = vld [vmem:[%s5666_s12 + $0x1728] sm:$0xff]  ;;  %v1061_v18 = vld [vmem:[%s5666_s12 + $0x17f8] sm:$0xff] }
 0x644   : > { %v4890_v32 = vadd.f32 %v4821_v6, %v4740_v15  ;;  %v4892_v36 = vadd.f32 %v4829_v7, %v4742_v20  ;;  %v4104_v23 = vpop.f32.mrb[19].mxu0  ;;  %v4268_v37 = vpop.f32.mrb[19].mxu1  ;;  %4405 = vmatprep.subr.bf16.mxu0 %v2379_v30  ;;  %4569 = vmatprep.subr.bf16.mxu1 %v2381_v8  ;;  %v2501_v4 = vunpack.c.h.s8.bf16 %v1013_v17  ;;  %v1037_v6 = vld [vmem:[%s5666_s12 + $0x1738] sm:$0xff]  ;;  %v2498_v7 = vunpack.c.h.s8.bf16 %v1010_v59  ;;  %v1059_v20 = vld [vmem:[%s5666_s12 + $0x17e8] sm:$0xff]  ;;  %v1058_v26 = vld [vmem:[%s5666_s12 + $0x17e0] sm:$0xff] }
 0x645   : > { %v4891_v39 = vadd.f32 %v4825_v13, %v4741_v22  ;;  %v4893_v40 = vadd.f32 %v4833_v14, %v4743_v19  ;;  %v2500_v30 = vunpack.c.h.s8.bf16 %v1012_v62  ;;  %v2523_v8 = vunpack.c.l.s8.bf16 %v1035_v5 }
 0x646   : > { %5318 = vtanh.f32 %v4890_v32  ;;  %v2525_v10 = vunpack.c.l.s8.bf16 %v1037_v6  ;;  %v2524_v13 = vunpack.c.l.s8.bf16 %v1036_v35  ;;  %v2547_v14 = vunpack.c.h.s8.bf16 %v1035_v5 }
 0x647   : > { %5320 = vtanh.f32 %v4892_v36  ;;  %4406 = vmatpush1.bf16.msra.mxu0 %v2378_v27  ;;  %4570 = vmatpush1.bf16.msra.mxu1 %v2380_v31  ;;  %v2549_v15 = vunpack.c.h.s8.bf16 %v1037_v6  ;;  %v2546_v21 = vunpack.c.h.s8.bf16 %v1034_v11  ;;  %v2548_v22 = vunpack.c.h.s8.bf16 %v1036_v35  ;;  %v1060_v27 = vld [vmem:[%s5666_s12 + $0x17f0] sm:$0xff] }
 0x648   : > { %5322 = vtanh.f32 %v4891_v39  ;;  %4407 = vmatprep.subr.bf16.mxu0 %v2403_v24  ;;  %4571 = vmatprep.subr.bf16.mxu1 %v2405_v38  ;;  %v2571_v19 = vunpack.c.l.s8.bf16 %v1059_v20  ;;  %v2573_v25 = vunpack.c.l.s8.bf16 %v1061_v18  ;;  %v2570_v31 = vunpack.c.l.s8.bf16 %v1058_v26 }
 0x649   : > { %5324 = vtanh.f32 %v4893_v40  ;;  %v2572_v32 = vunpack.c.l.s8.bf16 %v1060_v27  ;;  %v2595_v36 = vunpack.c.h.s8.bf16 %v1059_v20  ;;  %v2597_v23 = vunpack.c.h.s8.bf16 %v1061_v18 }
 0x64a   : > { %v2594_v37 = vunpack.c.h.s8.bf16 %v1058_v26  ;;  %v2596_v24 = vunpack.c.h.s8.bf16 %v1060_v27  ;;  %v4687_v38 = vrot.slane %v6679_v58, %v6193_v28  ;;  %v4695_v39 = vrot.slane %v6679_v58, %v6196_v29 }
 0x64b   : > { %4408 = vmatpush1.bf16.msra.mxu0 %v2402_v46  ;;  %4572 = vmatpush1.bf16.msra.mxu1 %v2404_v9  ;;  %v4691_v40 = vrot.slane %v6679_v58, %v6199_v33  ;;  %v4845_v46 = vrot.slane %v6682_v63, %v6196_v29 }
 0x64c   : > { %4409 = vmatprep.subr.bf16.mxu0 %v2427_v47  ;;  %4573 = vmatprep.subr.bf16.mxu1 %v2429_v48  ;;  %v4841_v47 = vrot.slane %v6682_v63, %v6199_v33  ;;  %v4849_v48 = vrot.slane %v6682_v63, %v6202_v34 }
 0x64f   : > { %4410 = vmatpush1.bf16.msra.mxu0 %v2426_v50  ;;  %4574 = vmatpush1.bf16.msra.mxu1 %v2428_v61 }
 0x650   : > { %v5319_v56 = vpop.eup %5318  ;;  %4411 = vmatprep.subr.bf16.mxu0 %v2451_v51  ;;  %4575 = vmatprep.subr.bf16.mxu1 %v2453_v52 }
 0x651   : > { %v5321_v0 = vpop.eup %5320  ;;  %4938 = vst [vmem:[%s6052_s11 + $0x80] sm:$0xff] %v5319_v56 }
 0x652   : > { %v5323_v1 = vpop.eup %5322  ;;  %4940 = vst [vmem:[%s6052_s11 + $0x90] sm:$0xff] %v5321_v0 }
 0x653   : > { %v5325_v43 = vpop.eup %5324  ;;  %4939 = vst [vmem:[%s6052_s11 + $0x88] sm:$0xff] %v5323_v1  ;;  %4412 = vmatpush1.bf16.msra.mxu0 %v2450_v54  ;;  %4576 = vmatpush1.bf16.msra.mxu1 %v2452_v55 }
 0x654   : > { %4941 = vst [vmem:[%s6052_s11 + $0x98] sm:$0xff] %v5325_v43  ;;  %4413 = vmatprep.subr.bf16.mxu0 %v2475_v57  ;;  %4577 = vmatprep.subr.bf16.mxu1 %v2477_v16 }
 0x657   : > { %4414 = vmatpush1.bf16.msra.mxu0 %v2474_v42  ;;  %4578 = vmatpush1.bf16.msra.mxu1 %v2476_v2 }
 0x658   : > { %4415 = vmatprep.subr.bf16.mxu0 %v2499_v3  ;;  %4579 = vmatprep.subr.bf16.mxu1 %v2501_v4 }
 0x65b   : > { %4416 = vmatpush1.bf16.msra.mxu0 %v2498_v7  ;;  %4580 = vmatpush1.bf16.msra.mxu1 %v2500_v30 }
 0x65c   : > { %4417 = vmatprep.subr.bf16.mxu0 %v2523_v8  ;;  %4581 = vmatprep.subr.bf16.mxu1 %v2525_v10 }
 0x65f   : > { %4418 = vmatpush1.bf16.msra.mxu0 %v2522_v12  ;;  %4582 = vmatpush1.bf16.msra.mxu1 %v2524_v13 }
 0x660   : > { %4419 = vmatprep.subr.bf16.mxu0 %v2547_v14  ;;  %4583 = vmatprep.subr.bf16.mxu1 %v2549_v15 }
 0x663   : > { %4420 = vmatpush1.bf16.msra.mxu0 %v2546_v21  ;;  %4584 = vmatpush1.bf16.msra.mxu1 %v2548_v22 }
 0x664   : > { %4421 = vmatprep.subr.bf16.mxu0 %v2571_v19  ;;  %4585 = vmatprep.subr.bf16.mxu1 %v2573_v25 }
 0x667   : > { %4422 = vmatpush1.bf16.msra.mxu0 %v2570_v31  ;;  %4586 = vmatpush1.bf16.msra.mxu1 %v2572_v32 }
 0x668   : > { %4423 = vmatprep.subr.bf16.mxu0 %v2595_v36  ;;  %4587 = vmatprep.subr.bf16.mxu1 %v2597_v23 }
 0x66b   : > { %4424 = vmatpush1.bf16.msra.mxu0 %v2594_v37  ;;  %4588 = vmatpush1.bf16.msra.mxu1 %v2596_v24 }
 0x66e   : > { %4426 = vmatmul.mubr.bf16.vlgmr.msra.gmra.mrb[20].mxu0 %v5878_v44  ;;  %4590 = vmatmul.mubr.bf16.vlgmr.msra.gmra.mrb[20].mxu1 %v5878_v44 }
 0x741   : > { %v4427_v9 = vpop.f32.mrb[20].mxu0  ;;  %v4591_v44 = vpop.f32.mrb[20].mxu1 }
 0x742   : > { %v4744_v60 = vmul.f32 %v4687_v38, %v4427_v9  ;;  %v4746_v49 = vmul.f32 %v4695_v39, %v4591_v44  ;;  %v4429_v50 = vpop.f32.mrb[21].mxu0  ;;  %v4593_v61 = vpop.f32.mrb[21].mxu1 }
 0x743   : > { %v4745_v51 = vmul.f32 %v4691_v40, %v4429_v50  ;;  %v4747_v58 = vmul.f32 %v4699_v41, %v4593_v61  ;;  %v4431_v52 = vpop.f32.mrb[22].mxu0  ;;  %v4595_v28 = vpop.f32.mrb[22].mxu1 }
 0x744   : > { %v4894_v53 = vadd.f32 %v4837_v45, %v4744_v60  ;;  %v4896_v29 = vadd.f32 %v4845_v46, %v4746_v49  ;;  %v4432_v17 = vpop.f32.mrb[23].mxu0  ;;  %v4596_v54 = vpop.f32.mrb[23].mxu1 }
 0x745   : > { %v4895_v33 = vadd.f32 %v4841_v47, %v4745_v51  ;;  %v4897_v55 = vadd.f32 %v4849_v48, %v4747_v58 }
 0x746   : > { %5326 = vtanh.f32 %v4894_v53 }
 0x747   : > { %5328 = vtanh.f32 %v4896_v29 }
 0x748   : > { %5330 = vtanh.f32 %v4895_v33 }
 0x749   : > { %5332 = vtanh.f32 %v4897_v55 }
 0x750   : > { %v5327_v34 = vpop.eup %5326 }
 0x751   : > { %v5329_v63 = vpop.eup %5328  ;;  %4942 = vst [vmem:[%s6052_s11 + $0xa0] sm:$0xff] %v5327_v34 }
 0x752   : > { %v5331_v56 = vpop.eup %5330  ;;  %4944 = vst [vmem:[%s6052_s11 + $0xb0] sm:$0xff] %v5329_v63 }
 0x753   : > { %v5333_v57 = vpop.eup %5332  ;;  %4943 = vst [vmem:[%s6052_s11 + $0xa8] sm:$0xff] %v5331_v56 }
 0x754   : > { %4945 = vst [vmem:[%s6052_s11 + $0xb8] sm:$0xff] %v5333_v57 }
 0x755 PF: > { %p17_p2 = scmp.ge.s32.totalorder %s5520_s20, 6   ;;  %s6776_s15 = smov %s5458_s16 }
 0x756   : > { %s6777_s16 = smov %s5462_s17  ;;  %s6778_s17 = smov %s5530_s23 }
 0x757   : > { %s6779_s18 = smov %s5520_s20  ;;  %19 = sbr.rel (!%p17_p2) target bundleno = 5 (0x5), region = 100 }
 0x75e   :  { %4968 = vsyncpa [#allocation3], 1 }
 0x75f   :  { %4970 = vsyncpa [#allocation3 + $0x1], 1 }
 0x760   :  { %4971 = vsyncpa [#allocation5], 1 }
 0x761   :  { %4973 = vsyncpa [#allocation5 + $0x1], 1 }

</bundles_post_ra>
